<compile_context>
chip_gen: v5e
topology: v5e:2x2
jax: 0.10.0
libtpu: 0.0.40
codegen_flags: <defaults>
</compile_context>

<pallas_src>
import functools
import math

import jax
import jax.numpy as jnp
from jax import lax
from jax.experimental import pallas as pl
from jax.experimental.pallas import tpu as pltpu

LANE = 128     # vreg lane width
SUBLANE = 8    # f32 sublane count


def _round_up(x, m):
    return (x + m - 1) // m * m


# ----------------------------------------------------------------------------
# Pallas kernel: fused bidirectional LSTM layer
# ----------------------------------------------------------------------------
def _bilstm_kernel(x_ref, wih_ref, whh_ref, b_ref, *rest,
                   chunk, n_chunks, Bp, Hp, emit_seq):
    """One (direction, seq-chunk) grid step of a bidirectional LSTM layer.

    x_ref   : [chunk*Bp, Dp] bf16   time-major rows (chunk x padded batch)
    wih_ref : [Dp, 4Hp]      bf16   this direction's input weights (gates at k*Hp)
    whh_ref : [Hp, 4Hp]      bf16
    b_ref   : [1, 4Hp]       f32    b_ih + b_hh
    outputs : optional seq chunk [chunk*Bp, Hp] bf16 (this direction's lane half)
              last [Bp, Hp] f32  = h at original time S-1 (classifier input)
    """
    if emit_seq:
        seq_ref, last_ref, xg_sc, out_sc, h_sc, c_sc = rest
    else:
        last_ref, xg_sc, out_sc, h_sc, c_sc = rest

    d = pl.program_id(0)   # 0 = forward, 1 = backward
    s = pl.program_id(1)   # sequence-chunk step

    @pl.when(s == 0)
    def _():               # fresh h0 = c0 = 0 at the start of each direction
        h_sc[...] = jnp.zeros_like(h_sc)
        c_sc[...] = jnp.zeros_like(c_sc)

    # Hoisted input projection (+ bias, added once per chunk, not per step):
    # one [chunk*Bp, Dp] x [Dp, 4Hp] MXU matmul instead of `chunk` tiny ones.
    xg_sc[...] = (
        jnp.dot(x_ref[...], wih_ref[...], preferred_element_type=jnp.float32)
        + b_ref[...])

    def step(t, carry):
        h, c = carry
        # in-chunk index in ORIGINAL time order (reverse traversal when d == 1)
        idx = t + d * (chunk - 1 - 2 * t)
        row = pl.multiple_of(idx * Bp, Bp)
        gates = xg_sc[pl.ds(row, Bp), :] + jnp.dot(
            h.astype(whh_ref.dtype), whh_ref[...],
            preferred_element_type=jnp.float32)          # [Bp, 4Hp] f32
        i_g = jax.nn.sigmoid(gates[:, 0 * Hp:1 * Hp])
        f_g = jax.nn.sigmoid(gates[:, 1 * Hp:2 * Hp])
        g_g = jnp.tanh(gates[:, 2 * Hp:3 * Hp])
        o_g = jax.nn.sigmoid(gates[:, 3 * Hp:4 * Hp])
        c = f_g * c + i_g * g_g
        h = o_g * jnp.tanh(c)
        if emit_seq:
            out_sc[pl.ds(row, Bp), :] = h

        # h at original time S-1: forward -> its very last step; backward -> its first.
        hit_fwd = jnp.logical_and(
            d == 0, jnp.logical_and(s == n_chunks - 1, t == chunk - 1))
        hit_bwd = jnp.logical_and(d == 1, jnp.logical_and(s == 0, t == 0))

        @pl.when(jnp.logical_or(hit_fwd, hit_bwd))
        def _():
            last_ref[...] = h

        return (h, c)

    hN, cN = lax.fori_loop(0, chunk, step, (h_sc[...], c_sc[...]), unroll=True)
    h_sc[...] = hN
    c_sc[...] = cN

    if emit_seq:
        # single dense [chunk*Bp, Hp] store of the whole chunk (lane-dense output)
        seq_ref[...] = out_sc[...].astype(seq_ref.dtype)


# ----------------------------------------------------------------------------
# pallas_call wrapper for one bidirectional LSTM layer
# ----------------------------------------------------------------------------
def bilstm_layer(x_flat, wih, whh, b, *, S, Bp, Hp, Dp, chunk, emit_seq):
    n_chunks = S // chunk
    rows = chunk * Bp

    def tblk(d, s):  # fwd: s ; bwd: n_chunks-1-s (pure integer arithmetic)
        return s + d * (n_chunks - 1 - 2 * s)

    in_specs = [
        pl.BlockSpec((rows, Dp), lambda d, s: (tblk(d, s), 0)),
        pl.BlockSpec((None, Dp, 4 * Hp), lambda d, s: (d, 0, 0)),
        pl.BlockSpec((None, Hp, 4 * Hp), lambda d, s: (d, 0, 0)),
        pl.BlockSpec((None, 1, 4 * Hp), lambda d, s: (d, 0, 0)),
    ]
    last_spec = pl.BlockSpec((Bp, Hp), lambda d, s: (0, d))
    last_shape = jax.ShapeDtypeStruct((Bp, 2 * Hp), jnp.float32)
    if emit_seq:
        # each direction writes its own lane half -> concatenated output, no jnp concat
        out_shape = (jax.ShapeDtypeStruct((S * Bp, 2 * Hp), jnp.bfloat16), last_shape)
        out_specs = (pl.BlockSpec((rows, Hp), lambda d, s: (tblk(d, s), d)), last_spec)
    else:
        out_shape = last_shape
        out_specs = last_spec

    kernel = functools.partial(_bilstm_kernel, chunk=chunk, n_chunks=n_chunks,
                               Bp=Bp, Hp=Hp, emit_seq=emit_seq)

    return pl.pallas_call(
        kernel,
        out_shape=out_shape,
        grid=(2, n_chunks),
        in_specs=in_specs,
        out_specs=out_specs,
        scratch_shapes=[
            pltpu.VMEM((rows, 4 * Hp), jnp.float32),  # hoisted input-gate products
            pltpu.VMEM((rows, Hp), jnp.float32),      # chunk output staging
            pltpu.VMEM((Bp, Hp), jnp.float32),        # h carried across chunks
            pltpu.VMEM((Bp, Hp), jnp.float32),        # c carried across chunks
        ],
        compiler_params=pltpu.CompilerParams(
            # direction axis is independent work -> shards across v7x's 2 TCs;
            # the chunk axis carries h/c sequentially.
            dimension_semantics=("parallel", "arbitrary"),
            # explicit VMEM budget, well under v7x's 64 MiB physical VMEM
            vmem_limit_bytes=32 * 1024 * 1024,
        ),
    )(x_flat, wih, whh, b)


# ----------------------------------------------------------------------------
# Parameters (PyTorch-style init, then padded to TPU-friendly kernel layout)
# ----------------------------------------------------------------------------
def _pad_gate_blocks(w, H, Hp):
    """[4H, ...] -> [4Hp, ...]; each PyTorch gate block (i,f,g,o) moved to k*Hp."""
    out = jnp.zeros((4 * Hp,) + w.shape[1:], w.dtype)
    for k in range(4):
        out = out.at[k * Hp:k * Hp + H].set(w[k * H:(k + 1) * H])
    return out


def init_params(key, *, vocab_size, bert_hidden, hidden_size, output_size,
                num_layers, bidirectional=True):
    assert bidirectional, "kernel path implements the module's bidirectional config"
    H = hidden_size
    Hp = _round_up(H, LANE)
    Dp0 = _round_up(bert_hidden, LANE)
    cfg = dict(H=H, Hp=Hp, Dp0=Dp0)

    params = {}
    k_emb, key = jax.random.split(key)
    # TODO(synk): the frozen BERT encoder (embeddings + transformer stack) is not
    # reimplemented; last_hidden_state is a deterministic embedding-lookup stand-in.
    params["bert_embedding"] = (
        jax.random.normal(k_emb, (vocab_size, bert_hidden), jnp.float32) * 0.02)

    layers = []
    for layer in range(num_layers):
        din = bert_hidden if layer == 0 else 2 * H
        wih_d, whh_d, b_d = [], [], []
        for _ in range(2):  # forward, backward
            keys = jax.random.split(key, 5)
            key = keys[0]
            bound = 1.0 / math.sqrt(H)
            w_ih = jax.random.uniform(keys[1], (4 * H, din), jnp.float32, -bound, bound)
            w_hh = jax.random.uniform(keys[2], (4 * H, H), jnp.float32, -bound, bound)
            b_ih = jax.random.uniform(keys[3], (4 * H,), jnp.float32, -bound, bound)
            b_hh = jax.random.uniform(keys[4], (4 * H,), jnp.float32, -bound, bound)

            # pad to lane-aligned layout; zero-padded hidden units stay exactly 0
            wih_p = _pad_gate_blocks(w_ih, H, Hp)                         # [4Hp, din]
            if layer == 0:
                wih_p = jnp.pad(wih_p, ((0, 0), (0, Dp0 - din)))          # [4Hp, Dp0]
            else:
                placed = jnp.zeros((4 * Hp, 2 * Hp), jnp.float32)
                placed = placed.at[:, :H].set(wih_p[:, :H])               # fwd half
                placed = placed.at[:, Hp:Hp + H].set(wih_p[:, H:2 * H])   # bwd half
                wih_p = placed                                            # [4Hp, 2Hp]
            whh_p = jnp.pad(_pad_gate_blocks(w_hh, H, Hp), ((0, 0), (0, Hp - H)))
            b_p = _pad_gate_blocks((b_ih + b_hh).reshape(4 * H, 1), H, Hp)

            wih_d.append(jnp.transpose(wih_p).astype(jnp.bfloat16))       # [Dp, 4Hp]
            whh_d.append(jnp.transpose(whh_p).astype(jnp.bfloat16))       # [Hp, 4Hp]
            b_d.append(jnp.transpose(b_p))                                # [1, 4Hp] f32
        layers.append(dict(wih=jnp.stack(wih_d), whh=jnp.stack(whh_d), b=jnp.stack(b_d)))
    params["lstm"] = layers

    keys = jax.random.split(key, 3)
    bound = 1.0 / math.sqrt(2 * H)
    params["fc_w"] = jax.random.uniform(keys[1], (output_size, 2 * H),
                                        jnp.float32, -bound, bound)
    params["fc_b"] = jax.random.uniform(keys[2], (output_size,),
                                        jnp.float32, -bound, bound)
    return params, cfg


# ----------------------------------------------------------------------------
# Forward pass (eval mode)
# ----------------------------------------------------------------------------
def bert_lstm_classifier_forward(params, cfg, input_ids, attention_mask):
    """Equivalent of BertLSTMClassifier.forward (eval mode)."""
    del attention_mask  # BERT stand-in ignores it; nn.LSTM/fc don't use it (no packing)
    H, Hp, Dp0 = cfg["H"], cfg["Hp"], cfg["Dp0"]
    B, S = input_ids.shape
    Bp = _round_up(B, SUBLANE)
    chunk = math.gcd(S, 16)                    # sequence pipelining chunk (divides S)

    # frozen "bert_model(...).last_hidden_state"
    hidden = jnp.take(params["bert_embedding"], input_ids, axis=0)      # [B,S,Dbert]

    # single transpose to time-major at entry; activations stay time-major after
    x = jnp.transpose(hidden, (1, 0, 2))                                 # [S,B,Dbert]
    x = jnp.pad(x, ((0, 0), (0, Bp - B), (0, Dp0 - hidden.shape[-1])))
    x_flat = x.reshape(S * Bp, Dp0).astype(jnp.bfloat16)                 # [S*Bp, Dp0]

    n_layers = len(params["lstm"])
    last = None
    for li, lp in enumerate(params["lstm"]):
        emit_seq = li < n_layers - 1
        Dp = Dp0 if li == 0 else 2 * Hp
        out = bilstm_layer(x_flat, lp["wih"], lp["whh"], lp["b"],
                           S=S, Bp=Bp, Hp=Hp, Dp=Dp, chunk=chunk, emit_seq=emit_seq)
        if emit_seq:
            x_flat, last = out                  # [S*Bp, 2Hp] bf16 feeds next layer
        else:
            last = out                          # [Bp, 2Hp] f32; only t=S-1 kept

    # nn.Dropout(0.2): identity at inference.
    # Final nn.Linear on lstm_output[:, -1, :]; done in plain jnp — a dedicated
    # pallas_call for a [B,2H]x[2H,2] matmul is pure launch/pipeline overhead.
    feat = jnp.concatenate([last[:B, :H], last[:B, Hp:Hp + H]], axis=-1)  # [B, 2H]
    logits = feat @ params["fc_w"].T + params["fc_b"]
    return logits


# ----------------------------------------------------------------------------
if __name__ == "__main__":
    B = 2            # batch
    S = 8            # sequence length (max_length=128 in the original; shrunk)
    VOCAB = 64       # stand-in vocab
    D_BERT = 32      # bert_model.config.hidden_size
    HIDDEN = 16      # LSTM hidden_size
    OUT = 2          # output_size (binary SQLi detector)
    NUM_LAYERS = 2

    key = jax.random.PRNGKey(0)
    k_params, k_ids = jax.random.split(key)

    params, cfg = init_params(
        k_params, vocab_size=VOCAB, bert_hidden=D_BERT, hidden_size=HIDDEN,
        output_size=OUT, num_layers=NUM_LAYERS, bidirectional=True)

    input_ids = jax.random.randint(k_ids, (B, S), 0, VOCAB, dtype=jnp.int32)
    attention_mask = jnp.ones((B, S), dtype=jnp.int32)

    fwd = jax.jit(lambda p, ids, m: bert_lstm_classifier_forward(p, cfg, ids, m))
    logits = jax.block_until_ready(fwd(params, input_ids, attention_mask))

    assert logits.shape == (B, OUT) and logits.dtype == jnp.float32
    print("KERNEL_OK")
</pallas_src>

<mosaic_0001>
module attributes {stable_mosaic.version = 11 : i64} {
  func.func @_bilstm_kernel(%arg0: i32, %arg1: i32, %arg2: memref<64x128xbf16, #tpu.memory_space<vmem>>, %arg3: memref<1x128x512xbf16, #tpu.memory_space<vmem>>, %arg4: memref<1x128x512xbf16, #tpu.memory_space<vmem>>, %arg5: memref<1x1x512xf32, #tpu.memory_space<vmem>>, %arg6: memref<64x128xbf16, #tpu.memory_space<vmem>>, %arg7: memref<8x128xf32, #tpu.memory_space<vmem>>, %arg8: memref<64x512xf32, #tpu.memory_space<vmem>>, %arg9: memref<64x128xf32, #tpu.memory_space<vmem>>, %arg10: memref<8x128xf32, #tpu.memory_space<vmem>>, %arg11: memref<8x128xf32, #tpu.memory_space<vmem>>) attributes {dimension_semantics = [#tpu.dimension_semantics<parallel>, #tpu.dimension_semantics<arbitrary>], iteration_bounds = array<i64: 2, 1>, scalar_prefetch = 0 : i64, scratch_operands = 4 : i64, tpu.core_type = #tpu.core_type<tc>, window_params = [{transform_indices = @transform_0, window_bounds = array<i64: 64, 128>}, {transform_indices = @transform_1, window_bounds = array<i64: 1, 128, 512>}, {transform_indices = @transform_2, window_bounds = array<i64: 1, 128, 512>}, {transform_indices = @transform_3, window_bounds = array<i64: 1, 1, 512>}, {transform_indices = @transform_4, window_bounds = array<i64: 64, 128>}, {transform_indices = @transform_5, window_bounds = array<i64: 8, 128>}]} {
    %c0_i32 = arith.constant 0 : i32
    %0 = arith.cmpi eq, %arg1, %c0_i32 : i32
    %1 = arith.extui %0 : i1 to i32
    %c0_i32_0 = arith.constant 0 : i32
    %2 = arith.cmpi ne, %1, %c0_i32_0 : i32
    scf.if %2 {
      %cst_175 = arith.constant 0.000000e+00 : f32
      %443 = vector.broadcast %cst_175 : f32 to vector<8x128xf32>
      %c0_176 = arith.constant 0 : index
      %c0_177 = arith.constant 0 : index
      %444 = vector.load %arg10[%c0_176, %c0_177] : memref<8x128xf32, #tpu.memory_space<vmem>>, vector<8x128xf32>
      tpu.vector_store %arg10[%c0_176, %c0_177], %443 {strides = array<i32>} : memref<8x128xf32, #tpu.memory_space<vmem>>, vector<8x128xf32>,
      %cst_178 = arith.constant 0.000000e+00 : f32
      %445 = vector.broadcast %cst_178 : f32 to vector<8x128xf32>
      %c0_179 = arith.constant 0 : index
      %c0_180 = arith.constant 0 : index
      %446 = vector.load %arg11[%c0_179, %c0_180] : memref<8x128xf32, #tpu.memory_space<vmem>>, vector<8x128xf32>
      tpu.vector_store %arg11[%c0_179, %c0_180], %445 {strides = array<i32>} : memref<8x128xf32, #tpu.memory_space<vmem>>, vector<8x128xf32>,
    } else {
    }
    %c0 = arith.constant 0 : index
    %c0_1 = arith.constant 0 : index
    %3 = vector.load %arg2[%c0, %c0_1] : memref<64x128xbf16, #tpu.memory_space<vmem>>, vector<64x128xbf16>
    %c0_2 = arith.constant 0 : index
    %c0_3 = arith.constant 0 : index
    %c0_4 = arith.constant 0 : index
    %4 = vector.load %arg3[%c0_2, %c0_3, %c0_4] : memref<1x128x512xbf16, #tpu.memory_space<vmem>>, vector<1x128x512xbf16>
    %5 = vector.shape_cast %4 : vector<1x128x512xbf16> to vector<128x512xbf16>
    %cst = arith.constant dense<0.000000e+00> : vector<64x512xf32>
    %6 = tpu.matmul %3, %5, %cst {dimension_numbers = #tpu.dot_dimension_numbers<[1], [0], [0], [1], [0, 0, 1, 1], [], []>} : vector<64x128xbf16>, vector<128x512xbf16>, vector<64x512xf32> -> vector<64x512xf32>
    %c0_5 = arith.constant 0 : index
    %c0_6 = arith.constant 0 : index
    %c0_7 = arith.constant 0 : index
    %7 = vector.load %arg5[%c0_5, %c0_6, %c0_7] : memref<1x1x512xf32, #tpu.memory_space<vmem>>, vector<1x1x512xf32>
    %8 = vector.shape_cast %7 : vector<1x1x512xf32> to vector<1x512xf32>
    %9 = vector.broadcast %8 : vector<1x512xf32> to vector<64x512xf32>
    %10 = arith.addf %6, %9 : vector<64x512xf32>
    %c0_8 = arith.constant 0 : index
    %c0_9 = arith.constant 0 : index
    %11 = vector.load %arg8[%c0_8, %c0_9] : memref<64x512xf32, #tpu.memory_space<vmem>>, vector<64x512xf32>
    tpu.vector_store %arg8[%c0_8, %c0_9], %10 {strides = array<i32>} : memref<64x512xf32, #tpu.memory_space<vmem>>, vector<64x512xf32>,
    %c0_10 = arith.constant 0 : index
    %c0_11 = arith.constant 0 : index
    %12 = vector.load %arg10[%c0_10, %c0_11] : memref<8x128xf32, #tpu.memory_space<vmem>>, vector<8x128xf32>
    %c0_12 = arith.constant 0 : index
    %c0_13 = arith.constant 0 : index
    %13 = vector.load %arg11[%c0_12, %c0_13] : memref<8x128xf32, #tpu.memory_space<vmem>>, vector<8x128xf32>
    %c0_i32_14 = arith.constant 0 : i32
    %c2_i32 = arith.constant 2 : i32
    %14 = arith.muli %c2_i32, %c0_i32_14 : i32
    %c7_i32 = arith.constant 7 : i32
    %15 = arith.subi %c7_i32, %14 : i32
    %16 = arith.muli %arg0, %15 : i32
    %17 = arith.addi %c0_i32_14, %16 : i32
    %c8_i32 = arith.constant 8 : i32
    %18 = arith.muli %17, %c8_i32 : i32
    %19 = tpu.assume_multiple %18, 8 : i32
    %20 = arith.index_cast %19 : i32 to index
    %c0_15 = arith.constant 0 : index
    %21 = vector.load %arg8[%20, %c0_15] : memref<64x512xf32, #tpu.memory_space<vmem>>, vector<8x512xf32>
    %22 = arith.truncf %12 : vector<8x128xf32> to vector<8x128xbf16>
    %c0_16 = arith.constant 0 : index
    %c0_17 = arith.constant 0 : index
    %c0_18 = arith.constant 0 : index
    %23 = vector.load %arg4[%c0_16, %c0_17, %c0_18] : memref<1x128x512xbf16, #tpu.memory_space<vmem>>, vector<1x128x512xbf16>
    %24 = vector.shape_cast %23 : vector<1x128x512xbf16> to vector<128x512xbf16>
    %cst_19 = arith.constant dense<0.000000e+00> : vector<8x512xf32>
    %25 = tpu.matmul %22, %24, %cst_19 {dimension_numbers = #tpu.dot_dimension_numbers<[1], [0], [0], [1], [0, 0, 1, 1], [], []>} : vector<8x128xbf16>, vector<128x512xbf16>, vector<8x512xf32> -> vector<8x512xf32>
    %26 = arith.addf %21, %25 : vector<8x512xf32>
    %27 = vector.extract_strided_slice %26 {offsets = [0, 0], sizes = [8, 128], strides = [1, 1]} : vector<8x512xf32> to vector<8x128xf32>
    %28 = arith.negf %27 : vector<8x128xf32>
    %29 = math.exp %28 : vector<8x128xf32>
    %cst_20 = arith.constant 1.000000e+00 : f32
    %30 = vector.broadcast %cst_20 : f32 to vector<8x128xf32>
    %31 = arith.addf %30, %29 : vector<8x128xf32>
    %32 = arith.divf %30, %31 : vector<8x128xf32>
    %33 = vector.extract_strided_slice %26 {offsets = [0, 128], sizes = [8, 128], strides = [1, 1]} : vector<8x512xf32> to vector<8x128xf32>
    %34 = arith.negf %33 : vector<8x128xf32>
    %35 = math.exp %34 : vector<8x128xf32>
    %cst_21 = arith.constant 1.000000e+00 : f32
    %36 = vector.broadcast %cst_21 : f32 to vector<8x128xf32>
    %37 = arith.addf %36, %35 : vector<8x128xf32>
    %38 = arith.divf %36, %37 : vector<8x128xf32>
    %39 = vector.extract_strided_slice %26 {offsets = [0, 256], sizes = [8, 128], strides = [1, 1]} : vector<8x512xf32> to vector<8x128xf32>
    %40 = math.tanh %39 : vector<8x128xf32>
    %41 = vector.extract_strided_slice %26 {offsets = [0, 384], sizes = [8, 128], strides = [1, 1]} : vector<8x512xf32> to vector<8x128xf32>
    %42 = arith.negf %41 : vector<8x128xf32>
    %43 = math.exp %42 : vector<8x128xf32>
    %cst_22 = arith.constant 1.000000e+00 : f32
    %44 = vector.broadcast %cst_22 : f32 to vector<8x128xf32>
    %45 = arith.addf %44, %43 : vector<8x128xf32>
    %46 = arith.divf %44, %45 : vector<8x128xf32>
    %47 = arith.mulf %38, %13 : vector<8x128xf32>
    %48 = arith.mulf %32, %40 : vector<8x128xf32>
    %49 = arith.addf %47, %48 : vector<8x128xf32>
    %50 = math.tanh %49 : vector<8x128xf32>
    %51 = arith.mulf %46, %50 : vector<8x128xf32>
    %52 = arith.index_cast %19 : i32 to index
    %c0_23 = arith.constant 0 : index
    %53 = vector.load %arg9[%52, %c0_23] : memref<64x128xf32, #tpu.memory_space<vmem>>, vector<8x128xf32>
    tpu.vector_store %arg9[%52, %c0_23], %51 {strides = array<i32>} : memref<64x128xf32, #tpu.memory_space<vmem>>, vector<8x128xf32>,
    %c0_i32_24 = arith.constant 0 : i32
    %54 = arith.cmpi eq, %arg0, %c0_i32_24 : i32
    %c0_i32_25 = arith.constant 0 : i32
    %55 = arith.cmpi eq, %arg1, %c0_i32_25 : i32
    %c7_i32_26 = arith.constant 7 : i32
    %56 = arith.cmpi eq, %c0_i32_14, %c7_i32_26 : i32
    %57 = arith.andi %55, %56 : i1
    %58 = arith.andi %54, %57 : i1
    %c1_i32 = arith.constant 1 : i32
    %59 = arith.cmpi eq, %arg0, %c1_i32 : i32
    %c0_i32_27 = arith.constant 0 : i32
    %60 = arith.cmpi eq, %arg1, %c0_i32_27 : i32
    %c0_i32_28 = arith.constant 0 : i32
    %61 = arith.cmpi eq, %c0_i32_14, %c0_i32_28 : i32
    %62 = arith.andi %60, %61 : i1
    %63 = arith.andi %59, %62 : i1
    %64 = arith.ori %58, %63 : i1
    %65 = arith.extui %64 : i1 to i32
    %c0_i32_29 = arith.constant 0 : i32
    %66 = arith.cmpi ne, %65, %c0_i32_29 : i32
    scf.if %66 {
      %c0_175 = arith.constant 0 : index
      %c0_176 = arith.constant 0 : index
      %443 = vector.load %arg7[%c0_175, %c0_176] : memref<8x128xf32, #tpu.memory_space<vmem>>, vector<8x128xf32>
      tpu.vector_store %arg7[%c0_175, %c0_176], %51 {strides = array<i32>} : memref<8x128xf32, #tpu.memory_space<vmem>>, vector<8x128xf32>,
    } else {
    }
    %c1_i32_30 = arith.constant 1 : i32
    %c2_i32_31 = arith.constant 2 : i32
    %67 = arith.muli %c2_i32_31, %c1_i32_30 : i32
    %c7_i32_32 = arith.constant 7 : i32
    %68 = arith.subi %c7_i32_32, %67 : i32
    %69 = arith.muli %arg0, %68 : i32
    %70 = arith.addi %c1_i32_30, %69 : i32
    %c8_i32_33 = arith.constant 8 : i32
    %71 = arith.muli %70, %c8_i32_33 : i32
    %72 = tpu.assume_multiple %71, 8 : i32
    %73 = arith.index_cast %72 : i32 to index
    %c0_34 = arith.constant 0 : index
    %74 = vector.load %arg8[%73, %c0_34] : memref<64x512xf32, #tpu.memory_space<vmem>>, vector<8x512xf32>
    %75 = arith.truncf %51 : vector<8x128xf32> to vector<8x128xbf16>
    %c0_35 = arith.constant 0 : index
    %c0_36 = arith.constant 0 : index
    %c0_37 = arith.constant 0 : index
    %76 = vector.load %arg4[%c0_35, %c0_36, %c0_37] : memref<1x128x512xbf16, #tpu.memory_space<vmem>>, vector<1x128x512xbf16>
    %77 = vector.shape_cast %76 : vector<1x128x512xbf16> to vector<128x512xbf16>
    %cst_38 = arith.constant dense<0.000000e+00> : vector<8x512xf32>
    %78 = tpu.matmul %75, %77, %cst_38 {dimension_numbers = #tpu.dot_dimension_numbers<[1], [0], [0], [1], [0, 0, 1, 1], [], []>} : vector<8x128xbf16>, vector<128x512xbf16>, vector<8x512xf32> -> vector<8x512xf32>
    %79 = arith.addf %74, %78 : vector<8x512xf32>
    %80 = vector.extract_strided_slice %79 {offsets = [0, 0], sizes = [8, 128], strides = [1, 1]} : vector<8x512xf32> to vector<8x128xf32>
    %81 = arith.negf %80 : vector<8x128xf32>
    %82 = math.exp %81 : vector<8x128xf32>
    %cst_39 = arith.constant 1.000000e+00 : f32
    %83 = vector.broadcast %cst_39 : f32 to vector<8x128xf32>
    %84 = arith.addf %83, %82 : vector<8x128xf32>
    %85 = arith.divf %83, %84 : vector<8x128xf32>
    %86 = vector.extract_strided_slice %79 {offsets = [0, 128], sizes = [8, 128], strides = [1, 1]} : vector<8x512xf32> to vector<8x128xf32>
    %87 = arith.negf %86 : vector<8x128xf32>
    %88 = math.exp %87 : vector<8x128xf32>
    %cst_40 = arith.constant 1.000000e+00 : f32
    %89 = vector.broadcast %cst_40 : f32 to vector<8x128xf32>
    %90 = arith.addf %89, %88 : vector<8x128xf32>
    %91 = arith.divf %89, %90 : vector<8x128xf32>
    %92 = vector.extract_strided_slice %79 {offsets = [0, 256], sizes = [8, 128], strides = [1, 1]} : vector<8x512xf32> to vector<8x128xf32>
    %93 = math.tanh %92 : vector<8x128xf32>
    %94 = vector.extract_strided_slice %79 {offsets = [0, 384], sizes = [8, 128], strides = [1, 1]} : vector<8x512xf32> to vector<8x128xf32>
    %95 = arith.negf %94 : vector<8x128xf32>
    %96 = math.exp %95 : vector<8x128xf32>
    %cst_41 = arith.constant 1.000000e+00 : f32
    %97 = vector.broadcast %cst_41 : f32 to vector<8x128xf32>
    %98 = arith.addf %97, %96 : vector<8x128xf32>
    %99 = arith.divf %97, %98 : vector<8x128xf32>
    %100 = arith.mulf %91, %49 : vector<8x128xf32>
    %101 = arith.mulf %85, %93 : vector<8x128xf32>
    %102 = arith.addf %100, %101 : vector<8x128xf32>
    %103 = math.tanh %102 : vector<8x128xf32>
    %104 = arith.mulf %99, %103 : vector<8x128xf32>
    %105 = arith.index_cast %72 : i32 to index
    %c0_42 = arith.constant 0 : index
    %106 = vector.load %arg9[%105, %c0_42] : memref<64x128xf32, #tpu.memory_space<vmem>>, vector<8x128xf32>
    tpu.vector_store %arg9[%105, %c0_42], %104 {strides = array<i32>} : memref<64x128xf32, #tpu.memory_space<vmem>>, vector<8x128xf32>,
    %c0_i32_43 = arith.constant 0 : i32
    %107 = arith.cmpi eq, %arg0, %c0_i32_43 : i32
    %c0_i32_44 = arith.constant 0 : i32
    %108 = arith.cmpi eq, %arg1, %c0_i32_44 : i32
    %c7_i32_45 = arith.constant 7 : i32
    %109 = arith.cmpi eq, %c1_i32_30, %c7_i32_45 : i32
    %110 = arith.andi %108, %109 : i1
    %111 = arith.andi %107, %110 : i1
    %c1_i32_46 = arith.constant 1 : i32
    %112 = arith.cmpi eq, %arg0, %c1_i32_46 : i32
    %c0_i32_47 = arith.constant 0 : i32
    %113 = arith.cmpi eq, %arg1, %c0_i32_47 : i32
    %c0_i32_48 = arith.constant 0 : i32
    %114 = arith.cmpi eq, %c1_i32_30, %c0_i32_48 : i32
    %115 = arith.andi %113, %114 : i1
    %116 = arith.andi %112, %115 : i1
    %117 = arith.ori %111, %116 : i1
    %118 = arith.extui %117 : i1 to i32
    %c0_i32_49 = arith.constant 0 : i32
    %119 = arith.cmpi ne, %118, %c0_i32_49 : i32
    scf.if %119 {
      %c0_175 = arith.constant 0 : index
      %c0_176 = arith.constant 0 : index
      %443 = vector.load %arg7[%c0_175, %c0_176] : memref<8x128xf32, #tpu.memory_space<vmem>>, vector<8x128xf32>
      tpu.vector_store %arg7[%c0_175, %c0_176], %104 {strides = array<i32>} : memref<8x128xf32, #tpu.memory_space<vmem>>, vector<8x128xf32>,
    } else {
    }
    %c2_i32_50 = arith.constant 2 : i32
    %c2_i32_51 = arith.constant 2 : i32
    %120 = arith.muli %c2_i32_51, %c2_i32_50 : i32
    %c7_i32_52 = arith.constant 7 : i32
    %121 = arith.subi %c7_i32_52, %120 : i32
    %122 = arith.muli %arg0, %121 : i32
    %123 = arith.addi %c2_i32_50, %122 : i32
    %c8_i32_53 = arith.constant 8 : i32
    %124 = arith.muli %123, %c8_i32_53 : i32
    %125 = tpu.assume_multiple %124, 8 : i32
    %126 = arith.index_cast %125 : i32 to index
    %c0_54 = arith.constant 0 : index
    %127 = vector.load %arg8[%126, %c0_54] : memref<64x512xf32, #tpu.memory_space<vmem>>, vector<8x512xf32>
    %128 = arith.truncf %104 : vector<8x128xf32> to vector<8x128xbf16>
    %c0_55 = arith.constant 0 : index
    %c0_56 = arith.constant 0 : index
    %c0_57 = arith.constant 0 : index
    %129 = vector.load %arg4[%c0_55, %c0_56, %c0_57] : memref<1x128x512xbf16, #tpu.memory_space<vmem>>, vector<1x128x512xbf16>
    %130 = vector.shape_cast %129 : vector<1x128x512xbf16> to vector<128x512xbf16>
    %cst_58 = arith.constant dense<0.000000e+00> : vector<8x512xf32>
    %131 = tpu.matmul %128, %130, %cst_58 {dimension_numbers = #tpu.dot_dimension_numbers<[1], [0], [0], [1], [0, 0, 1, 1], [], []>} : vector<8x128xbf16>, vector<128x512xbf16>, vector<8x512xf32> -> vector<8x512xf32>
    %132 = arith.addf %127, %131 : vector<8x512xf32>
    %133 = vector.extract_strided_slice %132 {offsets = [0, 0], sizes = [8, 128], strides = [1, 1]} : vector<8x512xf32> to vector<8x128xf32>
    %134 = arith.negf %133 : vector<8x128xf32>
    %135 = math.exp %134 : vector<8x128xf32>
    %cst_59 = arith.constant 1.000000e+00 : f32
    %136 = vector.broadcast %cst_59 : f32 to vector<8x128xf32>
    %137 = arith.addf %136, %135 : vector<8x128xf32>
    %138 = arith.divf %136, %137 : vector<8x128xf32>
    %139 = vector.extract_strided_slice %132 {offsets = [0, 128], sizes = [8, 128], strides = [1, 1]} : vector<8x512xf32> to vector<8x128xf32>
    %140 = arith.negf %139 : vector<8x128xf32>
    %141 = math.exp %140 : vector<8x128xf32>
    %cst_60 = arith.constant 1.000000e+00 : f32
    %142 = vector.broadcast %cst_60 : f32 to vector<8x128xf32>
    %143 = arith.addf %142, %141 : vector<8x128xf32>
    %144 = arith.divf %142, %143 : vector<8x128xf32>
    %145 = vector.extract_strided_slice %132 {offsets = [0, 256], sizes = [8, 128], strides = [1, 1]} : vector<8x512xf32> to vector<8x128xf32>
    %146 = math.tanh %145 : vector<8x128xf32>
    %147 = vector.extract_strided_slice %132 {offsets = [0, 384], sizes = [8, 128], strides = [1, 1]} : vector<8x512xf32> to vector<8x128xf32>
    %148 = arith.negf %147 : vector<8x128xf32>
    %149 = math.exp %148 : vector<8x128xf32>
    %cst_61 = arith.constant 1.000000e+00 : f32
    %150 = vector.broadcast %cst_61 : f32 to vector<8x128xf32>
    %151 = arith.addf %150, %149 : vector<8x128xf32>
    %152 = arith.divf %150, %151 : vector<8x128xf32>
    %153 = arith.mulf %144, %102 : vector<8x128xf32>
    %154 = arith.mulf %138, %146 : vector<8x128xf32>
    %155 = arith.addf %153, %154 : vector<8x128xf32>
    %156 = math.tanh %155 : vector<8x128xf32>
    %157 = arith.mulf %152, %156 : vector<8x128xf32>
    %158 = arith.index_cast %125 : i32 to index
    %c0_62 = arith.constant 0 : index
    %159 = vector.load %arg9[%158, %c0_62] : memref<64x128xf32, #tpu.memory_space<vmem>>, vector<8x128xf32>
    tpu.vector_store %arg9[%158, %c0_62], %157 {strides = array<i32>} : memref<64x128xf32, #tpu.memory_space<vmem>>, vector<8x128xf32>,
    %c0_i32_63 = arith.constant 0 : i32
    %160 = arith.cmpi eq, %arg0, %c0_i32_63 : i32
    %c0_i32_64 = arith.constant 0 : i32
    %161 = arith.cmpi eq, %arg1, %c0_i32_64 : i32
    %c7_i32_65 = arith.constant 7 : i32
    %162 = arith.cmpi eq, %c2_i32_50, %c7_i32_65 : i32
    %163 = arith.andi %161, %162 : i1
    %164 = arith.andi %160, %163 : i1
    %c1_i32_66 = arith.constant 1 : i32
    %165 = arith.cmpi eq, %arg0, %c1_i32_66 : i32
    %c0_i32_67 = arith.constant 0 : i32
    %166 = arith.cmpi eq, %arg1, %c0_i32_67 : i32
    %c0_i32_68 = arith.constant 0 : i32
    %167 = arith.cmpi eq, %c2_i32_50, %c0_i32_68 : i32
    %168 = arith.andi %166, %167 : i1
    %169 = arith.andi %165, %168 : i1
    %170 = arith.ori %164, %169 : i1
    %171 = arith.extui %170 : i1 to i32
    %c0_i32_69 = arith.constant 0 : i32
    %172 = arith.cmpi ne, %171, %c0_i32_69 : i32
    scf.if %172 {
      %c0_175 = arith.constant 0 : index
      %c0_176 = arith.constant 0 : index
      %443 = vector.load %arg7[%c0_175, %c0_176] : memref<8x128xf32, #tpu.memory_space<vmem>>, vector<8x128xf32>
      tpu.vector_store %arg7[%c0_175, %c0_176], %157 {strides = array<i32>} : memref<8x128xf32, #tpu.memory_space<vmem>>, vector<8x128xf32>,
    } else {
    }
    %c3_i32 = arith.constant 3 : i32
    %c2_i32_70 = arith.constant 2 : i32
    %173 = arith.muli %c2_i32_70, %c3_i32 : i32
    %c7_i32_71 = arith.constant 7 : i32
    %174 = arith.subi %c7_i32_71, %173 : i32
    %175 = arith.muli %arg0, %174 : i32
    %176 = arith.addi %c3_i32, %175 : i32
    %c8_i32_72 = arith.constant 8 : i32
    %177 = arith.muli %176, %c8_i32_72 : i32
    %178 = tpu.assume_multiple %177, 8 : i32
    %179 = arith.index_cast %178 : i32 to index
    %c0_73 = arith.constant 0 : index
    %180 = vector.load %arg8[%179, %c0_73] : memref<64x512xf32, #tpu.memory_space<vmem>>, vector<8x512xf32>
    %181 = arith.truncf %157 : vector<8x128xf32> to vector<8x128xbf16>
    %c0_74 = arith.constant 0 : index
    %c0_75 = arith.constant 0 : index
    %c0_76 = arith.constant 0 : index
    %182 = vector.load %arg4[%c0_74, %c0_75, %c0_76] : memref<1x128x512xbf16, #tpu.memory_space<vmem>>, vector<1x128x512xbf16>
    %183 = vector.shape_cast %182 : vector<1x128x512xbf16> to vector<128x512xbf16>
    %cst_77 = arith.constant dense<0.000000e+00> : vector<8x512xf32>
    %184 = tpu.matmul %181, %183, %cst_77 {dimension_numbers = #tpu.dot_dimension_numbers<[1], [0], [0], [1], [0, 0, 1, 1], [], []>} : vector<8x128xbf16>, vector<128x512xbf16>, vector<8x512xf32> -> vector<8x512xf32>
    %185 = arith.addf %180, %184 : vector<8x512xf32>
    %186 = vector.extract_strided_slice %185 {offsets = [0, 0], sizes = [8, 128], strides = [1, 1]} : vector<8x512xf32> to vector<8x128xf32>
    %187 = arith.negf %186 : vector<8x128xf32>
    %188 = math.exp %187 : vector<8x128xf32>
    %cst_78 = arith.constant 1.000000e+00 : f32
    %189 = vector.broadcast %cst_78 : f32 to vector<8x128xf32>
    %190 = arith.addf %189, %188 : vector<8x128xf32>
    %191 = arith.divf %189, %190 : vector<8x128xf32>
    %192 = vector.extract_strided_slice %185 {offsets = [0, 128], sizes = [8, 128], strides = [1, 1]} : vector<8x512xf32> to vector<8x128xf32>
    %193 = arith.negf %192 : vector<8x128xf32>
    %194 = math.exp %193 : vector<8x128xf32>
    %cst_79 = arith.constant 1.000000e+00 : f32
    %195 = vector.broadcast %cst_79 : f32 to vector<8x128xf32>
    %196 = arith.addf %195, %194 : vector<8x128xf32>
    %197 = arith.divf %195, %196 : vector<8x128xf32>
    %198 = vector.extract_strided_slice %185 {offsets = [0, 256], sizes = [8, 128], strides = [1, 1]} : vector<8x512xf32> to vector<8x128xf32>
    %199 = math.tanh %198 : vector<8x128xf32>
    %200 = vector.extract_strided_slice %185 {offsets = [0, 384], sizes = [8, 128], strides = [1, 1]} : vector<8x512xf32> to vector<8x128xf32>
    %201 = arith.negf %200 : vector<8x128xf32>
    %202 = math.exp %201 : vector<8x128xf32>
    %cst_80 = arith.constant 1.000000e+00 : f32
    %203 = vector.broadcast %cst_80 : f32 to vector<8x128xf32>
    %204 = arith.addf %203, %202 : vector<8x128xf32>
    %205 = arith.divf %203, %204 : vector<8x128xf32>
    %206 = arith.mulf %197, %155 : vector<8x128xf32>
    %207 = arith.mulf %191, %199 : vector<8x128xf32>
    %208 = arith.addf %206, %207 : vector<8x128xf32>
    %209 = math.tanh %208 : vector<8x128xf32>
    %210 = arith.mulf %205, %209 : vector<8x128xf32>
    %211 = arith.index_cast %178 : i32 to index
    %c0_81 = arith.constant 0 : index
    %212 = vector.load %arg9[%211, %c0_81] : memref<64x128xf32, #tpu.memory_space<vmem>>, vector<8x128xf32>
    tpu.vector_store %arg9[%211, %c0_81], %210 {strides = array<i32>} : memref<64x128xf32, #tpu.memory_space<vmem>>, vector<8x128xf32>,
    %c0_i32_82 = arith.constant 0 : i32
    %213 = arith.cmpi eq, %arg0, %c0_i32_82 : i32
    %c0_i32_83 = arith.constant 0 : i32
    %214 = arith.cmpi eq, %arg1, %c0_i32_83 : i32
    %c7_i32_84 = arith.constant 7 : i32
    %215 = arith.cmpi eq, %c3_i32, %c7_i32_84 : i32
    %216 = arith.andi %214, %215 : i1
    %217 = arith.andi %213, %216 : i1
    %c1_i32_85 = arith.constant 1 : i32
    %218 = arith.cmpi eq, %arg0, %c1_i32_85 : i32
    %c0_i32_86 = arith.constant 0 : i32
    %219 = arith.cmpi eq, %arg1, %c0_i32_86 : i32
    %c0_i32_87 = arith.constant 0 : i32
    %220 = arith.cmpi eq, %c3_i32, %c0_i32_87 : i32
    %221 = arith.andi %219, %220 : i1
    %222 = arith.andi %218, %221 : i1
    %223 = arith.ori %217, %222 : i1
    %224 = arith.extui %223 : i1 to i32
    %c0_i32_88 = arith.constant 0 : i32
    %225 = arith.cmpi ne, %224, %c0_i32_88 : i32
    scf.if %225 {
      %c0_175 = arith.constant 0 : index
      %c0_176 = arith.constant 0 : index
      %443 = vector.load %arg7[%c0_175, %c0_176] : memref<8x128xf32, #tpu.memory_space<vmem>>, vector<8x128xf32>
      tpu.vector_store %arg7[%c0_175, %c0_176], %210 {strides = array<i32>} : memref<8x128xf32, #tpu.memory_space<vmem>>, vector<8x128xf32>,
    } else {
    }
    %c4_i32 = arith.constant 4 : i32
    %c2_i32_89 = arith.constant 2 : i32
    %226 = arith.muli %c2_i32_89, %c4_i32 : i32
    %c7_i32_90 = arith.constant 7 : i32
    %227 = arith.subi %c7_i32_90, %226 : i32
    %228 = arith.muli %arg0, %227 : i32
    %229 = arith.addi %c4_i32, %228 : i32
    %c8_i32_91 = arith.constant 8 : i32
    %230 = arith.muli %229, %c8_i32_91 : i32
    %231 = tpu.assume_multiple %230, 8 : i32
    %232 = arith.index_cast %231 : i32 to index
    %c0_92 = arith.constant 0 : index
    %233 = vector.load %arg8[%232, %c0_92] : memref<64x512xf32, #tpu.memory_space<vmem>>, vector<8x512xf32>
    %234 = arith.truncf %210 : vector<8x128xf32> to vector<8x128xbf16>
    %c0_93 = arith.constant 0 : index
    %c0_94 = arith.constant 0 : index
    %c0_95 = arith.constant 0 : index
    %235 = vector.load %arg4[%c0_93, %c0_94, %c0_95] : memref<1x128x512xbf16, #tpu.memory_space<vmem>>, vector<1x128x512xbf16>
    %236 = vector.shape_cast %235 : vector<1x128x512xbf16> to vector<128x512xbf16>
    %cst_96 = arith.constant dense<0.000000e+00> : vector<8x512xf32>
    %237 = tpu.matmul %234, %236, %cst_96 {dimension_numbers = #tpu.dot_dimension_numbers<[1], [0], [0], [1], [0, 0, 1, 1], [], []>} : vector<8x128xbf16>, vector<128x512xbf16>, vector<8x512xf32> -> vector<8x512xf32>
    %238 = arith.addf %233, %237 : vector<8x512xf32>
    %239 = vector.extract_strided_slice %238 {offsets = [0, 0], sizes = [8, 128], strides = [1, 1]} : vector<8x512xf32> to vector<8x128xf32>
    %240 = arith.negf %239 : vector<8x128xf32>
    %241 = math.exp %240 : vector<8x128xf32>
    %cst_97 = arith.constant 1.000000e+00 : f32
    %242 = vector.broadcast %cst_97 : f32 to vector<8x128xf32>
    %243 = arith.addf %242, %241 : vector<8x128xf32>
    %244 = arith.divf %242, %243 : vector<8x128xf32>
    %245 = vector.extract_strided_slice %238 {offsets = [0, 128], sizes = [8, 128], strides = [1, 1]} : vector<8x512xf32> to vector<8x128xf32>
    %246 = arith.negf %245 : vector<8x128xf32>
    %247 = math.exp %246 : vector<8x128xf32>
    %cst_98 = arith.constant 1.000000e+00 : f32
    %248 = vector.broadcast %cst_98 : f32 to vector<8x128xf32>
    %249 = arith.addf %248, %247 : vector<8x128xf32>
    %250 = arith.divf %248, %249 : vector<8x128xf32>
    %251 = vector.extract_strided_slice %238 {offsets = [0, 256], sizes = [8, 128], strides = [1, 1]} : vector<8x512xf32> to vector<8x128xf32>
    %252 = math.tanh %251 : vector<8x128xf32>
    %253 = vector.extract_strided_slice %238 {offsets = [0, 384], sizes = [8, 128], strides = [1, 1]} : vector<8x512xf32> to vector<8x128xf32>
    %254 = arith.negf %253 : vector<8x128xf32>
    %255 = math.exp %254 : vector<8x128xf32>
    %cst_99 = arith.constant 1.000000e+00 : f32
    %256 = vector.broadcast %cst_99 : f32 to vector<8x128xf32>
    %257 = arith.addf %256, %255 : vector<8x128xf32>
    %258 = arith.divf %256, %257 : vector<8x128xf32>
    %259 = arith.mulf %250, %208 : vector<8x128xf32>
    %260 = arith.mulf %244, %252 : vector<8x128xf32>
    %261 = arith.addf %259, %260 : vector<8x128xf32>
    %262 = math.tanh %261 : vector<8x128xf32>
    %263 = arith.mulf %258, %262 : vector<8x128xf32>
    %264 = arith.index_cast %231 : i32 to index
    %c0_100 = arith.constant 0 : index
    %265 = vector.load %arg9[%264, %c0_100] : memref<64x128xf32, #tpu.memory_space<vmem>>, vector<8x128xf32>
    tpu.vector_store %arg9[%264, %c0_100], %263 {strides = array<i32>} : memref<64x128xf32, #tpu.memory_space<vmem>>, vector<8x128xf32>,
    %c0_i32_101 = arith.constant 0 : i32
    %266 = arith.cmpi eq, %arg0, %c0_i32_101 : i32
    %c0_i32_102 = arith.constant 0 : i32
    %267 = arith.cmpi eq, %arg1, %c0_i32_102 : i32
    %c7_i32_103 = arith.constant 7 : i32
    %268 = arith.cmpi eq, %c4_i32, %c7_i32_103 : i32
    %269 = arith.andi %267, %268 : i1
    %270 = arith.andi %266, %269 : i1
    %c1_i32_104 = arith.constant 1 : i32
    %271 = arith.cmpi eq, %arg0, %c1_i32_104 : i32
    %c0_i32_105 = arith.constant 0 : i32
    %272 = arith.cmpi eq, %arg1, %c0_i32_105 : i32
    %c0_i32_106 = arith.constant 0 : i32
    %273 = arith.cmpi eq, %c4_i32, %c0_i32_106 : i32
    %274 = arith.andi %272, %273 : i1
    %275 = arith.andi %271, %274 : i1
    %276 = arith.ori %270, %275 : i1
    %277 = arith.extui %276 : i1 to i32
    %c0_i32_107 = arith.constant 0 : i32
    %278 = arith.cmpi ne, %277, %c0_i32_107 : i32
    scf.if %278 {
      %c0_175 = arith.constant 0 : index
      %c0_176 = arith.constant 0 : index
      %443 = vector.load %arg7[%c0_175, %c0_176] : memref<8x128xf32, #tpu.memory_space<vmem>>, vector<8x128xf32>
      tpu.vector_store %arg7[%c0_175, %c0_176], %263 {strides = array<i32>} : memref<8x128xf32, #tpu.memory_space<vmem>>, vector<8x128xf32>,
    } else {
    }
    %c5_i32 = arith.constant 5 : i32
    %c2_i32_108 = arith.constant 2 : i32
    %279 = arith.muli %c2_i32_108, %c5_i32 : i32
    %c7_i32_109 = arith.constant 7 : i32
    %280 = arith.subi %c7_i32_109, %279 : i32
    %281 = arith.muli %arg0, %280 : i32
    %282 = arith.addi %c5_i32, %281 : i32
    %c8_i32_110 = arith.constant 8 : i32
    %283 = arith.muli %282, %c8_i32_110 : i32
    %284 = tpu.assume_multiple %283, 8 : i32
    %285 = arith.index_cast %284 : i32 to index
    %c0_111 = arith.constant 0 : index
    %286 = vector.load %arg8[%285, %c0_111] : memref<64x512xf32, #tpu.memory_space<vmem>>, vector<8x512xf32>
    %287 = arith.truncf %263 : vector<8x128xf32> to vector<8x128xbf16>
    %c0_112 = arith.constant 0 : index
    %c0_113 = arith.constant 0 : index
    %c0_114 = arith.constant 0 : index
    %288 = vector.load %arg4[%c0_112, %c0_113, %c0_114] : memref<1x128x512xbf16, #tpu.memory_space<vmem>>, vector<1x128x512xbf16>
    %289 = vector.shape_cast %288 : vector<1x128x512xbf16> to vector<128x512xbf16>
    %cst_115 = arith.constant dense<0.000000e+00> : vector<8x512xf32>
    %290 = tpu.matmul %287, %289, %cst_115 {dimension_numbers = #tpu.dot_dimension_numbers<[1], [0], [0], [1], [0, 0, 1, 1], [], []>} : vector<8x128xbf16>, vector<128x512xbf16>, vector<8x512xf32> -> vector<8x512xf32>
    %291 = arith.addf %286, %290 : vector<8x512xf32>
    %292 = vector.extract_strided_slice %291 {offsets = [0, 0], sizes = [8, 128], strides = [1, 1]} : vector<8x512xf32> to vector<8x128xf32>
    %293 = arith.negf %292 : vector<8x128xf32>
    %294 = math.exp %293 : vector<8x128xf32>
    %cst_116 = arith.constant 1.000000e+00 : f32
    %295 = vector.broadcast %cst_116 : f32 to vector<8x128xf32>
    %296 = arith.addf %295, %294 : vector<8x128xf32>
    %297 = arith.divf %295, %296 : vector<8x128xf32>
    %298 = vector.extract_strided_slice %291 {offsets = [0, 128], sizes = [8, 128], strides = [1, 1]} : vector<8x512xf32> to vector<8x128xf32>
    %299 = arith.negf %298 : vector<8x128xf32>
    %300 = math.exp %299 : vector<8x128xf32>
    %cst_117 = arith.constant 1.000000e+00 : f32
    %301 = vector.broadcast %cst_117 : f32 to vector<8x128xf32>
    %302 = arith.addf %301, %300 : vector<8x128xf32>
    %303 = arith.divf %301, %302 : vector<8x128xf32>
    %304 = vector.extract_strided_slice %291 {offsets = [0, 256], sizes = [8, 128], strides = [1, 1]} : vector<8x512xf32> to vector<8x128xf32>
    %305 = math.tanh %304 : vector<8x128xf32>
    %306 = vector.extract_strided_slice %291 {offsets = [0, 384], sizes = [8, 128], strides = [1, 1]} : vector<8x512xf32> to vector<8x128xf32>
    %307 = arith.negf %306 : vector<8x128xf32>
    %308 = math.exp %307 : vector<8x128xf32>
    %cst_118 = arith.constant 1.000000e+00 : f32
    %309 = vector.broadcast %cst_118 : f32 to vector<8x128xf32>
    %310 = arith.addf %309, %308 : vector<8x128xf32>
    %311 = arith.divf %309, %310 : vector<8x128xf32>
    %312 = arith.mulf %303, %261 : vector<8x128xf32>
    %313 = arith.mulf %297, %305 : vector<8x128xf32>
    %314 = arith.addf %312, %313 : vector<8x128xf32>
    %315 = math.tanh %314 : vector<8x128xf32>
    %316 = arith.mulf %311, %315 : vector<8x128xf32>
    %317 = arith.index_cast %284 : i32 to index
    %c0_119 = arith.constant 0 : index
    %318 = vector.load %arg9[%317, %c0_119] : memref<64x128xf32, #tpu.memory_space<vmem>>, vector<8x128xf32>
    tpu.vector_store %arg9[%317, %c0_119], %316 {strides = array<i32>} : memref<64x128xf32, #tpu.memory_space<vmem>>, vector<8x128xf32>,
    %c0_i32_120 = arith.constant 0 : i32
    %319 = arith.cmpi eq, %arg0, %c0_i32_120 : i32
    %c0_i32_121 = arith.constant 0 : i32
    %320 = arith.cmpi eq, %arg1, %c0_i32_121 : i32
    %c7_i32_122 = arith.constant 7 : i32
    %321 = arith.cmpi eq, %c5_i32, %c7_i32_122 : i32
    %322 = arith.andi %320, %321 : i1
    %323 = arith.andi %319, %322 : i1
    %c1_i32_123 = arith.constant 1 : i32
    %324 = arith.cmpi eq, %arg0, %c1_i32_123 : i32
    %c0_i32_124 = arith.constant 0 : i32
    %325 = arith.cmpi eq, %arg1, %c0_i32_124 : i32
    %c0_i32_125 = arith.constant 0 : i32
    %326 = arith.cmpi eq, %c5_i32, %c0_i32_125 : i32
    %327 = arith.andi %325, %326 : i1
    %328 = arith.andi %324, %327 : i1
    %329 = arith.ori %323, %328 : i1
    %330 = arith.extui %329 : i1 to i32
    %c0_i32_126 = arith.constant 0 : i32
    %331 = arith.cmpi ne, %330, %c0_i32_126 : i32
    scf.if %331 {
      %c0_175 = arith.constant 0 : index
      %c0_176 = arith.constant 0 : index
      %443 = vector.load %arg7[%c0_175, %c0_176] : memref<8x128xf32, #tpu.memory_space<vmem>>, vector<8x128xf32>
      tpu.vector_store %arg7[%c0_175, %c0_176], %316 {strides = array<i32>} : memref<8x128xf32, #tpu.memory_space<vmem>>, vector<8x128xf32>,
    } else {
    }
    %c6_i32 = arith.constant 6 : i32
    %c2_i32_127 = arith.constant 2 : i32
    %332 = arith.muli %c2_i32_127, %c6_i32 : i32
    %c7_i32_128 = arith.constant 7 : i32
    %333 = arith.subi %c7_i32_128, %332 : i32
    %334 = arith.muli %arg0, %333 : i32
    %335 = arith.addi %c6_i32, %334 : i32
    %c8_i32_129 = arith.constant 8 : i32
    %336 = arith.muli %335, %c8_i32_129 : i32
    %337 = tpu.assume_multiple %336, 8 : i32
    %338 = arith.index_cast %337 : i32 to index
    %c0_130 = arith.constant 0 : index
    %339 = vector.load %arg8[%338, %c0_130] : memref<64x512xf32, #tpu.memory_space<vmem>>, vector<8x512xf32>
    %340 = arith.truncf %316 : vector<8x128xf32> to vector<8x128xbf16>
    %c0_131 = arith.constant 0 : index
    %c0_132 = arith.constant 0 : index
    %c0_133 = arith.constant 0 : index
    %341 = vector.load %arg4[%c0_131, %c0_132, %c0_133] : memref<1x128x512xbf16, #tpu.memory_space<vmem>>, vector<1x128x512xbf16>
    %342 = vector.shape_cast %341 : vector<1x128x512xbf16> to vector<128x512xbf16>
    %cst_134 = arith.constant dense<0.000000e+00> : vector<8x512xf32>
    %343 = tpu.matmul %340, %342, %cst_134 {dimension_numbers = #tpu.dot_dimension_numbers<[1], [0], [0], [1], [0, 0, 1, 1], [], []>} : vector<8x128xbf16>, vector<128x512xbf16>, vector<8x512xf32> -> vector<8x512xf32>
    %344 = arith.addf %339, %343 : vector<8x512xf32>
    %345 = vector.extract_strided_slice %344 {offsets = [0, 0], sizes = [8, 128], strides = [1, 1]} : vector<8x512xf32> to vector<8x128xf32>
    %346 = arith.negf %345 : vector<8x128xf32>
    %347 = math.exp %346 : vector<8x128xf32>
    %cst_135 = arith.constant 1.000000e+00 : f32
    %348 = vector.broadcast %cst_135 : f32 to vector<8x128xf32>
    %349 = arith.addf %348, %347 : vector<8x128xf32>
    %350 = arith.divf %348, %349 : vector<8x128xf32>
    %351 = vector.extract_strided_slice %344 {offsets = [0, 128], sizes = [8, 128], strides = [1, 1]} : vector<8x512xf32> to vector<8x128xf32>
    %352 = arith.negf %351 : vector<8x128xf32>
    %353 = math.exp %352 : vector<8x128xf32>
    %cst_136 = arith.constant 1.000000e+00 : f32
    %354 = vector.broadcast %cst_136 : f32 to vector<8x128xf32>
    %355 = arith.addf %354, %353 : vector<8x128xf32>
    %356 = arith.divf %354, %355 : vector<8x128xf32>
    %357 = vector.extract_strided_slice %344 {offsets = [0, 256], sizes = [8, 128], strides = [1, 1]} : vector<8x512xf32> to vector<8x128xf32>
    %358 = math.tanh %357 : vector<8x128xf32>
    %359 = vector.extract_strided_slice %344 {offsets = [0, 384], sizes = [8, 128], strides = [1, 1]} : vector<8x512xf32> to vector<8x128xf32>
    %360 = arith.negf %359 : vector<8x128xf32>
    %361 = math.exp %360 : vector<8x128xf32>
    %cst_137 = arith.constant 1.000000e+00 : f32
    %362 = vector.broadcast %cst_137 : f32 to vector<8x128xf32>
    %363 = arith.addf %362, %361 : vector<8x128xf32>
    %364 = arith.divf %362, %363 : vector<8x128xf32>
    %365 = arith.mulf %356, %314 : vector<8x128xf32>
    %366 = arith.mulf %350, %358 : vector<8x128xf32>
    %367 = arith.addf %365, %366 : vector<8x128xf32>
    %368 = math.tanh %367 : vector<8x128xf32>
    %369 = arith.mulf %364, %368 : vector<8x128xf32>
    %370 = arith.index_cast %337 : i32 to index
    %c0_138 = arith.constant 0 : index
    %371 = vector.load %arg9[%370, %c0_138] : memref<64x128xf32, #tpu.memory_space<vmem>>, vector<8x128xf32>
    tpu.vector_store %arg9[%370, %c0_138], %369 {strides = array<i32>} : memref<64x128xf32, #tpu.memory_space<vmem>>, vector<8x128xf32>,
    %c0_i32_139 = arith.constant 0 : i32
    %372 = arith.cmpi eq, %arg0, %c0_i32_139 : i32
    %c0_i32_140 = arith.constant 0 : i32
    %373 = arith.cmpi eq, %arg1, %c0_i32_140 : i32
    %c7_i32_141 = arith.constant 7 : i32
    %374 = arith.cmpi eq, %c6_i32, %c7_i32_141 : i32
    %375 = arith.andi %373, %374 : i1
    %376 = arith.andi %372, %375 : i1
    %c1_i32_142 = arith.constant 1 : i32
    %377 = arith.cmpi eq, %arg0, %c1_i32_142 : i32
    %c0_i32_143 = arith.constant 0 : i32
    %378 = arith.cmpi eq, %arg1, %c0_i32_143 : i32
    %c0_i32_144 = arith.constant 0 : i32
    %379 = arith.cmpi eq, %c6_i32, %c0_i32_144 : i32
    %380 = arith.andi %378, %379 : i1
    %381 = arith.andi %377, %380 : i1
    %382 = arith.ori %376, %381 : i1
    %383 = arith.extui %382 : i1 to i32
    %c0_i32_145 = arith.constant 0 : i32
    %384 = arith.cmpi ne, %383, %c0_i32_145 : i32
    scf.if %384 {
      %c0_175 = arith.constant 0 : index
      %c0_176 = arith.constant 0 : index
      %443 = vector.load %arg7[%c0_175, %c0_176] : memref<8x128xf32, #tpu.memory_space<vmem>>, vector<8x128xf32>
      tpu.vector_store %arg7[%c0_175, %c0_176], %369 {strides = array<i32>} : memref<8x128xf32, #tpu.memory_space<vmem>>, vector<8x128xf32>,
    } else {
    }
    %c7_i32_146 = arith.constant 7 : i32
    %c2_i32_147 = arith.constant 2 : i32
    %385 = arith.muli %c2_i32_147, %c7_i32_146 : i32
    %c7_i32_148 = arith.constant 7 : i32
    %386 = arith.subi %c7_i32_148, %385 : i32
    %387 = arith.muli %arg0, %386 : i32
    %388 = arith.addi %c7_i32_146, %387 : i32
    %c8_i32_149 = arith.constant 8 : i32
    %389 = arith.muli %388, %c8_i32_149 : i32
    %390 = tpu.assume_multiple %389, 8 : i32
    %391 = arith.index_cast %390 : i32 to index
    %c0_150 = arith.constant 0 : index
    %392 = vector.load %arg8[%391, %c0_150] : memref<64x512xf32, #tpu.memory_space<vmem>>, vector<8x512xf32>
    %393 = arith.truncf %369 : vector<8x128xf32> to vector<8x128xbf16>
    %c0_151 = arith.constant 0 : index
    %c0_152 = arith.constant 0 : index
    %c0_153 = arith.constant 0 : index
    %394 = vector.load %arg4[%c0_151, %c0_152, %c0_153] : memref<1x128x512xbf16, #tpu.memory_space<vmem>>, vector<1x128x512xbf16>
    %395 = vector.shape_cast %394 : vector<1x128x512xbf16> to vector<128x512xbf16>
    %cst_154 = arith.constant dense<0.000000e+00> : vector<8x512xf32>
    %396 = tpu.matmul %393, %395, %cst_154 {dimension_numbers = #tpu.dot_dimension_numbers<[1], [0], [0], [1], [0, 0, 1, 1], [], []>} : vector<8x128xbf16>, vector<128x512xbf16>, vector<8x512xf32> -> vector<8x512xf32>
    %397 = arith.addf %392, %396 : vector<8x512xf32>
    %398 = vector.extract_strided_slice %397 {offsets = [0, 0], sizes = [8, 128], strides = [1, 1]} : vector<8x512xf32> to vector<8x128xf32>
    %399 = arith.negf %398 : vector<8x128xf32>
    %400 = math.exp %399 : vector<8x128xf32>
    %cst_155 = arith.constant 1.000000e+00 : f32
    %401 = vector.broadcast %cst_155 : f32 to vector<8x128xf32>
    %402 = arith.addf %401, %400 : vector<8x128xf32>
    %403 = arith.divf %401, %402 : vector<8x128xf32>
    %404 = vector.extract_strided_slice %397 {offsets = [0, 128], sizes = [8, 128], strides = [1, 1]} : vector<8x512xf32> to vector<8x128xf32>
    %405 = arith.negf %404 : vector<8x128xf32>
    %406 = math.exp %405 : vector<8x128xf32>
    %cst_156 = arith.constant 1.000000e+00 : f32
    %407 = vector.broadcast %cst_156 : f32 to vector<8x128xf32>
    %408 = arith.addf %407, %406 : vector<8x128xf32>
    %409 = arith.divf %407, %408 : vector<8x128xf32>
    %410 = vector.extract_strided_slice %397 {offsets = [0, 256], sizes = [8, 128], strides = [1, 1]} : vector<8x512xf32> to vector<8x128xf32>
    %411 = math.tanh %410 : vector<8x128xf32>
    %412 = vector.extract_strided_slice %397 {offsets = [0, 384], sizes = [8, 128], strides = [1, 1]} : vector<8x512xf32> to vector<8x128xf32>
    %413 = arith.negf %412 : vector<8x128xf32>
    %414 = math.exp %413 : vector<8x128xf32>
    %cst_157 = arith.constant 1.000000e+00 : f32
    %415 = vector.broadcast %cst_157 : f32 to vector<8x128xf32>
    %416 = arith.addf %415, %414 : vector<8x128xf32>
    %417 = arith.divf %415, %416 : vector<8x128xf32>
    %418 = arith.mulf %409, %367 : vector<8x128xf32>
    %419 = arith.mulf %403, %411 : vector<8x128xf32>
    %420 = arith.addf %418, %419 : vector<8x128xf32>
    %421 = math.tanh %420 : vector<8x128xf32>
    %422 = arith.mulf %417, %421 : vector<8x128xf32>
    %423 = arith.index_cast %390 : i32 to index
    %c0_158 = arith.constant 0 : index
    %424 = vector.load %arg9[%423, %c0_158] : memref<64x128xf32, #tpu.memory_space<vmem>>, vector<8x128xf32>
    tpu.vector_store %arg9[%423, %c0_158], %422 {strides = array<i32>} : memref<64x128xf32, #tpu.memory_space<vmem>>, vector<8x128xf32>,
    %c0_i32_159 = arith.constant 0 : i32
    %425 = arith.cmpi eq, %arg0, %c0_i32_159 : i32
    %c0_i32_160 = arith.constant 0 : i32
    %426 = arith.cmpi eq, %arg1, %c0_i32_160 : i32
    %c7_i32_161 = arith.constant 7 : i32
    %427 = arith.cmpi eq, %c7_i32_146, %c7_i32_161 : i32
    %428 = arith.andi %426, %427 : i1
    %429 = arith.andi %425, %428 : i1
    %c1_i32_162 = arith.constant 1 : i32
    %430 = arith.cmpi eq, %arg0, %c1_i32_162 : i32
    %c0_i32_163 = arith.constant 0 : i32
    %431 = arith.cmpi eq, %arg1, %c0_i32_163 : i32
    %c0_i32_164 = arith.constant 0 : i32
    %432 = arith.cmpi eq, %c7_i32_146, %c0_i32_164 : i32
    %433 = arith.andi %431, %432 : i1
    %434 = arith.andi %430, %433 : i1
    %435 = arith.ori %429, %434 : i1
    %436 = arith.extui %435 : i1 to i32
    %c0_i32_165 = arith.constant 0 : i32
    %437 = arith.cmpi ne, %436, %c0_i32_165 : i32
    scf.if %437 {
      %c0_175 = arith.constant 0 : index
      %c0_176 = arith.constant 0 : index
      %443 = vector.load %arg7[%c0_175, %c0_176] : memref<8x128xf32, #tpu.memory_space<vmem>>, vector<8x128xf32>
      tpu.vector_store %arg7[%c0_175, %c0_176], %422 {strides = array<i32>} : memref<8x128xf32, #tpu.memory_space<vmem>>, vector<8x128xf32>,
    } else {
    }
    %c8_i32_166 = arith.constant 8 : i32
    %c0_167 = arith.constant 0 : index
    %c0_168 = arith.constant 0 : index
    %438 = vector.load %arg10[%c0_167, %c0_168] : memref<8x128xf32, #tpu.memory_space<vmem>>, vector<8x128xf32>
    tpu.vector_store %arg10[%c0_167, %c0_168], %422 {strides = array<i32>} : memref<8x128xf32, #tpu.memory_space<vmem>>, vector<8x128xf32>,
    %c0_169 = arith.constant 0 : index
    %c0_170 = arith.constant 0 : index
    %439 = vector.load %arg11[%c0_169, %c0_170] : memref<8x128xf32, #tpu.memory_space<vmem>>, vector<8x128xf32>
    tpu.vector_store %arg11[%c0_169, %c0_170], %420 {strides = array<i32>} : memref<8x128xf32, #tpu.memory_space<vmem>>, vector<8x128xf32>,
    %c0_171 = arith.constant 0 : index
    %c0_172 = arith.constant 0 : index
    %440 = vector.load %arg9[%c0_171, %c0_172] : memref<64x128xf32, #tpu.memory_space<vmem>>, vector<64x128xf32>
    %441 = arith.truncf %440 : vector<64x128xf32> to vector<64x128xbf16>
    %c0_173 = arith.constant 0 : index
    %c0_174 = arith.constant 0 : index
    %442 = vector.load %arg6[%c0_173, %c0_174] : memref<64x128xbf16, #tpu.memory_space<vmem>>, vector<64x128xbf16>
    tpu.vector_store %arg6[%c0_173, %c0_174], %441 {strides = array<i32>} : memref<64x128xbf16, #tpu.memory_space<vmem>>, vector<64x128xbf16>,
    return
  }
  func.func @transform_0(%arg0: i32, %arg1: i32) -> (i32, i32) {
    %c2_i32 = arith.constant 2 : i32
    %0 = arith.muli %c2_i32, %arg1 : i32
    %c0_i32 = arith.constant 0 : i32
    %1 = arith.subi %c0_i32, %0 : i32
    %2 = arith.muli %arg0, %1 : i32
    %3 = arith.addi %arg1, %2 : i32
    %c0_i32_0 = arith.constant 0 : i32
    %c0_i32_1 = arith.constant 0 : i32
    return %3, %c0_i32_0 : i32, i32
  }
  func.func @transform_1(%arg0: i32, %arg1: i32) -> (i32, i32, i32) {
    %c0_i32 = arith.constant 0 : i32
    %c0_i32_0 = arith.constant 0 : i32
    %c0_i32_1 = arith.constant 0 : i32
    return %arg0, %c0_i32, %c0_i32_0 : i32, i32, i32
  }
  func.func @transform_2(%arg0: i32, %arg1: i32) -> (i32, i32, i32) {
    %c0_i32 = arith.constant 0 : i32
    %c0_i32_0 = arith.constant 0 : i32
    %c0_i32_1 = arith.constant 0 : i32
    return %arg0, %c0_i32, %c0_i32_0 : i32, i32, i32
  }
  func.func @transform_3(%arg0: i32, %arg1: i32) -> (i32, i32, i32) {
    %c0_i32 = arith.constant 0 : i32
    %c0_i32_0 = arith.constant 0 : i32
    %c0_i32_1 = arith.constant 0 : i32
    return %arg0, %c0_i32, %c0_i32_0 : i32, i32, i32
  }
  func.func @transform_4(%arg0: i32, %arg1: i32) -> (i32, i32) {
    %c2_i32 = arith.constant 2 : i32
    %0 = arith.muli %c2_i32, %arg1 : i32
    %c0_i32 = arith.constant 0 : i32
    %1 = arith.subi %c0_i32, %0 : i32
    %2 = arith.muli %arg0, %1 : i32
    %3 = arith.addi %arg1, %2 : i32
    %c0_i32_0 = arith.constant 0 : i32
    return %3, %arg0 : i32, i32
  }
  func.func @transform_5(%arg0: i32, %arg1: i32) -> (i32, i32) {
    %c0_i32 = arith.constant 0 : i32
    %c0_i32_0 = arith.constant 0 : i32
    return %c0_i32, %arg0 : i32, i32
  }
}

module attributes {stable_mosaic.version = 11 : i64} {
  func.func @_bilstm_kernel(%arg0: i32, %arg1: i32, %arg2: memref<64x256xbf16, #tpu.memory_space<vmem>>, %arg3: memref<1x256x512xbf16, #tpu.memory_space<vmem>>, %arg4: memref<1x128x512xbf16, #tpu.memory_space<vmem>>, %arg5: memref<1x1x512xf32, #tpu.memory_space<vmem>>, %arg6: memref<8x128xf32, #tpu.memory_space<vmem>>, %arg7: memref<64x512xf32, #tpu.memory_space<vmem>>, %arg8: memref<64x128xf32, #tpu.memory_space<vmem>>, %arg9: memref<8x128xf32, #tpu.memory_space<vmem>>, %arg10: memref<8x128xf32, #tpu.memory_space<vmem>>) attributes {dimension_semantics = [#tpu.dimension_semantics<parallel>, #tpu.dimension_semantics<arbitrary>], iteration_bounds = array<i64: 2, 1>, scalar_prefetch = 0 : i64, scratch_operands = 4 : i64, tpu.core_type = #tpu.core_type<tc>, window_params = [{transform_indices = @transform_0, window_bounds = array<i64: 64, 256>}, {transform_indices = @transform_1, window_bounds = array<i64: 1, 256, 512>}, {transform_indices = @transform_2, window_bounds = array<i64: 1, 128, 512>}, {transform_indices = @transform_3, window_bounds = array<i64: 1, 1, 512>}, {transform_indices = @transform_4, window_bounds = array<i64: 8, 128>}]} {
    %c0_i32 = arith.constant 0 : i32
    %0 = arith.cmpi eq, %arg1, %c0_i32 : i32
    %1 = arith.extui %0 : i1 to i32
    %c0_i32_0 = arith.constant 0 : i32
    %2 = arith.cmpi ne, %1, %c0_i32_0 : i32
    scf.if %2 {
      %cst_163 = arith.constant 0.000000e+00 : f32
      %424 = vector.broadcast %cst_163 : f32 to vector<8x128xf32>
      %c0_164 = arith.constant 0 : index
      %c0_165 = arith.constant 0 : index
      %425 = vector.load %arg9[%c0_164, %c0_165] : memref<8x128xf32, #tpu.memory_space<vmem>>, vector<8x128xf32>
      tpu.vector_store %arg9[%c0_164, %c0_165], %424 {strides = array<i32>} : memref<8x128xf32, #tpu.memory_space<vmem>>, vector<8x128xf32>,
      %cst_166 = arith.constant 0.000000e+00 : f32
      %426 = vector.broadcast %cst_166 : f32 to vector<8x128xf32>
      %c0_167 = arith.constant 0 : index
      %c0_168 = arith.constant 0 : index
      %427 = vector.load %arg10[%c0_167, %c0_168] : memref<8x128xf32, #tpu.memory_space<vmem>>, vector<8x128xf32>
      tpu.vector_store %arg10[%c0_167, %c0_168], %426 {strides = array<i32>} : memref<8x128xf32, #tpu.memory_space<vmem>>, vector<8x128xf32>,
    } else {
    }
    %c0 = arith.constant 0 : index
    %c0_1 = arith.constant 0 : index
    %3 = vector.load %arg2[%c0, %c0_1] : memref<64x256xbf16, #tpu.memory_space<vmem>>, vector<64x256xbf16>
    %c0_2 = arith.constant 0 : index
    %c0_3 = arith.constant 0 : index
    %c0_4 = arith.constant 0 : index
    %4 = vector.load %arg3[%c0_2, %c0_3, %c0_4] : memref<1x256x512xbf16, #tpu.memory_space<vmem>>, vector<1x256x512xbf16>
    %5 = vector.shape_cast %4 : vector<1x256x512xbf16> to vector<256x512xbf16>
    %cst = arith.constant dense<0.000000e+00> : vector<64x512xf32>
    %6 = tpu.matmul %3, %5, %cst {dimension_numbers = #tpu.dot_dimension_numbers<[1], [0], [0], [1], [0, 0, 1, 1], [], []>} : vector<64x256xbf16>, vector<256x512xbf16>, vector<64x512xf32> -> vector<64x512xf32>
    %c0_5 = arith.constant 0 : index
    %c0_6 = arith.constant 0 : index
    %c0_7 = arith.constant 0 : index
    %7 = vector.load %arg5[%c0_5, %c0_6, %c0_7] : memref<1x1x512xf32, #tpu.memory_space<vmem>>, vector<1x1x512xf32>
    %8 = vector.shape_cast %7 : vector<1x1x512xf32> to vector<1x512xf32>
    %9 = vector.broadcast %8 : vector<1x512xf32> to vector<64x512xf32>
    %10 = arith.addf %6, %9 : vector<64x512xf32>
    %c0_8 = arith.constant 0 : index
    %c0_9 = arith.constant 0 : index
    %11 = vector.load %arg7[%c0_8, %c0_9] : memref<64x512xf32, #tpu.memory_space<vmem>>, vector<64x512xf32>
    tpu.vector_store %arg7[%c0_8, %c0_9], %10 {strides = array<i32>} : memref<64x512xf32, #tpu.memory_space<vmem>>, vector<64x512xf32>,
    %c0_10 = arith.constant 0 : index
    %c0_11 = arith.constant 0 : index
    %12 = vector.load %arg9[%c0_10, %c0_11] : memref<8x128xf32, #tpu.memory_space<vmem>>, vector<8x128xf32>
    %c0_12 = arith.constant 0 : index
    %c0_13 = arith.constant 0 : index
    %13 = vector.load %arg10[%c0_12, %c0_13] : memref<8x128xf32, #tpu.memory_space<vmem>>, vector<8x128xf32>
    %c0_i32_14 = arith.constant 0 : i32
    %c2_i32 = arith.constant 2 : i32
    %14 = arith.muli %c2_i32, %c0_i32_14 : i32
    %c7_i32 = arith.constant 7 : i32
    %15 = arith.subi %c7_i32, %14 : i32
    %16 = arith.muli %arg0, %15 : i32
    %17 = arith.addi %c0_i32_14, %16 : i32
    %c8_i32 = arith.constant 8 : i32
    %18 = arith.muli %17, %c8_i32 : i32
    %19 = tpu.assume_multiple %18, 8 : i32
    %20 = arith.index_cast %19 : i32 to index
    %c0_15 = arith.constant 0 : index
    %21 = vector.load %arg7[%20, %c0_15] : memref<64x512xf32, #tpu.memory_space<vmem>>, vector<8x512xf32>
    %22 = arith.truncf %12 : vector<8x128xf32> to vector<8x128xbf16>
    %c0_16 = arith.constant 0 : index
    %c0_17 = arith.constant 0 : index
    %c0_18 = arith.constant 0 : index
    %23 = vector.load %arg4[%c0_16, %c0_17, %c0_18] : memref<1x128x512xbf16, #tpu.memory_space<vmem>>, vector<1x128x512xbf16>
    %24 = vector.shape_cast %23 : vector<1x128x512xbf16> to vector<128x512xbf16>
    %cst_19 = arith.constant dense<0.000000e+00> : vector<8x512xf32>
    %25 = tpu.matmul %22, %24, %cst_19 {dimension_numbers = #tpu.dot_dimension_numbers<[1], [0], [0], [1], [0, 0, 1, 1], [], []>} : vector<8x128xbf16>, vector<128x512xbf16>, vector<8x512xf32> -> vector<8x512xf32>
    %26 = arith.addf %21, %25 : vector<8x512xf32>
    %27 = vector.extract_strided_slice %26 {offsets = [0, 0], sizes = [8, 128], strides = [1, 1]} : vector<8x512xf32> to vector<8x128xf32>
    %28 = arith.negf %27 : vector<8x128xf32>
    %29 = math.exp %28 : vector<8x128xf32>
    %cst_20 = arith.constant 1.000000e+00 : f32
    %30 = vector.broadcast %cst_20 : f32 to vector<8x128xf32>
    %31 = arith.addf %30, %29 : vector<8x128xf32>
    %32 = arith.divf %30, %31 : vector<8x128xf32>
    %33 = vector.extract_strided_slice %26 {offsets = [0, 128], sizes = [8, 128], strides = [1, 1]} : vector<8x512xf32> to vector<8x128xf32>
    %34 = arith.negf %33 : vector<8x128xf32>
    %35 = math.exp %34 : vector<8x128xf32>
    %cst_21 = arith.constant 1.000000e+00 : f32
    %36 = vector.broadcast %cst_21 : f32 to vector<8x128xf32>
    %37 = arith.addf %36, %35 : vector<8x128xf32>
    %38 = arith.divf %36, %37 : vector<8x128xf32>
    %39 = vector.extract_strided_slice %26 {offsets = [0, 256], sizes = [8, 128], strides = [1, 1]} : vector<8x512xf32> to vector<8x128xf32>
    %40 = math.tanh %39 : vector<8x128xf32>
    %41 = vector.extract_strided_slice %26 {offsets = [0, 384], sizes = [8, 128], strides = [1, 1]} : vector<8x512xf32> to vector<8x128xf32>
    %42 = arith.negf %41 : vector<8x128xf32>
    %43 = math.exp %42 : vector<8x128xf32>
    %cst_22 = arith.constant 1.000000e+00 : f32
    %44 = vector.broadcast %cst_22 : f32 to vector<8x128xf32>
    %45 = arith.addf %44, %43 : vector<8x128xf32>
    %46 = arith.divf %44, %45 : vector<8x128xf32>
    %47 = arith.mulf %38, %13 : vector<8x128xf32>
    %48 = arith.mulf %32, %40 : vector<8x128xf32>
    %49 = arith.addf %47, %48 : vector<8x128xf32>
    %50 = math.tanh %49 : vector<8x128xf32>
    %51 = arith.mulf %46, %50 : vector<8x128xf32>
    %c0_i32_23 = arith.constant 0 : i32
    %52 = arith.cmpi eq, %arg0, %c0_i32_23 : i32
    %c0_i32_24 = arith.constant 0 : i32
    %53 = arith.cmpi eq, %arg1, %c0_i32_24 : i32
    %c7_i32_25 = arith.constant 7 : i32
    %54 = arith.cmpi eq, %c0_i32_14, %c7_i32_25 : i32
    %55 = arith.andi %53, %54 : i1
    %56 = arith.andi %52, %55 : i1
    %c1_i32 = arith.constant 1 : i32
    %57 = arith.cmpi eq, %arg0, %c1_i32 : i32
    %c0_i32_26 = arith.constant 0 : i32
    %58 = arith.cmpi eq, %arg1, %c0_i32_26 : i32
    %c0_i32_27 = arith.constant 0 : i32
    %59 = arith.cmpi eq, %c0_i32_14, %c0_i32_27 : i32
    %60 = arith.andi %58, %59 : i1
    %61 = arith.andi %57, %60 : i1
    %62 = arith.ori %56, %61 : i1
    %63 = arith.extui %62 : i1 to i32
    %c0_i32_28 = arith.constant 0 : i32
    %64 = arith.cmpi ne, %63, %c0_i32_28 : i32
    scf.if %64 {
      %c0_163 = arith.constant 0 : index
      %c0_164 = arith.constant 0 : index
      %424 = vector.load %arg6[%c0_163, %c0_164] : memref<8x128xf32, #tpu.memory_space<vmem>>, vector<8x128xf32>
      tpu.vector_store %arg6[%c0_163, %c0_164], %51 {strides = array<i32>} : memref<8x128xf32, #tpu.memory_space<vmem>>, vector<8x128xf32>,
    } else {
    }
    %c1_i32_29 = arith.constant 1 : i32
    %c2_i32_30 = arith.constant 2 : i32
    %65 = arith.muli %c2_i32_30, %c1_i32_29 : i32
    %c7_i32_31 = arith.constant 7 : i32
    %66 = arith.subi %c7_i32_31, %65 : i32
    %67 = arith.muli %arg0, %66 : i32
    %68 = arith.addi %c1_i32_29, %67 : i32
    %c8_i32_32 = arith.constant 8 : i32
    %69 = arith.muli %68, %c8_i32_32 : i32
    %70 = tpu.assume_multiple %69, 8 : i32
    %71 = arith.index_cast %70 : i32 to index
    %c0_33 = arith.constant 0 : index
    %72 = vector.load %arg7[%71, %c0_33] : memref<64x512xf32, #tpu.memory_space<vmem>>, vector<8x512xf32>
    %73 = arith.truncf %51 : vector<8x128xf32> to vector<8x128xbf16>
    %c0_34 = arith.constant 0 : index
    %c0_35 = arith.constant 0 : index
    %c0_36 = arith.constant 0 : index
    %74 = vector.load %arg4[%c0_34, %c0_35, %c0_36] : memref<1x128x512xbf16, #tpu.memory_space<vmem>>, vector<1x128x512xbf16>
    %75 = vector.shape_cast %74 : vector<1x128x512xbf16> to vector<128x512xbf16>
    %cst_37 = arith.constant dense<0.000000e+00> : vector<8x512xf32>
    %76 = tpu.matmul %73, %75, %cst_37 {dimension_numbers = #tpu.dot_dimension_numbers<[1], [0], [0], [1], [0, 0, 1, 1], [], []>} : vector<8x128xbf16>, vector<128x512xbf16>, vector<8x512xf32> -> vector<8x512xf32>
    %77 = arith.addf %72, %76 : vector<8x512xf32>
    %78 = vector.extract_strided_slice %77 {offsets = [0, 0], sizes = [8, 128], strides = [1, 1]} : vector<8x512xf32> to vector<8x128xf32>
    %79 = arith.negf %78 : vector<8x128xf32>
    %80 = math.exp %79 : vector<8x128xf32>
    %cst_38 = arith.constant 1.000000e+00 : f32
    %81 = vector.broadcast %cst_38 : f32 to vector<8x128xf32>
    %82 = arith.addf %81, %80 : vector<8x128xf32>
    %83 = arith.divf %81, %82 : vector<8x128xf32>
    %84 = vector.extract_strided_slice %77 {offsets = [0, 128], sizes = [8, 128], strides = [1, 1]} : vector<8x512xf32> to vector<8x128xf32>
    %85 = arith.negf %84 : vector<8x128xf32>
    %86 = math.exp %85 : vector<8x128xf32>
    %cst_39 = arith.constant 1.000000e+00 : f32
    %87 = vector.broadcast %cst_39 : f32 to vector<8x128xf32>
    %88 = arith.addf %87, %86 : vector<8x128xf32>
    %89 = arith.divf %87, %88 : vector<8x128xf32>
    %90 = vector.extract_strided_slice %77 {offsets = [0, 256], sizes = [8, 128], strides = [1, 1]} : vector<8x512xf32> to vector<8x128xf32>
    %91 = math.tanh %90 : vector<8x128xf32>
    %92 = vector.extract_strided_slice %77 {offsets = [0, 384], sizes = [8, 128], strides = [1, 1]} : vector<8x512xf32> to vector<8x128xf32>
    %93 = arith.negf %92 : vector<8x128xf32>
    %94 = math.exp %93 : vector<8x128xf32>
    %cst_40 = arith.constant 1.000000e+00 : f32
    %95 = vector.broadcast %cst_40 : f32 to vector<8x128xf32>
    %96 = arith.addf %95, %94 : vector<8x128xf32>
    %97 = arith.divf %95, %96 : vector<8x128xf32>
    %98 = arith.mulf %89, %49 : vector<8x128xf32>
    %99 = arith.mulf %83, %91 : vector<8x128xf32>
    %100 = arith.addf %98, %99 : vector<8x128xf32>
    %101 = math.tanh %100 : vector<8x128xf32>
    %102 = arith.mulf %97, %101 : vector<8x128xf32>
    %c0_i32_41 = arith.constant 0 : i32
    %103 = arith.cmpi eq, %arg0, %c0_i32_41 : i32
    %c0_i32_42 = arith.constant 0 : i32
    %104 = arith.cmpi eq, %arg1, %c0_i32_42 : i32
    %c7_i32_43 = arith.constant 7 : i32
    %105 = arith.cmpi eq, %c1_i32_29, %c7_i32_43 : i32
    %106 = arith.andi %104, %105 : i1
    %107 = arith.andi %103, %106 : i1
    %c1_i32_44 = arith.constant 1 : i32
    %108 = arith.cmpi eq, %arg0, %c1_i32_44 : i32
    %c0_i32_45 = arith.constant 0 : i32
    %109 = arith.cmpi eq, %arg1, %c0_i32_45 : i32
    %c0_i32_46 = arith.constant 0 : i32
    %110 = arith.cmpi eq, %c1_i32_29, %c0_i32_46 : i32
    %111 = arith.andi %109, %110 : i1
    %112 = arith.andi %108, %111 : i1
    %113 = arith.ori %107, %112 : i1
    %114 = arith.extui %113 : i1 to i32
    %c0_i32_47 = arith.constant 0 : i32
    %115 = arith.cmpi ne, %114, %c0_i32_47 : i32
    scf.if %115 {
      %c0_163 = arith.constant 0 : index
      %c0_164 = arith.constant 0 : index
      %424 = vector.load %arg6[%c0_163, %c0_164] : memref<8x128xf32, #tpu.memory_space<vmem>>, vector<8x128xf32>
      tpu.vector_store %arg6[%c0_163, %c0_164], %102 {strides = array<i32>} : memref<8x128xf32, #tpu.memory_space<vmem>>, vector<8x128xf32>,
    } else {
    }
    %c2_i32_48 = arith.constant 2 : i32
    %c2_i32_49 = arith.constant 2 : i32
    %116 = arith.muli %c2_i32_49, %c2_i32_48 : i32
    %c7_i32_50 = arith.constant 7 : i32
    %117 = arith.subi %c7_i32_50, %116 : i32
    %118 = arith.muli %arg0, %117 : i32
    %119 = arith.addi %c2_i32_48, %118 : i32
    %c8_i32_51 = arith.constant 8 : i32
    %120 = arith.muli %119, %c8_i32_51 : i32
    %121 = tpu.assume_multiple %120, 8 : i32
    %122 = arith.index_cast %121 : i32 to index
    %c0_52 = arith.constant 0 : index
    %123 = vector.load %arg7[%122, %c0_52] : memref<64x512xf32, #tpu.memory_space<vmem>>, vector<8x512xf32>
    %124 = arith.truncf %102 : vector<8x128xf32> to vector<8x128xbf16>
    %c0_53 = arith.constant 0 : index
    %c0_54 = arith.constant 0 : index
    %c0_55 = arith.constant 0 : index
    %125 = vector.load %arg4[%c0_53, %c0_54, %c0_55] : memref<1x128x512xbf16, #tpu.memory_space<vmem>>, vector<1x128x512xbf16>
    %126 = vector.shape_cast %125 : vector<1x128x512xbf16> to vector<128x512xbf16>
    %cst_56 = arith.constant dense<0.000000e+00> : vector<8x512xf32>
    %127 = tpu.matmul %124, %126, %cst_56 {dimension_numbers = #tpu.dot_dimension_numbers<[1], [0], [0], [1], [0, 0, 1, 1], [], []>} : vector<8x128xbf16>, vector<128x512xbf16>, vector<8x512xf32> -> vector<8x512xf32>
    %128 = arith.addf %123, %127 : vector<8x512xf32>
    %129 = vector.extract_strided_slice %128 {offsets = [0, 0], sizes = [8, 128], strides = [1, 1]} : vector<8x512xf32> to vector<8x128xf32>
    %130 = arith.negf %129 : vector<8x128xf32>
    %131 = math.exp %130 : vector<8x128xf32>
    %cst_57 = arith.constant 1.000000e+00 : f32
    %132 = vector.broadcast %cst_57 : f32 to vector<8x128xf32>
    %133 = arith.addf %132, %131 : vector<8x128xf32>
    %134 = arith.divf %132, %133 : vector<8x128xf32>
    %135 = vector.extract_strided_slice %128 {offsets = [0, 128], sizes = [8, 128], strides = [1, 1]} : vector<8x512xf32> to vector<8x128xf32>
    %136 = arith.negf %135 : vector<8x128xf32>
    %137 = math.exp %136 : vector<8x128xf32>
    %cst_58 = arith.constant 1.000000e+00 : f32
    %138 = vector.broadcast %cst_58 : f32 to vector<8x128xf32>
    %139 = arith.addf %138, %137 : vector<8x128xf32>
    %140 = arith.divf %138, %139 : vector<8x128xf32>
    %141 = vector.extract_strided_slice %128 {offsets = [0, 256], sizes = [8, 128], strides = [1, 1]} : vector<8x512xf32> to vector<8x128xf32>
    %142 = math.tanh %141 : vector<8x128xf32>
    %143 = vector.extract_strided_slice %128 {offsets = [0, 384], sizes = [8, 128], strides = [1, 1]} : vector<8x512xf32> to vector<8x128xf32>
    %144 = arith.negf %143 : vector<8x128xf32>
    %145 = math.exp %144 : vector<8x128xf32>
    %cst_59 = arith.constant 1.000000e+00 : f32
    %146 = vector.broadcast %cst_59 : f32 to vector<8x128xf32>
    %147 = arith.addf %146, %145 : vector<8x128xf32>
    %148 = arith.divf %146, %147 : vector<8x128xf32>
    %149 = arith.mulf %140, %100 : vector<8x128xf32>
    %150 = arith.mulf %134, %142 : vector<8x128xf32>
    %151 = arith.addf %149, %150 : vector<8x128xf32>
    %152 = math.tanh %151 : vector<8x128xf32>
    %153 = arith.mulf %148, %152 : vector<8x128xf32>
    %c0_i32_60 = arith.constant 0 : i32
    %154 = arith.cmpi eq, %arg0, %c0_i32_60 : i32
    %c0_i32_61 = arith.constant 0 : i32
    %155 = arith.cmpi eq, %arg1, %c0_i32_61 : i32
    %c7_i32_62 = arith.constant 7 : i32
    %156 = arith.cmpi eq, %c2_i32_48, %c7_i32_62 : i32
    %157 = arith.andi %155, %156 : i1
    %158 = arith.andi %154, %157 : i1
    %c1_i32_63 = arith.constant 1 : i32
    %159 = arith.cmpi eq, %arg0, %c1_i32_63 : i32
    %c0_i32_64 = arith.constant 0 : i32
    %160 = arith.cmpi eq, %arg1, %c0_i32_64 : i32
    %c0_i32_65 = arith.constant 0 : i32
    %161 = arith.cmpi eq, %c2_i32_48, %c0_i32_65 : i32
    %162 = arith.andi %160, %161 : i1
    %163 = arith.andi %159, %162 : i1
    %164 = arith.ori %158, %163 : i1
    %165 = arith.extui %164 : i1 to i32
    %c0_i32_66 = arith.constant 0 : i32
    %166 = arith.cmpi ne, %165, %c0_i32_66 : i32
    scf.if %166 {
      %c0_163 = arith.constant 0 : index
      %c0_164 = arith.constant 0 : index
      %424 = vector.load %arg6[%c0_163, %c0_164] : memref<8x128xf32, #tpu.memory_space<vmem>>, vector<8x128xf32>
      tpu.vector_store %arg6[%c0_163, %c0_164], %153 {strides = array<i32>} : memref<8x128xf32, #tpu.memory_space<vmem>>, vector<8x128xf32>,
    } else {
    }
    %c3_i32 = arith.constant 3 : i32
    %c2_i32_67 = arith.constant 2 : i32
    %167 = arith.muli %c2_i32_67, %c3_i32 : i32
    %c7_i32_68 = arith.constant 7 : i32
    %168 = arith.subi %c7_i32_68, %167 : i32
    %169 = arith.muli %arg0, %168 : i32
    %170 = arith.addi %c3_i32, %169 : i32
    %c8_i32_69 = arith.constant 8 : i32
    %171 = arith.muli %170, %c8_i32_69 : i32
    %172 = tpu.assume_multiple %171, 8 : i32
    %173 = arith.index_cast %172 : i32 to index
    %c0_70 = arith.constant 0 : index
    %174 = vector.load %arg7[%173, %c0_70] : memref<64x512xf32, #tpu.memory_space<vmem>>, vector<8x512xf32>
    %175 = arith.truncf %153 : vector<8x128xf32> to vector<8x128xbf16>
    %c0_71 = arith.constant 0 : index
    %c0_72 = arith.constant 0 : index
    %c0_73 = arith.constant 0 : index
    %176 = vector.load %arg4[%c0_71, %c0_72, %c0_73] : memref<1x128x512xbf16, #tpu.memory_space<vmem>>, vector<1x128x512xbf16>
    %177 = vector.shape_cast %176 : vector<1x128x512xbf16> to vector<128x512xbf16>
    %cst_74 = arith.constant dense<0.000000e+00> : vector<8x512xf32>
    %178 = tpu.matmul %175, %177, %cst_74 {dimension_numbers = #tpu.dot_dimension_numbers<[1], [0], [0], [1], [0, 0, 1, 1], [], []>} : vector<8x128xbf16>, vector<128x512xbf16>, vector<8x512xf32> -> vector<8x512xf32>
    %179 = arith.addf %174, %178 : vector<8x512xf32>
    %180 = vector.extract_strided_slice %179 {offsets = [0, 0], sizes = [8, 128], strides = [1, 1]} : vector<8x512xf32> to vector<8x128xf32>
    %181 = arith.negf %180 : vector<8x128xf32>
    %182 = math.exp %181 : vector<8x128xf32>
    %cst_75 = arith.constant 1.000000e+00 : f32
    %183 = vector.broadcast %cst_75 : f32 to vector<8x128xf32>
    %184 = arith.addf %183, %182 : vector<8x128xf32>
    %185 = arith.divf %183, %184 : vector<8x128xf32>
    %186 = vector.extract_strided_slice %179 {offsets = [0, 128], sizes = [8, 128], strides = [1, 1]} : vector<8x512xf32> to vector<8x128xf32>
    %187 = arith.negf %186 : vector<8x128xf32>
    %188 = math.exp %187 : vector<8x128xf32>
    %cst_76 = arith.constant 1.000000e+00 : f32
    %189 = vector.broadcast %cst_76 : f32 to vector<8x128xf32>
    %190 = arith.addf %189, %188 : vector<8x128xf32>
    %191 = arith.divf %189, %190 : vector<8x128xf32>
    %192 = vector.extract_strided_slice %179 {offsets = [0, 256], sizes = [8, 128], strides = [1, 1]} : vector<8x512xf32> to vector<8x128xf32>
    %193 = math.tanh %192 : vector<8x128xf32>
    %194 = vector.extract_strided_slice %179 {offsets = [0, 384], sizes = [8, 128], strides = [1, 1]} : vector<8x512xf32> to vector<8x128xf32>
    %195 = arith.negf %194 : vector<8x128xf32>
    %196 = math.exp %195 : vector<8x128xf32>
    %cst_77 = arith.constant 1.000000e+00 : f32
    %197 = vector.broadcast %cst_77 : f32 to vector<8x128xf32>
    %198 = arith.addf %197, %196 : vector<8x128xf32>
    %199 = arith.divf %197, %198 : vector<8x128xf32>
    %200 = arith.mulf %191, %151 : vector<8x128xf32>
    %201 = arith.mulf %185, %193 : vector<8x128xf32>
    %202 = arith.addf %200, %201 : vector<8x128xf32>
    %203 = math.tanh %202 : vector<8x128xf32>
    %204 = arith.mulf %199, %203 : vector<8x128xf32>
    %c0_i32_78 = arith.constant 0 : i32
    %205 = arith.cmpi eq, %arg0, %c0_i32_78 : i32
    %c0_i32_79 = arith.constant 0 : i32
    %206 = arith.cmpi eq, %arg1, %c0_i32_79 : i32
    %c7_i32_80 = arith.constant 7 : i32
    %207 = arith.cmpi eq, %c3_i32, %c7_i32_80 : i32
    %208 = arith.andi %206, %207 : i1
    %209 = arith.andi %205, %208 : i1
    %c1_i32_81 = arith.constant 1 : i32
    %210 = arith.cmpi eq, %arg0, %c1_i32_81 : i32
    %c0_i32_82 = arith.constant 0 : i32
    %211 = arith.cmpi eq, %arg1, %c0_i32_82 : i32
    %c0_i32_83 = arith.constant 0 : i32
    %212 = arith.cmpi eq, %c3_i32, %c0_i32_83 : i32
    %213 = arith.andi %211, %212 : i1
    %214 = arith.andi %210, %213 : i1
    %215 = arith.ori %209, %214 : i1
    %216 = arith.extui %215 : i1 to i32
    %c0_i32_84 = arith.constant 0 : i32
    %217 = arith.cmpi ne, %216, %c0_i32_84 : i32
    scf.if %217 {
      %c0_163 = arith.constant 0 : index
      %c0_164 = arith.constant 0 : index
      %424 = vector.load %arg6[%c0_163, %c0_164] : memref<8x128xf32, #tpu.memory_space<vmem>>, vector<8x128xf32>
      tpu.vector_store %arg6[%c0_163, %c0_164], %204 {strides = array<i32>} : memref<8x128xf32, #tpu.memory_space<vmem>>, vector<8x128xf32>,
    } else {
    }
    %c4_i32 = arith.constant 4 : i32
    %c2_i32_85 = arith.constant 2 : i32
    %218 = arith.muli %c2_i32_85, %c4_i32 : i32
    %c7_i32_86 = arith.constant 7 : i32
    %219 = arith.subi %c7_i32_86, %218 : i32
    %220 = arith.muli %arg0, %219 : i32
    %221 = arith.addi %c4_i32, %220 : i32
    %c8_i32_87 = arith.constant 8 : i32
    %222 = arith.muli %221, %c8_i32_87 : i32
    %223 = tpu.assume_multiple %222, 8 : i32
    %224 = arith.index_cast %223 : i32 to index
    %c0_88 = arith.constant 0 : index
    %225 = vector.load %arg7[%224, %c0_88] : memref<64x512xf32, #tpu.memory_space<vmem>>, vector<8x512xf32>
    %226 = arith.truncf %204 : vector<8x128xf32> to vector<8x128xbf16>
    %c0_89 = arith.constant 0 : index
    %c0_90 = arith.constant 0 : index
    %c0_91 = arith.constant 0 : index
    %227 = vector.load %arg4[%c0_89, %c0_90, %c0_91] : memref<1x128x512xbf16, #tpu.memory_space<vmem>>, vector<1x128x512xbf16>
    %228 = vector.shape_cast %227 : vector<1x128x512xbf16> to vector<128x512xbf16>
    %cst_92 = arith.constant dense<0.000000e+00> : vector<8x512xf32>
    %229 = tpu.matmul %226, %228, %cst_92 {dimension_numbers = #tpu.dot_dimension_numbers<[1], [0], [0], [1], [0, 0, 1, 1], [], []>} : vector<8x128xbf16>, vector<128x512xbf16>, vector<8x512xf32> -> vector<8x512xf32>
    %230 = arith.addf %225, %229 : vector<8x512xf32>
    %231 = vector.extract_strided_slice %230 {offsets = [0, 0], sizes = [8, 128], strides = [1, 1]} : vector<8x512xf32> to vector<8x128xf32>
    %232 = arith.negf %231 : vector<8x128xf32>
    %233 = math.exp %232 : vector<8x128xf32>
    %cst_93 = arith.constant 1.000000e+00 : f32
    %234 = vector.broadcast %cst_93 : f32 to vector<8x128xf32>
    %235 = arith.addf %234, %233 : vector<8x128xf32>
    %236 = arith.divf %234, %235 : vector<8x128xf32>
    %237 = vector.extract_strided_slice %230 {offsets = [0, 128], sizes = [8, 128], strides = [1, 1]} : vector<8x512xf32> to vector<8x128xf32>
    %238 = arith.negf %237 : vector<8x128xf32>
    %239 = math.exp %238 : vector<8x128xf32>
    %cst_94 = arith.constant 1.000000e+00 : f32
    %240 = vector.broadcast %cst_94 : f32 to vector<8x128xf32>
    %241 = arith.addf %240, %239 : vector<8x128xf32>
    %242 = arith.divf %240, %241 : vector<8x128xf32>
    %243 = vector.extract_strided_slice %230 {offsets = [0, 256], sizes = [8, 128], strides = [1, 1]} : vector<8x512xf32> to vector<8x128xf32>
    %244 = math.tanh %243 : vector<8x128xf32>
    %245 = vector.extract_strided_slice %230 {offsets = [0, 384], sizes = [8, 128], strides = [1, 1]} : vector<8x512xf32> to vector<8x128xf32>
    %246 = arith.negf %245 : vector<8x128xf32>
    %247 = math.exp %246 : vector<8x128xf32>
    %cst_95 = arith.constant 1.000000e+00 : f32
    %248 = vector.broadcast %cst_95 : f32 to vector<8x128xf32>
    %249 = arith.addf %248, %247 : vector<8x128xf32>
    %250 = arith.divf %248, %249 : vector<8x128xf32>
    %251 = arith.mulf %242, %202 : vector<8x128xf32>
    %252 = arith.mulf %236, %244 : vector<8x128xf32>
    %253 = arith.addf %251, %252 : vector<8x128xf32>
    %254 = math.tanh %253 : vector<8x128xf32>
    %255 = arith.mulf %250, %254 : vector<8x128xf32>
    %c0_i32_96 = arith.constant 0 : i32
    %256 = arith.cmpi eq, %arg0, %c0_i32_96 : i32
    %c0_i32_97 = arith.constant 0 : i32
    %257 = arith.cmpi eq, %arg1, %c0_i32_97 : i32
    %c7_i32_98 = arith.constant 7 : i32
    %258 = arith.cmpi eq, %c4_i32, %c7_i32_98 : i32
    %259 = arith.andi %257, %258 : i1
    %260 = arith.andi %256, %259 : i1
    %c1_i32_99 = arith.constant 1 : i32
    %261 = arith.cmpi eq, %arg0, %c1_i32_99 : i32
    %c0_i32_100 = arith.constant 0 : i32
    %262 = arith.cmpi eq, %arg1, %c0_i32_100 : i32
    %c0_i32_101 = arith.constant 0 : i32
    %263 = arith.cmpi eq, %c4_i32, %c0_i32_101 : i32
    %264 = arith.andi %262, %263 : i1
    %265 = arith.andi %261, %264 : i1
    %266 = arith.ori %260, %265 : i1
    %267 = arith.extui %266 : i1 to i32
    %c0_i32_102 = arith.constant 0 : i32
    %268 = arith.cmpi ne, %267, %c0_i32_102 : i32
    scf.if %268 {
      %c0_163 = arith.constant 0 : index
      %c0_164 = arith.constant 0 : index
      %424 = vector.load %arg6[%c0_163, %c0_164] : memref<8x128xf32, #tpu.memory_space<vmem>>, vector<8x128xf32>
      tpu.vector_store %arg6[%c0_163, %c0_164], %255 {strides = array<i32>} : memref<8x128xf32, #tpu.memory_space<vmem>>, vector<8x128xf32>,
    } else {
    }
    %c5_i32 = arith.constant 5 : i32
    %c2_i32_103 = arith.constant 2 : i32
    %269 = arith.muli %c2_i32_103, %c5_i32 : i32
    %c7_i32_104 = arith.constant 7 : i32
    %270 = arith.subi %c7_i32_104, %269 : i32
    %271 = arith.muli %arg0, %270 : i32
    %272 = arith.addi %c5_i32, %271 : i32
    %c8_i32_105 = arith.constant 8 : i32
    %273 = arith.muli %272, %c8_i32_105 : i32
    %274 = tpu.assume_multiple %273, 8 : i32
    %275 = arith.index_cast %274 : i32 to index
    %c0_106 = arith.constant 0 : index
    %276 = vector.load %arg7[%275, %c0_106] : memref<64x512xf32, #tpu.memory_space<vmem>>, vector<8x512xf32>
    %277 = arith.truncf %255 : vector<8x128xf32> to vector<8x128xbf16>
    %c0_107 = arith.constant 0 : index
    %c0_108 = arith.constant 0 : index
    %c0_109 = arith.constant 0 : index
    %278 = vector.load %arg4[%c0_107, %c0_108, %c0_109] : memref<1x128x512xbf16, #tpu.memory_space<vmem>>, vector<1x128x512xbf16>
    %279 = vector.shape_cast %278 : vector<1x128x512xbf16> to vector<128x512xbf16>
    %cst_110 = arith.constant dense<0.000000e+00> : vector<8x512xf32>
    %280 = tpu.matmul %277, %279, %cst_110 {dimension_numbers = #tpu.dot_dimension_numbers<[1], [0], [0], [1], [0, 0, 1, 1], [], []>} : vector<8x128xbf16>, vector<128x512xbf16>, vector<8x512xf32> -> vector<8x512xf32>
    %281 = arith.addf %276, %280 : vector<8x512xf32>
    %282 = vector.extract_strided_slice %281 {offsets = [0, 0], sizes = [8, 128], strides = [1, 1]} : vector<8x512xf32> to vector<8x128xf32>
    %283 = arith.negf %282 : vector<8x128xf32>
    %284 = math.exp %283 : vector<8x128xf32>
    %cst_111 = arith.constant 1.000000e+00 : f32
    %285 = vector.broadcast %cst_111 : f32 to vector<8x128xf32>
    %286 = arith.addf %285, %284 : vector<8x128xf32>
    %287 = arith.divf %285, %286 : vector<8x128xf32>
    %288 = vector.extract_strided_slice %281 {offsets = [0, 128], sizes = [8, 128], strides = [1, 1]} : vector<8x512xf32> to vector<8x128xf32>
    %289 = arith.negf %288 : vector<8x128xf32>
    %290 = math.exp %289 : vector<8x128xf32>
    %cst_112 = arith.constant 1.000000e+00 : f32
    %291 = vector.broadcast %cst_112 : f32 to vector<8x128xf32>
    %292 = arith.addf %291, %290 : vector<8x128xf32>
    %293 = arith.divf %291, %292 : vector<8x128xf32>
    %294 = vector.extract_strided_slice %281 {offsets = [0, 256], sizes = [8, 128], strides = [1, 1]} : vector<8x512xf32> to vector<8x128xf32>
    %295 = math.tanh %294 : vector<8x128xf32>
    %296 = vector.extract_strided_slice %281 {offsets = [0, 384], sizes = [8, 128], strides = [1, 1]} : vector<8x512xf32> to vector<8x128xf32>
    %297 = arith.negf %296 : vector<8x128xf32>
    %298 = math.exp %297 : vector<8x128xf32>
    %cst_113 = arith.constant 1.000000e+00 : f32
    %299 = vector.broadcast %cst_113 : f32 to vector<8x128xf32>
    %300 = arith.addf %299, %298 : vector<8x128xf32>
    %301 = arith.divf %299, %300 : vector<8x128xf32>
    %302 = arith.mulf %293, %253 : vector<8x128xf32>
    %303 = arith.mulf %287, %295 : vector<8x128xf32>
    %304 = arith.addf %302, %303 : vector<8x128xf32>
    %305 = math.tanh %304 : vector<8x128xf32>
    %306 = arith.mulf %301, %305 : vector<8x128xf32>
    %c0_i32_114 = arith.constant 0 : i32
    %307 = arith.cmpi eq, %arg0, %c0_i32_114 : i32
    %c0_i32_115 = arith.constant 0 : i32
    %308 = arith.cmpi eq, %arg1, %c0_i32_115 : i32
    %c7_i32_116 = arith.constant 7 : i32
    %309 = arith.cmpi eq, %c5_i32, %c7_i32_116 : i32
    %310 = arith.andi %308, %309 : i1
    %311 = arith.andi %307, %310 : i1
    %c1_i32_117 = arith.constant 1 : i32
    %312 = arith.cmpi eq, %arg0, %c1_i32_117 : i32
    %c0_i32_118 = arith.constant 0 : i32
    %313 = arith.cmpi eq, %arg1, %c0_i32_118 : i32
    %c0_i32_119 = arith.constant 0 : i32
    %314 = arith.cmpi eq, %c5_i32, %c0_i32_119 : i32
    %315 = arith.andi %313, %314 : i1
    %316 = arith.andi %312, %315 : i1
    %317 = arith.ori %311, %316 : i1
    %318 = arith.extui %317 : i1 to i32
    %c0_i32_120 = arith.constant 0 : i32
    %319 = arith.cmpi ne, %318, %c0_i32_120 : i32
    scf.if %319 {
      %c0_163 = arith.constant 0 : index
      %c0_164 = arith.constant 0 : index
      %424 = vector.load %arg6[%c0_163, %c0_164] : memref<8x128xf32, #tpu.memory_space<vmem>>, vector<8x128xf32>
      tpu.vector_store %arg6[%c0_163, %c0_164], %306 {strides = array<i32>} : memref<8x128xf32, #tpu.memory_space<vmem>>, vector<8x128xf32>,
    } else {
    }
    %c6_i32 = arith.constant 6 : i32
    %c2_i32_121 = arith.constant 2 : i32
    %320 = arith.muli %c2_i32_121, %c6_i32 : i32
    %c7_i32_122 = arith.constant 7 : i32
    %321 = arith.subi %c7_i32_122, %320 : i32
    %322 = arith.muli %arg0, %321 : i32
    %323 = arith.addi %c6_i32, %322 : i32
    %c8_i32_123 = arith.constant 8 : i32
    %324 = arith.muli %323, %c8_i32_123 : i32
    %325 = tpu.assume_multiple %324, 8 : i32
    %326 = arith.index_cast %325 : i32 to index
    %c0_124 = arith.constant 0 : index
    %327 = vector.load %arg7[%326, %c0_124] : memref<64x512xf32, #tpu.memory_space<vmem>>, vector<8x512xf32>
    %328 = arith.truncf %306 : vector<8x128xf32> to vector<8x128xbf16>
    %c0_125 = arith.constant 0 : index
    %c0_126 = arith.constant 0 : index
    %c0_127 = arith.constant 0 : index
    %329 = vector.load %arg4[%c0_125, %c0_126, %c0_127] : memref<1x128x512xbf16, #tpu.memory_space<vmem>>, vector<1x128x512xbf16>
    %330 = vector.shape_cast %329 : vector<1x128x512xbf16> to vector<128x512xbf16>
    %cst_128 = arith.constant dense<0.000000e+00> : vector<8x512xf32>
    %331 = tpu.matmul %328, %330, %cst_128 {dimension_numbers = #tpu.dot_dimension_numbers<[1], [0], [0], [1], [0, 0, 1, 1], [], []>} : vector<8x128xbf16>, vector<128x512xbf16>, vector<8x512xf32> -> vector<8x512xf32>
    %332 = arith.addf %327, %331 : vector<8x512xf32>
    %333 = vector.extract_strided_slice %332 {offsets = [0, 0], sizes = [8, 128], strides = [1, 1]} : vector<8x512xf32> to vector<8x128xf32>
    %334 = arith.negf %333 : vector<8x128xf32>
    %335 = math.exp %334 : vector<8x128xf32>
    %cst_129 = arith.constant 1.000000e+00 : f32
    %336 = vector.broadcast %cst_129 : f32 to vector<8x128xf32>
    %337 = arith.addf %336, %335 : vector<8x128xf32>
    %338 = arith.divf %336, %337 : vector<8x128xf32>
    %339 = vector.extract_strided_slice %332 {offsets = [0, 128], sizes = [8, 128], strides = [1, 1]} : vector<8x512xf32> to vector<8x128xf32>
    %340 = arith.negf %339 : vector<8x128xf32>
    %341 = math.exp %340 : vector<8x128xf32>
    %cst_130 = arith.constant 1.000000e+00 : f32
    %342 = vector.broadcast %cst_130 : f32 to vector<8x128xf32>
    %343 = arith.addf %342, %341 : vector<8x128xf32>
    %344 = arith.divf %342, %343 : vector<8x128xf32>
    %345 = vector.extract_strided_slice %332 {offsets = [0, 256], sizes = [8, 128], strides = [1, 1]} : vector<8x512xf32> to vector<8x128xf32>
    %346 = math.tanh %345 : vector<8x128xf32>
    %347 = vector.extract_strided_slice %332 {offsets = [0, 384], sizes = [8, 128], strides = [1, 1]} : vector<8x512xf32> to vector<8x128xf32>
    %348 = arith.negf %347 : vector<8x128xf32>
    %349 = math.exp %348 : vector<8x128xf32>
    %cst_131 = arith.constant 1.000000e+00 : f32
    %350 = vector.broadcast %cst_131 : f32 to vector<8x128xf32>
    %351 = arith.addf %350, %349 : vector<8x128xf32>
    %352 = arith.divf %350, %351 : vector<8x128xf32>
    %353 = arith.mulf %344, %304 : vector<8x128xf32>
    %354 = arith.mulf %338, %346 : vector<8x128xf32>
    %355 = arith.addf %353, %354 : vector<8x128xf32>
    %356 = math.tanh %355 : vector<8x128xf32>
    %357 = arith.mulf %352, %356 : vector<8x128xf32>
    %c0_i32_132 = arith.constant 0 : i32
    %358 = arith.cmpi eq, %arg0, %c0_i32_132 : i32
    %c0_i32_133 = arith.constant 0 : i32
    %359 = arith.cmpi eq, %arg1, %c0_i32_133 : i32
    %c7_i32_134 = arith.constant 7 : i32
    %360 = arith.cmpi eq, %c6_i32, %c7_i32_134 : i32
    %361 = arith.andi %359, %360 : i1
    %362 = arith.andi %358, %361 : i1
    %c1_i32_135 = arith.constant 1 : i32
    %363 = arith.cmpi eq, %arg0, %c1_i32_135 : i32
    %c0_i32_136 = arith.constant 0 : i32
    %364 = arith.cmpi eq, %arg1, %c0_i32_136 : i32
    %c0_i32_137 = arith.constant 0 : i32
    %365 = arith.cmpi eq, %c6_i32, %c0_i32_137 : i32
    %366 = arith.andi %364, %365 : i1
    %367 = arith.andi %363, %366 : i1
    %368 = arith.ori %362, %367 : i1
    %369 = arith.extui %368 : i1 to i32
    %c0_i32_138 = arith.constant 0 : i32
    %370 = arith.cmpi ne, %369, %c0_i32_138 : i32
    scf.if %370 {
      %c0_163 = arith.constant 0 : index
      %c0_164 = arith.constant 0 : index
      %424 = vector.load %arg6[%c0_163, %c0_164] : memref<8x128xf32, #tpu.memory_space<vmem>>, vector<8x128xf32>
      tpu.vector_store %arg6[%c0_163, %c0_164], %357 {strides = array<i32>} : memref<8x128xf32, #tpu.memory_space<vmem>>, vector<8x128xf32>,
    } else {
    }
    %c7_i32_139 = arith.constant 7 : i32
    %c2_i32_140 = arith.constant 2 : i32
    %371 = arith.muli %c2_i32_140, %c7_i32_139 : i32
    %c7_i32_141 = arith.constant 7 : i32
    %372 = arith.subi %c7_i32_141, %371 : i32
    %373 = arith.muli %arg0, %372 : i32
    %374 = arith.addi %c7_i32_139, %373 : i32
    %c8_i32_142 = arith.constant 8 : i32
    %375 = arith.muli %374, %c8_i32_142 : i32
    %376 = tpu.assume_multiple %375, 8 : i32
    %377 = arith.index_cast %376 : i32 to index
    %c0_143 = arith.constant 0 : index
    %378 = vector.load %arg7[%377, %c0_143] : memref<64x512xf32, #tpu.memory_space<vmem>>, vector<8x512xf32>
    %379 = arith.truncf %357 : vector<8x128xf32> to vector<8x128xbf16>
    %c0_144 = arith.constant 0 : index
    %c0_145 = arith.constant 0 : index
    %c0_146 = arith.constant 0 : index
    %380 = vector.load %arg4[%c0_144, %c0_145, %c0_146] : memref<1x128x512xbf16, #tpu.memory_space<vmem>>, vector<1x128x512xbf16>
    %381 = vector.shape_cast %380 : vector<1x128x512xbf16> to vector<128x512xbf16>
    %cst_147 = arith.constant dense<0.000000e+00> : vector<8x512xf32>
    %382 = tpu.matmul %379, %381, %cst_147 {dimension_numbers = #tpu.dot_dimension_numbers<[1], [0], [0], [1], [0, 0, 1, 1], [], []>} : vector<8x128xbf16>, vector<128x512xbf16>, vector<8x512xf32> -> vector<8x512xf32>
    %383 = arith.addf %378, %382 : vector<8x512xf32>
    %384 = vector.extract_strided_slice %383 {offsets = [0, 0], sizes = [8, 128], strides = [1, 1]} : vector<8x512xf32> to vector<8x128xf32>
    %385 = arith.negf %384 : vector<8x128xf32>
    %386 = math.exp %385 : vector<8x128xf32>
    %cst_148 = arith.constant 1.000000e+00 : f32
    %387 = vector.broadcast %cst_148 : f32 to vector<8x128xf32>
    %388 = arith.addf %387, %386 : vector<8x128xf32>
    %389 = arith.divf %387, %388 : vector<8x128xf32>
    %390 = vector.extract_strided_slice %383 {offsets = [0, 128], sizes = [8, 128], strides = [1, 1]} : vector<8x512xf32> to vector<8x128xf32>
    %391 = arith.negf %390 : vector<8x128xf32>
    %392 = math.exp %391 : vector<8x128xf32>
    %cst_149 = arith.constant 1.000000e+00 : f32
    %393 = vector.broadcast %cst_149 : f32 to vector<8x128xf32>
    %394 = arith.addf %393, %392 : vector<8x128xf32>
    %395 = arith.divf %393, %394 : vector<8x128xf32>
    %396 = vector.extract_strided_slice %383 {offsets = [0, 256], sizes = [8, 128], strides = [1, 1]} : vector<8x512xf32> to vector<8x128xf32>
    %397 = math.tanh %396 : vector<8x128xf32>
    %398 = vector.extract_strided_slice %383 {offsets = [0, 384], sizes = [8, 128], strides = [1, 1]} : vector<8x512xf32> to vector<8x128xf32>
    %399 = arith.negf %398 : vector<8x128xf32>
    %400 = math.exp %399 : vector<8x128xf32>
    %cst_150 = arith.constant 1.000000e+00 : f32
    %401 = vector.broadcast %cst_150 : f32 to vector<8x128xf32>
    %402 = arith.addf %401, %400 : vector<8x128xf32>
    %403 = arith.divf %401, %402 : vector<8x128xf32>
    %404 = arith.mulf %395, %355 : vector<8x128xf32>
    %405 = arith.mulf %389, %397 : vector<8x128xf32>
    %406 = arith.addf %404, %405 : vector<8x128xf32>
    %407 = math.tanh %406 : vector<8x128xf32>
    %408 = arith.mulf %403, %407 : vector<8x128xf32>
    %c0_i32_151 = arith.constant 0 : i32
    %409 = arith.cmpi eq, %arg0, %c0_i32_151 : i32
    %c0_i32_152 = arith.constant 0 : i32
    %410 = arith.cmpi eq, %arg1, %c0_i32_152 : i32
    %c7_i32_153 = arith.constant 7 : i32
    %411 = arith.cmpi eq, %c7_i32_139, %c7_i32_153 : i32
    %412 = arith.andi %410, %411 : i1
    %413 = arith.andi %409, %412 : i1
    %c1_i32_154 = arith.constant 1 : i32
    %414 = arith.cmpi eq, %arg0, %c1_i32_154 : i32
    %c0_i32_155 = arith.constant 0 : i32
    %415 = arith.cmpi eq, %arg1, %c0_i32_155 : i32
    %c0_i32_156 = arith.constant 0 : i32
    %416 = arith.cmpi eq, %c7_i32_139, %c0_i32_156 : i32
    %417 = arith.andi %415, %416 : i1
    %418 = arith.andi %414, %417 : i1
    %419 = arith.ori %413, %418 : i1
    %420 = arith.extui %419 : i1 to i32
    %c0_i32_157 = arith.constant 0 : i32
    %421 = arith.cmpi ne, %420, %c0_i32_157 : i32
    scf.if %421 {
      %c0_163 = arith.constant 0 : index
      %c0_164 = arith.constant 0 : index
      %424 = vector.load %arg6[%c0_163, %c0_164] : memref<8x128xf32, #tpu.memory_space<vmem>>, vector<8x128xf32>
      tpu.vector_store %arg6[%c0_163, %c0_164], %408 {strides = array<i32>} : memref<8x128xf32, #tpu.memory_space<vmem>>, vector<8x128xf32>,
    } else {
    }
    %c8_i32_158 = arith.constant 8 : i32
    %c0_159 = arith.constant 0 : index
    %c0_160 = arith.constant 0 : index
    %422 = vector.load %arg9[%c0_159, %c0_160] : memref<8x128xf32, #tpu.memory_space<vmem>>, vector<8x128xf32>
    tpu.vector_store %arg9[%c0_159, %c0_160], %408 {strides = array<i32>} : memref<8x128xf32, #tpu.memory_space<vmem>>, vector<8x128xf32>,
    %c0_161 = arith.constant 0 : index
    %c0_162 = arith.constant 0 : index
    %423 = vector.load %arg10[%c0_161, %c0_162] : memref<8x128xf32, #tpu.memory_space<vmem>>, vector<8x128xf32>
    tpu.vector_store %arg10[%c0_161, %c0_162], %406 {strides = array<i32>} : memref<8x128xf32, #tpu.memory_space<vmem>>, vector<8x128xf32>,
    return
  }
  func.func @transform_0(%arg0: i32, %arg1: i32) -> (i32, i32) {
    %c2_i32 = arith.constant 2 : i32
    %0 = arith.muli %c2_i32, %arg1 : i32
    %c0_i32 = arith.constant 0 : i32
    %1 = arith.subi %c0_i32, %0 : i32
    %2 = arith.muli %arg0, %1 : i32
    %3 = arith.addi %arg1, %2 : i32
    %c0_i32_0 = arith.constant 0 : i32
    %c0_i32_1 = arith.constant 0 : i32
    return %3, %c0_i32_0 : i32, i32
  }
  func.func @transform_1(%arg0: i32, %arg1: i32) -> (i32, i32, i32) {
    %c0_i32 = arith.constant 0 : i32
    %c0_i32_0 = arith.constant 0 : i32
    %c0_i32_1 = arith.constant 0 : i32
    return %arg0, %c0_i32, %c0_i32_0 : i32, i32, i32
  }
  func.func @transform_2(%arg0: i32, %arg1: i32) -> (i32, i32, i32) {
    %c0_i32 = arith.constant 0 : i32
    %c0_i32_0 = arith.constant 0 : i32
    %c0_i32_1 = arith.constant 0 : i32
    return %arg0, %c0_i32, %c0_i32_0 : i32, i32, i32
  }
  func.func @transform_3(%arg0: i32, %arg1: i32) -> (i32, i32, i32) {
    %c0_i32 = arith.constant 0 : i32
    %c0_i32_0 = arith.constant 0 : i32
    %c0_i32_1 = arith.constant 0 : i32
    return %arg0, %c0_i32, %c0_i32_0 : i32, i32, i32
  }
  func.func @transform_4(%arg0: i32, %arg1: i32) -> (i32, i32) {
    %c0_i32 = arith.constant 0 : i32
    %c0_i32_0 = arith.constant 0 : i32
    return %c0_i32, %arg0 : i32, i32
  }
}

</mosaic_0001>

<bundles_post_ra>
// kernel: _lambda_.3
= control target key start
LH: loop header
LB: loop body
LE: loop exit
PB: predicated region body
PF: predicated region fallthrough
CT: control target
= control target key end

     0   :  { %9 = vsyncpa [#allocation7], 0  ;;  %s4613_s0 = inlined_call_operand.vmem [shape: bf16[64,256], index: 0, kind: input, shape index: {}]   ;;  %s4614_s1 = inlined_call_operand.hbm [shape: bf16[2,256,512], index: 1, kind: input, shape index: {}]   ;;  %s4615_s2 = inlined_call_operand.hbm [shape: bf16[2,128,512], index: 2, kind: input, shape index: {}]   ;;  %s4616_s3 = inlined_call_operand.vmem [shape: f32[2,1,512], index: 3, kind: input, shape index: {}]   ;;  %s4617_s4 = inlined_call_operand.vmem [shape: f32[8,256], index: 4, kind: output, shape index: {}]  }
   0x1   :  { %11 = vsyncpa [#allocation7 + $0x1], 0 }
   0x2   :  { %12 = vsyncpa [#allocation9], 0 }
   0x3   :  { %14 = vsyncpa [#allocation9 + $0x1], 0  ;;  %s3753_s15 = smov 0   ;;  %s3755_s16 = smov 0  }
   0x4   :  { %s3757_s17 = smov 0   ;;  %s3759_s18 = smov 0  }
   0x5   :  { %s3761_s19 = smov 0   ;;  %s3763_s20 = smov 0  }
   0x6 LB: > { %s2642_s21 = sadd.s32 4294967295, %s3723_s20   ;;  %s32_s22 = sadd.s32 1, %s3719_s19  ;;  %s3723_s20 = sphi %s3763_s20, %s20_s20   ;;  %s3719_s19 = sphi %s3761_s19, %s4625_s19   ;;  %s3715_s18 = sphi %s3759_s18, %s4624_s18   ;;  %s3711_s17 = sphi %s3757_s17, %s4623_s17   ;;  %s3707_s16 = sphi %s3755_s16, %s4622_s16   ;;  %s3703_s15 = sphi %s3753_s15, %s4621_s15  }
   0x7   : > { %p34_p0 = scmp.ge.s32.totalorder %s32_s22, 2  ;;  %s73_s23 = sadd.s32 1, %s3711_s17 }
   0x8   : > { %p80_p1 = scmp.ne.s32.totalorder %s3711_s17, %s3707_s16  ;;  %p81_p2 = scmp.eq.s32.totalorder %s3723_s20, 0 }
   0x9   : > { %s4627_s22 = smov (%p34_p0, %s32_s22), 0  ;;  %p86_p4 = scmp.ne.s32.totalorder %s3707_s16, %s3703_s15 }
   0xa   : > { %p3789_p3 = por %p81_p2, %p80_p1  ;;  %s70_s25 = ssub.s32 %s3719_s19, %s4627_s22 }
   0xb   : > { %p87_p5 = scmp.eq.s32.totalorder %s2642_s21, 0  ;;  %p71_p6 = scmp.eq.s32.totalorder %s70_s25, 0 }
   0xc   : > { %p3429_p8 = scmp.lt.s32.totalorder %s3723_s20, 2  ;;  %s3805_s28 = sand.u32 1, %s3711_s17  }
   0xd   : > { %p3796_p7 = por %p87_p5, %p86_p4  ;;  %s3253_s29 = sshll.u32 %s3719_s19, 9 }
   0xe   : > { %s3802_s27 = scalar_select %p71_p6, %s3711_s17, %s73_s23  }
   0xf   : > { %s2647_s30 = sshll.u32 %s3805_s28, 9  ;;  %s215_s7 = scalar_lea.hbm %s4614_s1, %s3253_s29 }
  0x10   : > { %s216_s8 = sshll.u32 %s215_s7, 4  ;;  %s210_s9 = scalar_lea.vmem [#allocation6], %s2647_s30  ;;  %s217_s8 = int_to_ptr.hbm [resolvable:$true] %s216_s8 }
  0x11   : > { %s218_s10 = sshll.u32 %s210_s9, 4  ;;  %p3814_p9 = pnand %p3429_p8, %p3789_p3  ;;  %s219_s10 = int_to_ptr.vmem [resolvable:$true] %s218_s10 }
  0x12   : > { %p2653_p10 = scmp.ge.s32.totalorder %s3723_s20, 1  ;;  %p255_p11 = scmp.lt.s32.totalorder %s3723_s20, 3 }
  0x13   : > { %s207_s12 = scalar_lea.sflag [#allocation7], %s3805_s28  ;;  %s3725_s13 = smov 256  }
  0x14   : > { %s3726_s14 = smov 16   ;;  %p256_p12 = pnand %p2653_p10, %p255_p11 }
  0x15   : > { %3425 = dma.hbm_to_vmem [thread:$0]  (!%p3814_p9), %s217_s8, 8192, %s219_s10, %s207_s12, %s3725_s13, %s3725_s13, %s3726_s14  }
  0x16   : > { %s2650_s15 = sshll.u32 %s3805_s28, 8  ;;  %s3254_s21 = sshll.u32 %s3719_s19, 8 }
  0x17   : > { %s237_s24 = scalar_lea.hbm %s4615_s2, %s3254_s21  ;;  %s232_s30 = scalar_lea.vmem [#allocation8], %s2650_s15 }
  0x18   : > { %s238_s29 = sshll.u32 %s237_s24, 4  ;;  %s240_s5 = sshll.u32 %s232_s30, 4  ;;  %s239_s29 = int_to_ptr.hbm [resolvable:$true] %s238_s29  ;;  %s241_s5 = int_to_ptr.vmem [resolvable:$true] %s240_s5 }
  0x19   : > { %s229_s6 = scalar_lea.sflag [#allocation9], %s3805_s28  ;;  %259 = sbr.rel (%p256_p12) target bundleno = 1617 (0x651), region = 36 }
  0x1a   : > { %3428 = dma.hbm_to_vmem [thread:$0]  (!%p3814_p9), %s239_s29, 4096, %s241_s5, %s229_s6, %s3725_s13, %s3725_s13, %s3726_s14  }
  0x1b   : > { %s261_s7 = sand.u32 (!%p256_p12), 1, %s3707_s16  }
  0x1c   : > { %s2654_s8 = sshll.u32 (!%p256_p12), %s261_s7, 9  ;;  %s262_s9 = scalar_lea.sflag (!%p256_p12), [#allocation7], %s261_s7 }
  0x1d   : > { %s3832_s10 = scalar_lea.vmem (!%p256_p12), [#allocation6], %s2654_s8 }
  0x1e   : > { %3694 = dma.done.wait (%p3796_p7), %s262_s9, 8192  }
  0x1f   : > { %3696 = vsyncadd (%p3796_p7), %s262_s9, 4294959104  ;;  %s2655_s12 = sshll.u32 %s261_s7, 8  ;;  %s272_s15 = scalar_lea.sflag [#allocation9], %s261_s7 }
  0x20   : > { %s3838_s21 = scalar_lea.vmem [#allocation8], %s2655_s12 }
  0x21   : > { %3698 = dma.done.wait (%p3796_p7), %s272_s15, 4096  }
  0x22   : > { %3700 = vsyncadd (%p3796_p7), %s272_s15, 4294963200  ;;  %v2804_v0 = vld [vmem:[%s3832_s10 + $0xe0] sm:$0xf]  ;;  %v3293_v1 = vld [vmem:[%s3832_s10 + $0xec] sm:$0xf0]  ;;  %p334_p13 = scmp.lt.s32.totalorder %s3715_s18, 1 }
  0x23   : > { %v2932_v2 = vld [vmem:[%s3832_s10 + $0x1e0] sm:$0xf]  ;;  %v2805_v3 = vor.u32 %v3293_v1, %v2804_v0  ;;  %v3325_v4 = vld [vmem:[%s3832_s10 + $0x1ec] sm:$0xf0]  ;;  %v3291_v5 = vld [vmem:[%s3832_s10 + $0xe4] sm:$0xf] }
  0x24   : > { %v2806_v6 = vld [vmem:[%s3832_s10 + $0xf0] sm:$0xf0]  ;;  %v2933_v7 = vor.u32 %v3325_v4, %v2932_v2  ;;  %v3323_v9 = vld [vmem:[%s3832_s10 + $0x1e4] sm:$0xf]  ;;  %v2788_v11 = vld [vmem:[%s3832_s10 + $0xc0] sm:$0xf] }
  0x25   : > { %v2809_v8 = vor.u32 %v3291_v5, %v2806_v6  ;;  %v2934_v10 = vld [vmem:[%s3832_s10 + $0x1f0] sm:$0xf0]  ;;  %790 = vmatpush.bf16.msra.mxu0 %v2805_v3  ;;  %v3289_v13 = vld [vmem:[%s3832_s10 + $0xcc] sm:$0xf0]  ;;  %v2916_v14 = vld [vmem:[%s3832_s10 + $0x1c0] sm:$0xf] }
  0x26   : > { %v2937_v12 = vor.u32 %v3323_v9, %v2934_v10  ;;  %v3321_v15 = vld [vmem:[%s3832_s10 + $0x1cc] sm:$0xf0]  ;;  %819 = vmatpush.bf16.msra.mxu1 %v2933_v7  ;;  %v2789_v16 = vor.u32 %v3289_v13, %v2788_v11  ;;  %v3287_v18 = vld [vmem:[%s3832_s10 + $0xc4] sm:$0xf]  ;;  %v2790_v19 = vld [vmem:[%s3832_s10 + $0xd0] sm:$0xf0] }
  0x27   : > { %848 = vmatpush.bf16.msra.mxu2 %v2809_v8  ;;  %v2917_v17 = vor.u32 %v3321_v15, %v2916_v14  ;;  %v3319_v20 = vld [vmem:[%s3832_s10 + $0x1c4] sm:$0xf]  ;;  %v2793_v21 = vor.u32 %v3287_v18, %v2790_v19  ;;  %v2918_v22 = vld [vmem:[%s3832_s10 + $0x1d0] sm:$0xf0]  ;;  %v2772_v23 = vld [vmem:[%s3832_s10 + $0xa0] sm:$0xf] }
  0x28   : > { %877 = vmatpush.bf16.msra.mxu3 %v2937_v12  ;;  %v3285_v24 = vld [vmem:[%s3832_s10 + $0xac] sm:$0xf0]  ;;  %v2921_v25 = vor.u32 %v3319_v20, %v2918_v22  ;;  %v2900_v26 = vld [vmem:[%s3832_s10 + $0x1a0] sm:$0xf]  ;;  %v3283_v28 = vld [vmem:[%s3832_s10 + $0xa4] sm:$0xf] }
  0x29   : > { %v3317_v27 = vld [vmem:[%s3832_s10 + $0x1ac] sm:$0xf0]  ;;  %791 = vmatpush.bf16.msra.mxu0 %v2789_v16  ;;  %v2773_v29 = vor.u32 %v3285_v24, %v2772_v23  ;;  %v2774_v30 = vld [vmem:[%s3832_s10 + $0xb0] sm:$0xf0]  ;;  %v3315_v31 = vld [vmem:[%s3832_s10 + $0x1a4] sm:$0xf] }
  0x2a   : > { %v2902_v32 = vld [vmem:[%s3832_s10 + $0x1b0] sm:$0xf0]  ;;  %820 = vmatpush.bf16.msra.mxu1 %v2917_v17  ;;  %v2901_v33 = vor.u32 %v3317_v27, %v2900_v26  ;;  %v2777_v34 = vor.u32 %v3283_v28, %v2774_v30  ;;  %v2756_v35 = vld [vmem:[%s3832_s10 + $0x80] sm:$0xf]  ;;  %v3281_v36 = vld [vmem:[%s3832_s10 + $0x8c] sm:$0xf0] }
  0x2b   : > { %849 = vmatpush.bf16.msra.mxu2 %v2793_v21  ;;  %v2884_v37 = vld [vmem:[%s3832_s10 + $0x180] sm:$0xf]  ;;  %v2905_v38 = vor.u32 %v3315_v31, %v2902_v32  ;;  %v3313_v39 = vld [vmem:[%s3832_s10 + $0x18c] sm:$0xf0]  ;;  %v3279_v40 = vld [vmem:[%s3832_s10 + $0x84] sm:$0xf]  ;;  %v2757_v44 = vor.u32 %v3281_v36, %v2756_v35 }
  0x2c   : > { %878 = vmatpush.bf16.msra.mxu3 %v2921_v25  ;;  %v2758_v41 = vld [vmem:[%s3832_s10 + $0x90] sm:$0xf0]  ;;  %v3311_v42 = vld [vmem:[%s3832_s10 + $0x184] sm:$0xf]  ;;  %v2885_v45 = vor.u32 %v3313_v39, %v2884_v37  ;;  %v2740_v47 = vld [vmem:[%s3832_s10 + $0x60] sm:$0xf] }
  0x2d   : > { %v2886_v43 = vld [vmem:[%s3832_s10 + $0x190] sm:$0xf0]  ;;  %792 = vmatpush.bf16.msra.mxu0 %v2773_v29  ;;  %v2761_v46 = vor.u32 %v3279_v40, %v2758_v41  ;;  %v3277_v48 = vld [vmem:[%s3832_s10 + $0x6c] sm:$0xf0]  ;;  %v2868_v49 = vld [vmem:[%s3832_s10 + $0x160] sm:$0xf] }
  0x2e   : > { %821 = vmatpush.bf16.msra.mxu1 %v2901_v33  ;;  %v2889_v50 = vor.u32 %v3311_v42, %v2886_v43  ;;  %v3309_v51 = vld [vmem:[%s3832_s10 + $0x16c] sm:$0xf0]  ;;  %v3275_v52 = vld [vmem:[%s3832_s10 + $0x64] sm:$0xf]  ;;  %v2742_v53 = vld [vmem:[%s3832_s10 + $0x70] sm:$0xf0]  ;;  %v2741_v56 = vor.u32 %v3277_v48, %v2740_v47 }
  0x2f   : > { %850 = vmatpush.bf16.msra.mxu2 %v2777_v34  ;;  %v3307_v54 = vld [vmem:[%s3832_s10 + $0x164] sm:$0xf]  ;;  %v2870_v55 = vld [vmem:[%s3832_s10 + $0x170] sm:$0xf0]  ;;  %v2869_v57 = vor.u32 %v3309_v51, %v2868_v49  ;;  %v2745_v58 = vor.u32 %v3275_v52, %v2742_v53  ;;  %v2724_v59 = vld [vmem:[%s3832_s10 + $0x40] sm:$0xf] }
  0x30   : > { %879 = vmatpush.bf16.msra.mxu3 %v2905_v38  ;;  %v3273_v60 = vld [vmem:[%s3832_s10 + $0x4c] sm:$0xf0]  ;;  %v2852_v61 = vld [vmem:[%s3832_s10 + $0x140] sm:$0xf]  ;;  %v2873_v62 = vor.u32 %v3307_v54, %v2870_v55  ;;  %v3271_v0 = vld [vmem:[%s3832_s10 + $0x44] sm:$0xf] }
  0x31   : > { %793 = vmatpush.bf16.msra.mxu0 %v2757_v44  ;;  %v3305_v63 = vld [vmem:[%s3832_s10 + $0x14c] sm:$0xf0]  ;;  %v2726_v1 = vld [vmem:[%s3832_s10 + $0x50] sm:$0xf0]  ;;  %v3303_v2 = vld [vmem:[%s3832_s10 + $0x144] sm:$0xf]  ;;  %v2725_v4 = vor.u32 %v3273_v60, %v2724_v59 }
  0x32   : > { %822 = vmatpush.bf16.msra.mxu1 %v2885_v45  ;;  %v2854_v3 = vld [vmem:[%s3832_s10 + $0x150] sm:$0xf0]  ;;  %v2853_v5 = vor.u32 %v3305_v63, %v2852_v61  ;;  %v2729_v6 = vor.u32 %v3271_v0, %v2726_v1  ;;  %v2708_v7 = vld [vmem:[%s3832_s10 + $0x20] sm:$0xf]  ;;  %v3269_v8 = vld [vmem:[%s3832_s10 + $0x2c] sm:$0xf0] }
  0x33   : > { %851 = vmatpush.bf16.msra.mxu2 %v2761_v46  ;;  %v2836_v9 = vld [vmem:[%s3832_s10 + $0x120] sm:$0xf]  ;;  %v2857_v10 = vor.u32 %v3303_v2, %v2854_v3  ;;  %v3301_v11 = vld [vmem:[%s3832_s10 + $0x12c] sm:$0xf0]  ;;  %v3267_v12 = vld [vmem:[%s3832_s10 + $0x24] sm:$0xf]  ;;  %v2709_v16 = vor.u32 %v3269_v8, %v2708_v7 }
  0x34   : > { %880 = vmatpush.bf16.msra.mxu3 %v2889_v50  ;;  %v2710_v13 = vld [vmem:[%s3832_s10 + $0x30] sm:$0xf0]  ;;  %v3299_v14 = vld [vmem:[%s3832_s10 + $0x124] sm:$0xf]  ;;  %v2692_v17 = vld [vmem:[%s3832_s10] sm:$0xf]  ;;  %v2837_v19 = vor.u32 %v3301_v11, %v2836_v9 }
  0x35   : > { %794 = vmatpush.bf16.msra.mxu0 %v2741_v56  ;;  %v2838_v15 = vld [vmem:[%s3832_s10 + $0x130] sm:$0xf0]  ;;  %v3265_v18 = vld [vmem:[%s3832_s10 + $0xc] sm:$0xf0]  ;;  %v2713_v20 = vor.u32 %v3267_v12, %v2710_v13  ;;  %v2820_v21 = vld [vmem:[%s3832_s10 + $0x100] sm:$0xf] }
  0x36   : > { %823 = vmatpush.bf16.msra.mxu1 %v2869_v57  ;;  %v3297_v22 = vld [vmem:[%s3832_s10 + $0x10c] sm:$0xf0]  ;;  %v3263_v23 = vld [vmem:[%s3832_s10 + $0x4] sm:$0xf]  ;;  %v2841_v24 = vor.u32 %v3299_v14, %v2838_v15  ;;  %v2694_v25 = vld [vmem:[%s3832_s10 + $0x10] sm:$0xf0]  ;;  %v2693_v31 = vor.u32 %v3265_v18, %v2692_v17 }
  0x37   : > { %852 = vmatpush.bf16.msra.mxu2 %v2745_v58  ;;  %v3295_v26 = vld [vmem:[%s3832_s10 + $0x104] sm:$0xf]  ;;  %v2822_v27 = vld [vmem:[%s3832_s10 + $0x110] sm:$0xf0]  ;;  %v2660_v28 = vld [vmem:[%s4613_s0] sm:$0xf]  ;;  %v2821_v35 = vor.u32 %v3297_v22, %v2820_v21  ;;  %v2697_v36 = vor.u32 %v3263_v23, %v2694_v25 }
  0x38   : > { %881 = vmatpush.bf16.msra.mxu3 %v2873_v62  ;;  %v3292_v29 = vld [vmem:[%s3832_s10 + $0xec] sm:$0xf]  ;;  %v2814_v30 = vld [vmem:[%s3832_s10 + $0xf8] sm:$0xf0]  ;;  %v3256_v32 = vld [vmem:[%s4613_s0 + $0x4] sm:$0xf0]  ;;  %v2825_v39 = vor.u32 %v3295_v26, %v2822_v27 }
  0x39   : > { %795 = vmatpush.bf16.msra.mxu0 %v2725_v4  ;;  %v3324_v33 = vld [vmem:[%s3832_s10 + $0x1ec] sm:$0xf]  ;;  %v2942_v34 = vld [vmem:[%s3832_s10 + $0x1f8] sm:$0xf0]  ;;  %v3255_v37 = vld [vmem:[%s4613_s0 + $0x4] sm:$0xf]  ;;  %v2817_v40 = vor.u32 %v3292_v29, %v2814_v30  ;;  %v3927_v44 = vor.u32 %v3256_v32, %v2660_v28 }
  0x3a   : > { %824 = vmatpush.bf16.msra.mxu1 %v2853_v5  ;;  %v2662_v38 = vld [vmem:[%s4613_s0 + $0x8] sm:$0xf0]  ;;  %v2812_v41 = vld [vmem:[%s3832_s10 + $0xe8] sm:$0xf]  ;;  %v3294_v42 = vld [vmem:[%s3832_s10 + $0xf4] sm:$0xf0]  ;;  %v2945_v45 = vor.u32 %v3324_v33, %v2942_v34 }
  0x3b   : > { %853 = vmatpush.bf16.msra.mxu2 %v2729_v6  ;;  %v2940_v43 = vld [vmem:[%s3832_s10 + $0x1e8] sm:$0xf]  ;;  %v3326_v46 = vld [vmem:[%s3832_s10 + $0x1f4] sm:$0xf0]  ;;  %v3288_v47 = vld [vmem:[%s3832_s10 + $0xcc] sm:$0xf]  ;;  %v3932_v49 = vor.u32 %v3255_v37, %v2662_v38  ;;  %v2813_v52 = vor.u32 %v3294_v42, %v2812_v41 }
  0x3c   : > { %882 = vmatpush.bf16.msra.mxu3 %v2857_v10  ;;  %v2798_v48 = vld [vmem:[%s3832_s10 + $0xd8] sm:$0xf0]  ;;  %v3320_v50 = vld [vmem:[%s3832_s10 + $0x1cc] sm:$0xf]  ;;  %v2941_v53 = vor.u32 %v3326_v46, %v2940_v43  ;;  %v2796_v55 = vld [vmem:[%s3832_s10 + $0xc8] sm:$0xf] }
  0x3d   : > { %796 = vmatpush.bf16.msra.mxu0 %v2709_v16  ;;  %v2926_v51 = vld [vmem:[%s3832_s10 + $0x1d8] sm:$0xf0]  ;;  %v2801_v54 = vor.u32 %v3288_v47, %v2798_v48  ;;  %v3290_v56 = vld [vmem:[%s3832_s10 + $0xd4] sm:$0xf0]  ;;  %v2924_v57 = vld [vmem:[%s3832_s10 + $0x1c8] sm:$0xf] }
  0x3e   : > { %825 = vmatpush.bf16.msra.mxu1 %v2837_v19  ;;  %v2929_v58 = vor.u32 %v3320_v50, %v2926_v51  ;;  %v3322_v59 = vld [vmem:[%s3832_s10 + $0x1d4] sm:$0xf0]  ;;  %v3284_v60 = vld [vmem:[%s3832_s10 + $0xac] sm:$0xf]  ;;  %v2782_v61 = vld [vmem:[%s3832_s10 + $0xb8] sm:$0xf0]  ;;  %v2797_v0 = vor.u32 %v3290_v56, %v2796_v55 }
  0x3f   : > { %854 = vmatpush.bf16.msra.mxu2 %v2713_v20  ;;  %v3316_v62 = vld [vmem:[%s3832_s10 + $0x1ac] sm:$0xf]  ;;  %v2910_v63 = vld [vmem:[%s3832_s10 + $0x1b8] sm:$0xf0]  ;;  %v2780_v1 = vld [vmem:[%s3832_s10 + $0xa8] sm:$0xf]  ;;  %v2925_v2 = vor.u32 %v3322_v59, %v2924_v57  ;;  %v2785_v3 = vor.u32 %v3284_v60, %v2782_v61 }
  0x40   : > { %883 = vmatpush.bf16.msra.mxu3 %v2841_v24  ;;  %v3286_v4 = vld [vmem:[%s3832_s10 + $0xb4] sm:$0xf0]  ;;  %v2908_v5 = vld [vmem:[%s3832_s10 + $0x1a8] sm:$0xf]  ;;  %v2913_v7 = vor.u32 %v3316_v62, %v2910_v63  ;;  %v3280_v8 = vld [vmem:[%s3832_s10 + $0x8c] sm:$0xf] }
  0x41   : > { %797 = vmatpush.bf16.msra.mxu0 %v2693_v31  ;;  %v3318_v6 = vld [vmem:[%s3832_s10 + $0x1b4] sm:$0xf0]  ;;  %v2766_v9 = vld [vmem:[%s3832_s10 + $0x98] sm:$0xf0]  ;;  %v3312_v10 = vld [vmem:[%s3832_s10 + $0x18c] sm:$0xf]  ;;  %v2781_v12 = vor.u32 %v3286_v4, %v2780_v1 }
  0x42   : > { %826 = vmatpush.bf16.msra.mxu1 %v2821_v35  ;;  %v2894_v11 = vld [vmem:[%s3832_s10 + $0x198] sm:$0xf0]  ;;  %v2764_v13 = vld [vmem:[%s3832_s10 + $0x88] sm:$0xf]  ;;  %v2668_v14 = vld [vmem:[%s4613_s0 + $0x10] sm:$0xf]  ;;  %v2909_v15 = vor.u32 %v3318_v6, %v2908_v5  ;;  %v2769_v16 = vor.u32 %v3280_v8, %v2766_v9 }
  0x43   : > { %855 = vmatpush.bf16.msra.mxu2 %v2697_v36  ;;  %v3282_v17 = vld [vmem:[%s3832_s10 + $0x94] sm:$0xf0]  ;;  %v2892_v18 = vld [vmem:[%s3832_s10 + $0x188] sm:$0xf]  ;;  %v2897_v20 = vor.u32 %v3312_v10, %v2894_v11  ;;  %v3276_v21 = vld [vmem:[%s3832_s10 + $0x6c] sm:$0xf] }
  0x44   : > { %884 = vmatpush.bf16.msra.mxu3 %v2825_v39  ;;  %798 = vmatmul.bf16.vlgmr.msra.gmra.mxu0 %v3927_v44  ;;  %v3314_v19 = vld [vmem:[%s3832_s10 + $0x194] sm:$0xf0]  ;;  %v2750_v22 = vld [vmem:[%s3832_s10 + $0x78] sm:$0xf0]  ;;  %s3969_s5 = scalar_select %p334_p13, %s3715_s18, 1  ;;  %v2765_v28 = vor.u32 %v3282_v17, %v2764_v13 }
  0x45   : > { %827 = vmatmul.bf16.vlgmr.msra.gmra.mxu1 %v3932_v49  ;;  %906 = vmatpush.bf16.msrb.mxu0 %v2813_v52  ;;  %v3258_v23 = vld [vmem:[%s4613_s0 + $0x14] sm:$0xf0]  ;;  %v3308_v24 = vld [vmem:[%s3832_s10 + $0x16c] sm:$0xf]  ;;  %v2878_v25 = vld [vmem:[%s3832_s10 + $0x178] sm:$0xf0]  ;;  %v2893_v29 = vor.u32 %v3314_v19, %v2892_v18  ;;  %v2753_v30 = vor.u32 %v3276_v21, %v2750_v22 }
  0x46   : > { %856 = vmatmul.bf16.vlgmr.msra.gmra.mxu2 %v3927_v44  ;;  %935 = vmatpush.bf16.msrb.mxu1 %v2941_v53  ;;  %v3257_v26 = vld [vmem:[%s4613_s0 + $0x14] sm:$0xf]  ;;  %v2670_v27 = vld [vmem:[%s4613_s0 + $0x18] sm:$0xf0]  ;;  %s2657_s26 = sshll.u32 %s3969_s5, 3  ;;  %v3991_v34 = vor.u32 %v3258_v23, %v2668_v14  ;;  %v2881_v35 = vor.u32 %v3308_v24, %v2878_v25  ;;  %s2656_s14 = sshll.u32 %s3969_s5, 2 }
  0x47   : > { %964 = vmatpush.bf16.msrb.mxu2 %v2817_v40  ;;  %885 = vmatmul.bf16.vlgmr.msra.gmra.mxu3 %v3932_v49  ;;  %v2748_v31 = vld [vmem:[%s3832_s10 + $0x68] sm:$0xf]  ;;  %v3278_v32 = vld [vmem:[%s3832_s10 + $0x74] sm:$0xf0]  ;;  %s3989_s13 = scalar_lea.vmem %s4617_s4, %s2657_s26  ;;  %v3272_v37 = vld [vmem:[%s3832_s10 + $0x4c] sm:$0xf]  ;;  %v3996_v39 = vor.u32 %v3257_v26, %v2670_v27  ;;  %s337_s24 = scalar_lea.vmem %s4616_s3, %s2656_s14 }
  0x48   : > { %993 = vmatpush.bf16.msrb.mxu3 %v2945_v45  ;;  %v2876_v33 = vld [vmem:[%s3832_s10 + $0x168] sm:$0xf]  ;;  %v3310_v36 = vld [vmem:[%s3832_s10 + $0x174] sm:$0xf0]  ;;  %v2734_v38 = vld [vmem:[%s3832_s10 + $0x58] sm:$0xf0]  ;;  %v2749_v42 = vor.u32 %v3278_v32, %v2748_v31 }
  0x49   : > { %907 = vmatpush.bf16.msrb.mxu0 %v2797_v0  ;;  %v3304_v40 = vld [vmem:[%s3832_s10 + $0x14c] sm:$0xf]  ;;  %v2862_v41 = vld [vmem:[%s3832_s10 + $0x158] sm:$0xf0]  ;;  %v2877_v43 = vor.u32 %v3310_v36, %v2876_v33  ;;  %v2737_v45 = vor.u32 %v3272_v37, %v2734_v38  ;;  %v2732_v46 = vld [vmem:[%s3832_s10 + $0x48] sm:$0xf] }
  0x4a   : > { %936 = vmatpush.bf16.msrb.mxu1 %v2925_v2  ;;  %v3274_v47 = vld [vmem:[%s3832_s10 + $0x54] sm:$0xf0]  ;;  %v2865_v48 = vor.u32 %v3304_v40, %v2862_v41  ;;  %v2860_v51 = vld [vmem:[%s3832_s10 + $0x148] sm:$0xf]  ;;  %v3268_v53 = vld [vmem:[%s3832_s10 + $0x2c] sm:$0xf] }
  0x4b   : > { %965 = vmatpush.bf16.msrb.mxu2 %v2801_v54  ;;  %v2733_v50 = vor.u32 %v3274_v47, %v2732_v46  ;;  %v3306_v52 = vld [vmem:[%s3832_s10 + $0x154] sm:$0xf0]  ;;  %v2718_v55 = vld [vmem:[%s3832_s10 + $0x38] sm:$0xf0]  ;;  %v3300_v56 = vld [vmem:[%s3832_s10 + $0x12c] sm:$0xf] }
  0x4c   : > { %994 = vmatpush.bf16.msrb.mxu3 %v2929_v58  ;;  %v2861_v54 = vor.u32 %v3306_v52, %v2860_v51  ;;  %v2846_v57 = vld [vmem:[%s3832_s10 + $0x138] sm:$0xf0]  ;;  %v2721_v58 = vor.u32 %v3268_v53, %v2718_v55  ;;  %v2716_v60 = vld [vmem:[%s3832_s10 + $0x28] sm:$0xf]  ;;  %v3270_v61 = vld [vmem:[%s3832_s10 + $0x34] sm:$0xf0] }
  0x4d   : > { %908 = vmatpush.bf16.msrb.mxu0 %v2781_v12  ;;  %v2849_v59 = vor.u32 %v3300_v56, %v2846_v57  ;;  %v2844_v62 = vld [vmem:[%s3832_s10 + $0x128] sm:$0xf]  ;;  %v3302_v63 = vld [vmem:[%s3832_s10 + $0x134] sm:$0xf0]  ;;  %v3264_v0 = vld [vmem:[%s3832_s10 + $0xc] sm:$0xf]  ;;  %v2717_v2 = vor.u32 %v3270_v61, %v2716_v60 }
  0x4e   : > { %937 = vmatpush.bf16.msrb.mxu1 %v2909_v15  ;;  %v2702_v1 = vld [vmem:[%s3832_s10 + $0x18] sm:$0xf0]  ;;  %v2845_v5 = vor.u32 %v3302_v63, %v2844_v62  ;;  %v3266_v8 = vld [vmem:[%s3832_s10 + $0x14] sm:$0xf0]  ;;  %v2828_v10 = vld [vmem:[%s3832_s10 + $0x108] sm:$0xf] }
  0x4f   : > { %966 = vmatpush.bf16.msrb.mxu2 %v2785_v3  ;;  %v3296_v3 = vld [vmem:[%s3832_s10 + $0x10c] sm:$0xf]  ;;  %v2830_v4 = vld [vmem:[%s3832_s10 + $0x118] sm:$0xf0]  ;;  %v2705_v6 = vor.u32 %v3264_v0, %v2702_v1  ;;  %v3298_v11 = vld [vmem:[%s3832_s10 + $0x114] sm:$0xf0] }
  0x50   : > { %995 = vmatpush.bf16.msrb.mxu3 %v2913_v7  ;;  %v2700_v7 = vld [vmem:[%s3832_s10 + $0x8] sm:$0xf]  ;;  %v2833_v9 = vor.u32 %v3296_v3, %v2830_v4  ;;  %v2676_v12 = vld [vmem:[%s4613_s0 + $0x20] sm:$0xf]  ;;  %v3259_v14 = vld [vmem:[%s4613_s0 + $0x24] sm:$0xf]  ;;  %v2829_v17 = vor.u32 %v3298_v11, %v2828_v10 }
  0x51   : > { %909 = vmatpush.bf16.msrb.mxu0 %v2765_v28  ;;  %v3260_v13 = vld [vmem:[%s4613_s0 + $0x24] sm:$0xf0]  ;;  %v2678_v15 = vld [vmem:[%s4613_s0 + $0x28] sm:$0xf0]  ;;  %v3358_v21 = vld [vmem:[%s3838_s21 + $0xec] sm:$0xf0] }
  0x52   : > { %938 = vmatpush.bf16.msrb.mxu1 %v2893_v29  ;;  %v4036_v18 = vor.u32 %v3260_v13, %v2676_v12  ;;  %v4038_v19 = vor.u32 %v3259_v14, %v2678_v15  ;;  %v3356_v22 = vld [vmem:[%s3838_s21 + $0xe4] sm:$0xf]  ;;  %v3064_v24 = vld [vmem:[%s3838_s21 + $0xf0] sm:$0xf0]  ;;  %v3357_v25 = vld [vmem:[%s3838_s21 + $0xec] sm:$0xf] }
  0x53   : > { %967 = vmatpush.bf16.msrb.mxu2 %v2769_v16  ;;  %v2701_v16 = vor.u32 %v3266_v8, %v2700_v7  ;;  %v3072_v26 = vld [vmem:[%s3838_s21 + $0xf8] sm:$0xf0]  ;;  %v3067_v27 = vor.u32 %v3356_v22, %v3064_v24  ;;  %v2684_v29 = vld [vmem:[%s4613_s0 + $0x30] sm:$0xf]  ;;  %v3261_v31 = vld [vmem:[%s4613_s0 + $0x34] sm:$0xf] }
  0x54   : > { %996 = vmatpush.bf16.msrb.mxu3 %v2897_v20  ;;  %803 = vmatmul.bf16.gmra.mxu0 %v3991_v34  ;;  %v3062_v20 = vld [vmem:[%s3838_s21 + $0xe0] sm:$0xf]  ;;  %v3075_v28 = vor.u32 %v3357_v25, %v3072_v26  ;;  %v2686_v32 = vld [vmem:[%s4613_s0 + $0x38] sm:$0xf0]  ;;  %v3354_v37 = vld [vmem:[%s3838_s21 + $0xcc] sm:$0xf0] }
  0x55   : > { %832 = vmatmul.bf16.gmra.mxu1 %v3996_v39  ;;  %910 = vmatpush.bf16.msrb.mxu0 %v2749_v42  ;;  %v3063_v23 = vor.u32 %v3358_v21, %v3062_v20  ;;  %v3046_v36 = vld [vmem:[%s3838_s21 + $0xc0] sm:$0xf]  ;;  %v3352_v38 = vld [vmem:[%s3838_s21 + $0xc4] sm:$0xf]  ;;  %v3048_v41 = vld [vmem:[%s3838_s21 + $0xd0] sm:$0xf0] }
  0x56   : > { %861 = vmatmul.bf16.gmra.mxu2 %v3991_v34  ;;  %939 = vmatpush.bf16.msrb.mxu1 %v2877_v43  ;;  %v3047_v40 = vor.u32 %v3354_v37, %v3046_v36  ;;  %v3353_v42 = vld [vmem:[%s3838_s21 + $0xcc] sm:$0xf]  ;;  %v3056_v43 = vld [vmem:[%s3838_s21 + $0xd8] sm:$0xf0]  ;;  %v3070_v47 = vld [vmem:[%s3838_s21 + $0xe8] sm:$0xf] }
  0x57   : > { %968 = vmatpush.bf16.msrb.mxu2 %v2753_v30  ;;  %890 = vmatmul.bf16.gmra.mxu3 %v3996_v39  ;;  %v3262_v30 = vld [vmem:[%s4613_s0 + $0x34] sm:$0xf0]  ;;  %v3059_v46 = vor.u32 %v3353_v42, %v3056_v43  ;;  %v3350_v52 = vld [vmem:[%s3838_s21 + $0xac] sm:$0xf0]  ;;  %v3348_v53 = vld [vmem:[%s3838_s21 + $0xa4] sm:$0xf] }
  0x58   : > { %997 = vmatpush.bf16.msrb.mxu3 %v2881_v35  ;;  %v4062_v33 = vor.u32 %v3262_v30, %v2684_v29  ;;  %v4064_v35 = vor.u32 %v3261_v31, %v2686_v32  ;;  %v3349_v57 = vld [vmem:[%s3838_s21 + $0xac] sm:$0xf]  ;;  %v3054_v60 = vld [vmem:[%s3838_s21 + $0xc8] sm:$0xf]  ;;  %v3355_v61 = vld [vmem:[%s3838_s21 + $0xd4] sm:$0xf0] }
  0x59   : > { %911 = vmatpush.bf16.msrb.mxu0 %v2733_v50  ;;  %v3030_v50 = vld [vmem:[%s3838_s21 + $0xa0] sm:$0xf]  ;;  %v3055_v63 = vor.u32 %v3355_v61, %v3054_v60  ;;  %v3346_v0 = vld [vmem:[%s3838_s21 + $0x8c] sm:$0xf0]  ;;  %v3344_v1 = vld [vmem:[%s3838_s21 + $0x84] sm:$0xf] }
  0x5a   : > { %940 = vmatpush.bf16.msrb.mxu1 %v2861_v54  ;;  %v3032_v54 = vld [vmem:[%s3838_s21 + $0xb0] sm:$0xf0]  ;;  %v3031_v55 = vor.u32 %v3350_v52, %v3030_v50  ;;  %v3014_v62 = vld [vmem:[%s3838_s21 + $0x80] sm:$0xf]  ;;  %v3351_v7 = vld [vmem:[%s3838_s21 + $0xb4] sm:$0xf0] }
  0x5b   : > { %969 = vmatpush.bf16.msrb.mxu2 %v2737_v45  ;;  %v3051_v45 = vor.u32 %v3352_v38, %v3048_v41  ;;  %v3035_v56 = vor.u32 %v3348_v53, %v3032_v54  ;;  %v3015_v3 = vor.u32 %v3346_v0, %v3014_v62  ;;  %v2998_v8 = vld [vmem:[%s3838_s21 + $0x60] sm:$0xf]  ;;  %v3340_v12 = vld [vmem:[%s3838_s21 + $0x64] sm:$0xf]  ;;  %v3000_v13 = vld [vmem:[%s3838_s21 + $0x70] sm:$0xf0] }
  0x5c   : > { %998 = vmatpush.bf16.msrb.mxu3 %v2865_v48  ;;  %v3359_v48 = vld [vmem:[%s3838_s21 + $0xf4] sm:$0xf0]  ;;  %v3341_v14 = vld [vmem:[%s3838_s21 + $0x6c] sm:$0xf]  ;;  %v3003_v15 = vor.u32 %v3340_v12, %v3000_v13  ;;  %v3022_v20 = vld [vmem:[%s3838_s21 + $0x88] sm:$0xf] }
  0x5d   : > { %912 = vmatpush.bf16.msrb.mxu0 %v2717_v2  ;;  %v3071_v51 = vor.u32 %v3359_v48, %v3070_v47  ;;  %v3016_v2 = vld [vmem:[%s3838_s21 + $0x90] sm:$0xf0]  ;;  %v3347_v21 = vld [vmem:[%s3838_s21 + $0x94] sm:$0xf0]  ;;  %v3338_v24 = vld [vmem:[%s3838_s21 + $0x4c] sm:$0xf0] }
  0x5e   : > { %941 = vmatpush.bf16.msrb.mxu1 %v2845_v5  ;;  %v3019_v4 = vor.u32 %v3344_v1, %v3016_v2  ;;  %v3345_v5 = vld [vmem:[%s3838_s21 + $0x8c] sm:$0xf]  ;;  %v3023_v22 = vor.u32 %v3347_v21, %v3022_v20  ;;  %v3336_v25 = vld [vmem:[%s3838_s21 + $0x44] sm:$0xf]  ;;  %v3343_v29 = vld [vmem:[%s3838_s21 + $0x74] sm:$0xf0] }
  0x5f   : > { %970 = vmatpush.bf16.msrb.mxu2 %v2721_v58  ;;  %v3040_v58 = vld [vmem:[%s3838_s21 + $0xb8] sm:$0xf0]  ;;  %v3337_v32 = vld [vmem:[%s3838_s21 + $0x4c] sm:$0xf]  ;;  %v2990_v36 = vld [vmem:[%s3838_s21 + $0x48] sm:$0xf] }
  0x60   : > { %999 = vmatpush.bf16.msrb.mxu3 %v2849_v59  ;;  %v3043_v59 = vor.u32 %v3349_v57, %v3040_v58  ;;  %v3339_v37 = vld [vmem:[%s3838_s21 + $0x54] sm:$0xf0]  ;;  %v2966_v38 = vld [vmem:[%s3838_s21 + $0x20] sm:$0xf]  ;;  %v3332_v42 = vld [vmem:[%s3838_s21 + $0x24] sm:$0xf] }
  0x61   : > { %913 = vmatpush.bf16.msrb.mxu0 %v2701_v16  ;;  %v3008_v16 = vld [vmem:[%s3838_s21 + $0x78] sm:$0xf0]  ;;  %v2968_v43 = vld [vmem:[%s3838_s21 + $0x30] sm:$0xf0]  ;;  %v2974_v47 = vld [vmem:[%s3838_s21 + $0x28] sm:$0xf] }
  0x62   : > { %942 = vmatpush.bf16.msrb.mxu1 %v2829_v17  ;;  %v3011_v17 = vor.u32 %v3341_v14, %v3008_v16  ;;  %v3335_v48 = vld [vmem:[%s3838_s21 + $0x34] sm:$0xf0]  ;;  %v3333_v50 = vld [vmem:[%s3838_s21 + $0x2c] sm:$0xf]  ;;  %v2976_v52 = vld [vmem:[%s3838_s21 + $0x38] sm:$0xf0] }
  0x63   : > { %971 = vmatpush.bf16.msrb.mxu2 %v2705_v6  ;;  %v3024_v6 = vld [vmem:[%s3838_s21 + $0x98] sm:$0xf0]  ;;  %v2979_v53 = vor.u32 %v3333_v50, %v2976_v52  ;;  %v2950_v54 = vld [vmem:[%s3838_s21] sm:$0xf]  ;;  %v2952_v58 = vld [vmem:[%s3838_s21 + $0x10] sm:$0xf0] }
  0x64   : > { %1000 = vmatpush.bf16.msrb.mxu3 %v2833_v9  ;;  %808 = vmatmul.bf16.gmra.mxu0 %v4036_v18  ;;  %v3342_v9 = vld [vmem:[%s3838_s21 + $0x6c] sm:$0xf0]  ;;  %v2958_v60 = vld [vmem:[%s3838_s21 + $0x8] sm:$0xf]  ;;  %v3331_v61 = vld [vmem:[%s3838_s21 + $0x14] sm:$0xf0] }
  0x65   : > { %837 = vmatmul.bf16.gmra.mxu1 %v4038_v19  ;;  %1259 = vmatpush.bf16.msra.mxu0 %v3063_v23  ;;  %v2999_v11 = vor.u32 %v3342_v9, %v2998_v8  ;;  %v2982_v23 = vld [vmem:[%s3838_s21 + $0x40] sm:$0xf]  ;;  %v3329_v62 = vld [vmem:[%s3838_s21 + $0xc] sm:$0xf]  ;;  %v2960_v0 = vld [vmem:[%s3838_s21 + $0x18] sm:$0xf0] }
  0x66   : > { %866 = vmatmul.bf16.gmra.mxu2 %v4036_v18  ;;  %1272 = vmatpush.bf16.msra.mxu1 %v3067_v27  ;;  %v2983_v26 = vor.u32 %v3338_v24, %v2982_v23  ;;  %v2984_v27 = vld [vmem:[%s3838_s21 + $0x50] sm:$0xf0]  ;;  %v2963_v1 = vor.u32 %v3329_v62, %v2960_v0  ;;  %p1378_p0 = scmp.eq.s32.totalorder %s3715_s18, 1  ;;  %s1056_s5 = smul.u32 56, %s3715_s18 }
  0x67   : > { %895 = vmatmul.bf16.gmra.mxu3 %v4038_v19  ;;  %1285 = vmatpush.bf16.msra.mxu2 %v3071_v51  ;;  %v2987_v30 = vor.u32 %v3336_v25, %v2984_v27  ;;  %v2975_v51 = vor.u32 %v3335_v48, %v2974_v47 }
  0x68   : > { %1298 = vmatpush.bf16.msra.mxu3 %v3075_v28  ;;  %v3006_v28 = vld [vmem:[%s3838_s21 + $0x68] sm:$0xf]  ;;  %s1057_s29 = sshra.s32 %s1056_s5, 3 }
  0x69   : > { %1260 = vmatpush.bf16.msra.mxu0 %v3047_v40  ;;  %v3007_v31 = vor.u32 %v3343_v29, %v3006_v28  ;;  %v3334_v40 = vld [vmem:[%s3838_s21 + $0x2c] sm:$0xf0]  ;;  %s3327_s30 = sshll.u32 %s1057_s29, 5 }
  0x6a   : > { %1273 = vmatpush.bf16.msra.mxu1 %v3051_v45  ;;  %v2967_v41 = vor.u32 %v3334_v40, %v2966_v38  ;;  %v2991_v45 = vor.u32 %v3339_v37, %v2990_v36  ;;  %s1061_s6 = scalar_lea.vmem [#allocation2], %s3327_s30 }
  0x6b   : > { %1286 = vmatpush.bf16.msra.mxu2 %v3055_v63  ;;  %v2959_v63 = vor.u32 %v3331_v61, %v2958_v60 }
  0x6c   : > { %1299 = vmatpush.bf16.msra.mxu3 %v3059_v46  ;;  %v2971_v46 = vor.u32 %v3332_v42, %v2968_v43 }
  0x6d   : > { %1261 = vmatpush.bf16.msra.mxu0 %v3031_v55  ;;  %v3330_v55 = vld [vmem:[%s3838_s21 + $0xc] sm:$0xf0] }
  0x6e   : > { %1274 = vmatpush.bf16.msra.mxu1 %v3035_v56  ;;  %v3328_v56 = vld [vmem:[%s3838_s21 + $0x4] sm:$0xf]  ;;  %v2951_v57 = vor.u32 %v3330_v55, %v2950_v54 }
  0x70   : > { %1300 = vmatpush.bf16.msra.mxu3 %v3043_v59  ;;  %v2955_v59 = vor.u32 %v3328_v56, %v2952_v58 }
  0x71   : > { %1262 = vmatpush.bf16.msra.mxu0 %v3015_v3 }
  0x72   : > { %1275 = vmatpush.bf16.msra.mxu1 %v3019_v4 }
  0x74   : > { %813 = vmatmul.bf16.gmra.mxu0 %v4062_v33 }
  0x75   : > { %842 = vmatmul.bf16.gmra.mxu1 %v4064_v35  ;;  %1263 = vmatpush.bf16.msra.mxu0 %v2999_v11 }
  0x76   : > { %871 = vmatmul.bf16.gmra.mxu2 %v4062_v33  ;;  %1276 = vmatpush.bf16.msra.mxu1 %v3003_v15 }
  0x77   : > { %900 = vmatmul.bf16.gmra.mxu3 %v4064_v35 }
  0x79   : > { %1264 = vmatpush.bf16.msra.mxu0 %v2983_v26 }
  0x7a   : > { %1277 = vmatpush.bf16.msra.mxu1 %v2987_v30 }
  0x7d   : > { %1265 = vmatpush.bf16.msra.mxu0 %v2967_v41 }
  0x7e   : > { %1278 = vmatpush.bf16.msra.mxu1 %v2971_v46 }
  0x81   : > { %1266 = vmatpush.bf16.msra.mxu0 %v2951_v57 }
  0x82   : > { %1279 = vmatpush.bf16.msra.mxu1 %v2955_v59 }
  0x84   : > { %914 = vmatmul.bf16.vlgmr.msrb.gmra.mxu0 %v3927_v44 }
  0x85   : > { %943 = vmatmul.bf16.vlgmr.msrb.gmra.mxu1 %v3932_v49 }
  0x86   : > { %972 = vmatmul.bf16.vlgmr.msrb.gmra.mxu2 %v3927_v44  ;;  %v3038_v44 = vld [vmem:[%s3838_s21 + $0xa8] sm:$0xf] }
  0x87   : > { %1001 = vmatmul.bf16.vlgmr.msrb.gmra.mxu3 %v3932_v49  ;;  %v3027_v49 = vor.u32 %v3345_v5, %v3024_v6  ;;  %v3039_v10 = vor.u32 %v3351_v7, %v3038_v44  ;;  %v3727_v6 = vmov 0.0|0.0  }
  0x89   : > { %1301 = vmatpush.bf16.msra.mxu3 %v3027_v49  ;;  %1287 = vmatpush.bf16.msra.mxu2 %v3039_v10 }
  0x8d   : > { %1302 = vmatpush.bf16.msra.mxu3 %v3011_v17  ;;  %1288 = vmatpush.bf16.msra.mxu2 %v3023_v22 }
  0x91   : > { %1289 = vmatpush.bf16.msra.mxu2 %v3007_v31 }
  0x94   : > { %919 = vmatmul.bf16.gmra.mxu0 %v3991_v34 }
  0x95   : > { %948 = vmatmul.bf16.gmra.mxu1 %v3996_v39  ;;  %1290 = vmatpush.bf16.msra.mxu2 %v2991_v45 }
  0x96   : > { %977 = vmatmul.bf16.gmra.mxu2 %v3991_v34  ;;  %v2992_v34 = vld [vmem:[%s3838_s21 + $0x58] sm:$0xf0] }
  0x97   : > { %1006 = vmatmul.bf16.gmra.mxu3 %v3996_v39  ;;  %v2995_v39 = vor.u32 %v3337_v32, %v2992_v34 }
  0x99   : > { %1303 = vmatpush.bf16.msra.mxu3 %v2995_v39  ;;  %1291 = vmatpush.bf16.msra.mxu2 %v2975_v51 }
  0x9d   : > { %1304 = vmatpush.bf16.msra.mxu3 %v2979_v53  ;;  %1292 = vmatpush.bf16.msra.mxu2 %v2959_v63 }
  0xa1   : > { %1305 = vmatpush.bf16.msra.mxu3 %v2963_v1 }
  0xa4   : > { %924 = vmatmul.bf16.gmra.mxu0 %v4036_v18 }
  0xa5   : > { %953 = vmatmul.bf16.gmra.mxu1 %v4038_v19 }
  0xa6   : > { %982 = vmatmul.bf16.gmra.mxu2 %v4036_v18  ;;  %v4148_v18 = vld [vmem:[%s337_s24] sm:$0xf] }
  0xa7   : > { %1011 = vmatmul.bf16.gmra.mxu3 %v4038_v19  ;;  %v4151_v19 = vperm.slane %v4148_v18, 0 }
  0xb4   : > { %929 = vmatmul.bf16.gmra.mxu0 %v4062_v33 }
  0xb5   : > { %958 = vmatmul.bf16.gmra.mxu1 %v4064_v35 }
  0xb6   : > { %987 = vmatmul.bf16.gmra.mxu2 %v4062_v33  ;;  %v4155_v33 = vperm.slane %v4148_v18, 1 }
  0xb7   : > { %1016 = vmatmul.bf16.gmra.mxu3 %v4064_v35 }
  0xc1   : > { %v799_v2 = vpop.f32.mrf.mxu0 }
  0xc2   : > { %v800_v3 = vadd.f32 %v799_v2, %v4151_v19  ;;  %v828_v4 = vpop.f32.mrf.mxu1  ;;  %v4173_v2 = vperm.slane %v4148_v18, 2 }
  0xc4   : > { %v829_v5 = vadd.f32 %v828_v4, %v800_v3  ;;  %1267 = vmatmul.bf16.vlgmr.msra.gmra.mxu0 %v3727_v6 }
  0xc5   : > { %1280 = vmatmul.bf16.vlgmr.msra.gmra.mxu1 %v3727_v6 }
  0xc6   : > { %1293 = vmatmul.bf16.vlgmr.msra.gmra.mxu2 %v3727_v6  ;;  %1022 = vst [vmem:[#allocation2] sm:$0xff] %v829_v5 }
  0xc7   : > { %1306 = vmatmul.bf16.vlgmr.msra.gmra.mxu3 %v3727_v6 }
  0xc9   : > { %v857_v35 = vpop.f32.mrf.mxu2  ;;  %v801_v7 = vpop.f32.mrf.mxu0 }
  0xca   : > { %v858_v44 = vadd.f32 %v857_v35, %v4155_v33  ;;  %v886_v49 = vpop.f32.mrf.mxu3  ;;  %v802_v8 = vadd.f32 %v801_v7, %v4151_v19  ;;  %v830_v9 = vpop.f32.mrf.mxu1 }
  0xcc   : > { %v887_v10 = vadd.f32 %v886_v49, %v858_v44  ;;  %v831_v11 = vadd.f32 %v830_v9, %v802_v8 }
  0xce   : > { %1023 = vst [vmem:[#allocation2 + $0x8] sm:$0xff] %v887_v10 }
  0xcf   : > { %1026 = vst [vmem:[#allocation2 + $0x20] sm:$0xff] %v831_v11 }
  0xd1   : > { %v859_v12 = vpop.f32.mrf.mxu2  ;;  %v804_v15 = vpop.f32.mrf.mxu0 }
  0xd2   : > { %v860_v13 = vadd.f32 %v859_v12, %v4155_v33  ;;  %v888_v14 = vpop.f32.mrf.mxu3  ;;  %v805_v16 = vadd.f32 %v804_v15, %v4151_v19  ;;  %v833_v17 = vpop.f32.mrf.mxu1 }
  0xd4   : > { %v889_v20 = vadd.f32 %v888_v14, %v860_v13  ;;  %v834_v21 = vadd.f32 %v833_v17, %v805_v16 }
  0xd6   : > { %1027 = vst [vmem:[#allocation2 + $0x28] sm:$0xff] %v889_v20 }
  0xd7   : > { %1030 = vst [vmem:[#allocation2 + $0x40] sm:$0xff] %v834_v21 }
  0xd9   : > { %v862_v22 = vpop.f32.mrf.mxu2  ;;  %v806_v25 = vpop.f32.mrf.mxu0 }
  0xda   : > { %v863_v23 = vadd.f32 %v862_v22, %v4155_v33  ;;  %v891_v24 = vpop.f32.mrf.mxu3  ;;  %v807_v26 = vadd.f32 %v806_v25, %v4151_v19  ;;  %v835_v27 = vpop.f32.mrf.mxu1 }
  0xdc   : > { %v892_v28 = vadd.f32 %v891_v24, %v863_v23  ;;  %v836_v29 = vadd.f32 %v835_v27, %v807_v26 }
  0xde   : > { %1031 = vst [vmem:[#allocation2 + $0x48] sm:$0xff] %v892_v28 }
  0xdf   : > { %1034 = vst [vmem:[#allocation2 + $0x60] sm:$0xff] %v836_v29 }
  0xe1   : > { %v864_v30 = vpop.f32.mrf.mxu2  ;;  %v809_v34 = vpop.f32.mrf.mxu0 }
  0xe2   : > { %v865_v31 = vadd.f32 %v864_v30, %v4155_v33  ;;  %v893_v32 = vpop.f32.mrf.mxu3  ;;  %v810_v36 = vadd.f32 %v809_v34, %v4151_v19  ;;  %v838_v39 = vpop.f32.mrf.mxu1 }
  0xe4   : > { %v894_v37 = vadd.f32 %v893_v32, %v865_v31  ;;  %v839_v38 = vadd.f32 %v838_v39, %v810_v36 }
  0xe6   : > { %1035 = vst [vmem:[#allocation2 + $0x68] sm:$0xff] %v894_v37 }
  0xe7   : > { %1038 = vst [vmem:[#allocation2 + $0x80] sm:$0xff] %v839_v38 }
  0xe9   : > { %v867_v40 = vpop.f32.mrf.mxu2  ;;  %v811_v43 = vpop.f32.mrf.mxu0 }
  0xea   : > { %v868_v41 = vadd.f32 %v867_v40, %v4155_v33  ;;  %v896_v42 = vpop.f32.mrf.mxu3  ;;  %v812_v45 = vadd.f32 %v811_v43, %v4151_v19  ;;  %v840_v46 = vpop.f32.mrf.mxu1 }
  0xec   : > { %v897_v47 = vadd.f32 %v896_v42, %v868_v41  ;;  %v841_v48 = vadd.f32 %v840_v46, %v812_v45 }
  0xee   : > { %1039 = vst [vmem:[#allocation2 + $0x88] sm:$0xff] %v897_v47 }
  0xef   : > { %1042 = vst [vmem:[#allocation2 + $0xa0] sm:$0xff] %v841_v48 }
  0xf1   : > { %v869_v50 = vpop.f32.mrf.mxu2  ;;  %v814_v53 = vpop.f32.mrf.mxu0 }
  0xf2   : > { %v870_v51 = vadd.f32 %v869_v50, %v4155_v33  ;;  %v898_v52 = vpop.f32.mrf.mxu3  ;;  %v815_v54 = vadd.f32 %v814_v53, %v4151_v19  ;;  %v843_v55 = vpop.f32.mrf.mxu1 }
  0xf4   : > { %v899_v56 = vadd.f32 %v898_v52, %v870_v51  ;;  %v844_v57 = vadd.f32 %v843_v55, %v815_v54 }
  0xf6   : > { %1043 = vst [vmem:[#allocation2 + $0xa8] sm:$0xff] %v899_v56 }
  0xf7   : > { %1046 = vst [vmem:[#allocation2 + $0xc0] sm:$0xff] %v844_v57 }
  0xf9   : > { %v872_v58 = vpop.f32.mrf.mxu2  ;;  %v816_v61 = vpop.f32.mrf.mxu0 }
  0xfa   : > { %v873_v59 = vadd.f32 %v872_v58, %v4155_v33  ;;  %v901_v60 = vpop.f32.mrf.mxu3  ;;  %v817_v62 = vadd.f32 %v816_v61, %v4151_v19  ;;  %v845_v63 = vpop.f32.mrf.mxu1  ;;  %v4178_v19 = vperm.slane %v4148_v18, 3 }
  0xfc   : > { %v902_v0 = vadd.f32 %v901_v60, %v873_v59  ;;  %v846_v1 = vadd.f32 %v845_v63, %v817_v62 }
  0xfe   : > { %1047 = vst [vmem:[#allocation2 + $0xc8] sm:$0xff] %v902_v0 }
  0xff   : > { %1050 = vst [vmem:[#allocation2 + $0xe0] sm:$0xff] %v846_v1 }
 0x101   : > { %v874_v3 = vpop.f32.mrf.mxu2  ;;  %v915_v6 = vpop.f32.mrf.mxu0 }
 0x102   : > { %v875_v4 = vadd.f32 %v874_v3, %v4155_v33  ;;  %v903_v5 = vpop.f32.mrf.mxu3  ;;  %v916_v35 = vadd.f32 %v915_v6, %v4173_v2  ;;  %v944_v44 = vpop.f32.mrf.mxu1 }
 0x104   : > { %v904_v49 = vadd.f32 %v903_v5, %v875_v4  ;;  %v945_v7 = vadd.f32 %v944_v44, %v916_v35 }
 0x106   : > { %1051 = vst [vmem:[#allocation2 + $0xe8] sm:$0xff] %v904_v49 }
 0x107   : > { %1024 = vst [vmem:[#allocation2 + $0x10] sm:$0xff] %v945_v7 }
 0x109   : > { %v973_v8 = vpop.f32.mrf.mxu2  ;;  %v917_v11 = vpop.f32.mrf.mxu0 }
 0x10a   : > { %v974_v9 = vadd.f32 %v973_v8, %v4178_v19  ;;  %v1002_v10 = vpop.f32.mrf.mxu3  ;;  %v918_v12 = vadd.f32 %v917_v11, %v4173_v2  ;;  %v946_v33 = vpop.f32.mrf.mxu1 }
 0x10c   : > { %v1003_v13 = vadd.f32 %v1002_v10, %v974_v9  ;;  %v947_v14 = vadd.f32 %v946_v33, %v918_v12 }
 0x10e   : > { %1025 = vst [vmem:[#allocation2 + $0x18] sm:$0xff] %v1003_v13 }
 0x10f   : > { %1028 = vst [vmem:[#allocation2 + $0x30] sm:$0xff] %v947_v14 }
 0x111   : > { %v975_v15 = vpop.f32.mrf.mxu2  ;;  %v920_v20 = vpop.f32.mrf.mxu0 }
 0x112   : > { %v976_v16 = vadd.f32 %v975_v15, %v4178_v19  ;;  %v1004_v17 = vpop.f32.mrf.mxu3  ;;  %v921_v18 = vadd.f32 %v920_v20, %v4173_v2  ;;  %v949_v21 = vpop.f32.mrf.mxu1 }
 0x114   : > { %v1005_v22 = vadd.f32 %v1004_v17, %v976_v16  ;;  %v950_v23 = vadd.f32 %v949_v21, %v921_v18 }
 0x116   : > { %1029 = vst [vmem:[#allocation2 + $0x38] sm:$0xff] %v1005_v22 }
 0x117   : > { %1032 = vst [vmem:[#allocation2 + $0x50] sm:$0xff] %v950_v23 }
 0x119   : > { %v978_v24 = vpop.f32.mrf.mxu2  ;;  %v922_v27 = vpop.f32.mrf.mxu0 }
 0x11a   : > { %v979_v25 = vadd.f32 %v978_v24, %v4178_v19  ;;  %v1007_v26 = vpop.f32.mrf.mxu3  ;;  %v923_v28 = vadd.f32 %v922_v27, %v4173_v2  ;;  %v951_v29 = vpop.f32.mrf.mxu1 }
 0x11c   : > { %v1008_v30 = vadd.f32 %v1007_v26, %v979_v25  ;;  %v952_v31 = vadd.f32 %v951_v29, %v923_v28 }
 0x11e   : > { %1033 = vst [vmem:[#allocation2 + $0x58] sm:$0xff] %v1008_v30 }
 0x11f   : > { %1036 = vst [vmem:[#allocation2 + $0x70] sm:$0xff] %v952_v31 }
 0x121   : > { %v980_v32 = vpop.f32.mrf.mxu2  ;;  %v925_v39 = vpop.f32.mrf.mxu0 }
 0x122   : > { %v981_v34 = vadd.f32 %v980_v32, %v4178_v19  ;;  %v1009_v36 = vpop.f32.mrf.mxu3  ;;  %v926_v37 = vadd.f32 %v925_v39, %v4173_v2  ;;  %v954_v38 = vpop.f32.mrf.mxu1 }
 0x124   : > { %v1010_v40 = vadd.f32 %v1009_v36, %v981_v34  ;;  %v955_v41 = vadd.f32 %v954_v38, %v926_v37 }
 0x126   : > { %1037 = vst [vmem:[#allocation2 + $0x78] sm:$0xff] %v1010_v40 }
 0x127   : > { %1040 = vst [vmem:[#allocation2 + $0x90] sm:$0xff] %v955_v41 }
 0x129   : > { %v983_v42 = vpop.f32.mrf.mxu2  ;;  %v927_v46 = vpop.f32.mrf.mxu0 }
 0x12a   : > { %v984_v43 = vadd.f32 %v983_v42, %v4178_v19  ;;  %v1012_v45 = vpop.f32.mrf.mxu3  ;;  %v928_v47 = vadd.f32 %v927_v46, %v4173_v2  ;;  %v956_v48 = vpop.f32.mrf.mxu1 }
 0x12c   : > { %v1013_v50 = vadd.f32 %v1012_v45, %v984_v43  ;;  %v957_v51 = vadd.f32 %v956_v48, %v928_v47 }
 0x12e   : > { %1041 = vst [vmem:[#allocation2 + $0x98] sm:$0xff] %v1013_v50 }
 0x12f   : > { %1044 = vst [vmem:[#allocation2 + $0xb0] sm:$0xff] %v957_v51 }
 0x131   : > { %v985_v52 = vpop.f32.mrf.mxu2  ;;  %v930_v55 = vpop.f32.mrf.mxu0 }
 0x132   : > { %v986_v53 = vadd.f32 %v985_v52, %v4178_v19  ;;  %v1014_v54 = vpop.f32.mrf.mxu3  ;;  %v931_v56 = vadd.f32 %v930_v55, %v4173_v2  ;;  %v959_v57 = vpop.f32.mrf.mxu1 }
 0x134   : > { %v1015_v58 = vadd.f32 %v1014_v54, %v986_v53  ;;  %v960_v59 = vadd.f32 %v959_v57, %v931_v56 }
 0x136   : > { %1045 = vst [vmem:[#allocation2 + $0xb8] sm:$0xff] %v1015_v58 }
 0x137   : > { %1048 = vst [vmem:[#allocation2 + $0xd0] sm:$0xff] %v960_v59 }
 0x139   : > { %v988_v60 = vpop.f32.mrf.mxu2  ;;  %v932_v63 = vpop.f32.mrf.mxu0 }
 0x13a   : > { %v989_v61 = vadd.f32 %v988_v60, %v4178_v19  ;;  %v1017_v62 = vpop.f32.mrf.mxu3  ;;  %v933_v0 = vadd.f32 %v932_v63, %v4173_v2  ;;  %v961_v1 = vpop.f32.mrf.mxu1 }
 0x13c   : > { %v1018_v3 = vadd.f32 %v1017_v62, %v989_v61  ;;  %v962_v4 = vadd.f32 %v961_v1, %v933_v0 }
 0x13e   : > { %1049 = vst [vmem:[#allocation2 + $0xd8] sm:$0xff] %v1018_v3 }
 0x13f   : > { %1052 = vst [vmem:[#allocation2 + $0xf0] sm:$0xff] %v962_v4 }
 0x141   : > { %v990_v5 = vpop.f32.mrf.mxu2  ;;  %v1268_v44 = vpop.f32.mrf.mxu0 }
 0x142   : > { %v991_v6 = vadd.f32 %v990_v5, %v4178_v19  ;;  %v1019_v35 = vpop.f32.mrf.mxu3  ;;  %v1281_v49 = vpop.f32.mrf.mxu1 }
 0x144   : > { %v1020_v7 = vadd.f32 %v1019_v35, %v991_v6 }
 0x146   : > { %1053 = vst [vmem:[#allocation2 + $0xf8] sm:$0xff] %v1020_v7 }
 0x149   : > { %v1294_v8 = vpop.f32.mrf.mxu2  ;;  %v1270_v9 = vpop.f32.mrf.mxu0 }
 0x14a   : > { %v1307_v10 = vpop.f32.mrf.mxu3  ;;  %v1283_v2 = vpop.f32.mrf.mxu1 }
 0x14d   : > { %v1062_v11 = vld [vmem:[%s1061_s6] sm:$0xff]  ;;  %v1063_v12 = vld [vmem:[%s1061_s6 + $0x8] sm:$0xff]  ;;  %v1065_v14 = vld [vmem:[%s1061_s6 + $0x18] sm:$0xff] }
 0x14e   : > { %v1311_v33 = vadd.f32 %v1268_v44, %v1062_v11  ;;  %v1312_v13 = vadd.f32 %v1281_v49, %v1063_v12  ;;  %v1314_v15 = vadd.f32 %v1307_v10, %v1065_v14  ;;  %v1064_v27 = vld [vmem:[%s1061_s6 + $0x10] sm:$0xff] }
 0x14f   : > { %v1313_v29 = vadd.f32 %v1294_v8, %v1064_v27 }
 0x150   : > { %v3076_v16 = vmul.f32 -1.442695, %v1311_v33  ;;  %v3077_v19 = vmul.f32 -1.442695, %v1312_v13  ;;  %v3078_v17 = vmul.f32 -1.442695, %v1314_v15 }
 0x151   : > { %v1296_v20 = vpop.f32.mrf.mxu2 }
 0x152   : > { %3481 = vpow2.f32 %v3076_v16  ;;  %v1309_v18 = vpop.f32.mrf.mxu3 }
 0x153   : > { %3483 = vpow2.f32 %v3077_v19 }
 0x154   : > { %3485 = vpow2.f32 %v3078_v17 }
 0x158   : > { %v3482_v21 = vpop.eup %3481 }
 0x159   : > { %v3484_v22 = vpop.eup %3483  ;;  %v1318_v23 = vadd.f32 1.0, %v3482_v21 }
 0x15a   : > { %v3486_v24 = vpop.eup %3485  ;;  %v1337_v25 = vadd.f32 1.0, %v3484_v22 }
 0x15b   : > { %3487 = vrcp.f32 %v1318_v23  ;;  %v1357_v26 = vadd.f32 1.0, %v3486_v24  ;;  %v1328_v37 = vand.u32 2147483647, %v1318_v23  ;;  %v1330_v38 = vand.u32 2147483648, %v1318_v23 }
 0x15c   : > { %3489 = vrcp.f32 %v1337_v25  ;;  %v1349_v40 = vand.u32 2147483648, %v1337_v25  ;;  %v1347_v45 = vand.u32 2147483647, %v1337_v25  ;;  %vm1324_vm2 = vweird.f32 %v1318_v23 }
 0x15d   : > { %3491 = vrcp.f32 %v1357_v26  ;;  %vm1343_vm3 = vweird.f32 %v1337_v25  ;;  %v1331_v48 = vor.u32 1.1754944e-38, %v1330_v38  ;;  %vm1329_vm6 = vcmp.eq.f32.partialorder %v1328_v37, 8.507059e+37 }
 0x15e   : > { %3493 = vtanh.f32 %v1313_v29  ;;  %v1350_v51 = vor.u32 1.1754944e-38, %v1349_v40  ;;  %vm1348_vm7 = vcmp.eq.f32.partialorder %v1347_v45, 8.507059e+37  ;;  %v1369_v62 = vand.u32 2147483648, %v1357_v26 }
 0x15f   : > { %vm1363_vm9 = vweird.f32 %v1357_v26  ;;  %v1367_v63 = vand.u32 2147483647, %v1357_v26 }
 0x160   : > { %v1370_v1 = vor.u32 1.1754944e-38, %v1369_v62 }
 0x161   : > { %v3488_v28 = vpop.eup %3487  ;;  %vm1368_vm11 = vcmp.eq.f32.partialorder %v1367_v63, 8.507059e+37 }
 0x162   : > { %v3490_v30 = vpop.eup %3489  ;;  %v1320_v31 = vmul.f32 %v3488_v28, %v1318_v23  ;;  %vm1325_vm0 = vweird.f32 %v3488_v28 }
 0x163   : > { %v1339_v32 = vmul.f32 %v3490_v30, %v1337_v25  ;;  %v3492_v36 = vpop.eup %3491  ;;  %vm1344_vm1 = vweird.f32 %v3490_v30  ;;  %vm1326_vm4 = vmor %vm1324_vm2, %vm1325_vm0 }
 0x164   : > { %v1321_v34 = vsub.f32 1.0, %v1320_v31  ;;  %v1359_v42 = vmul.f32 %v3492_v36, %v1357_v26  ;;  %vm1345_vm5 = vmor %vm1343_vm3, %vm1344_vm1  ;;  %v3494_v53 = vpop.eup %3493  ;;  %vm1364_vm8 = vweird.f32 %v3492_v36 }
 0x165   : > { %v1340_v39 = vsub.f32 1.0, %v1339_v32  ;;  %vm1365_vm10 = vmor %vm1363_vm9, %vm1364_vm8 }
 0x166   : > { %v1322_v41 = vmul.f32 %v3488_v28, %v1321_v34  ;;  %v1360_v47 = vsub.f32 1.0, %v1359_v42 }
 0x167   : > { %v1341_v43 = vmul.f32 %v3490_v30, %v1340_v39 }
 0x168   : > { %v1323_v46 = vadd.f32 %v3488_v28, %v1322_v41  ;;  %v1361_v58 = vmul.f32 %v3492_v36, %v1360_v47 }
 0x169   : > { %v1342_v50 = vadd.f32 %v3490_v30, %v1341_v43 }
 0x16a   : > { %v1327_v52 = vsel %vm1326_vm4, %v3488_v28, %v1323_v46  ;;  %v1362_v61 = vadd.f32 %v3492_v36, %v1361_v58 }
 0x16b   : > { %v1332_v54 = vsel %vm1329_vm6, %v1331_v48, %v1327_v52  ;;  %v1346_v55 = vsel %vm1345_vm5, %v3490_v30, %v1342_v50 }
 0x16c   : > { %v1351_v56 = vsel %vm1348_vm7, %v1350_v51, %v1346_v55  ;;  %v1374_v57 = vmul.f32 %v3494_v53, %v1332_v54  ;;  %v1366_v0 = vsel %vm1365_vm10, %v3492_v36, %v1362_v61 }
 0x16d   : > { %v1373_v59 = vmul.f32 0.0, %v1351_v56  ;;  %v1371_v4 = vsel %vm1368_vm11, %v1370_v1, %v1366_v0 }
 0x16f   : > { %v4196_v60 = vadd.f32 %v1374_v57, %v1373_v59 }
 0x171   : > { %3495 = vtanh.f32 %v4196_v60 }
 0x174   : > { %1382 = sbr.rel (!%p1378_p0) target bundleno = 379 (0x17b), region = 52 }
 0x177   : > { %v3496_v3 = vpop.eup %3495 }
 0x178   : > { %v4199_v5 = vmul.f32 %v3496_v3, %v1371_v4 }
 0x17a   : > { %1383 = vst [vmem:[%s3989_s13] sm:$0xff] %v4199_v5 }
 0x17b PF: > { %v3197_v6 = vld [vmem:[%s3838_s21 + $0xe0] sm:$0xf]  ;;  %v3394_v35 = vld [vmem:[%s3838_s21 + $0xec] sm:$0xf0]  ;;  %v3392_v44 = vld [vmem:[%s3838_s21 + $0xe4] sm:$0xf] }
 0x17c   : > { %v4208_v49 = vor.u32 %v3394_v35, %v3197_v6  ;;  %v3199_v7 = vld [vmem:[%s3838_s21 + $0xf0] sm:$0xf0]  ;;  %v3393_v8 = vld [vmem:[%s3838_s21 + $0xec] sm:$0xf]  ;;  %v3207_v9 = vld [vmem:[%s3838_s21 + $0xf8] sm:$0xf0] }
 0x17d   : > { %v4213_v10 = vor.u32 %v3392_v44, %v3199_v7  ;;  %v4215_v2 = vor.u32 %v3393_v8, %v3207_v9  ;;  %v3181_v11 = vld [vmem:[%s3838_s21 + $0xc0] sm:$0xf]  ;;  %v3390_v12 = vld [vmem:[%s3838_s21 + $0xcc] sm:$0xf0]  ;;  %v3388_v33 = vld [vmem:[%s3838_s21 + $0xc4] sm:$0xf] }
 0x17e   : > { %1589 = vmatpush.bf16.msrb.mxu0 %v4208_v49  ;;  %v4221_v13 = vor.u32 %v3390_v12, %v3181_v11  ;;  %v3183_v14 = vld [vmem:[%s3838_s21 + $0xd0] sm:$0xf0]  ;;  %v3389_v15 = vld [vmem:[%s3838_s21 + $0xcc] sm:$0xf]  ;;  %v3191_v16 = vld [vmem:[%s3838_s21 + $0xd8] sm:$0xf0] }
 0x17f   : > { %1602 = vmatpush.bf16.msrb.mxu1 %v4213_v10  ;;  %1628 = vmatpush.bf16.msrb.mxu3 %v4215_v2  ;;  %v4228_v19 = vor.u32 %v3388_v33, %v3183_v14  ;;  %v4230_v17 = vor.u32 %v3389_v15, %v3191_v16  ;;  %v3205_v20 = vld [vmem:[%s3838_s21 + $0xe8] sm:$0xf]  ;;  %v3395_v18 = vld [vmem:[%s3838_s21 + $0xf4] sm:$0xf0]  ;;  %v3165_v21 = vld [vmem:[%s3838_s21 + $0xa0] sm:$0xf] }
 0x180   : > { %v4235_v22 = vor.u32 %v3395_v18, %v3205_v20  ;;  %v3386_v23 = vld [vmem:[%s3838_s21 + $0xac] sm:$0xf0]  ;;  %v3384_v24 = vld [vmem:[%s3838_s21 + $0xa4] sm:$0xf]  ;;  %v3167_v25 = vld [vmem:[%s3838_s21 + $0xb0] sm:$0xf0] }
 0x181   : > { %v3385_v26 = vld [vmem:[%s3838_s21 + $0xac] sm:$0xf]  ;;  %v3175_v27 = vld [vmem:[%s3838_s21 + $0xb8] sm:$0xf0]  ;;  %v3189_v28 = vld [vmem:[%s3838_s21 + $0xc8] sm:$0xf]  ;;  %v4245_v29 = vor.u32 %v3386_v23, %v3165_v21  ;;  %v4252_v34 = vor.u32 %v3384_v24, %v3167_v25 }
 0x182   : > { %1590 = vmatpush.bf16.msrb.mxu0 %v4221_v13  ;;  %1615 = vmatpush.bf16.msrb.mxu2 %v4235_v22  ;;  %v3391_v30 = vld [vmem:[%s3838_s21 + $0xd4] sm:$0xf0]  ;;  %v3149_v31 = vld [vmem:[%s3838_s21 + $0x80] sm:$0xf]  ;;  %v3382_v32 = vld [vmem:[%s3838_s21 + $0x8c] sm:$0xf0]  ;;  %v4254_v36 = vor.u32 %v3385_v26, %v3175_v27 }
 0x183   : > { %1603 = vmatpush.bf16.msrb.mxu1 %v4228_v19  ;;  %1629 = vmatpush.bf16.msrb.mxu3 %v4230_v17  ;;  %v4256_v39 = vor.u32 %v3391_v30, %v3189_v28  ;;  %v3380_v37 = vld [vmem:[%s3838_s21 + $0x84] sm:$0xf]  ;;  %v3151_v38 = vld [vmem:[%s3838_s21 + $0x90] sm:$0xf0]  ;;  %v3381_v40 = vld [vmem:[%s3838_s21 + $0x8c] sm:$0xf]  ;;  %v4266_v45 = vor.u32 %v3382_v32, %v3149_v31 }
 0x184   : > { %v3159_v41 = vld [vmem:[%s3838_s21 + $0x98] sm:$0xf0]  ;;  %v3173_v42 = vld [vmem:[%s3838_s21 + $0xa8] sm:$0xf]  ;;  %v3387_v43 = vld [vmem:[%s3838_s21 + $0xb4] sm:$0xf0]  ;;  %v4274_v50 = vor.u32 %v3380_v37, %v3151_v38 }
 0x185   : > { %v4268_v46 = vor.u32 %v3387_v43, %v3173_v42  ;;  %v3133_v47 = vld [vmem:[%s3838_s21 + $0x60] sm:$0xf]  ;;  %v3378_v48 = vld [vmem:[%s3838_s21 + $0x6c] sm:$0xf0]  ;;  %v4276_v51 = vor.u32 %v3381_v40, %v3159_v41  ;;  %v3376_v52 = vld [vmem:[%s3838_s21 + $0x64] sm:$0xf] }
 0x186   : > { %1591 = vmatpush.bf16.msrb.mxu0 %v4245_v29  ;;  %1616 = vmatpush.bf16.msrb.mxu2 %v4256_v39  ;;  %v3157_v53 = vld [vmem:[%s3838_s21 + $0x88] sm:$0xf]  ;;  %v3383_v54 = vld [vmem:[%s3838_s21 + $0x94] sm:$0xf0]  ;;  %v3135_v55 = vld [vmem:[%s3838_s21 + $0x70] sm:$0xf0]  ;;  %v4286_v58 = vor.u32 %v3378_v48, %v3133_v47 }
 0x187   : > { %1604 = vmatpush.bf16.msrb.mxu1 %v4252_v34  ;;  %1630 = vmatpush.bf16.msrb.mxu3 %v4254_v36  ;;  %v3377_v56 = vld [vmem:[%s3838_s21 + $0x6c] sm:$0xf]  ;;  %v3143_v57 = vld [vmem:[%s3838_s21 + $0x78] sm:$0xf0]  ;;  %v4288_v59 = vor.u32 %v3383_v54, %v3157_v53  ;;  %v3117_v61 = vld [vmem:[%s3838_s21 + $0x40] sm:$0xf]  ;;  %v4294_v63 = vor.u32 %v3376_v52, %v3135_v55  ;;  %v1396_v53 = vpack.c.bf16 %v4199_v5, %v4199_v5 }
 0x188   : > { %v3374_v62 = vld [vmem:[%s3838_s21 + $0x4c] sm:$0xf0]  ;;  %v4296_v0 = vor.u32 %v3377_v56, %v3143_v57  ;;  %v3372_v1 = vld [vmem:[%s3838_s21 + $0x44] sm:$0xf]  ;;  %v3141_v3 = vld [vmem:[%s3838_s21 + $0x68] sm:$0xf] }
 0x189   : > { %v3379_v4 = vld [vmem:[%s3838_s21 + $0x74] sm:$0xf0]  ;;  %v3119_v6 = vld [vmem:[%s3838_s21 + $0x50] sm:$0xf0]  ;;  %v3373_v35 = vld [vmem:[%s3838_s21 + $0x4c] sm:$0xf]  ;;  %v4306_v7 = vor.u32 %v3374_v62, %v3117_v61 }
 0x18a   : > { %1592 = vmatpush.bf16.msrb.mxu0 %v4266_v45  ;;  %1617 = vmatpush.bf16.msrb.mxu2 %v4268_v46  ;;  %v3127_v44 = vld [vmem:[%s3838_s21 + $0x58] sm:$0xf0]  ;;  %v4308_v8 = vor.u32 %v3379_v4, %v3141_v3  ;;  %v3101_v9 = vld [vmem:[%s3838_s21 + $0x20] sm:$0xf]  ;;  %v3370_v11 = vld [vmem:[%s3838_s21 + $0x2c] sm:$0xf0]  ;;  %v4314_v12 = vor.u32 %v3372_v1, %v3119_v6 }
 0x18b   : > { %1605 = vmatpush.bf16.msrb.mxu1 %v4274_v50  ;;  %1631 = vmatpush.bf16.msrb.mxu3 %v4276_v51  ;;  %v4316_v33 = vor.u32 %v3373_v35, %v3127_v44  ;;  %v3368_v14 = vld [vmem:[%s3838_s21 + $0x24] sm:$0xf]  ;;  %v3125_v15 = vld [vmem:[%s3838_s21 + $0x48] sm:$0xf]  ;;  %v3375_v16 = vld [vmem:[%s3838_s21 + $0x54] sm:$0xf0]  ;;  %v4326_v23 = vor.u32 %v3370_v11, %v3101_v9 }
 0x18c   : > { %v3103_v20 = vld [vmem:[%s3838_s21 + $0x30] sm:$0xf0]  ;;  %v3369_v18 = vld [vmem:[%s3838_s21 + $0x2c] sm:$0xf]  ;;  %v3111_v21 = vld [vmem:[%s3838_s21 + $0x38] sm:$0xf0]  ;;  %v4328_v24 = vor.u32 %v3375_v16, %v3125_v15 }
 0x18d   : > { %v3085_v25 = vld [vmem:[%s3838_s21] sm:$0xf]  ;;  %v3366_v26 = vld [vmem:[%s3838_s21 + $0xc] sm:$0xf0]  ;;  %v4334_v27 = vor.u32 %v3368_v14, %v3103_v20  ;;  %v4336_v28 = vor.u32 %v3369_v18, %v3111_v21  ;;  %v3364_v30 = vld [vmem:[%s3838_s21 + $0x4] sm:$0xf] }
 0x18e   : > { %1593 = vmatpush.bf16.msrb.mxu0 %v4286_v58  ;;  %1618 = vmatpush.bf16.msrb.mxu2 %v4288_v59  ;;  %v3109_v31 = vld [vmem:[%s3838_s21 + $0x28] sm:$0xf]  ;;  %v3371_v32 = vld [vmem:[%s3838_s21 + $0x34] sm:$0xf0]  ;;  %v3087_v37 = vld [vmem:[%s3838_s21 + $0x10] sm:$0xf0]  ;;  %v4346_v41 = vor.u32 %v3366_v26, %v3085_v25 }
 0x18f   : > { %1606 = vmatpush.bf16.msrb.mxu1 %v4294_v63  ;;  %1632 = vmatpush.bf16.msrb.mxu3 %v4296_v0  ;;  %v3365_v38 = vld [vmem:[%s3838_s21 + $0xc] sm:$0xf]  ;;  %v3095_v40 = vld [vmem:[%s3838_s21 + $0x18] sm:$0xf0]  ;;  %v4348_v42 = vor.u32 %v3371_v32, %v3109_v31  ;;  %v4352_v43 = vor.u32 %v3364_v30, %v3087_v37  ;;  %v3093_v48 = vld [vmem:[%s3838_s21 + $0x8] sm:$0xf] }
 0x190   : > { %v4354_v47 = vor.u32 %v3365_v38, %v3095_v40  ;;  %v3367_v52 = vld [vmem:[%s3838_s21 + $0x14] sm:$0xf0]  ;;  %s3413_s21 = smul.u32 40, %s3715_s18  ;;  %s3399_s14 = sshll.u32 %s3715_s18, 3 }
 0x191   : > { %v4364_v54 = vor.u32 %v3367_v52, %v3093_v48  ;;  %s3414_s12 = smul.u32 24, %s3715_s18  ;;  %s3400_s23 = sadd.s32 24, %s3399_s14 }
 0x192   : > { %1594 = vmatpush.bf16.msrb.mxu0 %v4306_v7  ;;  %1619 = vmatpush.bf16.msrb.mxu2 %v4308_v8  ;;  %s3362_s7 = sadd.s32 8, %s3413_s21  ;;  %s1842_s25 = sshra.s32 %s3400_s23, 3 }
 0x193   : > { %1607 = vmatpush.bf16.msrb.mxu1 %v4314_v12  ;;  %1633 = vmatpush.bf16.msrb.mxu3 %v4316_v33  ;;  %s1387_s10 = sshra.s32 %s3362_s7, 3  ;;  %s3397_s15 = sadd.s32 16, %s3414_s12 }
 0x194   : > { %s3363_s8 = sshll.u32 %s1387_s10, 5  ;;  %s1711_s26 = sshra.s32 %s3397_s15, 3 }
 0x195   : > { %s1391_s9 = scalar_lea.vmem [#allocation2], %s3363_s8  ;;  %s3398_s28 = sshll.u32 %s1711_s26, 5 }
 0x196   : > { %1595 = vmatpush.bf16.msrb.mxu0 %v4326_v23  ;;  %1620 = vmatpush.bf16.msrb.mxu2 %v4328_v24  ;;  %v1392_v5 = vld [vmem:[%s1391_s9] sm:$0xff]  ;;  %v1393_v55 = vld [vmem:[%s1391_s9 + $0x8] sm:$0xff]  ;;  %v1395_v4 = vld [vmem:[%s1391_s9 + $0x18] sm:$0xff]  ;;  %s1715_s11 = scalar_lea.vmem [#allocation2], %s3398_s28  ;;  %s3401_s24 = sshll.u32 %s1842_s25, 5 }
 0x197   : > { %1608 = vmatpush.bf16.msrb.mxu1 %v4334_v27  ;;  %1634 = vmatpush.bf16.msrb.mxu3 %v4336_v28  ;;  %v1394_v21 = vld [vmem:[%s1391_s9 + $0x10] sm:$0xff]  ;;  %s1846_s5 = scalar_lea.vmem [#allocation2], %s3401_s24  ;;  %s1971_s29 = ssub.s32 4, %s3715_s18 }
 0x198   : > { %s3226_s30 = sshll.u32 %s1971_s29, 3  ;;  %s3415_s10 = smul.u32 4294967272, %s3715_s18 }
 0x199   : > { %s1973_s6 = sshra.s32 %s3226_s30, 3  ;;  %s3416_s26 = smul.u32 4294967256, %s3715_s18 }
 0x19a   : > { %1596 = vmatpush.bf16.msrb.mxu0 %v4346_v41  ;;  %1621 = vmatpush.bf16.msrb.mxu2 %v4348_v42  ;;  %s3402_s21 = sshll.u32 %s1973_s6, 5  ;;  %s3404_s8 = sadd.s32 40, %s3415_s10 }
 0x19b   : > { %1609 = vmatpush.bf16.msrb.mxu1 %v4352_v43  ;;  %1635 = vmatpush.bf16.msrb.mxu3 %v4354_v47  ;;  %s1977_s7 = scalar_lea.vmem [#allocation2], %s3402_s21  ;;  %s2105_s9 = sshra.s32 %s3404_s8, 3 }
 0x19c   : > { %s3405_s12 = sshll.u32 %s2105_s9, 5  ;;  %s3407_s28 = sadd.s32 48, %s3416_s26 }
 0x19d   : > { %1597 = vmatmul.bf16.vlgmr.msrb.gmra.mxu0 %v1396_v53  ;;  %s2109_s15 = scalar_lea.vmem [#allocation2], %s3405_s12  ;;  %p2498_p1 = scmp.eq.s32.totalorder %s3715_s18, 0 }
 0x19e   : > { %1721 = vmatpush.bf16.msra.mxu0 %v4208_v49  ;;  %1610 = vmatmul.bf16.vlgmr.msrb.gmra.mxu1 %v1396_v53  ;;  %s3417_s25 = smul.u32 4294967240, %s3715_s18 }
 0x19f   : > { %1734 = vmatpush.bf16.msra.mxu1 %v4213_v10  ;;  %1760 = vmatpush.bf16.msra.mxu3 %v4215_v2 }
 0x1a0   : > { %1636 = vmatmul.bf16.vlgmr.msrb.gmra.mxu3 %v1396_v53  ;;  %1622 = vmatpush.bf16.msrb.mxu2 %v4364_v54  ;;  %s3410_s24 = sadd.s32 56, %s3417_s25 }
 0x1a2   : > { %1722 = vmatpush.bf16.msra.mxu0 %v4221_v13 }
 0x1a3   : > { %1735 = vmatpush.bf16.msra.mxu1 %v4228_v19  ;;  %1761 = vmatpush.bf16.msra.mxu3 %v4230_v17 }
 0x1a4   : > { %1747 = vmatpush.bf16.msra.mxu2 %v4235_v22 }
 0x1a5   : > { %1623 = vmatmul.bf16.vlgmr.msrb.gmra.mxu2 %v1396_v53 }
 0x1a6   : > { %1723 = vmatpush.bf16.msra.mxu0 %v4245_v29 }
 0x1a7   : > { %1736 = vmatpush.bf16.msra.mxu1 %v4252_v34  ;;  %1762 = vmatpush.bf16.msra.mxu3 %v4254_v36 }
 0x1a8   : > { %1748 = vmatpush.bf16.msra.mxu2 %v4256_v39 }
 0x1aa   : > { %1724 = vmatpush.bf16.msra.mxu0 %v4266_v45 }
 0x1ab   : > { %1737 = vmatpush.bf16.msra.mxu1 %v4274_v50  ;;  %1763 = vmatpush.bf16.msra.mxu3 %v4276_v51 }
 0x1ac   : > { %1749 = vmatpush.bf16.msra.mxu2 %v4268_v46 }
 0x1ae   : > { %1725 = vmatpush.bf16.msra.mxu0 %v4286_v58 }
 0x1af   : > { %1738 = vmatpush.bf16.msra.mxu1 %v4294_v63  ;;  %1764 = vmatpush.bf16.msra.mxu3 %v4296_v0 }
 0x1b0   : > { %1750 = vmatpush.bf16.msra.mxu2 %v4288_v59 }
 0x1b2   : > { %1726 = vmatpush.bf16.msra.mxu0 %v4306_v7 }
 0x1b3   : > { %1739 = vmatpush.bf16.msra.mxu1 %v4314_v12  ;;  %1765 = vmatpush.bf16.msra.mxu3 %v4316_v33 }
 0x1b4   : > { %1751 = vmatpush.bf16.msra.mxu2 %v4308_v8 }
 0x1b6   : > { %1727 = vmatpush.bf16.msra.mxu0 %v4326_v23 }
 0x1b7   : > { %1740 = vmatpush.bf16.msra.mxu1 %v4334_v27  ;;  %1766 = vmatpush.bf16.msra.mxu3 %v4336_v28 }
 0x1b8   : > { %1752 = vmatpush.bf16.msra.mxu2 %v4328_v24 }
 0x1ba   : > { %1728 = vmatpush.bf16.msra.mxu0 %v4346_v41 }
 0x1bb   : > { %1741 = vmatpush.bf16.msra.mxu1 %v4352_v43  ;;  %1767 = vmatpush.bf16.msra.mxu3 %v4354_v47 }
 0x1bc   : > { %1753 = vmatpush.bf16.msra.mxu2 %v4348_v42 }
 0x1be   : > { %1852 = vmatpush.bf16.msrb.mxu0 %v4208_v49 }
 0x1bf   : > { %1865 = vmatpush.bf16.msrb.mxu1 %v4213_v10  ;;  %1891 = vmatpush.bf16.msrb.mxu3 %v4215_v2 }
 0x1c0   : > { %1754 = vmatpush.bf16.msra.mxu2 %v4364_v54 }
 0x1c2   : > { %1853 = vmatpush.bf16.msrb.mxu0 %v4221_v13 }
 0x1c3   : > { %1866 = vmatpush.bf16.msrb.mxu1 %v4228_v19  ;;  %1892 = vmatpush.bf16.msrb.mxu3 %v4230_v17 }
 0x1c4   : > { %1878 = vmatpush.bf16.msrb.mxu2 %v4235_v22 }
 0x1c6   : > { %1854 = vmatpush.bf16.msrb.mxu0 %v4245_v29 }
 0x1c7   : > { %1867 = vmatpush.bf16.msrb.mxu1 %v4252_v34  ;;  %1893 = vmatpush.bf16.msrb.mxu3 %v4254_v36 }
 0x1c8   : > { %1879 = vmatpush.bf16.msrb.mxu2 %v4256_v39 }
 0x1ca   : > { %1855 = vmatpush.bf16.msrb.mxu0 %v4266_v45 }
 0x1cb   : > { %1868 = vmatpush.bf16.msrb.mxu1 %v4274_v50  ;;  %1894 = vmatpush.bf16.msrb.mxu3 %v4276_v51 }
 0x1cc   : > { %1880 = vmatpush.bf16.msrb.mxu2 %v4268_v46 }
 0x1ce   : > { %1856 = vmatpush.bf16.msrb.mxu0 %v4286_v58 }
 0x1cf   : > { %1869 = vmatpush.bf16.msrb.mxu1 %v4294_v63  ;;  %1895 = vmatpush.bf16.msrb.mxu3 %v4296_v0 }
 0x1d0   : > { %1881 = vmatpush.bf16.msrb.mxu2 %v4288_v59 }
 0x1d2   : > { %1857 = vmatpush.bf16.msrb.mxu0 %v4306_v7 }
 0x1d3   : > { %1870 = vmatpush.bf16.msrb.mxu1 %v4314_v12  ;;  %1896 = vmatpush.bf16.msrb.mxu3 %v4316_v33 }
 0x1d4   : > { %1882 = vmatpush.bf16.msrb.mxu2 %v4308_v8 }
 0x1d6   : > { %1858 = vmatpush.bf16.msrb.mxu0 %v4326_v23 }
 0x1d7   : > { %1871 = vmatpush.bf16.msrb.mxu1 %v4334_v27  ;;  %1897 = vmatpush.bf16.msrb.mxu3 %v4336_v28 }
 0x1d8   : > { %1883 = vmatpush.bf16.msrb.mxu2 %v4328_v24 }
 0x1da   : > { %1859 = vmatpush.bf16.msrb.mxu0 %v4346_v41 }
 0x1db   : > { %1872 = vmatpush.bf16.msrb.mxu1 %v4352_v43  ;;  %1898 = vmatpush.bf16.msrb.mxu3 %v4354_v47 }
 0x1dc   : > { %1884 = vmatpush.bf16.msrb.mxu2 %v4348_v42 }
 0x1e0   : > { %1885 = vmatpush.bf16.msrb.mxu2 %v4364_v54 }
 0x21a   : > { %v1598_v56 = vpop.f32.mrf.mxu0 }
 0x21b   : > { %v1641_v57 = vadd.f32 %v1598_v56, %v1392_v5  ;;  %v1611_v61 = vpop.f32.mrf.mxu1 }
 0x21c   : > { %v1642_v62 = vadd.f32 %v1611_v61, %v1393_v55 }
 0x21d   : > { %v3211_v1 = vmul.f32 -1.442695, %v1641_v57 }
 0x21e   : > { %v3212_v3 = vmul.f32 -1.442695, %v1642_v62 }
 0x21f   : > { %3497 = vpow2.f32 %v3211_v1 }
 0x220   : > { %3499 = vpow2.f32 %v3212_v3 }
 0x222   : > { %v1600_v44 = vpop.f32.mrf.mxu0 }
 0x223   : > { %v1637_v6 = vpop.f32.mrf.mxu3  ;;  %v1613_v9 = vpop.f32.mrf.mxu1 }
 0x224   : > { %v1644_v35 = vadd.f32 %v1637_v6, %v1395_v4 }
 0x225   : > { %v3498_v14 = vpop.eup %3497 }
 0x226   : > { %v3213_v11 = vmul.f32 -1.442695, %v1644_v35  ;;  %v3500_v16 = vpop.eup %3499  ;;  %v1648_v20 = vadd.f32 1.0, %v3498_v14 }
 0x227   : > { %v1667_v18 = vadd.f32 1.0, %v3500_v16 }
 0x228   : > { %v1624_v15 = vpop.f32.mrf.mxu2  ;;  %3501 = vpow2.f32 %v3213_v11  ;;  %v1660_v5 = vand.u32 2147483648, %v1648_v20  ;;  %v1658_v57 = vand.u32 2147483647, %v1648_v20  ;;  %vm1654_vm14 = vweird.f32 %v1648_v20 }
 0x229   : > { %3503 = vrcp.f32 %v1648_v20  ;;  %v1643_v30 = vadd.f32 %v1624_v15, %v1394_v21  ;;  %v1679_v55 = vand.u32 2147483648, %v1667_v18  ;;  %v1677_v62 = vand.u32 2147483647, %v1667_v18 }
 0x22a   : > { %3505 = vrcp.f32 %v1667_v18  ;;  %vm1673_vm15 = vweird.f32 %v1667_v18  ;;  %v1661_v35 = vor.u32 1.1754944e-38, %v1660_v5  ;;  %vm1659_vm1 = vcmp.eq.f32.partialorder %v1658_v57, 8.507059e+37 }
 0x22b   : > { %v1639_v25 = vpop.f32.mrf.mxu3  ;;  %v1680_v9 = vor.u32 1.1754944e-38, %v1679_v55  ;;  %vm1678_vm3 = vcmp.eq.f32.partialorder %v1677_v62, 8.507059e+37 }
 0x22e   : > { %v3502_v26 = vpop.eup %3501 }
 0x22f   : > { %v1687_v31 = vadd.f32 1.0, %v3502_v26  ;;  %v3504_v37 = vpop.eup %3503 }
 0x230   : > { %v1626_v32 = vpop.f32.mrf.mxu2  ;;  %v3506_v38 = vpop.eup %3505  ;;  %v1650_v40 = vmul.f32 %v3504_v37, %v1648_v20  ;;  %vm1655_vm12 = vweird.f32 %v3504_v37 }
 0x231   : > { %3507 = vrcp.f32 %v1687_v31  ;;  %v1669_v48 = vmul.f32 %v3506_v38, %v1667_v18  ;;  %vm1674_vm13 = vweird.f32 %v3506_v38  ;;  %vm1656_vm0 = vmor %vm1654_vm14, %vm1655_vm12  ;;  %v1699_v32 = vand.u32 2147483648, %v1687_v31 }
 0x232   : > { %3509 = vtanh.f32 %v1643_v30  ;;  %v1651_v52 = vsub.f32 1.0, %v1650_v40  ;;  %vm1675_vm2 = vmor %vm1673_vm15, %vm1674_vm13  ;;  %vm1693_vm5 = vweird.f32 %v1687_v31 }
 0x233   : > { %v1670_v53 = vsub.f32 1.0, %v1669_v48  ;;  %v1700_v48 = vor.u32 1.1754944e-38, %v1699_v32 }
 0x234   : > { %v1652_v56 = vmul.f32 %v3504_v37, %v1651_v52 }
 0x235   : > { %v1671_v61 = vmul.f32 %v3506_v38, %v1670_v53 }
 0x236   : > { %v1653_v3 = vadd.f32 %v3504_v37, %v1652_v56 }
 0x237   : > { %v3508_v1 = vpop.eup %3507  ;;  %v1672_v44 = vadd.f32 %v3506_v38, %v1671_v61 }
 0x238   : > { %v3510_v4 = vpop.eup %3509  ;;  %v1689_v6 = vmul.f32 %v3508_v1, %v1687_v31  ;;  %v1657_v11 = vsel %vm1656_vm0, %v3504_v37, %v1653_v3  ;;  %vm1694_vm4 = vweird.f32 %v3508_v1  ;;  %v1697_v37 = vand.u32 2147483647, %v1687_v31  ;;  %v1717_v31 = vld [vmem:[%s1715_s11 + $0x8] sm:$0xff]  ;;  %v1719_v3 = vld [vmem:[%s1715_s11 + $0x18] sm:$0xff] }
 0x239   : > { %v1662_v15 = vsel %vm1659_vm1, %v1661_v35, %v1657_v11  ;;  %v1676_v16 = vsel %vm1675_vm2, %v3506_v38, %v1672_v44  ;;  %vm1695_vm6 = vmor %vm1693_vm5, %vm1694_vm4 }
 0x23a   : > { %v1690_v14 = vsub.f32 1.0, %v1689_v6  ;;  %v1681_v21 = vsel %vm1678_vm3, %v1680_v9, %v1676_v16  ;;  %v1704_v25 = vmul.f32 %v3510_v4, %v1662_v15  ;;  %vm1698_vm7 = vcmp.eq.f32.partialorder %v1697_v37, 8.507059e+37 }
 0x23b   : > { %v1703_v26 = vmul.f32 %v1681_v21, %v4196_v60  ;;  %v1716_v60 = vld [vmem:[%s1715_s11] sm:$0xff] }
 0x23c   : > { %v1691_v30 = vmul.f32 %v3508_v1, %v1690_v14 }
 0x23d   : > { %v4433_v20 = vadd.f32 %v1704_v25, %v1703_v26 }
 0x23e   : > { %v1692_v18 = vadd.f32 %v3508_v1, %v1691_v30  ;;  %v1718_v30 = vld [vmem:[%s1715_s11 + $0x10] sm:$0xff]  ;;  %s2237_s11 = sshra.s32 %s3407_s28, 3 }
 0x23f   : > { %3511 = vtanh.f32 %v4433_v20  ;;  %s3408_s14 = sshll.u32 %s2237_s11, 5 }
 0x240   : > { %v1696_v40 = vsel %vm1695_vm6, %v3508_v1, %v1692_v18  ;;  %s2241_s23 = scalar_lea.vmem [#allocation2], %s3408_s14 }
 0x241   : > { %v1701_v52 = vsel %vm1698_vm7, %v1700_v48, %v1696_v40 }
 0x245   : > { %v3512_v38 = vpop.eup %3511 }
 0x246   : > { %v1707_v53 = vmul.f32 %v3512_v38, %v1701_v52 }
 0x248   : > { %v1720_v5 = vpack.c.bf16 %v1707_v53, %v1707_v53 }
 0x24a   : > { %1729 = vmatmul.bf16.vlgmr.msra.gmra.mxu0 %v1720_v5  ;;  %1742 = vmatmul.bf16.vlgmr.msra.gmra.mxu1 %v1720_v5 }
 0x24b   : > { %1755 = vmatmul.bf16.vlgmr.msra.gmra.mxu2 %v1720_v5  ;;  %1768 = vmatmul.bf16.vlgmr.msra.gmra.mxu3 %v1720_v5 }
 0x24c   : > { %1983 = vmatpush.bf16.msra.mxu0 %v4208_v49  ;;  %1996 = vmatpush.bf16.msra.mxu1 %v4213_v10 }
 0x24d   : > { %2009 = vmatpush.bf16.msra.mxu2 %v4235_v22  ;;  %2022 = vmatpush.bf16.msra.mxu3 %v4215_v2 }
 0x250   : > { %1984 = vmatpush.bf16.msra.mxu0 %v4221_v13  ;;  %1997 = vmatpush.bf16.msra.mxu1 %v4228_v19 }
 0x251   : > { %2010 = vmatpush.bf16.msra.mxu2 %v4256_v39  ;;  %2023 = vmatpush.bf16.msra.mxu3 %v4230_v17 }
 0x254   : > { %1985 = vmatpush.bf16.msra.mxu0 %v4245_v29  ;;  %1998 = vmatpush.bf16.msra.mxu1 %v4252_v34 }
 0x255   : > { %2011 = vmatpush.bf16.msra.mxu2 %v4268_v46  ;;  %2024 = vmatpush.bf16.msra.mxu3 %v4254_v36 }
 0x258   : > { %1986 = vmatpush.bf16.msra.mxu0 %v4266_v45  ;;  %1999 = vmatpush.bf16.msra.mxu1 %v4274_v50 }
 0x259   : > { %2012 = vmatpush.bf16.msra.mxu2 %v4288_v59  ;;  %2025 = vmatpush.bf16.msra.mxu3 %v4276_v51 }
 0x25c   : > { %1987 = vmatpush.bf16.msra.mxu0 %v4286_v58  ;;  %2000 = vmatpush.bf16.msra.mxu1 %v4294_v63 }
 0x25d   : > { %2013 = vmatpush.bf16.msra.mxu2 %v4308_v8  ;;  %2026 = vmatpush.bf16.msra.mxu3 %v4296_v0 }
 0x260   : > { %1988 = vmatpush.bf16.msra.mxu0 %v4306_v7  ;;  %2001 = vmatpush.bf16.msra.mxu1 %v4314_v12 }
 0x261   : > { %2014 = vmatpush.bf16.msra.mxu2 %v4328_v24  ;;  %2027 = vmatpush.bf16.msra.mxu3 %v4316_v33 }
 0x264   : > { %1989 = vmatpush.bf16.msra.mxu0 %v4326_v23  ;;  %2002 = vmatpush.bf16.msra.mxu1 %v4334_v27 }
 0x265   : > { %2015 = vmatpush.bf16.msra.mxu2 %v4348_v42  ;;  %2028 = vmatpush.bf16.msra.mxu3 %v4336_v28 }
 0x268   : > { %1990 = vmatpush.bf16.msra.mxu0 %v4346_v41  ;;  %2003 = vmatpush.bf16.msra.mxu1 %v4352_v43 }
 0x269   : > { %2016 = vmatpush.bf16.msra.mxu2 %v4364_v54  ;;  %2029 = vmatpush.bf16.msra.mxu3 %v4354_v47 }
 0x2c7   : > { %v1730_v55 = vpop.f32.mrf.mxu0  ;;  %v1743_v56 = vpop.f32.mrf.mxu1 }
 0x2c8   : > { %v1773_v57 = vadd.f32 %v1730_v55, %v1716_v60  ;;  %v1774_v61 = vadd.f32 %v1743_v56, %v1717_v31 }
 0x2ca   : > { %v3217_v62 = vmul.f32 -1.442695, %v1773_v57  ;;  %v3218_v1 = vmul.f32 -1.442695, %v1774_v61 }
 0x2cc   : > { %3513 = vpow2.f32 %v3217_v62 }
 0x2cd   : > { %3515 = vpow2.f32 %v3218_v1 }
 0x2ce   : > { %v1756_v4 = vpop.f32.mrf.mxu2  ;;  %v1769_v6 = vpop.f32.mrf.mxu3 }
 0x2cf   : > { %v1776_v35 = vadd.f32 %v1769_v6, %v1719_v3  ;;  %v1732_v44 = vpop.f32.mrf.mxu0  ;;  %v1745_v9 = vpop.f32.mrf.mxu1  ;;  %v1775_v40 = vadd.f32 %v1756_v4, %v1718_v30 }
 0x2d1   : > { %v3219_v11 = vmul.f32 -1.442695, %v1776_v35 }
 0x2d2   : > { %v3514_v14 = vpop.eup %3513 }
 0x2d3   : > { %v3516_v15 = vpop.eup %3515  ;;  %v1780_v16 = vadd.f32 1.0, %v3514_v14  ;;  %3517 = vpow2.f32 %v3219_v11 }
 0x2d4   : > { %v1799_v21 = vadd.f32 1.0, %v3516_v15 }
 0x2d5   : > { %3519 = vrcp.f32 %v1780_v16  ;;  %v1792_v60 = vand.u32 2147483648, %v1780_v16  ;;  %v1790_v56 = vand.u32 2147483647, %v1780_v16  ;;  %vm1786_vm10 = vweird.f32 %v1780_v16 }
 0x2d6   : > { %3521 = vrcp.f32 %v1799_v21  ;;  %v1758_v25 = vpop.f32.mrf.mxu2  ;;  %v1771_v26 = vpop.f32.mrf.mxu3  ;;  %v1811_v31 = vand.u32 2147483648, %v1799_v21  ;;  %v1809_v61 = vand.u32 2147483647, %v1799_v21  ;;  %vm1805_vm11 = vweird.f32 %v1799_v21 }
 0x2d7   : > { %v1793_v3 = vor.u32 1.1754944e-38, %v1792_v60  ;;  %vm1791_vm14 = vcmp.eq.f32.partialorder %v1790_v56, 8.507059e+37 }
 0x2d8   : > { %v1812_v35 = vor.u32 1.1754944e-38, %v1811_v31  ;;  %vm1810_vm15 = vcmp.eq.f32.partialorder %v1809_v61, 8.507059e+37 }
 0x2d9   : > { %v3518_v18 = vpop.eup %3517 }
 0x2da   : > { %v1819_v32 = vadd.f32 1.0, %v3518_v18 }
 0x2db   : > { %v3520_v37 = vpop.eup %3519 }
 0x2dc   : > { %v3522_v48 = vpop.eup %3521  ;;  %v1782_v38 = vmul.f32 %v3520_v37, %v1780_v16  ;;  %3523 = vrcp.f32 %v1819_v32  ;;  %vm1787_vm8 = vweird.f32 %v3520_v37  ;;  %vm1825_vm1 = vweird.f32 %v1819_v32 }
 0x2dd   : > { %v1801_v52 = vmul.f32 %v3522_v48, %v1799_v21  ;;  %3525 = vtanh.f32 %v1775_v40  ;;  %vm1806_vm9 = vweird.f32 %v3522_v48  ;;  %vm1788_vm12 = vmor %vm1786_vm10, %vm1787_vm8  ;;  %v1831_v40 = vand.u32 2147483648, %v1819_v32 }
 0x2de   : > { %v1783_v53 = vsub.f32 1.0, %v1782_v38  ;;  %vm1807_vm13 = vmor %vm1805_vm11, %vm1806_vm9 }
 0x2df   : > { %v1802_v5 = vsub.f32 1.0, %v1801_v52  ;;  %v1832_v52 = vor.u32 1.1754944e-38, %v1831_v40 }
 0x2e0   : > { %v1784_v55 = vmul.f32 %v3520_v37, %v1783_v53 }
 0x2e1   : > { %v1803_v57 = vmul.f32 %v3522_v48, %v1802_v5 }
 0x2e2   : > { %v3524_v62 = vpop.eup %3523  ;;  %v1785_v1 = vadd.f32 %v3520_v37, %v1784_v55 }
 0x2e3   : > { %v1804_v4 = vadd.f32 %v3522_v48, %v1803_v57  ;;  %v1821_v6 = vmul.f32 %v3524_v62, %v1819_v32  ;;  %v3526_v9 = vpop.eup %3525  ;;  %vm1826_vm0 = vweird.f32 %v3524_v62 }
 0x2e4   : > { %v1789_v44 = vsel %vm1788_vm12, %v3520_v37, %v1785_v1  ;;  %v1829_v37 = vand.u32 2147483647, %v1819_v32  ;;  %vm1827_vm2 = vmor %vm1825_vm1, %vm1826_vm0  ;;  %v1848_v32 = vld [vmem:[%s1846_s5 + $0x8] sm:$0xff]  ;;  %v1850_v1 = vld [vmem:[%s1846_s5 + $0x18] sm:$0xff] }
 0x2e5   : > { %v1794_v11 = vsel %vm1791_vm14, %v1793_v3, %v1789_v44  ;;  %v1808_v14 = vsel %vm1807_vm13, %v3522_v48, %v1804_v4  ;;  %v1822_v15 = vsub.f32 1.0, %v1821_v6 }
 0x2e6   : > { %v1813_v25 = vsel %vm1810_vm15, %v1812_v35, %v1808_v14  ;;  %v1836_v26 = vmul.f32 %v3526_v9, %v1794_v11  ;;  %vm1830_vm3 = vcmp.eq.f32.partialorder %v1829_v37, 8.507059e+37 }
 0x2e7   : > { %v1835_v30 = vmul.f32 %v1813_v25, %v4433_v20  ;;  %v1823_v18 = vmul.f32 %v3524_v62, %v1822_v15  ;;  %v1847_v20 = vld [vmem:[%s1846_s5] sm:$0xff] }
 0x2e9   : > { %v4470_v16 = vadd.f32 %v1836_v26, %v1835_v30  ;;  %v1824_v21 = vadd.f32 %v3524_v62, %v1823_v18  ;;  %v1849_v18 = vld [vmem:[%s1846_s5 + $0x10] sm:$0xff]  ;;  %s2369_s5 = sshra.s32 %s3410_s24, 3 }
 0x2ea   : > { %s3411_s29 = sshll.u32 %s2369_s5, 5 }
 0x2eb   : > { %3527 = vtanh.f32 %v4470_v16  ;;  %v1828_v38 = vsel %vm1827_vm2, %v3524_v62, %v1824_v21  ;;  %s2373_s30 = scalar_lea.vmem [#allocation2], %s3411_s29 }
 0x2ec   : > { %v1833_v53 = vsel %vm1830_vm3, %v1832_v52, %v1828_v38 }
 0x2f1   : > { %v3528_v48 = vpop.eup %3527 }
 0x2f2   : > { %v1839_v5 = vmul.f32 %v3528_v48, %v1833_v53 }
 0x2f4   : > { %v1851_v60 = vpack.c.bf16 %v1839_v5, %v1839_v5 }
 0x2f6   : > { %1860 = vmatmul.bf16.vlgmr.msrb.gmra.mxu0 %v1851_v60  ;;  %1873 = vmatmul.bf16.vlgmr.msrb.gmra.mxu1 %v1851_v60 }
 0x2f7   : > { %1886 = vmatmul.bf16.vlgmr.msrb.gmra.mxu2 %v1851_v60  ;;  %1899 = vmatmul.bf16.vlgmr.msrb.gmra.mxu3 %v1851_v60 }
 0x2f8   : > { %2115 = vmatpush.bf16.msrb.mxu0 %v4208_v49  ;;  %2128 = vmatpush.bf16.msrb.mxu1 %v4213_v10 }
 0x2f9   : > { %2141 = vmatpush.bf16.msrb.mxu2 %v4235_v22  ;;  %2154 = vmatpush.bf16.msrb.mxu3 %v4215_v2 }
 0x2fc   : > { %2116 = vmatpush.bf16.msrb.mxu0 %v4221_v13  ;;  %2129 = vmatpush.bf16.msrb.mxu1 %v4228_v19 }
 0x2fd   : > { %2142 = vmatpush.bf16.msrb.mxu2 %v4256_v39  ;;  %2155 = vmatpush.bf16.msrb.mxu3 %v4230_v17 }
 0x300   : > { %2117 = vmatpush.bf16.msrb.mxu0 %v4245_v29  ;;  %2130 = vmatpush.bf16.msrb.mxu1 %v4252_v34 }
 0x301   : > { %2143 = vmatpush.bf16.msrb.mxu2 %v4268_v46  ;;  %2156 = vmatpush.bf16.msrb.mxu3 %v4254_v36 }
 0x304   : > { %2118 = vmatpush.bf16.msrb.mxu0 %v4266_v45  ;;  %2131 = vmatpush.bf16.msrb.mxu1 %v4274_v50 }
 0x305   : > { %2144 = vmatpush.bf16.msrb.mxu2 %v4288_v59  ;;  %2157 = vmatpush.bf16.msrb.mxu3 %v4276_v51 }
 0x308   : > { %2119 = vmatpush.bf16.msrb.mxu0 %v4286_v58  ;;  %2132 = vmatpush.bf16.msrb.mxu1 %v4294_v63 }
 0x309   : > { %2145 = vmatpush.bf16.msrb.mxu2 %v4308_v8  ;;  %2158 = vmatpush.bf16.msrb.mxu3 %v4296_v0 }
 0x30c   : > { %2120 = vmatpush.bf16.msrb.mxu0 %v4306_v7  ;;  %2133 = vmatpush.bf16.msrb.mxu1 %v4314_v12 }
 0x30d   : > { %2146 = vmatpush.bf16.msrb.mxu2 %v4328_v24  ;;  %2159 = vmatpush.bf16.msrb.mxu3 %v4316_v33 }
 0x310   : > { %2121 = vmatpush.bf16.msrb.mxu0 %v4326_v23  ;;  %2134 = vmatpush.bf16.msrb.mxu1 %v4334_v27 }
 0x311   : > { %2147 = vmatpush.bf16.msrb.mxu2 %v4348_v42  ;;  %2160 = vmatpush.bf16.msrb.mxu3 %v4336_v28 }
 0x314   : > { %2122 = vmatpush.bf16.msrb.mxu0 %v4346_v41  ;;  %2135 = vmatpush.bf16.msrb.mxu1 %v4352_v43 }
 0x315   : > { %2148 = vmatpush.bf16.msrb.mxu2 %v4364_v54  ;;  %2161 = vmatpush.bf16.msrb.mxu3 %v4354_v47 }
 0x373   : > { %v1861_v31 = vpop.f32.mrf.mxu0  ;;  %v1874_v55 = vpop.f32.mrf.mxu1 }
 0x374   : > { %v1904_v56 = vadd.f32 %v1861_v31, %v1847_v20  ;;  %v1905_v57 = vadd.f32 %v1874_v55, %v1848_v32 }
 0x376   : > { %v3223_v61 = vmul.f32 -1.442695, %v1904_v56  ;;  %v3224_v62 = vmul.f32 -1.442695, %v1905_v57 }
 0x378   : > { %3529 = vpow2.f32 %v3223_v61 }
 0x379   : > { %3531 = vpow2.f32 %v3224_v62 }
 0x37a   : > { %v1887_v3 = vpop.f32.mrf.mxu2  ;;  %v1900_v4 = vpop.f32.mrf.mxu3 }
 0x37b   : > { %v1907_v6 = vadd.f32 %v1900_v4, %v1850_v1  ;;  %v1863_v35 = vpop.f32.mrf.mxu0  ;;  %v1876_v44 = vpop.f32.mrf.mxu1  ;;  %v1906_v38 = vadd.f32 %v1887_v3, %v1849_v18 }
 0x37d   : > { %v3225_v9 = vmul.f32 -1.442695, %v1907_v6 }
 0x37e   : > { %v3530_v11 = vpop.eup %3529 }
 0x37f   : > { %v3532_v14 = vpop.eup %3531  ;;  %v1911_v15 = vadd.f32 1.0, %v3530_v11  ;;  %3533 = vpow2.f32 %v3225_v9 }
 0x380   : > { %v1930_v25 = vadd.f32 1.0, %v3532_v14 }
 0x381   : > { %3535 = vrcp.f32 %v1911_v15  ;;  %v1923_v20 = vand.u32 2147483648, %v1911_v15  ;;  %v1921_v55 = vand.u32 2147483647, %v1911_v15  ;;  %vm1917_vm6 = vweird.f32 %v1911_v15 }
 0x382   : > { %3537 = vrcp.f32 %v1930_v25  ;;  %v1889_v26 = vpop.f32.mrf.mxu2  ;;  %v1902_v30 = vpop.f32.mrf.mxu3  ;;  %v1942_v32 = vand.u32 2147483648, %v1930_v25  ;;  %v1940_v57 = vand.u32 2147483647, %v1930_v25  ;;  %vm1936_vm7 = vweird.f32 %v1930_v25 }
 0x383   : > { %v1924_v1 = vor.u32 1.1754944e-38, %v1923_v20  ;;  %vm1922_vm10 = vcmp.eq.f32.partialorder %v1921_v55, 8.507059e+37 }
 0x384   : > { %v1943_v6 = vor.u32 1.1754944e-38, %v1942_v32  ;;  %vm1941_vm11 = vcmp.eq.f32.partialorder %v1940_v57, 8.507059e+37 }
 0x385   : > { %v3534_v21 = vpop.eup %3533 }
 0x386   : > { %v1950_v40 = vadd.f32 1.0, %v3534_v21 }
 0x387   : > { %v3536_v37 = vpop.eup %3535 }
 0x388   : > { %v3538_v52 = vpop.eup %3537  ;;  %v1913_v48 = vmul.f32 %v3536_v37, %v1911_v15  ;;  %3539 = vrcp.f32 %v1950_v40  ;;  %vm1918_vm4 = vweird.f32 %v3536_v37  ;;  %vm1956_vm13 = vweird.f32 %v1950_v40 }
 0x389   : > { %v1932_v53 = vmul.f32 %v3538_v52, %v1930_v25  ;;  %3541 = vtanh.f32 %v1906_v38  ;;  %vm1937_vm5 = vweird.f32 %v3538_v52  ;;  %vm1919_vm8 = vmor %vm1917_vm6, %vm1918_vm4  ;;  %v1962_v38 = vand.u32 2147483648, %v1950_v40 }
 0x38a   : > { %v1914_v5 = vsub.f32 1.0, %v1913_v48  ;;  %vm1938_vm9 = vmor %vm1936_vm7, %vm1937_vm5 }
 0x38b   : > { %v1933_v60 = vsub.f32 1.0, %v1932_v53  ;;  %v1963_v53 = vor.u32 1.1754944e-38, %v1962_v38 }
 0x38c   : > { %v1915_v31 = vmul.f32 %v3536_v37, %v1914_v5 }
 0x38d   : > { %v1934_v56 = vmul.f32 %v3538_v52, %v1933_v60 }
 0x38e   : > { %v3540_v61 = vpop.eup %3539  ;;  %v1916_v62 = vadd.f32 %v3536_v37, %v1915_v31 }
 0x38f   : > { %v1935_v3 = vadd.f32 %v3538_v52, %v1934_v56  ;;  %v1952_v4 = vmul.f32 %v3540_v61, %v1950_v40  ;;  %v3542_v44 = vpop.eup %3541  ;;  %vm1957_vm12 = vweird.f32 %v3540_v61 }
 0x390   : > { %v1920_v35 = vsel %vm1919_vm8, %v3536_v37, %v1916_v62  ;;  %v1960_v37 = vand.u32 2147483647, %v1950_v40  ;;  %vm1958_vm14 = vmor %vm1956_vm13, %vm1957_vm12  ;;  %v1979_v40 = vld [vmem:[%s1977_s7 + $0x8] sm:$0xff]  ;;  %v1981_v62 = vld [vmem:[%s1977_s7 + $0x18] sm:$0xff] }
 0x391   : > { %v1925_v9 = vsel %vm1922_vm10, %v1924_v1, %v1920_v35  ;;  %v1939_v11 = vsel %vm1938_vm9, %v3538_v52, %v1935_v3  ;;  %v1953_v14 = vsub.f32 1.0, %v1952_v4 }
 0x392   : > { %v1944_v26 = vsel %vm1941_vm11, %v1943_v6, %v1939_v11  ;;  %v1967_v30 = vmul.f32 %v3542_v44, %v1925_v9  ;;  %vm1961_vm15 = vcmp.eq.f32.partialorder %v1960_v37, 8.507059e+37 }
 0x393   : > { %v1966_v18 = vmul.f32 %v1944_v26, %v4470_v16  ;;  %v1954_v21 = vmul.f32 %v3540_v61, %v1953_v14  ;;  %v1978_v16 = vld [vmem:[%s1977_s7] sm:$0xff] }
 0x395   : > { %v4507_v15 = vadd.f32 %v1967_v30, %v1966_v18  ;;  %v1955_v25 = vadd.f32 %v3540_v61, %v1954_v21  ;;  %v1980_v21 = vld [vmem:[%s1977_s7 + $0x10] sm:$0xff] }
 0x397   : > { %3543 = vtanh.f32 %v4507_v15  ;;  %v1959_v48 = vsel %vm1958_vm14, %v3540_v61, %v1955_v25 }
 0x398   : > { %v1964_v5 = vsel %vm1961_vm15, %v1963_v53, %v1959_v48 }
 0x39d   : > { %v3544_v52 = vpop.eup %3543 }
 0x39e   : > { %v1970_v60 = vmul.f32 %v3544_v52, %v1964_v5 }
 0x3a0   : > { %v1982_v20 = vpack.c.bf16 %v1970_v60, %v1970_v60 }
 0x3a2   : > { %1991 = vmatmul.bf16.vlgmr.msra.gmra.mxu0 %v1982_v20  ;;  %2004 = vmatmul.bf16.vlgmr.msra.gmra.mxu1 %v1982_v20 }
 0x3a3   : > { %2017 = vmatmul.bf16.vlgmr.msra.gmra.mxu2 %v1982_v20  ;;  %2030 = vmatmul.bf16.vlgmr.msra.gmra.mxu3 %v1982_v20 }
 0x3a4   : > { %2247 = vmatpush.bf16.msra.mxu0 %v4208_v49  ;;  %2260 = vmatpush.bf16.msra.mxu1 %v4213_v10 }
 0x3a5   : > { %2273 = vmatpush.bf16.msra.mxu2 %v4235_v22  ;;  %2286 = vmatpush.bf16.msra.mxu3 %v4215_v2 }
 0x3a8   : > { %2248 = vmatpush.bf16.msra.mxu0 %v4221_v13  ;;  %2261 = vmatpush.bf16.msra.mxu1 %v4228_v19 }
 0x3a9   : > { %2274 = vmatpush.bf16.msra.mxu2 %v4256_v39  ;;  %2287 = vmatpush.bf16.msra.mxu3 %v4230_v17 }
 0x3ac   : > { %2249 = vmatpush.bf16.msra.mxu0 %v4245_v29  ;;  %2262 = vmatpush.bf16.msra.mxu1 %v4252_v34 }
 0x3ad   : > { %2275 = vmatpush.bf16.msra.mxu2 %v4268_v46  ;;  %2288 = vmatpush.bf16.msra.mxu3 %v4254_v36 }
 0x3b0   : > { %2250 = vmatpush.bf16.msra.mxu0 %v4266_v45  ;;  %2263 = vmatpush.bf16.msra.mxu1 %v4274_v50 }
 0x3b1   : > { %2276 = vmatpush.bf16.msra.mxu2 %v4288_v59  ;;  %2289 = vmatpush.bf16.msra.mxu3 %v4276_v51 }
 0x3b4   : > { %2251 = vmatpush.bf16.msra.mxu0 %v4286_v58  ;;  %2264 = vmatpush.bf16.msra.mxu1 %v4294_v63 }
 0x3b5   : > { %2277 = vmatpush.bf16.msra.mxu2 %v4308_v8  ;;  %2290 = vmatpush.bf16.msra.mxu3 %v4296_v0 }
 0x3b8   : > { %2252 = vmatpush.bf16.msra.mxu0 %v4306_v7  ;;  %2265 = vmatpush.bf16.msra.mxu1 %v4314_v12 }
 0x3b9   : > { %2278 = vmatpush.bf16.msra.mxu2 %v4328_v24  ;;  %2291 = vmatpush.bf16.msra.mxu3 %v4316_v33 }
 0x3bc   : > { %2253 = vmatpush.bf16.msra.mxu0 %v4326_v23  ;;  %2266 = vmatpush.bf16.msra.mxu1 %v4334_v27 }
 0x3bd   : > { %2279 = vmatpush.bf16.msra.mxu2 %v4348_v42  ;;  %2292 = vmatpush.bf16.msra.mxu3 %v4336_v28 }
 0x3c0   : > { %2254 = vmatpush.bf16.msra.mxu0 %v4346_v41  ;;  %2267 = vmatpush.bf16.msra.mxu1 %v4352_v43 }
 0x3c1   : > { %2280 = vmatpush.bf16.msra.mxu2 %v4364_v54  ;;  %2293 = vmatpush.bf16.msra.mxu3 %v4354_v47 }
 0x41f   : > { %v1992_v32 = vpop.f32.mrf.mxu0  ;;  %v2005_v31 = vpop.f32.mrf.mxu1 }
 0x420   : > { %v2035_v55 = vadd.f32 %v1992_v32, %v1978_v16  ;;  %v2036_v56 = vadd.f32 %v2005_v31, %v1979_v40 }
 0x422   : > { %v3229_v57 = vmul.f32 -1.442695, %v2035_v55  ;;  %v3230_v61 = vmul.f32 -1.442695, %v2036_v56 }
 0x424   : > { %3545 = vpow2.f32 %v3229_v57 }
 0x425   : > { %3547 = vpow2.f32 %v3230_v61 }
 0x426   : > { %v2018_v1 = vpop.f32.mrf.mxu2  ;;  %v2031_v3 = vpop.f32.mrf.mxu3 }
 0x427   : > { %v2038_v4 = vadd.f32 %v2031_v3, %v1981_v62  ;;  %v1994_v6 = vpop.f32.mrf.mxu0  ;;  %v2007_v35 = vpop.f32.mrf.mxu1  ;;  %v2037_v48 = vadd.f32 %v2018_v1, %v1980_v21 }
 0x429   : > { %v3231_v44 = vmul.f32 -1.442695, %v2038_v4 }
 0x42a   : > { %v3546_v9 = vpop.eup %3545 }
 0x42b   : > { %v3548_v11 = vpop.eup %3547  ;;  %v2042_v14 = vadd.f32 1.0, %v3546_v9  ;;  %3549 = vpow2.f32 %v3231_v44 }
 0x42c   : > { %v2061_v26 = vadd.f32 1.0, %v3548_v11 }
 0x42d   : > { %3551 = vrcp.f32 %v2042_v14  ;;  %v2054_v16 = vand.u32 2147483648, %v2042_v14  ;;  %v2052_v31 = vand.u32 2147483647, %v2042_v14  ;;  %vm2048_vm2 = vweird.f32 %v2042_v14 }
 0x42e   : > { %3553 = vrcp.f32 %v2061_v26  ;;  %v2020_v30 = vpop.f32.mrf.mxu2  ;;  %v2033_v18 = vpop.f32.mrf.mxu3  ;;  %v2073_v40 = vand.u32 2147483648, %v2061_v26  ;;  %v2071_v56 = vand.u32 2147483647, %v2061_v26  ;;  %vm2067_vm3 = vweird.f32 %v2061_v26 }
 0x42f   : > { %v2055_v62 = vor.u32 1.1754944e-38, %v2054_v16  ;;  %vm2053_vm6 = vcmp.eq.f32.partialorder %v2052_v31, 8.507059e+37 }
 0x430   : > { %v2074_v4 = vor.u32 1.1754944e-38, %v2073_v40  ;;  %vm2072_vm7 = vcmp.eq.f32.partialorder %v2071_v56, 8.507059e+37 }
 0x431   : > { %v3550_v25 = vpop.eup %3549 }
 0x432   : > { %v2081_v38 = vadd.f32 1.0, %v3550_v25 }
 0x433   : > { %v3552_v37 = vpop.eup %3551 }
 0x434   : > { %v3554_v53 = vpop.eup %3553  ;;  %v2044_v52 = vmul.f32 %v3552_v37, %v2042_v14  ;;  %3555 = vrcp.f32 %v2081_v38  ;;  %vm2049_vm0 = vweird.f32 %v3552_v37  ;;  %vm2087_vm9 = vweird.f32 %v2081_v38 }
 0x435   : > { %v2063_v5 = vmul.f32 %v3554_v53, %v2061_v26  ;;  %3557 = vtanh.f32 %v2037_v48  ;;  %vm2068_vm1 = vweird.f32 %v3554_v53  ;;  %vm2050_vm4 = vmor %vm2048_vm2, %vm2049_vm0  ;;  %v2093_v48 = vand.u32 2147483648, %v2081_v38 }
 0x436   : > { %v2045_v60 = vsub.f32 1.0, %v2044_v52  ;;  %vm2069_vm5 = vmor %vm2067_vm3, %vm2068_vm1 }
 0x437   : > { %v2064_v20 = vsub.f32 1.0, %v2063_v5  ;;  %v2094_v5 = vor.u32 1.1754944e-38, %v2093_v48 }
 0x438   : > { %v2046_v32 = vmul.f32 %v3552_v37, %v2045_v60 }
 0x439   : > { %v2065_v55 = vmul.f32 %v3554_v53, %v2064_v20 }
 0x43a   : > { %v3556_v57 = vpop.eup %3555  ;;  %v2047_v61 = vadd.f32 %v3552_v37, %v2046_v32 }
 0x43b   : > { %v2066_v1 = vadd.f32 %v3554_v53, %v2065_v55  ;;  %v2083_v3 = vmul.f32 %v3556_v57, %v2081_v38  ;;  %v3558_v35 = vpop.eup %3557  ;;  %vm2088_vm8 = vweird.f32 %v3556_v57 }
 0x43c   : > { %v2051_v6 = vsel %vm2050_vm4, %v3552_v37, %v2047_v61  ;;  %v2091_v37 = vand.u32 2147483647, %v2081_v38  ;;  %vm2089_vm10 = vmor %vm2087_vm9, %vm2088_vm8 }
 0x43d   : > { %v2056_v44 = vsel %vm2053_vm6, %v2055_v62, %v2051_v6  ;;  %v2070_v9 = vsel %vm2069_vm5, %v3554_v53, %v2066_v1  ;;  %v2084_v11 = vsub.f32 1.0, %v2083_v3 }
 0x43e   : > { %v2075_v30 = vsel %vm2072_vm7, %v2074_v4, %v2070_v9  ;;  %v2098_v18 = vmul.f32 %v3558_v35, %v2056_v44  ;;  %vm2092_vm11 = vcmp.eq.f32.partialorder %v2091_v37, 8.507059e+37 }
 0x43f   : > { %v2097_v21 = vmul.f32 %v2075_v30, %v4507_v15  ;;  %v2085_v25 = vmul.f32 %v3556_v57, %v2084_v11 }
 0x441   : > { %v4544_v14 = vadd.f32 %v2098_v18, %v2097_v21  ;;  %v2086_v26 = vadd.f32 %v3556_v57, %v2085_v25 }
 0x443   : > { %3559 = vtanh.f32 %v4544_v14  ;;  %v2090_v52 = vsel %vm2089_vm10, %v3556_v57, %v2086_v26 }
 0x444   : > { %v2095_v60 = vsel %vm2092_vm11, %v2094_v5, %v2090_v52 }
 0x449   : > { %v3560_v53 = vpop.eup %3559 }
 0x44a   : > { %v2101_v20 = vmul.f32 %v3560_v53, %v2095_v60 }
 0x44c   : > { %v2114_v16 = vpack.c.bf16 %v2101_v20, %v2101_v20 }
 0x44e   : > { %2123 = vmatmul.bf16.vlgmr.msrb.gmra.mxu0 %v2114_v16  ;;  %2136 = vmatmul.bf16.vlgmr.msrb.gmra.mxu1 %v2114_v16 }
 0x44f   : > { %2149 = vmatmul.bf16.vlgmr.msrb.gmra.mxu2 %v2114_v16  ;;  %2162 = vmatmul.bf16.vlgmr.msrb.gmra.mxu3 %v2114_v16  ;;  %v2243_v16 = vld [vmem:[%s2241_s23 + $0x8] sm:$0xff] }
 0x450   : > { %2379 = vmatpush.bf16.msrb.mxu0 %v4208_v49  ;;  %2392 = vmatpush.bf16.msrb.mxu1 %v4213_v10  ;;  %v2110_v49 = vld [vmem:[%s2109_s15] sm:$0xff]  ;;  %v2111_v10 = vld [vmem:[%s2109_s15 + $0x8] sm:$0xff] }
 0x451   : > { %2405 = vmatpush.bf16.msrb.mxu2 %v4235_v22  ;;  %2418 = vmatpush.bf16.msrb.mxu3 %v4215_v2 }
 0x454   : > { %2380 = vmatpush.bf16.msrb.mxu0 %v4221_v13  ;;  %2393 = vmatpush.bf16.msrb.mxu1 %v4228_v19 }
 0x455   : > { %2406 = vmatpush.bf16.msrb.mxu2 %v4256_v39  ;;  %2419 = vmatpush.bf16.msrb.mxu3 %v4230_v17 }
 0x458   : > { %2381 = vmatpush.bf16.msrb.mxu0 %v4245_v29  ;;  %2394 = vmatpush.bf16.msrb.mxu1 %v4252_v34  ;;  %v2113_v34 = vld [vmem:[%s2109_s15 + $0x18] sm:$0xff] }
 0x459   : > { %2407 = vmatpush.bf16.msrb.mxu2 %v4268_v46  ;;  %2420 = vmatpush.bf16.msrb.mxu3 %v4254_v36 }
 0x45c   : > { %2382 = vmatpush.bf16.msrb.mxu0 %v4266_v45  ;;  %2395 = vmatpush.bf16.msrb.mxu1 %v4274_v50 }
 0x45d   : > { %2408 = vmatpush.bf16.msrb.mxu2 %v4288_v59  ;;  %2421 = vmatpush.bf16.msrb.mxu3 %v4276_v51 }
 0x460   : > { %2383 = vmatpush.bf16.msrb.mxu0 %v4286_v58  ;;  %2396 = vmatpush.bf16.msrb.mxu1 %v4294_v63 }
 0x461   : > { %2409 = vmatpush.bf16.msrb.mxu2 %v4308_v8  ;;  %2422 = vmatpush.bf16.msrb.mxu3 %v4296_v0 }
 0x464   : > { %2384 = vmatpush.bf16.msrb.mxu0 %v4306_v7  ;;  %2397 = vmatpush.bf16.msrb.mxu1 %v4314_v12  ;;  %v2112_v12 = vld [vmem:[%s2109_s15 + $0x10] sm:$0xff] }
 0x465   : > { %2410 = vmatpush.bf16.msrb.mxu2 %v4328_v24  ;;  %2423 = vmatpush.bf16.msrb.mxu3 %v4316_v33 }
 0x468   : > { %2385 = vmatpush.bf16.msrb.mxu0 %v4326_v23  ;;  %2398 = vmatpush.bf16.msrb.mxu1 %v4334_v27 }
 0x469   : > { %2411 = vmatpush.bf16.msrb.mxu2 %v4348_v42  ;;  %2424 = vmatpush.bf16.msrb.mxu3 %v4336_v28 }
 0x46c   : > { %2386 = vmatpush.bf16.msrb.mxu0 %v4346_v41  ;;  %2399 = vmatpush.bf16.msrb.mxu1 %v4352_v43 }
 0x46d   : > { %2412 = vmatpush.bf16.msrb.mxu2 %v4364_v54  ;;  %2425 = vmatpush.bf16.msrb.mxu3 %v4354_v47 }
 0x4cb   : > { %v2124_v2 = vpop.f32.mrf.mxu0  ;;  %v2137_v13 = vpop.f32.mrf.mxu1 }
 0x4cc   : > { %v2167_v19 = vadd.f32 %v2124_v2, %v2110_v49  ;;  %v2168_v17 = vadd.f32 %v2137_v13, %v2111_v10 }
 0x4ce   : > { %v3235_v22 = vmul.f32 -1.442695, %v2167_v19  ;;  %v3236_v29 = vmul.f32 -1.442695, %v2168_v17 }
 0x4d0   : > { %3561 = vpow2.f32 %v3235_v22  ;;  %v2245_v22 = vld [vmem:[%s2241_s23 + $0x18] sm:$0xff] }
 0x4d1   : > { %3563 = vpow2.f32 %v3236_v29 }
 0x4d2   : > { %v2150_v36 = vpop.f32.mrf.mxu2  ;;  %v2163_v39 = vpop.f32.mrf.mxu3 }
 0x4d3   : > { %v2170_v45 = vadd.f32 %v2163_v39, %v2113_v34  ;;  %v2126_v46 = vpop.f32.mrf.mxu0  ;;  %v2139_v50 = vpop.f32.mrf.mxu1  ;;  %v2169_v27 = vadd.f32 %v2150_v36, %v2112_v12 }
 0x4d5   : > { %v3237_v51 = vmul.f32 -1.442695, %v2170_v45 }
 0x4d6   : > { %v3562_v58 = vpop.eup %3561 }
 0x4d7   : > { %v3564_v59 = vpop.eup %3563  ;;  %v2174_v63 = vadd.f32 1.0, %v3562_v58  ;;  %3565 = vpow2.f32 %v3237_v51 }
 0x4d8   : > { %v2193_v0 = vadd.f32 1.0, %v3564_v59 }
 0x4d9   : > { %3567 = vrcp.f32 %v2174_v63  ;;  %v2186_v54 = vand.u32 2147483648, %v2174_v63  ;;  %v2184_v40 = vand.u32 2147483647, %v2174_v63  ;;  %vm2180_vm14 = vweird.f32 %v2174_v63 }
 0x4da   : > { %3569 = vrcp.f32 %v2193_v0  ;;  %v2152_v7 = vpop.f32.mrf.mxu2  ;;  %v2165_v8 = vpop.f32.mrf.mxu3  ;;  %v2205_v15 = vand.u32 2147483648, %v2193_v0  ;;  %v2203_v31 = vand.u32 2147483647, %v2193_v0  ;;  %vm2199_vm15 = vweird.f32 %v2193_v0 }
 0x4db   : > { %v2187_v57 = vor.u32 1.1754944e-38, %v2186_v54  ;;  %vm2185_vm2 = vcmp.eq.f32.partialorder %v2184_v40, 8.507059e+37  ;;  %v2244_v7 = vld [vmem:[%s2241_s23 + $0x10] sm:$0xff] }
 0x4dc   : > { %v2206_v1 = vor.u32 1.1754944e-38, %v2205_v15  ;;  %vm2204_vm3 = vcmp.eq.f32.partialorder %v2203_v31, 8.507059e+37 }
 0x4dd   : > { %v3566_v33 = vpop.eup %3565 }
 0x4de   : > { %v2213_v23 = vadd.f32 1.0, %v3566_v33 }
 0x4df   : > { %v3568_v24 = vpop.eup %3567 }
 0x4e0   : > { %v3570_v28 = vpop.eup %3569  ;;  %v2176_v41 = vmul.f32 %v3568_v24, %v2174_v63  ;;  %3571 = vrcp.f32 %v2213_v23  ;;  %vm2181_vm12 = vweird.f32 %v3568_v24  ;;  %v2225_v26 = vand.u32 2147483648, %v2213_v23 }
 0x4e1   : > { %v2195_v42 = vmul.f32 %v3570_v28, %v2193_v0  ;;  %3573 = vtanh.f32 %v2169_v27  ;;  %vm2200_vm13 = vweird.f32 %v3570_v28  ;;  %vm2182_vm0 = vmor %vm2180_vm14, %vm2181_vm12  ;;  %vm2219_vm5 = vweird.f32 %v2213_v23 }
 0x4e2   : > { %v2177_v43 = vsub.f32 1.0, %v2176_v41  ;;  %vm2201_vm1 = vmor %vm2199_vm15, %vm2200_vm13  ;;  %v2223_v48 = vand.u32 2147483647, %v2213_v23  ;;  %v2226_v52 = vor.u32 1.1754944e-38, %v2225_v26 }
 0x4e3   : > { %v2196_v47 = vsub.f32 1.0, %v2195_v42 }
 0x4e4   : > { %v2178_v38 = vmul.f32 %v3568_v24, %v2177_v43  ;;  %vm2224_vm7 = vcmp.eq.f32.partialorder %v2223_v48, 8.507059e+37 }
 0x4e5   : > { %v2197_v32 = vmul.f32 %v3570_v28, %v2196_v47 }
 0x4e6   : > { %v3572_v55 = vpop.eup %3571  ;;  %v2179_v56 = vadd.f32 %v3568_v24, %v2178_v38 }
 0x4e7   : > { %v2198_v61 = vadd.f32 %v3570_v28, %v2197_v32  ;;  %v2215_v62 = vmul.f32 %v3572_v55, %v2213_v23  ;;  %v3574_v4 = vpop.eup %3573  ;;  %vm2220_vm4 = vweird.f32 %v3572_v55 }
 0x4e8   : > { %v2183_v3 = vsel %vm2182_vm0, %v3568_v24, %v2179_v56  ;;  %vm2221_vm6 = vmor %vm2219_vm5, %vm2220_vm4 }
 0x4e9   : > { %v2188_v6 = vsel %vm2185_vm2, %v2187_v57, %v2183_v3  ;;  %v2202_v35 = vsel %vm2201_vm1, %v3570_v28, %v2198_v61  ;;  %v2216_v44 = vsub.f32 1.0, %v2215_v62 }
 0x4ea   : > { %v2207_v9 = vsel %vm2204_vm3, %v2206_v1, %v2202_v35  ;;  %v2230_v11 = vmul.f32 %v3574_v4, %v2188_v6 }
 0x4eb   : > { %v2229_v30 = vmul.f32 %v2207_v9, %v4544_v14  ;;  %v2217_v18 = vmul.f32 %v3572_v55, %v2216_v44  ;;  %v2242_v14 = vld [vmem:[%s2241_s23] sm:$0xff] }
 0x4ed   : > { %v4581_v21 = vadd.f32 %v2230_v11, %v2229_v30  ;;  %v2218_v25 = vadd.f32 %v3572_v55, %v2217_v18 }
 0x4ef   : > { %3575 = vtanh.f32 %v4581_v21  ;;  %v2222_v37 = vsel %vm2221_vm6, %v3572_v55, %v2218_v25 }
 0x4f0   : > { %v2227_v53 = vsel %vm2224_vm7, %v2226_v52, %v2222_v37 }
 0x4f5   : > { %v3576_v5 = vpop.eup %3575 }
 0x4f6   : > { %v2233_v60 = vmul.f32 %v3576_v5, %v2227_v53 }
 0x4f8   : > { %v2246_v20 = vpack.c.bf16 %v2233_v60, %v2233_v60  ;;  %v2374_v60 = vld [vmem:[%s2373_s30] sm:$0xff] }
 0x4fa   : > { %2255 = vmatmul.bf16.vlgmr.msra.gmra.mxu0 %v2246_v20  ;;  %2268 = vmatmul.bf16.vlgmr.msra.gmra.mxu1 %v2246_v20 }
 0x4fb   : > { %2281 = vmatmul.bf16.vlgmr.msra.gmra.mxu2 %v2246_v20  ;;  %2294 = vmatmul.bf16.vlgmr.msra.gmra.mxu3 %v2246_v20  ;;  %v2375_v20 = vld [vmem:[%s2373_s30 + $0x8] sm:$0xff] }
 0x577   : > { %v2256_v49 = vpop.f32.mrf.mxu0  ;;  %v2269_v10 = vpop.f32.mrf.mxu1 }
 0x578   : > { %v2299_v2 = vadd.f32 %v2256_v49, %v2242_v14  ;;  %v2300_v13 = vadd.f32 %v2269_v10, %v2243_v16 }
 0x57a   : > { %v3241_v19 = vmul.f32 -1.442695, %v2299_v2  ;;  %v3242_v17 = vmul.f32 -1.442695, %v2300_v13 }
 0x57c   : > { %3577 = vpow2.f32 %v3241_v19  ;;  %v2377_v19 = vld [vmem:[%s2373_s30 + $0x18] sm:$0xff] }
 0x57d   : > { %3579 = vpow2.f32 %v3242_v17 }
 0x57e   : > { %v2282_v29 = vpop.f32.mrf.mxu2  ;;  %v2295_v34 = vpop.f32.mrf.mxu3 }
 0x57f   : > { %v2302_v36 = vadd.f32 %v2295_v34, %v2245_v22  ;;  %v2258_v39 = vpop.f32.mrf.mxu0  ;;  %v2271_v45 = vpop.f32.mrf.mxu1  ;;  %v2301_v23 = vadd.f32 %v2282_v29, %v2244_v7 }
 0x581   : > { %v3243_v46 = vmul.f32 -1.442695, %v2302_v36 }
 0x582   : > { %v3578_v50 = vpop.eup %3577 }
 0x583   : > { %v3580_v51 = vpop.eup %3579  ;;  %v2306_v58 = vadd.f32 1.0, %v3578_v50  ;;  %3581 = vpow2.f32 %v3243_v46 }
 0x584   : > { %v2325_v59 = vadd.f32 1.0, %v3580_v51 }
 0x585   : > { %3583 = vrcp.f32 %v2306_v58  ;;  %v2318_v43 = vand.u32 2147483648, %v2306_v58  ;;  %v2316_v15 = vand.u32 2147483647, %v2306_v58  ;;  %vm2312_vm10 = vweird.f32 %v2306_v58 }
 0x586   : > { %3585 = vrcp.f32 %v2325_v59  ;;  %v2284_v63 = vpop.f32.mrf.mxu2  ;;  %v2297_v0 = vpop.f32.mrf.mxu3  ;;  %v2337_v47 = vand.u32 2147483648, %v2325_v59  ;;  %v2335_v40 = vand.u32 2147483647, %v2325_v59  ;;  %vm2331_vm11 = vweird.f32 %v2325_v59 }
 0x587   : > { %v2319_v55 = vor.u32 1.1754944e-38, %v2318_v43  ;;  %vm2317_vm14 = vcmp.eq.f32.partialorder %v2316_v15, 8.507059e+37  ;;  %v2376_v63 = vld [vmem:[%s2373_s30 + $0x10] sm:$0xff] }
 0x588   : > { %v2338_v61 = vor.u32 1.1754944e-38, %v2337_v47  ;;  %vm2336_vm15 = vcmp.eq.f32.partialorder %v2335_v40, 8.507059e+37 }
 0x589   : > { %v3582_v8 = vpop.eup %3581 }
 0x58a   : > { %v2345_v12 = vadd.f32 1.0, %v3582_v8 }
 0x58b   : > { %v3584_v33 = vpop.eup %3583 }
 0x58c   : > { %v3586_v24 = vpop.eup %3585  ;;  %v2308_v27 = vmul.f32 %v3584_v33, %v2306_v58  ;;  %3587 = vrcp.f32 %v2345_v12  ;;  %vm2313_vm8 = vweird.f32 %v3584_v33  ;;  %v2357_v25 = vand.u32 2147483648, %v2345_v12 }
 0x58d   : > { %v2327_v28 = vmul.f32 %v3586_v24, %v2325_v59  ;;  %3589 = vtanh.f32 %v2301_v23  ;;  %vm2332_vm9 = vweird.f32 %v3586_v24  ;;  %vm2314_vm12 = vmor %vm2312_vm10, %vm2313_vm8  ;;  %vm2351_vm1 = vweird.f32 %v2345_v12 }
 0x58e   : > { %v2309_v41 = vsub.f32 1.0, %v2308_v27  ;;  %vm2333_vm13 = vmor %vm2331_vm11, %vm2332_vm9  ;;  %v2355_v26 = vand.u32 2147483647, %v2345_v12  ;;  %v2358_v37 = vor.u32 1.1754944e-38, %v2357_v25 }
 0x58f   : > { %v2328_v42 = vsub.f32 1.0, %v2327_v28 }
 0x590   : > { %v2310_v54 = vmul.f32 %v3584_v33, %v2309_v41  ;;  %vm2356_vm3 = vcmp.eq.f32.partialorder %v2355_v26, 8.507059e+37 }
 0x591   : > { %v2329_v38 = vmul.f32 %v3586_v24, %v2328_v42 }
 0x592   : > { %v3588_v32 = vpop.eup %3587  ;;  %v2311_v31 = vadd.f32 %v3584_v33, %v2310_v54 }
 0x593   : > { %v2330_v56 = vadd.f32 %v3586_v24, %v2329_v38  ;;  %v2347_v57 = vmul.f32 %v3588_v32, %v2345_v12  ;;  %v3590_v1 = vpop.eup %3589  ;;  %vm2352_vm0 = vweird.f32 %v3588_v32 }
 0x594   : > { %v2315_v62 = vsel %vm2314_vm12, %v3584_v33, %v2311_v31  ;;  %vm2353_vm2 = vmor %vm2351_vm1, %vm2352_vm0 }
 0x595   : > { %v2320_v3 = vsel %vm2317_vm14, %v2319_v55, %v2315_v62  ;;  %v2334_v4 = vsel %vm2333_vm13, %v3586_v24, %v2330_v56  ;;  %v2348_v6 = vsub.f32 1.0, %v2347_v57 }
 0x596   : > { %v2339_v35 = vsel %vm2336_vm15, %v2338_v61, %v2334_v4  ;;  %v2362_v44 = vmul.f32 %v3590_v1, %v2320_v3 }
 0x597   : > { %v2361_v9 = vmul.f32 %v2339_v35, %v4581_v21  ;;  %v2349_v11 = vmul.f32 %v3588_v32, %v2348_v6 }
 0x599   : > { %v4586_v30 = vadd.f32 %v2362_v44, %v2361_v9  ;;  %v2350_v18 = vadd.f32 %v3588_v32, %v2349_v11 }
 0x59b   : > { %3591 = vtanh.f32 %v4586_v30  ;;  %v2354_v48 = vsel %vm2353_vm2, %v3588_v32, %v2350_v18 }
 0x59c   : > { %v2359_v5 = vsel %vm2356_vm3, %v2358_v37, %v2354_v48 }
 0x5a1   : > { %v3592_v52 = vpop.eup %3591 }
 0x5a2   : > { %v2365_v53 = vmul.f32 %v3592_v52, %v2359_v5 }
 0x5a4   : > { %v2378_v21 = vpack.c.bf16 %v2365_v53, %v2365_v53 }
 0x5a6   : > { %2387 = vmatmul.bf16.vlgmr.msrb.gmra.mxu0 %v2378_v21  ;;  %2400 = vmatmul.bf16.vlgmr.msrb.gmra.mxu1 %v2378_v21 }
 0x5a7   : > { %2413 = vmatmul.bf16.vlgmr.msrb.gmra.mxu2 %v2378_v21  ;;  %2426 = vmatmul.bf16.vlgmr.msrb.gmra.mxu3 %v2378_v21 }
 0x623   : > { %v2388_v14 = vpop.f32.mrf.mxu0  ;;  %v2401_v16 = vpop.f32.mrf.mxu1 }
 0x624   : > { %v2431_v49 = vadd.f32 %v2388_v14, %v2374_v60  ;;  %v2432_v10 = vadd.f32 %v2401_v16, %v2375_v20 }
 0x626   : > { %v3247_v2 = vmul.f32 -1.442695, %v2431_v49  ;;  %v3248_v13 = vmul.f32 -1.442695, %v2432_v10 }
 0x628   : > { %3593 = vpow2.f32 %v3247_v2 }
 0x629   : > { %3595 = vpow2.f32 %v3248_v13 }
 0x62a   : > { %v2414_v17 = vpop.f32.mrf.mxu2  ;;  %v2427_v22 = vpop.f32.mrf.mxu3 }
 0x62b   : > { %v2434_v29 = vadd.f32 %v2427_v22, %v2377_v19  ;;  %v2390_v34 = vpop.f32.mrf.mxu0  ;;  %v2403_v36 = vpop.f32.mrf.mxu1  ;;  %v2433_v12 = vadd.f32 %v2414_v17, %v2376_v63 }
 0x62d   : > { %v3249_v39 = vmul.f32 -1.442695, %v2434_v29 }
 0x62e   : > { %v3594_v45 = vpop.eup %3593 }
 0x62f   : > { %v3596_v46 = vpop.eup %3595  ;;  %v2438_v50 = vadd.f32 1.0, %v3594_v45  ;;  %3597 = vpow2.f32 %v3249_v39 }
 0x630   : > { %v2457_v51 = vadd.f32 1.0, %v3596_v46 }
 0x631   : > { %3599 = vrcp.f32 %v2438_v50  ;;  %v2450_v41 = vand.u32 2147483648, %v2438_v50  ;;  %v2448_v47 = vand.u32 2147483647, %v2438_v50  ;;  %vm2444_vm6 = vweird.f32 %v2438_v50 }
 0x632   : > { %3601 = vrcp.f32 %v2457_v51  ;;  %v2416_v58 = vpop.f32.mrf.mxu2  ;;  %v2429_v59 = vpop.f32.mrf.mxu3  ;;  %v2469_v42 = vand.u32 2147483648, %v2457_v51  ;;  %v2467_v15 = vand.u32 2147483647, %v2457_v51  ;;  %vm2463_vm7 = vweird.f32 %v2457_v51 }
 0x633   : > { %v2451_v32 = vor.u32 1.1754944e-38, %v2450_v41  ;;  %vm2449_vm10 = vcmp.eq.f32.partialorder %v2448_v47, 8.507059e+37 }
 0x634   : > { %v2470_v56 = vor.u32 1.1754944e-38, %v2469_v42  ;;  %vm2468_vm11 = vcmp.eq.f32.partialorder %v2467_v15, 8.507059e+37 }
 0x635   : > { %v3598_v0 = vpop.eup %3597 }
 0x636   : > { %v2477_v7 = vadd.f32 1.0, %v3598_v0 }
 0x637   : > { %v3600_v8 = vpop.eup %3599 }
 0x638   : > { %v3602_v33 = vpop.eup %3601  ;;  %v2440_v23 = vmul.f32 %v3600_v8, %v2438_v50  ;;  %3603 = vrcp.f32 %v2477_v7  ;;  %vm2445_vm4 = vweird.f32 %v3600_v8  ;;  %v2489_v18 = vand.u32 2147483648, %v2477_v7 }
 0x639   : > { %v2459_v24 = vmul.f32 %v3602_v33, %v2457_v51  ;;  %3605 = vtanh.f32 %v2433_v12  ;;  %vm2464_vm5 = vweird.f32 %v3602_v33  ;;  %vm2446_vm8 = vmor %vm2444_vm6, %vm2445_vm4  ;;  %vm2483_vm13 = vweird.f32 %v2477_v7 }
 0x63a   : > { %v2441_v27 = vsub.f32 1.0, %v2440_v23  ;;  %vm2465_vm9 = vmor %vm2463_vm7, %vm2464_vm5  ;;  %v2487_v25 = vand.u32 2147483647, %v2477_v7  ;;  %v2490_v48 = vor.u32 1.1754944e-38, %v2489_v18 }
 0x63b   : > { %v2460_v28 = vsub.f32 1.0, %v2459_v24 }
 0x63c   : > { %v2442_v43 = vmul.f32 %v3600_v8, %v2441_v27  ;;  %vm2488_vm15 = vcmp.eq.f32.partialorder %v2487_v25, 8.507059e+37 }
 0x63d   : > { %v2461_v54 = vmul.f32 %v3602_v33, %v2460_v28 }
 0x63e   : > { %v3604_v38 = vpop.eup %3603  ;;  %v2443_v40 = vadd.f32 %v3600_v8, %v2442_v43 }
 0x63f   : > { %v2462_v31 = vadd.f32 %v3602_v33, %v2461_v54  ;;  %v2479_v55 = vmul.f32 %v3604_v38, %v2477_v7  ;;  %v3606_v61 = vpop.eup %3605  ;;  %vm2484_vm12 = vweird.f32 %v3604_v38 }
 0x640   : > { %v2447_v57 = vsel %vm2446_vm8, %v3600_v8, %v2443_v40  ;;  %vm2485_vm14 = vmor %vm2483_vm13, %vm2484_vm12 }
 0x641   : > { %v2452_v62 = vsel %vm2449_vm10, %v2451_v32, %v2447_v57  ;;  %v2466_v1 = vsel %vm2465_vm9, %v3602_v33, %v2462_v31  ;;  %v2480_v3 = vsub.f32 1.0, %v2479_v55 }
 0x642   : > { %v2471_v4 = vsel %vm2468_vm11, %v2470_v56, %v2466_v1  ;;  %v2494_v6 = vmul.f32 %v3606_v61, %v2452_v62 }
 0x643   : > { %v2493_v35 = vmul.f32 %v2471_v4, %v4586_v30  ;;  %v2481_v44 = vmul.f32 %v3604_v38, %v2480_v3 }
 0x645   : > { %v2495_v9 = vadd.f32 %v2494_v6, %v2493_v35  ;;  %v2482_v11 = vadd.f32 %v3604_v38, %v2481_v44 }
 0x647   : > { %3607 = vtanh.f32 %v2495_v9  ;;  %v2486_v26 = vsel %vm2485_vm14, %v3604_v38, %v2482_v11 }
 0x648   : > { %v2491_v52 = vsel %vm2488_vm15, %v2490_v48, %v2486_v26 }
 0x64a   : > { %2502 = sbr.rel (!%p2498_p1) target bundleno = 1617 (0x651), region = 56 }
 0x64d   : > { %v3608_v37 = vpop.eup %3607 }
 0x64e   : > { %v2497_v5 = vmul.f32 %v3608_v37, %v2491_v52 }
 0x650   : > { %2503 = vst [vmem:[%s3989_s13] sm:$0xff] %v2497_v5 }
 0x651 PF: > { %s20_s20 = sadd.s32 1, %s3723_s20   ;;  %s4621_s15 = smov %s3707_s16 }
 0x652   : > { %p17_p2 = scmp.ge.s32.totalorder %s20_s20, 4   ;;  %s4622_s16 = smov %s3711_s17 }
 0x653   : > { %s4623_s17 = smov %s3802_s27  ;;  %s4624_s18 = smov %s3719_s19 }
 0x654   : > { %s4625_s19 = smov %s4627_s22  ;;  %19 = sbr.rel (!%p17_p2) target bundleno = 6 (0x6), region = 115 }
 0x659   :  { %2525 = vsyncpa [#allocation7], 1 }
 0x65a   :  { %2527 = vsyncpa [#allocation7 + $0x1], 1 }
 0x65b   :  { %2528 = vsyncpa [#allocation9], 1 }
 0x65c   :  { %2530 = vsyncpa [#allocation9 + $0x1], 1 }

// kernel: _lambda_.2
= control target key start
LH: loop header
LB: loop body
LE: loop exit
PB: predicated region body
PF: predicated region fallthrough
CT: control target
= control target key end

     0   :  { %s6654_s0 = inlined_call_operand.vmem [shape: bf16[64,128], index: 0, kind: input, shape index: {}]   ;;  %s6655_s1 = inlined_call_operand.hbm [shape: bf16[2,128,512], index: 1, kind: input, shape index: {}]   ;;  %s6656_s2 = inlined_call_operand.hbm [shape: bf16[2,128,512], index: 2, kind: input, shape index: {}]   ;;  %s6657_s3 = inlined_call_operand.vmem [shape: f32[2,1,512], index: 3, kind: input, shape index: {}]   ;;  %s6658_s4 = inlined_call_operand.vmem [shape: bf16[64,256], index: 4, kind: output, shape index: {0}]   ;;  %s6659_s5 = inlined_call_operand.hbm [shape: f32[8,256], index: 5, kind: output, shape index: {1}]  }
   0x1   :  { %6662 = sst [smem:[#allocation18_spill]] %s6655_s1 }
   0x2   :  { %11 = vsyncpa [#allocation7], 0 }
   0x3   :  { %13 = vsyncpa [#allocation7 + $0x1], 0 }
   0x4   :  { %14 = vsyncpa [#allocation10], 0 }
   0x5   :  { %16 = vsyncpa [#allocation10 + $0x1], 0 }
   0x6   :  { %17 = vsyncpa [#allocation8], 0 }
   0x7   :  { %19 = vsyncpa [#allocation8 + $0x1], 0  ;;  %s5695_s18 = smov 0   ;;  %s5697_s19 = smov 0  }
   0x8   :  { %s5699_s20 = smov 0   ;;  %s5701_s21 = smov 0  }
   0x9   :  { %s5703_s22 = smov 0   ;;  %s5705_s23 = smov 0  }
   0xa LB: > { %6663 = sst [smem:[#allocation16_spill]] %s5656_s22  ;;  %s3720_s24 = sadd.s32 4294967295, %s5660_s23   ;;  %s5660_s23 = sphi %s5705_s23, %s25_s23   ;;  %s5656_s22 = sphi %s5703_s22, %s6672_s22   ;;  %s5652_s21 = sphi %s5701_s21, %s6671_s21   ;;  %s5648_s20 = sphi %s5699_s20, %s6675_s20   ;;  %s5644_s19 = sphi %s5697_s19, %s6674_s19   ;;  %s5640_s18 = sphi %s5695_s18, %s6673_s18  }
   0xb   : > { %s3721_s25 = sadd.s32 4294967294, %s5660_s23   ;;  %s37_s26 = sadd.s32 1, %s5656_s22 }
   0xc   : > { %s78_s27 = sadd.s32 1, %s5648_s20  ;;  %p39_p0 = scmp.ge.s32.totalorder %s37_s26, 2 }
   0xd   : > { %p85_p1 = scmp.ne.s32.totalorder %s5648_s20, %s5644_s19  ;;  %p86_p2 = scmp.eq.s32.totalorder %s5660_s23, 0 }
   0xe   : > { %p91_p3 = scmp.ne.s32.totalorder %s5644_s19, %s5640_s18  ;;  %s6677_s26 = smov (%p39_p0, %s37_s26), 0 }
   0xf   : > { %6664 = sst [smem:[#allocation17_spill]] %s6677_s26  ;;  %p5736_p4 = por %p86_p2, %p85_p1 }
  0x10   : > { %p92_p5 = scmp.eq.s32.totalorder %s3720_s24, 0  ;;  %s75_s29 = ssub.s32 %s5656_s22, %s6677_s26 }
  0x11   : > { %p177_p6 = scmp.eq.s32.totalorder %s3720_s24, 1  ;;  %p76_p7 = scmp.eq.s32.totalorder %s75_s29, 0 }
  0x12   : > { %p5742_p8 = por %p92_p5, %p91_p3  ;;  %p209_p10 = scmp.eq.s32.totalorder %s3721_s25, 1 }
  0x13   : > { %p5746_p9 = por %p177_p6, %p85_p1  ;;  %p3723_p12 = scmp.ge.s32.totalorder %s5660_s23, 2 }
  0x14   : > { %s5751_s7 = scalar_select %p76_p7, %s5648_s20, %s78_s27  }
  0x15   : > { %p5753_p11 = por %p209_p10, %p91_p3  ;;  %p5333_p13 = scmp.lt.s32.totalorder %s5660_s23, 2 }
  0x16   : > { %s5760_s9 = sand.u32 1, %s5648_s20   ;;  %s4972_s11 = sshll.u32 %s5656_s22, 8 }
  0x17   : > { %s3725_s10 = sshll.u32 %s5760_s9, 8  ;;  %s6669_s1 = sld [smem:[#allocation18_spill]] }
  0x18   : > { %s250_s15 = scalar_lea.vmem [#allocation6], %s3725_s10  ;;  %p5769_p0 = pnand %p5333_p13, %p5736_p4 }
  0x19   : > { %s258_s16 = sshll.u32 %s250_s15, 4  ;;  %p3731_p1 = scmp.ge.s32.totalorder %s5660_s23, 1  ;;  %s259_s16 = int_to_ptr.vmem [resolvable:$true] %s258_s16 }
  0x1a   : > { %s247_s25 = scalar_lea.sflag [#allocation7], %s5760_s9  ;;  %s5662_s27 = smov 256  }
  0x1b   : > { %s5663_s29 = smov 16   ;;  %p295_p2 = scmp.lt.s32.totalorder %s5660_s23, 3 }
  0x1c   : > { %s272_s28 = scalar_lea.vmem [#allocation9], %s3725_s10  ;;  %s269_s26 = scalar_lea.sflag [#allocation10], %s5760_s9 }
  0x1d   : > { %s255_s14 = scalar_lea.hbm %s6669_s1, %s4972_s11  ;;  %p296_p3 = pnand %p3731_p1, %p295_p2 }
  0x1e   : > { %s256_s17 = sshll.u32 %s255_s14, 4  ;;  %s277_s14 = scalar_lea.hbm %s6656_s2, %s4972_s11  ;;  %s257_s17 = int_to_ptr.hbm [resolvable:$true] %s256_s17 }
  0x1f   : > { %5325 = dma.hbm_to_vmem [thread:$0]  (!%p5769_p0), %s257_s17, 4096, %s259_s16, %s247_s25, %s5662_s27, %s5662_s27, %s5663_s29  }
  0x20   : > { %s278_s15 = sshll.u32 %s277_s14, 4  ;;  %s280_s1 = sshll.u32 %s272_s28, 4  ;;  %s279_s15 = int_to_ptr.hbm [resolvable:$true] %s278_s15  ;;  %s281_s1 = int_to_ptr.vmem [resolvable:$true] %s280_s1 }
  0x21   : > { %5328 = dma.hbm_to_vmem [thread:$0]  (!%p5769_p0), %s279_s15, 4096, %s281_s1, %s269_s26, %s5662_s27, %s5662_s27, %s5663_s29  }
  0x22   : > { %299 = sbr.rel (%p296_p3) target bundleno = 1601 (0x641), region = 36  ;;  %s5785_s22 = sand.u32 (!%p296_p3), 1, %s5644_s19  }
  0x23   : > { %s3732_s16 = sshll.u32 (!%p296_p3), %s5785_s22, 8  ;;  %s302_s17 = scalar_lea.sflag (!%p296_p3), [#allocation7], %s5785_s22 }
  0x24   : > { %s5789_s25 = scalar_lea.vmem (!%p296_p3), [#allocation6], %s3732_s16 }
  0x27   : > { %5627 = dma.done.wait (%p5742_p8), %s302_s17, 4096  }
  0x28   : > { %5629 = vsyncadd (%p5742_p8), %s302_s17, 4294963200  ;;  %s312_s9 = scalar_lea.sflag [#allocation10], %s5785_s22  ;;  %s5796_s1 = scalar_lea.vmem [#allocation9], %s3732_s16 }
  0x29   : > { %5631 = dma.done.wait (%p5742_p8), %s312_s9, 4096  }
  0x2a   : > { %5633 = vsyncadd (%p5742_p8), %s312_s9, 4294963200  ;;  %s3734_s26 = sshll.u32 %s5785_s22, 5  ;;  %s3735_s10 = sshll.u32 %s5785_s22, 3  ;;  %v3867_v0 = vld [vmem:[%s5789_s25 + $0xe0] sm:$0xf] }
  0x2b   : > { %v5008_v1 = vld [vmem:[%s5789_s25 + $0xec] sm:$0xf0]  ;;  %v5006_v2 = vld [vmem:[%s5789_s25 + $0xe4] sm:$0xf]  ;;  %v3869_v4 = vld [vmem:[%s5789_s25 + $0xf0] sm:$0xf0] }
  0x2c   : > { %v3868_v3 = vor.u32 %v5008_v1, %v3867_v0  ;;  %v3875_v5 = vld [vmem:[%s5789_s25 + $0xe8] sm:$0xf]  ;;  %v5009_v6 = vld [vmem:[%s5789_s25 + $0xf4] sm:$0xf0]  ;;  %v3872_v7 = vor.u32 %v5006_v2, %v3869_v4  ;;  %v5007_v9 = vld [vmem:[%s5789_s25 + $0xec] sm:$0xf] }
  0x2d   : > { %v3876_v8 = vor.u32 %v5009_v6, %v3875_v5  ;;  %v3877_v10 = vld [vmem:[%s5789_s25 + $0xf8] sm:$0xf0]  ;;  %v3851_v11 = vld [vmem:[%s5789_s25 + $0xc0] sm:$0xf]  ;;  %v5004_v13 = vld [vmem:[%s5789_s25 + $0xcc] sm:$0xf0] }
  0x2e   : > { %628 = vmatpush.bf16.msra.mxu0 %v3868_v3  ;;  %v3880_v12 = vor.u32 %v5007_v9, %v3877_v10  ;;  %v5002_v14 = vld [vmem:[%s5789_s25 + $0xc4] sm:$0xf]  ;;  %v3853_v15 = vld [vmem:[%s5789_s25 + $0xd0] sm:$0xf0]  ;;  %657 = vmatpush.bf16.msra.mxu1 %v3872_v7  ;;  %v3852_v16 = vor.u32 %v5004_v13, %v3851_v11  ;;  %v3859_v18 = vld [vmem:[%s5789_s25 + $0xc8] sm:$0xf] }
  0x2f   : > { %686 = vmatpush.bf16.msra.mxu2 %v3876_v8  ;;  %v3856_v17 = vor.u32 %v5002_v14, %v3853_v15  ;;  %v5005_v19 = vld [vmem:[%s5789_s25 + $0xd4] sm:$0xf0]  ;;  %v5003_v20 = vld [vmem:[%s5789_s25 + $0xcc] sm:$0xf]  ;;  %v3861_v22 = vld [vmem:[%s5789_s25 + $0xd8] sm:$0xf0] }
  0x30   : > { %715 = vmatpush.bf16.msra.mxu3 %v3880_v12  ;;  %v3860_v21 = vor.u32 %v5005_v19, %v3859_v18  ;;  %v3835_v23 = vld [vmem:[%s5789_s25 + $0xa0] sm:$0xf]  ;;  %v5000_v24 = vld [vmem:[%s5789_s25 + $0xac] sm:$0xf0]  ;;  %v3864_v25 = vor.u32 %v5003_v20, %v3861_v22  ;;  %v4998_v26 = vld [vmem:[%s5789_s25 + $0xa4] sm:$0xf] }
  0x31   : > { %v3837_v27 = vld [vmem:[%s5789_s25 + $0xb0] sm:$0xf0]  ;;  %v3843_v28 = vld [vmem:[%s5789_s25 + $0xa8] sm:$0xf]  ;;  %v3836_v29 = vor.u32 %v5000_v24, %v3835_v23  ;;  %v5001_v30 = vld [vmem:[%s5789_s25 + $0xb4] sm:$0xf0] }
  0x32   : > { %629 = vmatpush.bf16.msra.mxu0 %v3852_v16  ;;  %v4999_v31 = vld [vmem:[%s5789_s25 + $0xac] sm:$0xf]  ;;  %v3845_v32 = vld [vmem:[%s5789_s25 + $0xb8] sm:$0xf0]  ;;  %658 = vmatpush.bf16.msra.mxu1 %v3856_v17  ;;  %v3840_v33 = vor.u32 %v4998_v26, %v3837_v27  ;;  %v3844_v34 = vor.u32 %v5001_v30, %v3843_v28  ;;  %v3819_v35 = vld [vmem:[%s5789_s25 + $0x80] sm:$0xf] }
  0x33   : > { %687 = vmatpush.bf16.msra.mxu2 %v3860_v21  ;;  %v4996_v36 = vld [vmem:[%s5789_s25 + $0x8c] sm:$0xf0]  ;;  %v4994_v37 = vld [vmem:[%s5789_s25 + $0x84] sm:$0xf]  ;;  %v3848_v38 = vor.u32 %v4999_v31, %v3845_v32  ;;  %v3821_v39 = vld [vmem:[%s5789_s25 + $0x90] sm:$0xf0] }
  0x34   : > { %716 = vmatpush.bf16.msra.mxu3 %v3864_v25  ;;  %v3827_v40 = vld [vmem:[%s5789_s25 + $0x88] sm:$0xf]  ;;  %v4997_v41 = vld [vmem:[%s5789_s25 + $0x94] sm:$0xf0]  ;;  %v4995_v42 = vld [vmem:[%s5789_s25 + $0x8c] sm:$0xf]  ;;  %v3820_v44 = vor.u32 %v4996_v36, %v3819_v35  ;;  %v3824_v45 = vor.u32 %v4994_v37, %v3821_v39 }
  0x35   : > { %v3829_v43 = vld [vmem:[%s5789_s25 + $0x98] sm:$0xf0]  ;;  %v3828_v46 = vor.u32 %v4997_v41, %v3827_v40  ;;  %v3803_v47 = vld [vmem:[%s5789_s25 + $0x60] sm:$0xf]  ;;  %v4992_v48 = vld [vmem:[%s5789_s25 + $0x6c] sm:$0xf0] }
  0x36   : > { %630 = vmatpush.bf16.msra.mxu0 %v3836_v29  ;;  %659 = vmatpush.bf16.msra.mxu1 %v3840_v33  ;;  %v4990_v49 = vld [vmem:[%s5789_s25 + $0x64] sm:$0xf]  ;;  %v3832_v50 = vor.u32 %v4995_v42, %v3829_v43  ;;  %v3805_v51 = vld [vmem:[%s5789_s25 + $0x70] sm:$0xf0]  ;;  %v3811_v52 = vld [vmem:[%s5789_s25 + $0x68] sm:$0xf]  ;;  %v3804_v56 = vor.u32 %v4992_v48, %v3803_v47 }
  0x37   : > { %688 = vmatpush.bf16.msra.mxu2 %v3844_v34  ;;  %v4993_v53 = vld [vmem:[%s5789_s25 + $0x74] sm:$0xf0]  ;;  %v4991_v54 = vld [vmem:[%s5789_s25 + $0x6c] sm:$0xf]  ;;  %v3813_v55 = vld [vmem:[%s5789_s25 + $0x78] sm:$0xf0]  ;;  %v3808_v57 = vor.u32 %v4990_v49, %v3805_v51 }
  0x38   : > { %717 = vmatpush.bf16.msra.mxu3 %v3848_v38  ;;  %v3812_v58 = vor.u32 %v4993_v53, %v3811_v52  ;;  %v3787_v59 = vld [vmem:[%s5789_s25 + $0x40] sm:$0xf]  ;;  %v4988_v60 = vld [vmem:[%s5789_s25 + $0x4c] sm:$0xf0]  ;;  %v4986_v61 = vld [vmem:[%s5789_s25 + $0x44] sm:$0xf]  ;;  %v3816_v62 = vor.u32 %v4991_v54, %v3813_v55 }
  0x39   : > { %v3789_v63 = vld [vmem:[%s5789_s25 + $0x50] sm:$0xf0]  ;;  %v3795_v0 = vld [vmem:[%s5789_s25 + $0x48] sm:$0xf]  ;;  %v4989_v1 = vld [vmem:[%s5789_s25 + $0x54] sm:$0xf0]  ;;  %v3788_v4 = vor.u32 %v4988_v60, %v3787_v59 }
  0x3a   : > { %631 = vmatpush.bf16.msra.mxu0 %v3820_v44  ;;  %660 = vmatpush.bf16.msra.mxu1 %v3824_v45  ;;  %v4987_v2 = vld [vmem:[%s5789_s25 + $0x4c] sm:$0xf]  ;;  %v3797_v3 = vld [vmem:[%s5789_s25 + $0x58] sm:$0xf0]  ;;  %v3792_v5 = vor.u32 %v4986_v61, %v3789_v63  ;;  %v3796_v6 = vor.u32 %v4989_v1, %v3795_v0  ;;  %v3771_v7 = vld [vmem:[%s5789_s25 + $0x20] sm:$0xf] }
  0x3b   : > { %689 = vmatpush.bf16.msra.mxu2 %v3828_v46  ;;  %v4984_v8 = vld [vmem:[%s5789_s25 + $0x2c] sm:$0xf0]  ;;  %v4982_v9 = vld [vmem:[%s5789_s25 + $0x24] sm:$0xf]  ;;  %v3800_v10 = vor.u32 %v4987_v2, %v3797_v3  ;;  %v3773_v11 = vld [vmem:[%s5789_s25 + $0x30] sm:$0xf0] }
  0x3c   : > { %718 = vmatpush.bf16.msra.mxu3 %v3832_v50  ;;  %v3779_v12 = vld [vmem:[%s5789_s25 + $0x28] sm:$0xf]  ;;  %v4985_v13 = vld [vmem:[%s5789_s25 + $0x34] sm:$0xf0]  ;;  %v4983_v14 = vld [vmem:[%s5789_s25 + $0x2c] sm:$0xf]  ;;  %v3772_v16 = vor.u32 %v4984_v8, %v3771_v7  ;;  %v3776_v18 = vor.u32 %v4982_v9, %v3773_v11 }
  0x3d   : > { %v3781_v15 = vld [vmem:[%s5789_s25 + $0x38] sm:$0xf0]  ;;  %v3755_v17 = vld [vmem:[%s5789_s25] sm:$0xf]  ;;  %v3780_v19 = vor.u32 %v4985_v13, %v3779_v12  ;;  %v4980_v20 = vld [vmem:[%s5789_s25 + $0xc] sm:$0xf0] }
  0x3e   : > { %632 = vmatpush.bf16.msra.mxu0 %v3804_v56  ;;  %661 = vmatpush.bf16.msra.mxu1 %v3808_v57  ;;  %v4978_v21 = vld [vmem:[%s5789_s25 + $0x4] sm:$0xf]  ;;  %v3757_v22 = vld [vmem:[%s5789_s25 + $0x10] sm:$0xf0]  ;;  %v3784_v23 = vor.u32 %v4983_v14, %v3781_v15  ;;  %v3763_v24 = vld [vmem:[%s5789_s25 + $0x8] sm:$0xf]  ;;  %v3756_v30 = vor.u32 %v4980_v20, %v3755_v17 }
  0x3f   : > { %690 = vmatpush.bf16.msra.mxu2 %v3812_v58  ;;  %v4981_v25 = vld [vmem:[%s5789_s25 + $0x14] sm:$0xf0]  ;;  %v4979_v26 = vld [vmem:[%s5789_s25 + $0xc] sm:$0xf]  ;;  %v3765_v27 = vld [vmem:[%s5789_s25 + $0x18] sm:$0xf0]  ;;  %v3760_v33 = vor.u32 %v4978_v21, %v3757_v22 }
  0x40   : > { %719 = vmatpush.bf16.msra.mxu3 %v3816_v62  ;;  %v3997_v28 = vld [vmem:[%s5796_s1 + $0xe0] sm:$0xf]  ;;  %v5041_v29 = vld [vmem:[%s5796_s1 + $0xec] sm:$0xf0]  ;;  %v5039_v31 = vld [vmem:[%s5796_s1 + $0xe4] sm:$0xf]  ;;  %v3764_v34 = vor.u32 %v4981_v25, %v3763_v24  ;;  %v3768_v36 = vor.u32 %v4979_v26, %v3765_v27 }
  0x41   : > { %v3999_v32 = vld [vmem:[%s5796_s1 + $0xf0] sm:$0xf0]  ;;  %v4974_v35 = vld [vmem:[%s6654_s0] sm:$0xff]  ;;  %v3998_v37 = vor.u32 %v5041_v29, %v3997_v28  ;;  %v5040_v38 = vld [vmem:[%s5796_s1 + $0xec] sm:$0xf]  ;;  %p379_p4 = scmp.lt.s32.totalorder %s5652_s21, 1 }
  0x42   : > { %633 = vmatpush.bf16.msra.mxu0 %v3788_v4  ;;  %662 = vmatpush.bf16.msra.mxu1 %v3792_v5  ;;  %v4005_v39 = vld [vmem:[%s5796_s1 + $0xe8] sm:$0xf]  ;;  %v5042_v40 = vld [vmem:[%s5796_s1 + $0xf4] sm:$0xf0]  ;;  %v4002_v41 = vor.u32 %v5039_v31, %v3999_v32  ;;  %v4007_v42 = vld [vmem:[%s5796_s1 + $0xf8] sm:$0xf0] }
  0x43   : > { %691 = vmatpush.bf16.msra.mxu2 %v3796_v6  ;;  %v3981_v43 = vld [vmem:[%s5796_s1 + $0xc0] sm:$0xf]  ;;  %v5037_v44 = vld [vmem:[%s5796_s1 + $0xcc] sm:$0xf0]  ;;  %v5035_v45 = vld [vmem:[%s5796_s1 + $0xc4] sm:$0xf]  ;;  %v4006_v47 = vor.u32 %v5042_v40, %v4005_v39  ;;  %v4010_v48 = vor.u32 %v5040_v38, %v4007_v42 }
  0x44   : > { %720 = vmatpush.bf16.msra.mxu3 %v3800_v10  ;;  %v3983_v46 = vld [vmem:[%s5796_s1 + $0xd0] sm:$0xf0]  ;;  %v3982_v49 = vor.u32 %v5037_v44, %v3981_v43  ;;  %v5036_v50 = vld [vmem:[%s5796_s1 + $0xcc] sm:$0xf]  ;;  %v3989_v51 = vld [vmem:[%s5796_s1 + $0xc8] sm:$0xf] }
  0x45   : > { %v5038_v52 = vld [vmem:[%s5796_s1 + $0xd4] sm:$0xf0]  ;;  %v3986_v53 = vor.u32 %v5035_v45, %v3983_v46  ;;  %v3991_v54 = vld [vmem:[%s5796_s1 + $0xd8] sm:$0xf0]  ;;  %v3965_v55 = vld [vmem:[%s5796_s1 + $0xa0] sm:$0xf] }
  0x46   : > { %634 = vmatpush.bf16.msra.mxu0 %v3772_v16  ;;  %663 = vmatpush.bf16.msra.mxu1 %v3776_v18  ;;  %v5033_v56 = vld [vmem:[%s5796_s1 + $0xac] sm:$0xf0]  ;;  %v5031_v57 = vld [vmem:[%s5796_s1 + $0xa4] sm:$0xf]  ;;  %v3967_v58 = vld [vmem:[%s5796_s1 + $0xb0] sm:$0xf0]  ;;  %v3990_v59 = vor.u32 %v5038_v52, %v3989_v51  ;;  %v3994_v60 = vor.u32 %v5036_v50, %v3991_v54 }
  0x47   : > { %692 = vmatpush.bf16.msra.mxu2 %v3780_v19  ;;  %v3966_v61 = vor.u32 %v5033_v56, %v3965_v55  ;;  %v5032_v62 = vld [vmem:[%s5796_s1 + $0xac] sm:$0xf]  ;;  %v3975_v63 = vld [vmem:[%s5796_s1 + $0xb8] sm:$0xf0]  ;;  %v3949_v0 = vld [vmem:[%s5796_s1 + $0x80] sm:$0xf]  ;;  %v3970_v1 = vor.u32 %v5031_v57, %v3967_v58 }
  0x48   : > { %721 = vmatpush.bf16.msra.mxu3 %v3784_v23  ;;  %v5029_v2 = vld [vmem:[%s5796_s1 + $0x8c] sm:$0xf0]  ;;  %v3973_v3 = vld [vmem:[%s5796_s1 + $0xa8] sm:$0xf]  ;;  %v5034_v4 = vld [vmem:[%s5796_s1 + $0xb4] sm:$0xf0]  ;;  %v3978_v8 = vor.u32 %v5032_v62, %v3975_v63 }
  0x49   : > { %v5027_v5 = vld [vmem:[%s5796_s1 + $0x84] sm:$0xf]  ;;  %v3951_v6 = vld [vmem:[%s5796_s1 + $0x90] sm:$0xf0]  ;;  %v3974_v7 = vor.u32 %v5034_v4, %v3973_v3  ;;  %v3950_v9 = vor.u32 %v5029_v2, %v3949_v0  ;;  %v5028_v10 = vld [vmem:[%s5796_s1 + $0x8c] sm:$0xf] }
  0x4a   : > { %635 = vmatpush.bf16.msra.mxu0 %v3756_v30  ;;  %664 = vmatpush.bf16.msra.mxu1 %v3760_v33  ;;  %v3957_v11 = vld [vmem:[%s5796_s1 + $0x88] sm:$0xf]  ;;  %v5030_v12 = vld [vmem:[%s5796_s1 + $0x94] sm:$0xf0]  ;;  %v3954_v13 = vor.u32 %v5027_v5, %v3951_v6  ;;  %v3959_v14 = vld [vmem:[%s5796_s1 + $0x98] sm:$0xf0] }
  0x4b   : > { %693 = vmatpush.bf16.msra.mxu2 %v3764_v34  ;;  %v3933_v15 = vld [vmem:[%s5796_s1 + $0x60] sm:$0xf]  ;;  %v5025_v16 = vld [vmem:[%s5796_s1 + $0x6c] sm:$0xf0]  ;;  %v5023_v17 = vld [vmem:[%s5796_s1 + $0x64] sm:$0xf]  ;;  %v3958_v19 = vor.u32 %v5030_v12, %v3957_v11  ;;  %v3962_v20 = vor.u32 %v5028_v10, %v3959_v14 }
  0x4c   : > { %722 = vmatpush.bf16.msra.mxu3 %v3768_v36  ;;  %v3935_v18 = vld [vmem:[%s5796_s1 + $0x70] sm:$0xf0]  ;;  %v3934_v21 = vor.u32 %v5025_v16, %v3933_v15  ;;  %v4975_v22 = vld [vmem:[%s6654_s0 + $0x8] sm:$0xff]  ;;  %v3943_v25 = vld [vmem:[%s5796_s1 + $0x78] sm:$0xf0]  ;;  %v5664_v4 = vmov 0.0|0.0  }
  0x4d   : > { %636 = vmatmul.bf16.vlgmr.msra.gmra.mxu0 %v4974_v35  ;;  %665 = vmatmul.bf16.vlgmr.msra.gmra.mxu1 %v4974_v35  ;;  %v3938_v23 = vor.u32 %v5023_v17, %v3935_v18  ;;  %v5024_v24 = vld [vmem:[%s5796_s1 + $0x6c] sm:$0xf]  ;;  %v3917_v27 = vld [vmem:[%s5796_s1 + $0x40] sm:$0xf]  ;;  %v5021_v28 = vld [vmem:[%s5796_s1 + $0x4c] sm:$0xf0] }
  0x4e   : > { %981 = vmatpush.bf16.msrb.mxu0 %v3998_v37  ;;  %994 = vmatpush.bf16.msrb.mxu1 %v4002_v41  ;;  %v3946_v26 = vor.u32 %v5024_v24, %v3943_v25  ;;  %v5019_v29 = vld [vmem:[%s5796_s1 + $0x44] sm:$0xf]  ;;  %v3918_v30 = vor.u32 %v5021_v28, %v3917_v27  ;;  %v3919_v31 = vld [vmem:[%s5796_s1 + $0x50] sm:$0xf0]  ;;  %v3941_v32 = vld [vmem:[%s5796_s1 + $0x68] sm:$0xf] }
  0x4f   : > { %694 = vmatmul.bf16.vlgmr.msra.gmra.mxu2 %v4974_v35  ;;  %723 = vmatmul.bf16.vlgmr.msra.gmra.mxu3 %v4974_v35  ;;  %v5026_v33 = vld [vmem:[%s5796_s1 + $0x74] sm:$0xf0]  ;;  %v3922_v34 = vor.u32 %v5019_v29, %v3919_v31  ;;  %v5020_v36 = vld [vmem:[%s5796_s1 + $0x4c] sm:$0xf]  ;;  %v3927_v37 = vld [vmem:[%s5796_s1 + $0x58] sm:$0xf0] }
  0x50   : > { %1007 = vmatpush.bf16.msrb.mxu2 %v4006_v47  ;;  %1020 = vmatpush.bf16.msrb.mxu3 %v4010_v48  ;;  %v3942_v35 = vor.u32 %v5026_v33, %v3941_v32  ;;  %v3925_v38 = vld [vmem:[%s5796_s1 + $0x48] sm:$0xf]  ;;  %v3930_v39 = vor.u32 %v5020_v36, %v3927_v37  ;;  %v5022_v40 = vld [vmem:[%s5796_s1 + $0x54] sm:$0xf0]  ;;  %v3901_v41 = vld [vmem:[%s5796_s1 + $0x20] sm:$0xf] }
  0x51   : > { %v5017_v42 = vld [vmem:[%s5796_s1 + $0x2c] sm:$0xf0]  ;;  %v3926_v43 = vor.u32 %v5022_v40, %v3925_v38  ;;  %v5015_v45 = vld [vmem:[%s5796_s1 + $0x24] sm:$0xf]  ;;  %v3903_v46 = vld [vmem:[%s5796_s1 + $0x30] sm:$0xf0] }
  0x52   : > { %982 = vmatpush.bf16.msrb.mxu0 %v3982_v49  ;;  %995 = vmatpush.bf16.msrb.mxu1 %v3986_v53  ;;  %v3902_v44 = vor.u32 %v5017_v42, %v3901_v41  ;;  %v3909_v47 = vld [vmem:[%s5796_s1 + $0x28] sm:$0xf]  ;;  %v3906_v48 = vor.u32 %v5015_v45, %v3903_v46  ;;  %v5018_v49 = vld [vmem:[%s5796_s1 + $0x34] sm:$0xf0]  ;;  %v5016_v50 = vld [vmem:[%s5796_s1 + $0x2c] sm:$0xf] }
  0x53   : > { %v3911_v51 = vld [vmem:[%s5796_s1 + $0x38] sm:$0xf0]  ;;  %v3885_v53 = vld [vmem:[%s5796_s1] sm:$0xf]  ;;  %v5013_v54 = vld [vmem:[%s5796_s1 + $0xc] sm:$0xf0]  ;;  %v3910_v58 = vor.u32 %v5018_v49, %v3909_v47 }
  0x54   : > { %1008 = vmatpush.bf16.msrb.mxu2 %v3990_v59  ;;  %1021 = vmatpush.bf16.msrb.mxu3 %v3994_v60  ;;  %v3914_v52 = vor.u32 %v5016_v50, %v3911_v51  ;;  %v5011_v55 = vld [vmem:[%s5796_s1 + $0x4] sm:$0xf]  ;;  %v3886_v56 = vor.u32 %v5013_v54, %v3885_v53  ;;  %v3887_v57 = vld [vmem:[%s5796_s1 + $0x10] sm:$0xf0]  ;;  %v5012_v60 = vld [vmem:[%s5796_s1 + $0xc] sm:$0xf] }
  0x55   : > { %v3890_v59 = vor.u32 %v5011_v55, %v3887_v57  ;;  %v3893_v62 = vld [vmem:[%s5796_s1 + $0x8] sm:$0xf]  ;;  %v5014_v63 = vld [vmem:[%s5796_s1 + $0x14] sm:$0xf0]  ;;  %s380_s15 = scalar_select %p379_p4, %s5652_s21, 1 }
  0x56   : > { %983 = vmatpush.bf16.msrb.mxu0 %v3966_v61  ;;  %996 = vmatpush.bf16.msrb.mxu1 %v3970_v1  ;;  %v3895_v61 = vld [vmem:[%s5796_s1 + $0x18] sm:$0xf0]  ;;  %v4976_v1 = vld [vmem:[%s6654_s0 + $0x10] sm:$0xff]  ;;  %v3894_v2 = vor.u32 %v5014_v63, %v3893_v62  ;;  %p1102_p5 = scmp.eq.s32.totalorder %s5652_s21, 1  ;;  %s778_s9 = smul.u32 56, %s5652_s21 }
  0x57   : > { %v3898_v0 = vor.u32 %v5012_v60, %v3895_v61  ;;  %v4977_v3 = vld [vmem:[%s6654_s0 + $0x18] sm:$0xff]  ;;  %s3736_s28 = sshll.u32 %s380_s15, 2  ;;  %s6003_s29 = scalar_lea.vmem [#allocation11], %s3734_s26 }
  0x58   : > { %1009 = vmatpush.bf16.msrb.mxu2 %v3974_v7  ;;  %1022 = vmatpush.bf16.msrb.mxu3 %v3978_v8  ;;  %s382_s25 = scalar_lea.vmem %s6657_s3, %s3736_s28  ;;  %s779_s30 = sshra.s32 %s778_s9, 3 }
  0x59   : > { %v434_v5 = vld [vmem:[%s382_s25] sm:$0xf]  ;;  %s5010_s11 = sshll.u32 %s779_s30, 5  ;;  %s1100_s27 = scalar_lea.vmem [#allocation3], %s778_s9 }
  0x5a   : > { %984 = vmatpush.bf16.msrb.mxu0 %v3950_v9  ;;  %997 = vmatpush.bf16.msrb.mxu1 %v3954_v13  ;;  %v5950_v6 = vperm.slane %v434_v5, 0  ;;  %v5952_v7 = vperm.slane %v434_v5, 1  ;;  %v5956_v12 = vperm.slane %v434_v5, 2  ;;  %v5958_v13 = vperm.slane %v434_v5, 3  ;;  %s783_s24 = scalar_lea.vmem [#allocation2], %s5010_s11  ;;  %s6007_s12 = scalar_lea.vmem [#allocation12], %s3735_s10 }
  0x5c   : > { %1010 = vmatpush.bf16.msrb.mxu2 %v3958_v19  ;;  %1023 = vmatpush.bf16.msrb.mxu3 %v3962_v20 }
  0x5d   : > { %641 = vmatmul.bf16.gmra.mxu0 %v4975_v22  ;;  %670 = vmatmul.bf16.gmra.mxu1 %v4975_v22 }
  0x5e   : > { %985 = vmatpush.bf16.msrb.mxu0 %v3934_v21  ;;  %998 = vmatpush.bf16.msrb.mxu1 %v3938_v23 }
  0x5f   : > { %699 = vmatmul.bf16.gmra.mxu2 %v4975_v22  ;;  %728 = vmatmul.bf16.gmra.mxu3 %v4975_v22 }
  0x60   : > { %1024 = vmatpush.bf16.msrb.mxu3 %v3946_v26  ;;  %1011 = vmatpush.bf16.msrb.mxu2 %v3942_v35 }
  0x62   : > { %986 = vmatpush.bf16.msrb.mxu0 %v3918_v30  ;;  %999 = vmatpush.bf16.msrb.mxu1 %v3922_v34 }
  0x64   : > { %1025 = vmatpush.bf16.msrb.mxu3 %v3930_v39  ;;  %1012 = vmatpush.bf16.msrb.mxu2 %v3926_v43 }
  0x66   : > { %987 = vmatpush.bf16.msrb.mxu0 %v3902_v44  ;;  %1000 = vmatpush.bf16.msrb.mxu1 %v3906_v48 }
  0x68   : > { %1026 = vmatpush.bf16.msrb.mxu3 %v3914_v52  ;;  %1013 = vmatpush.bf16.msrb.mxu2 %v3910_v58 }
  0x6a   : > { %988 = vmatpush.bf16.msrb.mxu0 %v3886_v56  ;;  %1001 = vmatpush.bf16.msrb.mxu1 %v3890_v59 }
  0x6c   : > { %1027 = vmatpush.bf16.msrb.mxu3 %v3898_v0  ;;  %1014 = vmatpush.bf16.msrb.mxu2 %v3894_v2 }
  0x6d   : > { %646 = vmatmul.bf16.gmra.mxu0 %v4976_v1  ;;  %675 = vmatmul.bf16.gmra.mxu1 %v4976_v1 }
  0x6f   : > { %704 = vmatmul.bf16.gmra.mxu2 %v4976_v1  ;;  %733 = vmatmul.bf16.gmra.mxu3 %v4976_v1 }
  0x7d   : > { %651 = vmatmul.bf16.gmra.mxu0 %v4977_v3  ;;  %680 = vmatmul.bf16.gmra.mxu1 %v4977_v3 }
  0x7f   : > { %709 = vmatmul.bf16.gmra.mxu2 %v4977_v3  ;;  %738 = vmatmul.bf16.gmra.mxu3 %v4977_v3 }
  0x8d   : > { %989 = vmatmul.bf16.vlgmr.msrb.gmra.mxu0 %v5664_v4  ;;  %1002 = vmatmul.bf16.vlgmr.msrb.gmra.mxu1 %v5664_v4 }
  0x8f   : > { %1015 = vmatmul.bf16.vlgmr.msrb.gmra.mxu2 %v5664_v4  ;;  %1028 = vmatmul.bf16.vlgmr.msrb.gmra.mxu3 %v5664_v4 }
  0xca   : > { %v637_v8 = vpop.f32.mrf.mxu0  ;;  %v666_v10 = vpop.f32.mrf.mxu1 }
  0xcb   : > { %v638_v9 = vadd.f32 %v637_v8, %v5950_v6  ;;  %v667_v11 = vadd.f32 %v666_v10, %v5952_v7 }
  0xcd   : > { %744 = vst [vmem:[#allocation2] sm:$0xff] %v638_v9 }
  0xce   : > { %745 = vst [vmem:[#allocation2 + $0x8] sm:$0xff] %v667_v11 }
  0xd2   : > { %v695_v14 = vpop.f32.mrf.mxu2  ;;  %v724_v16 = vpop.f32.mrf.mxu3 }
  0xd3   : > { %v696_v15 = vadd.f32 %v695_v14, %v5956_v12  ;;  %v639_v17 = vpop.f32.mrf.mxu0  ;;  %v725_v18 = vadd.f32 %v724_v16, %v5958_v13  ;;  %v668_v20 = vpop.f32.mrf.mxu1 }
  0xd4   : > { %v640_v19 = vadd.f32 %v639_v17, %v5950_v6  ;;  %v669_v21 = vadd.f32 %v668_v20, %v5952_v7 }
  0xd5   : > { %746 = vst [vmem:[#allocation2 + $0x10] sm:$0xff] %v696_v15 }
  0xd6   : > { %747 = vst [vmem:[#allocation2 + $0x18] sm:$0xff] %v725_v18 }
  0xd7   : > { %748 = vst [vmem:[#allocation2 + $0x20] sm:$0xff] %v640_v19 }
  0xd8   : > { %749 = vst [vmem:[#allocation2 + $0x28] sm:$0xff] %v669_v21 }
  0xda   : > { %v697_v22 = vpop.f32.mrf.mxu2  ;;  %v726_v24 = vpop.f32.mrf.mxu3 }
  0xdb   : > { %v698_v23 = vadd.f32 %v697_v22, %v5956_v12  ;;  %v642_v25 = vpop.f32.mrf.mxu0  ;;  %v727_v26 = vadd.f32 %v726_v24, %v5958_v13  ;;  %v671_v28 = vpop.f32.mrf.mxu1 }
  0xdc   : > { %v643_v27 = vadd.f32 %v642_v25, %v5950_v6  ;;  %v672_v29 = vadd.f32 %v671_v28, %v5952_v7 }
  0xdd   : > { %750 = vst [vmem:[#allocation2 + $0x30] sm:$0xff] %v698_v23 }
  0xde   : > { %751 = vst [vmem:[#allocation2 + $0x38] sm:$0xff] %v727_v26 }
  0xdf   : > { %752 = vst [vmem:[#allocation2 + $0x40] sm:$0xff] %v643_v27 }
  0xe0   : > { %753 = vst [vmem:[#allocation2 + $0x48] sm:$0xff] %v672_v29 }
  0xe2   : > { %v700_v30 = vpop.f32.mrf.mxu2  ;;  %v729_v32 = vpop.f32.mrf.mxu3 }
  0xe3   : > { %v701_v31 = vadd.f32 %v700_v30, %v5956_v12  ;;  %v644_v33 = vpop.f32.mrf.mxu0  ;;  %v730_v34 = vadd.f32 %v729_v32, %v5958_v13  ;;  %v673_v36 = vpop.f32.mrf.mxu1 }
  0xe4   : > { %v645_v35 = vadd.f32 %v644_v33, %v5950_v6  ;;  %v674_v37 = vadd.f32 %v673_v36, %v5952_v7 }
  0xe5   : > { %754 = vst [vmem:[#allocation2 + $0x50] sm:$0xff] %v701_v31 }
  0xe6   : > { %755 = vst [vmem:[#allocation2 + $0x58] sm:$0xff] %v730_v34 }
  0xe7   : > { %756 = vst [vmem:[#allocation2 + $0x60] sm:$0xff] %v645_v35 }
  0xe8   : > { %757 = vst [vmem:[#allocation2 + $0x68] sm:$0xff] %v674_v37 }
  0xea   : > { %v702_v38 = vpop.f32.mrf.mxu2  ;;  %v731_v40 = vpop.f32.mrf.mxu3 }
  0xeb   : > { %v703_v39 = vadd.f32 %v702_v38, %v5956_v12  ;;  %v647_v41 = vpop.f32.mrf.mxu0  ;;  %v732_v42 = vadd.f32 %v731_v40, %v5958_v13  ;;  %v676_v44 = vpop.f32.mrf.mxu1 }
  0xec   : > { %v648_v43 = vadd.f32 %v647_v41, %v5950_v6  ;;  %v677_v45 = vadd.f32 %v676_v44, %v5952_v7 }
  0xed   : > { %758 = vst [vmem:[#allocation2 + $0x70] sm:$0xff] %v703_v39 }
  0xee   : > { %759 = vst [vmem:[#allocation2 + $0x78] sm:$0xff] %v732_v42 }
  0xef   : > { %760 = vst [vmem:[#allocation2 + $0x80] sm:$0xff] %v648_v43 }
  0xf0   : > { %761 = vst [vmem:[#allocation2 + $0x88] sm:$0xff] %v677_v45 }
  0xf2   : > { %v705_v46 = vpop.f32.mrf.mxu2  ;;  %v734_v48 = vpop.f32.mrf.mxu3 }
  0xf3   : > { %v706_v47 = vadd.f32 %v705_v46, %v5956_v12  ;;  %v649_v49 = vpop.f32.mrf.mxu0  ;;  %v735_v50 = vadd.f32 %v734_v48, %v5958_v13  ;;  %v678_v52 = vpop.f32.mrf.mxu1 }
  0xf4   : > { %v650_v51 = vadd.f32 %v649_v49, %v5950_v6  ;;  %v679_v53 = vadd.f32 %v678_v52, %v5952_v7 }
  0xf5   : > { %762 = vst [vmem:[#allocation2 + $0x90] sm:$0xff] %v706_v47 }
  0xf6   : > { %763 = vst [vmem:[#allocation2 + $0x98] sm:$0xff] %v735_v50 }
  0xf7   : > { %764 = vst [vmem:[#allocation2 + $0xa0] sm:$0xff] %v650_v51 }
  0xf8   : > { %765 = vst [vmem:[#allocation2 + $0xa8] sm:$0xff] %v679_v53 }
  0xfa   : > { %v707_v54 = vpop.f32.mrf.mxu2  ;;  %v736_v56 = vpop.f32.mrf.mxu3 }
  0xfb   : > { %v708_v55 = vadd.f32 %v707_v54, %v5956_v12  ;;  %v652_v57 = vpop.f32.mrf.mxu0  ;;  %v737_v58 = vadd.f32 %v736_v56, %v5958_v13  ;;  %v681_v60 = vpop.f32.mrf.mxu1 }
  0xfc   : > { %v653_v59 = vadd.f32 %v652_v57, %v5950_v6  ;;  %v682_v61 = vadd.f32 %v681_v60, %v5952_v7 }
  0xfd   : > { %766 = vst [vmem:[#allocation2 + $0xb0] sm:$0xff] %v708_v55 }
  0xfe   : > { %767 = vst [vmem:[#allocation2 + $0xb8] sm:$0xff] %v737_v58 }
  0xff   : > { %768 = vst [vmem:[#allocation2 + $0xc0] sm:$0xff] %v653_v59 }
 0x100   : > { %769 = vst [vmem:[#allocation2 + $0xc8] sm:$0xff] %v682_v61 }
 0x102   : > { %v710_v62 = vpop.f32.mrf.mxu2  ;;  %v739_v0 = vpop.f32.mrf.mxu3 }
 0x103   : > { %v711_v63 = vadd.f32 %v710_v62, %v5956_v12  ;;  %v654_v1 = vpop.f32.mrf.mxu0  ;;  %v740_v2 = vadd.f32 %v739_v0, %v5958_v13  ;;  %v683_v4 = vpop.f32.mrf.mxu1 }
 0x104   : > { %v655_v3 = vadd.f32 %v654_v1, %v5950_v6  ;;  %v684_v5 = vadd.f32 %v683_v4, %v5952_v7 }
 0x105   : > { %770 = vst [vmem:[#allocation2 + $0xd0] sm:$0xff] %v711_v63 }
 0x106   : > { %771 = vst [vmem:[#allocation2 + $0xd8] sm:$0xff] %v740_v2 }
 0x107   : > { %772 = vst [vmem:[#allocation2 + $0xe0] sm:$0xff] %v655_v3 }
 0x108   : > { %773 = vst [vmem:[#allocation2 + $0xe8] sm:$0xff] %v684_v5 }
 0x10a   : > { %v712_v8 = vpop.f32.mrf.mxu2  ;;  %v741_v10 = vpop.f32.mrf.mxu3 }
 0x10b   : > { %v713_v9 = vadd.f32 %v712_v8, %v5956_v12  ;;  %v990_v11 = vpop.f32.mrf.mxu0  ;;  %v742_v14 = vadd.f32 %v741_v10, %v5958_v13  ;;  %v1003_v15 = vpop.f32.mrf.mxu1 }
 0x10d   : > { %774 = vst [vmem:[#allocation2 + $0xf0] sm:$0xff] %v713_v9 }
 0x10e   : > { %775 = vst [vmem:[#allocation2 + $0xf8] sm:$0xff] %v742_v14 }
 0x112   : > { %v1016_v6 = vpop.f32.mrf.mxu2  ;;  %v1029_v7 = vpop.f32.mrf.mxu3 }
 0x113   : > { %v992_v16 = vpop.f32.mrf.mxu0  ;;  %v1005_v17 = vpop.f32.mrf.mxu1 }
 0x115   : > { %v784_v18 = vld [vmem:[%s783_s24] sm:$0xff]  ;;  %v785_v19 = vld [vmem:[%s783_s24 + $0x8] sm:$0xff]  ;;  %v787_v12 = vld [vmem:[%s783_s24 + $0x18] sm:$0xff] }
 0x116   : > { %v1033_v20 = vadd.f32 %v990_v11, %v784_v18  ;;  %v1034_v21 = vadd.f32 %v1003_v15, %v785_v19  ;;  %v1036_v22 = vadd.f32 %v1029_v7, %v787_v12  ;;  %v786_v33 = vld [vmem:[%s783_s24 + $0x10] sm:$0xff] }
 0x117   : > { %v1035_v35 = vadd.f32 %v1016_v6, %v786_v33 }
 0x118   : > { %v4011_v23 = vmul.f32 -1.442695, %v1033_v20  ;;  %v4012_v24 = vmul.f32 -1.442695, %v1034_v21  ;;  %v4013_v13 = vmul.f32 -1.442695, %v1036_v22 }
 0x11a   : > { %5386 = vpow2.f32 %v4011_v23  ;;  %v1018_v25 = vpop.f32.mrf.mxu2  ;;  %v1031_v26 = vpop.f32.mrf.mxu3 }
 0x11b   : > { %5388 = vpow2.f32 %v4012_v24 }
 0x11c   : > { %5390 = vpow2.f32 %v4013_v13 }
 0x120   : > { %v5387_v27 = vpop.eup %5386 }
 0x121   : > { %v5389_v28 = vpop.eup %5388  ;;  %v1040_v29 = vadd.f32 1.0, %v5387_v27 }
 0x122   : > { %v5391_v30 = vpop.eup %5390  ;;  %v1059_v31 = vadd.f32 1.0, %v5389_v28 }
 0x123   : > { %5392 = vrcp.f32 %v1040_v29  ;;  %v1079_v32 = vadd.f32 1.0, %v5391_v30  ;;  %v1050_v42 = vand.u32 2147483647, %v1040_v29  ;;  %v1052_v43 = vand.u32 2147483648, %v1040_v29 }
 0x124   : > { %5394 = vrcp.f32 %v1059_v31  ;;  %v1071_v44 = vand.u32 2147483648, %v1059_v31  ;;  %v1069_v48 = vand.u32 2147483647, %v1059_v31  ;;  %vm1046_vm2 = vweird.f32 %v1040_v29 }
 0x125   : > { %5396 = vrcp.f32 %v1079_v32  ;;  %vm1065_vm3 = vweird.f32 %v1059_v31  ;;  %v1053_v51 = vor.u32 1.1754944e-38, %v1052_v43  ;;  %vm1051_vm6 = vcmp.eq.f32.partialorder %v1050_v42, 8.507059e+37 }
 0x126   : > { %5398 = vtanh.f32 %v1035_v35  ;;  %v1072_v53 = vor.u32 1.1754944e-38, %v1071_v44  ;;  %vm1070_vm7 = vcmp.eq.f32.partialorder %v1069_v48, 8.507059e+37  ;;  %v1091_v0 = vand.u32 2147483648, %v1079_v32 }
 0x127   : > { %vm1085_vm9 = vweird.f32 %v1079_v32  ;;  %v1089_v1 = vand.u32 2147483647, %v1079_v32 }
 0x128   : > { %v1092_v3 = vor.u32 1.1754944e-38, %v1091_v0 }
 0x129   : > { %v5393_v34 = vpop.eup %5392  ;;  %vm1090_vm11 = vcmp.eq.f32.partialorder %v1089_v1, 8.507059e+37 }
 0x12a   : > { %v5395_v36 = vpop.eup %5394  ;;  %v1042_v37 = vmul.f32 %v5393_v34, %v1040_v29  ;;  %vm1047_vm0 = vweird.f32 %v5393_v34 }
 0x12b   : > { %v1061_v38 = vmul.f32 %v5395_v36, %v1059_v31  ;;  %v5397_v40 = vpop.eup %5396  ;;  %vm1066_vm1 = vweird.f32 %v5395_v36  ;;  %vm1048_vm4 = vmor %vm1046_vm2, %vm1047_vm0 }
 0x12c   : > { %v1043_v39 = vsub.f32 1.0, %v1042_v37  ;;  %v1081_v46 = vmul.f32 %v5397_v40, %v1079_v32  ;;  %vm1067_vm5 = vmor %vm1065_vm3, %vm1066_vm1  ;;  %v5399_v55 = vpop.eup %5398  ;;  %vm1086_vm8 = vweird.f32 %v5397_v40 }
 0x12d   : > { %v1062_v41 = vsub.f32 1.0, %v1061_v38  ;;  %vm1087_vm10 = vmor %vm1085_vm9, %vm1086_vm8 }
 0x12e   : > { %v1044_v45 = vmul.f32 %v5393_v34, %v1043_v39  ;;  %v1082_v50 = vsub.f32 1.0, %v1081_v46 }
 0x12f   : > { %v1063_v47 = vmul.f32 %v5395_v36, %v1062_v41 }
 0x130   : > { %v1045_v49 = vadd.f32 %v5393_v34, %v1044_v45  ;;  %v1083_v60 = vmul.f32 %v5397_v40, %v1082_v50 }
 0x131   : > { %v1064_v52 = vadd.f32 %v5395_v36, %v1063_v47 }
 0x132   : > { %v1049_v54 = vsel %vm1048_vm4, %v5393_v34, %v1045_v49  ;;  %v1084_v63 = vadd.f32 %v5397_v40, %v1083_v60 }
 0x133   : > { %v1054_v56 = vsel %vm1051_vm6, %v1053_v51, %v1049_v54  ;;  %v1068_v57 = vsel %vm1067_vm5, %v5395_v36, %v1064_v52 }
 0x134   : > { %v1073_v58 = vsel %vm1070_vm7, %v1072_v53, %v1068_v57  ;;  %v1096_v59 = vmul.f32 %v5399_v55, %v1054_v56  ;;  %v1088_v2 = vsel %vm1087_vm10, %v5397_v40, %v1084_v63 }
 0x135   : > { %v1095_v61 = vmul.f32 0.0, %v1073_v58  ;;  %v1093_v5 = vsel %vm1090_vm11, %v1092_v3, %v1088_v2 }
 0x137   : > { %v5993_v62 = vadd.f32 %v1096_v59, %v1095_v61 }
 0x139   : > { %5400 = vtanh.f32 %v5993_v62 }
 0x13e   : > { %1106 = sbr.rel (!%p1102_p5) target bundleno = 324 (0x144), region = 52 }
 0x13f   : > { %v5401_v4 = vpop.eup %5400 }
 0x140   : > { %v5996_v8 = vmul.f32 %v5401_v4, %v1093_v5 }
 0x142   : > { %1101 = vst [vmem:[%s1100_s27] sm:$0xff] %v5996_v8 }
 0x143   : > { %1107 = vst [vmem:[%s6007_s12] sm:$0xff] %v5996_v8 }
 0x144 PF: > { %v4132_v9 = vld [vmem:[%s5796_s1 + $0xe0] sm:$0xf]  ;;  %v5077_v10 = vld [vmem:[%s5796_s1 + $0xec] sm:$0xf0]  ;;  %v5075_v11 = vld [vmem:[%s5796_s1 + $0xe4] sm:$0xf] }
 0x145   : > { %v4133_v14 = vor.u32 %v5077_v10, %v4132_v9  ;;  %v4134_v15 = vld [vmem:[%s5796_s1 + $0xf0] sm:$0xf0]  ;;  %v5076_v6 = vld [vmem:[%s5796_s1 + $0xec] sm:$0xf]  ;;  %v4142_v16 = vld [vmem:[%s5796_s1 + $0xf8] sm:$0xf0] }
 0x146   : > { %v4137_v7 = vor.u32 %v5075_v11, %v4134_v15  ;;  %v4145_v17 = vor.u32 %v5076_v6, %v4142_v16  ;;  %v4116_v18 = vld [vmem:[%s5796_s1 + $0xc0] sm:$0xf]  ;;  %v5073_v19 = vld [vmem:[%s5796_s1 + $0xcc] sm:$0xf0]  ;;  %v5071_v20 = vld [vmem:[%s5796_s1 + $0xc4] sm:$0xf] }
 0x147   : > { %1313 = vmatpush.bf16.msra.mxu0 %v4133_v14  ;;  %v4117_v21 = vor.u32 %v5073_v19, %v4116_v18  ;;  %v4118_v12 = vld [vmem:[%s5796_s1 + $0xd0] sm:$0xf0]  ;;  %v5072_v22 = vld [vmem:[%s5796_s1 + $0xcc] sm:$0xf]  ;;  %v4126_v23 = vld [vmem:[%s5796_s1 + $0xd8] sm:$0xf0] }
 0x148   : > { %1326 = vmatpush.bf16.msra.mxu1 %v4137_v7  ;;  %1352 = vmatpush.bf16.msra.mxu3 %v4145_v17  ;;  %v4121_v24 = vor.u32 %v5071_v20, %v4118_v12  ;;  %v4129_v13 = vor.u32 %v5072_v22, %v4126_v23  ;;  %v4140_v25 = vld [vmem:[%s5796_s1 + $0xe8] sm:$0xf]  ;;  %v5078_v26 = vld [vmem:[%s5796_s1 + $0xf4] sm:$0xf0]  ;;  %v4100_v27 = vld [vmem:[%s5796_s1 + $0xa0] sm:$0xf] }
 0x149   : > { %v4141_v28 = vor.u32 %v5078_v26, %v4140_v25  ;;  %v5069_v29 = vld [vmem:[%s5796_s1 + $0xac] sm:$0xf0]  ;;  %v5067_v30 = vld [vmem:[%s5796_s1 + $0xa4] sm:$0xf]  ;;  %v4102_v31 = vld [vmem:[%s5796_s1 + $0xb0] sm:$0xf0] }
 0x14a   : > { %v5068_v32 = vld [vmem:[%s5796_s1 + $0xac] sm:$0xf]  ;;  %v4110_v33 = vld [vmem:[%s5796_s1 + $0xb8] sm:$0xf0]  ;;  %v4124_v34 = vld [vmem:[%s5796_s1 + $0xc8] sm:$0xf]  ;;  %v4101_v35 = vor.u32 %v5069_v29, %v4100_v27  ;;  %v4105_v39 = vor.u32 %v5067_v30, %v4102_v31 }
 0x14b   : > { %1314 = vmatpush.bf16.msra.mxu0 %v4117_v21  ;;  %1339 = vmatpush.bf16.msra.mxu2 %v4141_v28  ;;  %v5074_v36 = vld [vmem:[%s5796_s1 + $0xd4] sm:$0xf0]  ;;  %v4084_v37 = vld [vmem:[%s5796_s1 + $0x80] sm:$0xf]  ;;  %v5065_v38 = vld [vmem:[%s5796_s1 + $0x8c] sm:$0xf0]  ;;  %v4113_v40 = vor.u32 %v5068_v32, %v4110_v33 }
 0x14c   : > { %1327 = vmatpush.bf16.msra.mxu1 %v4121_v24  ;;  %1353 = vmatpush.bf16.msra.mxu3 %v4129_v13  ;;  %v4125_v41 = vor.u32 %v5074_v36, %v4124_v34  ;;  %v5063_v42 = vld [vmem:[%s5796_s1 + $0x84] sm:$0xf]  ;;  %v4086_v43 = vld [vmem:[%s5796_s1 + $0x90] sm:$0xf0]  ;;  %v5064_v44 = vld [vmem:[%s5796_s1 + $0x8c] sm:$0xf]  ;;  %v4085_v48 = vor.u32 %v5065_v38, %v4084_v37 }
 0x14d   : > { %v4094_v45 = vld [vmem:[%s5796_s1 + $0x98] sm:$0xf0]  ;;  %v4108_v46 = vld [vmem:[%s5796_s1 + $0xa8] sm:$0xf]  ;;  %v5070_v47 = vld [vmem:[%s5796_s1 + $0xb4] sm:$0xf0]  ;;  %v4089_v52 = vor.u32 %v5063_v42, %v4086_v43 }
 0x14e   : > { %v4109_v49 = vor.u32 %v5070_v47, %v4108_v46  ;;  %v4068_v50 = vld [vmem:[%s5796_s1 + $0x60] sm:$0xf]  ;;  %v5061_v51 = vld [vmem:[%s5796_s1 + $0x6c] sm:$0xf0]  ;;  %v4097_v53 = vor.u32 %v5064_v44, %v4094_v45  ;;  %v5059_v54 = vld [vmem:[%s5796_s1 + $0x64] sm:$0xf] }
 0x14f   : > { %1315 = vmatpush.bf16.msra.mxu0 %v4101_v35  ;;  %1340 = vmatpush.bf16.msra.mxu2 %v4125_v41  ;;  %v4092_v55 = vld [vmem:[%s5796_s1 + $0x88] sm:$0xf]  ;;  %v5066_v56 = vld [vmem:[%s5796_s1 + $0x94] sm:$0xf0]  ;;  %v4070_v57 = vld [vmem:[%s5796_s1 + $0x70] sm:$0xf0]  ;;  %v4069_v60 = vor.u32 %v5061_v51, %v4068_v50 }
 0x150   : > { %1328 = vmatpush.bf16.msra.mxu1 %v4105_v39  ;;  %1354 = vmatpush.bf16.msra.mxu3 %v4113_v40  ;;  %v5060_v58 = vld [vmem:[%s5796_s1 + $0x6c] sm:$0xf]  ;;  %v4078_v59 = vld [vmem:[%s5796_s1 + $0x78] sm:$0xf0]  ;;  %v4093_v61 = vor.u32 %v5066_v56, %v4092_v55  ;;  %v4052_v63 = vld [vmem:[%s5796_s1 + $0x40] sm:$0xf]  ;;  %v4073_v1 = vor.u32 %v5059_v54, %v4070_v57  ;;  %v1120_v40 = vpack.c.bf16 %v5996_v8, %v5996_v8 }
 0x151   : > { %v5057_v0 = vld [vmem:[%s5796_s1 + $0x4c] sm:$0xf0]  ;;  %v4081_v2 = vor.u32 %v5060_v58, %v4078_v59  ;;  %v5055_v3 = vld [vmem:[%s5796_s1 + $0x44] sm:$0xf]  ;;  %v4076_v4 = vld [vmem:[%s5796_s1 + $0x68] sm:$0xf] }
 0x152   : > { %v5062_v5 = vld [vmem:[%s5796_s1 + $0x74] sm:$0xf0]  ;;  %v4054_v9 = vld [vmem:[%s5796_s1 + $0x50] sm:$0xf0]  ;;  %v5056_v10 = vld [vmem:[%s5796_s1 + $0x4c] sm:$0xf]  ;;  %v4053_v14 = vor.u32 %v5057_v0, %v4052_v63 }
 0x153   : > { %1316 = vmatpush.bf16.msra.mxu0 %v4085_v48  ;;  %1341 = vmatpush.bf16.msra.mxu2 %v4109_v49  ;;  %v4062_v11 = vld [vmem:[%s5796_s1 + $0x58] sm:$0xf0]  ;;  %v4077_v15 = vor.u32 %v5062_v5, %v4076_v4  ;;  %v4036_v6 = vld [vmem:[%s5796_s1 + $0x20] sm:$0xf]  ;;  %v5053_v16 = vld [vmem:[%s5796_s1 + $0x2c] sm:$0xf0]  ;;  %v4057_v7 = vor.u32 %v5055_v3, %v4054_v9 }
 0x154   : > { %1329 = vmatpush.bf16.msra.mxu1 %v4089_v52  ;;  %1355 = vmatpush.bf16.msra.mxu3 %v4097_v53  ;;  %v4065_v17 = vor.u32 %v5056_v10, %v4062_v11  ;;  %v5051_v18 = vld [vmem:[%s5796_s1 + $0x24] sm:$0xf]  ;;  %v4060_v19 = vld [vmem:[%s5796_s1 + $0x48] sm:$0xf]  ;;  %v5058_v20 = vld [vmem:[%s5796_s1 + $0x54] sm:$0xf0]  ;;  %v4037_v23 = vor.u32 %v5053_v16, %v4036_v6 }
 0x155   : > { %v4038_v21 = vld [vmem:[%s5796_s1 + $0x30] sm:$0xf0]  ;;  %v5052_v12 = vld [vmem:[%s5796_s1 + $0x2c] sm:$0xf]  ;;  %v4046_v22 = vld [vmem:[%s5796_s1 + $0x38] sm:$0xf0]  ;;  %v4061_v24 = vor.u32 %v5058_v20, %v4060_v19 }
 0x156   : > { %v4020_v13 = vld [vmem:[%s5796_s1] sm:$0xf]  ;;  %v5049_v25 = vld [vmem:[%s5796_s1 + $0xc] sm:$0xf0]  ;;  %v4041_v26 = vor.u32 %v5051_v18, %v4038_v21  ;;  %v4049_v27 = vor.u32 %v5052_v12, %v4046_v22  ;;  %v5047_v28 = vld [vmem:[%s5796_s1 + $0x4] sm:$0xf] }
 0x157   : > { %1317 = vmatpush.bf16.msra.mxu0 %v4069_v60  ;;  %1342 = vmatpush.bf16.msra.mxu2 %v4093_v61  ;;  %v4044_v29 = vld [vmem:[%s5796_s1 + $0x28] sm:$0xf]  ;;  %v5054_v30 = vld [vmem:[%s5796_s1 + $0x34] sm:$0xf0]  ;;  %v4022_v31 = vld [vmem:[%s5796_s1 + $0x10] sm:$0xf0]  ;;  %v4021_v34 = vor.u32 %v5049_v25, %v4020_v13 }
 0x158   : > { %1330 = vmatpush.bf16.msra.mxu1 %v4073_v1  ;;  %1356 = vmatpush.bf16.msra.mxu3 %v4081_v2  ;;  %v5048_v32 = vld [vmem:[%s5796_s1 + $0xc] sm:$0xf]  ;;  %v4030_v33 = vld [vmem:[%s5796_s1 + $0x18] sm:$0xf0]  ;;  %v4045_v35 = vor.u32 %v5054_v30, %v4044_v29  ;;  %v4025_v36 = vor.u32 %v5047_v28, %v4022_v31  ;;  %v4028_v38 = vld [vmem:[%s5796_s1 + $0x8] sm:$0xf] }
 0x159   : > { %v4033_v37 = vor.u32 %v5048_v32, %v4030_v33  ;;  %v5050_v39 = vld [vmem:[%s5796_s1 + $0x14] sm:$0xf0]  ;;  %s5308_s26 = smul.u32 40, %s5652_s21  ;;  %v4268_v8 = vld [vmem:[%s5796_s1 + $0xe0] sm:$0xf]  ;;  %s6250_s24 = sshll.u32 %s5652_s21, 3 }
 0x15a   : > { %v4029_v41 = vor.u32 %v5050_v39, %v4028_v38  ;;  %v5112_v42 = vld [vmem:[%s5796_s1 + $0xec] sm:$0xf0]  ;;  %v5110_v43 = vld [vmem:[%s5796_s1 + $0xe4] sm:$0xf]  ;;  %v4270_v45 = vld [vmem:[%s5796_s1 + $0xf0] sm:$0xf0] }
 0x15b   : > { %1318 = vmatpush.bf16.msra.mxu0 %v4053_v14  ;;  %1343 = vmatpush.bf16.msra.mxu2 %v4077_v15  ;;  %s6082_s10 = sadd.s32 8, %s5308_s26  ;;  %v4269_v44 = vor.u32 %v5112_v42, %v4268_v8  ;;  %v4276_v46 = vld [vmem:[%s5796_s1 + $0xe8] sm:$0xf]  ;;  %v5113_v47 = vld [vmem:[%s5796_s1 + $0xf4] sm:$0xf0]  ;;  %v4273_v48 = vor.u32 %v5110_v43, %v4270_v45  ;;  %s3602_s28 = scalar_lea.vmem [#allocation3], %s5308_s26 }
 0x15c   : > { %1331 = vmatpush.bf16.msra.mxu1 %v4057_v7  ;;  %1357 = vmatpush.bf16.msra.mxu3 %v4065_v17  ;;  %v4277_v49 = vor.u32 %v5113_v47, %v4276_v46  ;;  %v5111_v50 = vld [vmem:[%s5796_s1 + $0xec] sm:$0xf]  ;;  %v4278_v51 = vld [vmem:[%s5796_s1 + $0xf8] sm:$0xf0]  ;;  %s1111_s13 = sshra.s32 %s6082_s10, 3  ;;  %s5309_s16 = smul.u32 24, %s5652_s21 }
 0x15d   : > { %v4281_v52 = vor.u32 %v5111_v50, %v4278_v51  ;;  %v4252_v53 = vld [vmem:[%s5796_s1 + $0xc0] sm:$0xf]  ;;  %v5108_v54 = vld [vmem:[%s5796_s1 + $0xcc] sm:$0xf0]  ;;  %v5106_v55 = vld [vmem:[%s5796_s1 + $0xc4] sm:$0xf] }
 0x15e   : > { %v4253_v56 = vor.u32 %v5108_v54, %v4252_v53  ;;  %v4254_v57 = vld [vmem:[%s5796_s1 + $0xd0] sm:$0xf0]  ;;  %v4260_v58 = vld [vmem:[%s5796_s1 + $0xc8] sm:$0xf]  ;;  %v5109_v59 = vld [vmem:[%s5796_s1 + $0xd4] sm:$0xf0] }
 0x15f   : > { %1319 = vmatpush.bf16.msra.mxu0 %v4037_v23  ;;  %1344 = vmatpush.bf16.msra.mxu2 %v4061_v24  ;;  %v4257_v60 = vor.u32 %v5106_v55, %v4254_v57  ;;  %v4261_v61 = vor.u32 %v5109_v59, %v4260_v58  ;;  %v5107_v63 = vld [vmem:[%s5796_s1 + $0xcc] sm:$0xf]  ;;  %v4262_v0 = vld [vmem:[%s5796_s1 + $0xd8] sm:$0xf0]  ;;  %s6101_s14 = sshll.u32 %s1111_s13, 5  ;;  %s6167_s17 = sadd.s32 16, %s5309_s16 }
 0x160   : > { %1332 = vmatpush.bf16.msra.mxu1 %v4041_v26  ;;  %1358 = vmatpush.bf16.msra.mxu3 %v4049_v27  ;;  %v4265_v1 = vor.u32 %v5107_v63, %v4262_v0  ;;  %v4236_v2 = vld [vmem:[%s5796_s1 + $0xa0] sm:$0xf]  ;;  %v5104_v3 = vld [vmem:[%s5796_s1 + $0xac] sm:$0xf0]  ;;  %v5102_v4 = vld [vmem:[%s5796_s1 + $0xa4] sm:$0xf] }
 0x161   : > { %v4237_v5 = vor.u32 %v5104_v3, %v4236_v2  ;;  %v4238_v9 = vld [vmem:[%s5796_s1 + $0xb0] sm:$0xf0]  ;;  %v4244_v10 = vld [vmem:[%s5796_s1 + $0xa8] sm:$0xf]  ;;  %v5105_v14 = vld [vmem:[%s5796_s1 + $0xb4] sm:$0xf0] }
 0x162   : > { %v4241_v11 = vor.u32 %v5102_v4, %v4238_v9  ;;  %v5103_v15 = vld [vmem:[%s5796_s1 + $0xac] sm:$0xf]  ;;  %v4246_v6 = vld [vmem:[%s5796_s1 + $0xb8] sm:$0xf0]  ;;  %v4245_v16 = vor.u32 %v5105_v14, %v4244_v10  ;;  %v4220_v17 = vld [vmem:[%s5796_s1 + $0x80] sm:$0xf] }
 0x163   : > { %1320 = vmatpush.bf16.msra.mxu0 %v4021_v34  ;;  %1345 = vmatpush.bf16.msra.mxu2 %v4045_v35  ;;  %v4249_v7 = vor.u32 %v5103_v15, %v4246_v6  ;;  %v5100_v18 = vld [vmem:[%s5796_s1 + $0x8c] sm:$0xf0]  ;;  %v5098_v19 = vld [vmem:[%s5796_s1 + $0x84] sm:$0xf]  ;;  %v4222_v21 = vld [vmem:[%s5796_s1 + $0x90] sm:$0xf0] }
 0x164   : > { %1333 = vmatpush.bf16.msra.mxu1 %v4025_v36  ;;  %1359 = vmatpush.bf16.msra.mxu3 %v4033_v37  ;;  %v4221_v20 = vor.u32 %v5100_v18, %v4220_v17  ;;  %v4228_v12 = vld [vmem:[%s5796_s1 + $0x88] sm:$0xf]  ;;  %v5101_v22 = vld [vmem:[%s5796_s1 + $0x94] sm:$0xf0]  ;;  %v4225_v23 = vor.u32 %v5098_v19, %v4222_v21  ;;  %v5099_v13 = vld [vmem:[%s5796_s1 + $0x8c] sm:$0xf] }
 0x165   : > { %v4229_v24 = vor.u32 %v5101_v22, %v4228_v12  ;;  %v4230_v25 = vld [vmem:[%s5796_s1 + $0x98] sm:$0xf0]  ;;  %s6120_s15 = scalar_lea.vmem [#allocation2], %s6101_s14  ;;  %v4204_v28 = vld [vmem:[%s5796_s1 + $0x60] sm:$0xf]  ;;  %s1437_s25 = sshra.s32 %s6167_s17, 3 }
 0x166   : > { %1321 = vmatmul.bf16.vlgmr.msra.gmra.mxu0 %v1120_v40  ;;  %v1116_v26 = vld [vmem:[%s6120_s15] sm:$0xff]  ;;  %v4233_v27 = vor.u32 %v5099_v13, %v4230_v25  ;;  %v5096_v29 = vld [vmem:[%s5796_s1 + $0x6c] sm:$0xf0]  ;;  %v4206_v32 = vld [vmem:[%s5796_s1 + $0x70] sm:$0xf0]  ;;  %s6186_s9 = sshll.u32 %s1437_s25, 5 }
 0x167   : > { %1334 = vmatmul.bf16.vlgmr.msra.gmra.mxu1 %v1120_v40  ;;  %1360 = vmatmul.bf16.vlgmr.msra.gmra.mxu3 %v1120_v40  ;;  %v5094_v30 = vld [vmem:[%s5796_s1 + $0x64] sm:$0xf]  ;;  %v4205_v31 = vor.u32 %v5096_v29, %v4204_v28  ;;  %v4212_v33 = vld [vmem:[%s5796_s1 + $0x68] sm:$0xf]  ;;  %v5097_v34 = vld [vmem:[%s5796_s1 + $0x74] sm:$0xf0] }
 0x168   : > { %1346 = vmatpush.bf16.msra.mxu2 %v4029_v41  ;;  %1639 = vmatpush.bf16.msrb.mxu0 %v4269_v44  ;;  %v1117_v35 = vld [vmem:[%s6120_s15 + $0x8] sm:$0xff]  ;;  %v4209_v36 = vor.u32 %v5094_v30, %v4206_v32  ;;  %v4213_v37 = vor.u32 %v5097_v34, %v4212_v33  ;;  %v4214_v39 = vld [vmem:[%s5796_s1 + $0x78] sm:$0xf0]  ;;  %v4188_v43 = vld [vmem:[%s5796_s1 + $0x40] sm:$0xf]  ;;  %s6205_s30 = scalar_lea.vmem [#allocation2], %s6186_s9 }
 0x169   : > { %1652 = vmatpush.bf16.msrb.mxu1 %v4273_v48  ;;  %1678 = vmatpush.bf16.msrb.mxu3 %v4281_v52  ;;  %v5095_v38 = vld [vmem:[%s5796_s1 + $0x6c] sm:$0xf]  ;;  %v5092_v44 = vld [vmem:[%s5796_s1 + $0x4c] sm:$0xf0]  ;;  %v5090_v45 = vld [vmem:[%s5796_s1 + $0x44] sm:$0xf] }
 0x16a   : > { %v4217_v41 = vor.u32 %v5095_v38, %v4214_v39  ;;  %v4189_v47 = vor.u32 %v5092_v44, %v4188_v43  ;;  %v4190_v48 = vld [vmem:[%s5796_s1 + $0x50] sm:$0xf0]  ;;  %v5093_v50 = vld [vmem:[%s5796_s1 + $0x54] sm:$0xf0]  ;;  %v5091_v55 = vld [vmem:[%s5796_s1 + $0x4c] sm:$0xf] }
 0x16b   : > { %1347 = vmatmul.bf16.vlgmr.msra.gmra.mxu2 %v1120_v40  ;;  %v1119_v52 = vld [vmem:[%s6120_s15 + $0x18] sm:$0xff]  ;;  %v4193_v53 = vor.u32 %v5090_v45, %v4190_v48  ;;  %v4172_v59 = vld [vmem:[%s5796_s1 + $0x20] sm:$0xf]  ;;  %v5086_v63 = vld [vmem:[%s5796_s1 + $0x24] sm:$0xf]  ;;  %s3608_s11 = scalar_lea.vmem [#allocation3], %s5309_s16 }
 0x16c   : > { %1665 = vmatpush.bf16.msrb.mxu2 %v4277_v49  ;;  %1640 = vmatpush.bf16.msrb.mxu0 %v4253_v56  ;;  %v4196_v49 = vld [vmem:[%s5796_s1 + $0x48] sm:$0xf]  ;;  %v4198_v56 = vld [vmem:[%s5796_s1 + $0x58] sm:$0xf0]  ;;  %v4174_v0 = vld [vmem:[%s5796_s1 + $0x30] sm:$0xf0] }
 0x16d   : > { %1653 = vmatpush.bf16.msrb.mxu1 %v4257_v60  ;;  %1679 = vmatpush.bf16.msrb.mxu3 %v4265_v1  ;;  %v4197_v54 = vor.u32 %v5093_v50, %v4196_v49  ;;  %v4201_v58 = vor.u32 %v5091_v55, %v4198_v56  ;;  %v5088_v60 = vld [vmem:[%s5796_s1 + $0x2c] sm:$0xf0]  ;;  %v4180_v1 = vld [vmem:[%s5796_s1 + $0x28] sm:$0xf]  ;;  %v4177_v2 = vor.u32 %v5086_v63, %v4174_v0  ;;  %v5089_v3 = vld [vmem:[%s5796_s1 + $0x34] sm:$0xf0] }
 0x16e   : > { %v5087_v4 = vld [vmem:[%s5796_s1 + $0x2c] sm:$0xf]  ;;  %v4181_v10 = vor.u32 %v5089_v3, %v4180_v1  ;;  %v4156_v14 = vld [vmem:[%s5796_s1] sm:$0xf]  ;;  %v5084_v15 = vld [vmem:[%s5796_s1 + $0xc] sm:$0xf0] }
 0x16f   : > { %v5082_v6 = vld [vmem:[%s5796_s1 + $0x4] sm:$0xf]  ;;  %v4157_v17 = vor.u32 %v5084_v15, %v4156_v14  ;;  %v4158_v18 = vld [vmem:[%s5796_s1 + $0x10] sm:$0xf0]  ;;  %v4164_v19 = vld [vmem:[%s5796_s1 + $0x8] sm:$0xf] }
 0x170   : > { %1666 = vmatpush.bf16.msrb.mxu2 %v4261_v61  ;;  %1641 = vmatpush.bf16.msrb.mxu0 %v4237_v5  ;;  %v4173_v61 = vor.u32 %v5088_v60, %v4172_v59  ;;  %v4182_v5 = vld [vmem:[%s5796_s1 + $0x38] sm:$0xf0]  ;;  %v4161_v12 = vor.u32 %v5082_v6, %v4158_v18  ;;  %v5083_v22 = vld [vmem:[%s5796_s1 + $0xc] sm:$0xf]  ;;  %v4404_v14 = vld [vmem:[%s5796_s1 + $0xe0] sm:$0xf] }
 0x171   : > { %1654 = vmatpush.bf16.msrb.mxu1 %v4241_v11  ;;  %1680 = vmatpush.bf16.msrb.mxu3 %v4249_v7  ;;  %v4185_v11 = vor.u32 %v5087_v4, %v4182_v5  ;;  %v5147_v15 = vld [vmem:[%s5796_s1 + $0xec] sm:$0xf0]  ;;  %v5145_v6 = vld [vmem:[%s5796_s1 + $0xe4] sm:$0xf]  ;;  %v5148_v18 = vld [vmem:[%s5796_s1 + $0xf4] sm:$0xf0] }
 0x172   : > { %s5115_s27 = sadd.s32 24, %s6250_s24  ;;  %s3613_s14 = scalar_lea.vmem [#allocation3], %s6250_s24 }
 0x173   : > { %s6261_s26 = sshra.s32 %s5115_s27, 3  ;;  %p3388_p6 = scmp.eq.s32.totalorder %s5652_s21, 0 }
 0x174   : > { %1667 = vmatpush.bf16.msrb.mxu2 %v4245_v16  ;;  %1642 = vmatpush.bf16.msrb.mxu0 %v4221_v20  ;;  %v5085_v20 = vld [vmem:[%s5796_s1 + $0x14] sm:$0xf0]  ;;  %s5116_s10 = sshll.u32 %s6261_s26, 5 }
 0x175   : > { %1655 = vmatpush.bf16.msrb.mxu1 %v4225_v23  ;;  %1681 = vmatpush.bf16.msrb.mxu3 %v4233_v27  ;;  %v4166_v23 = vld [vmem:[%s5796_s1 + $0x18] sm:$0xf0]  ;;  %v4165_v13 = vor.u32 %v5085_v20, %v4164_v19  ;;  %s6290_s13 = scalar_lea.vmem [#allocation2], %s5116_s10 }
 0x176   : > { %v4169_v25 = vor.u32 %v5083_v22, %v4166_v23  ;;  %v4388_v23 = vld [vmem:[%s5796_s1 + $0xc0] sm:$0xf] }
 0x178   : > { %1668 = vmatpush.bf16.msrb.mxu2 %v4229_v24  ;;  %1643 = vmatpush.bf16.msrb.mxu0 %v4205_v31  ;;  %v1118_v31 = vld [vmem:[%s6120_s15 + $0x10] sm:$0xff]  ;;  %s2085_s15 = ssub.s32 4, %s5652_s21 }
 0x179   : > { %1656 = vmatpush.bf16.msrb.mxu1 %v4209_v36  ;;  %1682 = vmatpush.bf16.msrb.mxu3 %v4217_v41 }
 0x17c   : > { %1669 = vmatpush.bf16.msrb.mxu2 %v4213_v37  ;;  %1644 = vmatpush.bf16.msrb.mxu0 %v4189_v47 }
 0x17d   : > { %1657 = vmatpush.bf16.msrb.mxu1 %v4193_v53  ;;  %1683 = vmatpush.bf16.msrb.mxu3 %v4201_v58 }
 0x180   : > { %1670 = vmatpush.bf16.msrb.mxu2 %v4197_v54  ;;  %1645 = vmatpush.bf16.msrb.mxu0 %v4173_v61 }
 0x181   : > { %1658 = vmatpush.bf16.msrb.mxu1 %v4177_v2  ;;  %1684 = vmatpush.bf16.msrb.mxu3 %v4185_v11 }
 0x184   : > { %1671 = vmatpush.bf16.msrb.mxu2 %v4181_v10  ;;  %1646 = vmatpush.bf16.msrb.mxu0 %v4157_v17  ;;  %v4412_v17 = vld [vmem:[%s5796_s1 + $0xe8] sm:$0xf] }
 0x185   : > { %1659 = vmatpush.bf16.msrb.mxu1 %v4161_v12  ;;  %1685 = vmatpush.bf16.msrb.mxu3 %v4169_v25  ;;  %v4413_v20 = vor.u32 %v5148_v18, %v4412_v17  ;;  %v4414_v12 = vld [vmem:[%s5796_s1 + $0xf8] sm:$0xf0]  ;;  %v5125_v17 = vld [vmem:[%s5796_s1 + $0x44] sm:$0xf] }
 0x188   : > { %1672 = vmatpush.bf16.msrb.mxu2 %v4165_v13  ;;  %v5141_v13 = vld [vmem:[%s5796_s1 + $0xc4] sm:$0xf] }
 0x18c   : > { %1990 = vmatpush.bf16.msra.mxu2 %v4413_v20  ;;  %v4332_v20 = vld [vmem:[%s5796_s1 + $0x48] sm:$0xf] }
 0x1e3   : > { %v1322_v40 = vpop.f32.mrf.mxu0 }
 0x1e4   : > { %v1365_v8 = vadd.f32 %v1322_v40, %v1116_v26  ;;  %v1335_v42 = vpop.f32.mrf.mxu1 }
 0x1e5   : > { %v1366_v46 = vadd.f32 %v1335_v42, %v1117_v35 }
 0x1e6   : > { %v4146_v51 = vmul.f32 -1.442695, %v1365_v8 }
 0x1e7   : > { %v4147_v57 = vmul.f32 -1.442695, %v1366_v46 }
 0x1e8   : > { %5402 = vpow2.f32 %v4146_v51 }
 0x1e9   : > { %5404 = vpow2.f32 %v4147_v57 }
 0x1ea   : > { %v1361_v9 = vpop.f32.mrf.mxu3 }
 0x1eb   : > { %v1368_v16 = vadd.f32 %v1361_v9, %v1119_v52  ;;  %v1324_v7 = vpop.f32.mrf.mxu0 }
 0x1ec   : > { %v1337_v21 = vpop.f32.mrf.mxu1  ;;  %v4406_v7 = vld [vmem:[%s5796_s1 + $0xf0] sm:$0xf0] }
 0x1ed   : > { %v4148_v24 = vmul.f32 -1.442695, %v1368_v16  ;;  %v4405_v16 = vor.u32 %v5147_v15, %v4404_v14  ;;  %v4409_v19 = vor.u32 %v5145_v6, %v4406_v7  ;;  %v5146_v21 = vld [vmem:[%s5796_s1 + $0xec] sm:$0xf]  ;;  %v5127_v7 = vld [vmem:[%s5796_s1 + $0x4c] sm:$0xf0] }
 0x1ee   : > { %v5403_v26 = vpop.eup %5402  ;;  %v1348_v27 = vpop.f32.mrf.mxu2  ;;  %v4417_v22 = vor.u32 %v5146_v21, %v4414_v12  ;;  %v5128_v21 = vld [vmem:[%s5796_s1 + $0x54] sm:$0xf0] }
 0x1ef   : > { %v5405_v28 = vpop.eup %5404  ;;  %v1372_v29 = vadd.f32 1.0, %v5403_v26  ;;  %5406 = vpow2.f32 %v4148_v24  ;;  %v1367_v34 = vadd.f32 %v1348_v27, %v1118_v31  ;;  %1964 = vmatpush.bf16.msra.mxu0 %v4405_v16  ;;  %1977 = vmatpush.bf16.msra.mxu1 %v4409_v19  ;;  %v5143_v24 = vld [vmem:[%s5796_s1 + $0xcc] sm:$0xf0]  ;;  %v4390_v26 = vld [vmem:[%s5796_s1 + $0xd0] sm:$0xf0] }
 0x1f0   : > { %v1391_v30 = vadd.f32 1.0, %v5405_v28  ;;  %2003 = vmatpush.bf16.msra.mxu3 %v4417_v22  ;;  %v4389_v25 = vor.u32 %v5143_v24, %v4388_v23  ;;  %v4396_v27 = vld [vmem:[%s5796_s1 + $0xc8] sm:$0xf]  ;;  %v5144_v28 = vld [vmem:[%s5796_s1 + $0xd4] sm:$0xf0] }
 0x1f1   : > { %5408 = vrcp.f32 %v1372_v29  ;;  %v1384_v42 = vand.u32 2147483648, %v1372_v29  ;;  %v1382_v45 = vand.u32 2147483647, %v1372_v29  ;;  %vm1378_vm14 = vweird.f32 %v1372_v29  ;;  %v5142_v31 = vld [vmem:[%s5796_s1 + $0xcc] sm:$0xf]  ;;  %v1445_v23 = vld [vmem:[%s6205_s30 + $0x18] sm:$0xff] }
 0x1f2   : > { %5410 = vrcp.f32 %v1391_v30  ;;  %v1363_v32 = vpop.f32.mrf.mxu3  ;;  %v1403_v43 = vand.u32 2147483648, %v1391_v30  ;;  %v1401_v47 = vand.u32 2147483647, %v1391_v30  ;;  %vm1397_vm15 = vweird.f32 %v1391_v30  ;;  %v4324_v16 = vld [vmem:[%s5796_s1 + $0x40] sm:$0xf] }
 0x1f3   : > { %v1385_v52 = vor.u32 1.1754944e-38, %v1384_v42  ;;  %vm1383_vm1 = vcmp.eq.f32.partialorder %v1382_v45, 8.507059e+37  ;;  %v4398_v32 = vld [vmem:[%s5796_s1 + $0xd8] sm:$0xf0]  ;;  %1965 = vmatpush.bf16.msra.mxu0 %v4389_v25  ;;  %v5138_v42 = vld [vmem:[%s5796_s1 + $0xac] sm:$0xf]  ;;  %v4325_v18 = vor.u32 %v5127_v7, %v4324_v16 }
 0x1f4   : > { %v1404_v54 = vor.u32 1.1754944e-38, %v1403_v43  ;;  %vm1402_vm3 = vcmp.eq.f32.partialorder %v1401_v47, 8.507059e+37  ;;  %v4382_v43 = vld [vmem:[%s5796_s1 + $0xb8] sm:$0xf0]  ;;  %v4356_v45 = vld [vmem:[%s5796_s1 + $0x80] sm:$0xf] }
 0x1f5   : > { %v5407_v33 = vpop.eup %5406  ;;  %v5133_v47 = vld [vmem:[%s5796_s1 + $0x84] sm:$0xf]  ;;  %v4326_v19 = vld [vmem:[%s5796_s1 + $0x50] sm:$0xf0]  ;;  %v5126_v25 = vld [vmem:[%s5796_s1 + $0x4c] sm:$0xf] }
 0x1f6   : > { %v1411_v35 = vadd.f32 1.0, %v5407_v33  ;;  %v1350_v36 = vpop.f32.mrf.mxu2  ;;  %v4401_v33 = vor.u32 %v5142_v31, %v4398_v32  ;;  %v4329_v24 = vor.u32 %v5125_v17, %v4326_v19  ;;  %v5121_v31 = vld [vmem:[%s5796_s1 + $0x24] sm:$0xf]  ;;  %v4310_v32 = vld [vmem:[%s5796_s1 + $0x30] sm:$0xf0] }
 0x1f7   : > { %v5409_v37 = vpop.eup %5408  ;;  %v5137_v36 = vld [vmem:[%s5796_s1 + $0xa4] sm:$0xf] }
 0x1f8   : > { %v5411_v38 = vpop.eup %5410  ;;  %v1374_v39 = vmul.f32 %v5409_v37, %v1372_v29  ;;  %5412 = vrcp.f32 %v1411_v35  ;;  %vm1379_vm12 = vweird.f32 %v5409_v37  ;;  %v1423_v2 = vand.u32 2147483648, %v1411_v35  ;;  %2004 = vmatpush.bf16.msra.mxu3 %v4401_v33  ;;  %v4316_v33 = vld [vmem:[%s5796_s1 + $0x28] sm:$0xf] }
 0x1f9   : > { %v1393_v40 = vmul.f32 %v5411_v38, %v1391_v30  ;;  %5414 = vtanh.f32 %v1367_v34  ;;  %vm1398_vm13 = vweird.f32 %v5411_v38  ;;  %vm1380_vm0 = vmor %vm1378_vm14, %vm1379_vm12  ;;  %vm1417_vm5 = vweird.f32 %v1411_v35  ;;  %v4372_v34 = vld [vmem:[%s5796_s1 + $0xa0] sm:$0xf] }
 0x1fa   : > { %v1375_v41 = vsub.f32 1.0, %v1374_v39  ;;  %vm1399_vm2 = vmor %vm1397_vm15, %vm1398_vm13  ;;  %v1421_v3 = vand.u32 2147483647, %v1411_v35  ;;  %v1424_v5 = vor.u32 1.1754944e-38, %v1423_v2  ;;  %v4393_v29 = vor.u32 %v5141_v13, %v4390_v26  ;;  %v4380_v39 = vld [vmem:[%s5796_s1 + $0xa8] sm:$0xf] }
 0x1fb   : > { %v1394_v8 = vsub.f32 1.0, %v1393_v40  ;;  %v4397_v30 = vor.u32 %v5144_v28, %v4396_v27  ;;  %v5140_v40 = vld [vmem:[%s5796_s1 + $0xb4] sm:$0xf0]  ;;  %v4348_v2 = vld [vmem:[%s5796_s1 + $0x68] sm:$0xf]  ;;  %v4333_v13 = vor.u32 %v5128_v21, %v4332_v20 }
 0x1fc   : > { %v1376_v44 = vmul.f32 %v5409_v37, %v1375_v41  ;;  %vm1422_vm7 = vcmp.eq.f32.partialorder %v1421_v3, 8.507059e+37  ;;  %1978 = vmatpush.bf16.msra.mxu1 %v4393_v29  ;;  %v5132_v3 = vld [vmem:[%s5796_s1 + $0x74] sm:$0xf0]  ;;  %v4334_v26 = vld [vmem:[%s5796_s1 + $0x58] sm:$0xf0] }
 0x1fd   : > { %v1395_v46 = vmul.f32 %v5411_v38, %v1394_v8  ;;  %1991 = vmatpush.bf16.msra.mxu2 %v4397_v30  ;;  %v4381_v8 = vor.u32 %v5140_v40, %v4380_v39  ;;  %v4308_v27 = vld [vmem:[%s5796_s1 + $0x20] sm:$0xf]  ;;  %v5123_v28 = vld [vmem:[%s5796_s1 + $0x2c] sm:$0xf0]  ;;  %v4337_v29 = vor.u32 %v5126_v25, %v4334_v26 }
 0x1fe   : > { %v5413_v48 = vpop.eup %5412  ;;  %v1377_v49 = vadd.f32 %v5409_v37, %v1376_v44  ;;  %v4385_v44 = vor.u32 %v5138_v42, %v4382_v43  ;;  %v4309_v30 = vor.u32 %v5123_v28, %v4308_v27  ;;  %v5119_v42 = vld [vmem:[%s5796_s1 + $0xc] sm:$0xf0]  ;;  %v5117_v43 = vld [vmem:[%s5796_s1 + $0x4] sm:$0xf] }
 0x1ff   : > { %v5415_v50 = vpop.eup %5414  ;;  %v1413_v51 = vmul.f32 %v5413_v48, %v1411_v35  ;;  %v1396_v53 = vadd.f32 %v5411_v38, %v1395_v46  ;;  %vm1418_vm4 = vweird.f32 %v5413_v48  ;;  %v5139_v35 = vld [vmem:[%s5796_s1 + $0xac] sm:$0xf0] }
 0x200   : > { %v1381_v55 = vsel %vm1380_vm0, %v5409_v37, %v1377_v49  ;;  %vm1419_vm6 = vmor %vm1417_vm5, %vm1418_vm4  ;;  %v4373_v37 = vor.u32 %v5139_v35, %v4372_v34  ;;  %v5135_v46 = vld [vmem:[%s5796_s1 + $0x8c] sm:$0xf0]  ;;  %2005 = vmatpush.bf16.msra.mxu3 %v4385_v44  ;;  %v4358_v49 = vld [vmem:[%s5796_s1 + $0x90] sm:$0xf0]  ;;  %v4313_v34 = vor.u32 %v5121_v31, %v4310_v32 }
 0x201   : > { %v1414_v56 = vsub.f32 1.0, %v1413_v51  ;;  %v1386_v57 = vsel %vm1383_vm1, %v1385_v52, %v1381_v55  ;;  %v1400_v58 = vsel %vm1399_vm2, %v5411_v38, %v1396_v53  ;;  %v4374_v38 = vld [vmem:[%s5796_s1 + $0xb0] sm:$0xf0]  ;;  %1992 = vmatpush.bf16.msra.mxu2 %v4381_v8  ;;  %v5136_v51 = vld [vmem:[%s5796_s1 + $0x94] sm:$0xf0]  ;;  %v4361_v52 = vor.u32 %v5133_v47, %v4358_v49 }
 0x202   : > { %v1405_v59 = vsel %vm1402_vm3, %v1404_v54, %v1400_v58  ;;  %v1428_v60 = vmul.f32 %v5415_v50, %v1386_v57  ;;  %v4377_v41 = vor.u32 %v5137_v36, %v4374_v38  ;;  %1966 = vmatpush.bf16.msra.mxu0 %v4373_v37  ;;  %v4364_v50 = vld [vmem:[%s5796_s1 + $0x88] sm:$0xf]  ;;  %v5134_v54 = vld [vmem:[%s5796_s1 + $0x8c] sm:$0xf]  ;;  %v4366_v55 = vld [vmem:[%s5796_s1 + $0x98] sm:$0xf0] }
 0x203   : > { %v1415_v61 = vmul.f32 %v5413_v48, %v1414_v56  ;;  %v1427_v63 = vmul.f32 %v1405_v59, %v5993_v62  ;;  %v4365_v53 = vor.u32 %v5136_v51, %v4364_v50  ;;  %v1442_v56 = vld [vmem:[%s6205_s30] sm:$0xff]  ;;  %v1443_v57 = vld [vmem:[%s6205_s30 + $0x8] sm:$0xff]  ;;  %v4369_v58 = vor.u32 %v5134_v54, %v4366_v55  ;;  %v5124_v35 = vld [vmem:[%s5796_s1 + $0x34] sm:$0xf0] }
 0x204   : > { %1979 = vmatpush.bf16.msra.mxu1 %v4377_v41  ;;  %v4340_v59 = vld [vmem:[%s5796_s1 + $0x60] sm:$0xf]  ;;  %v5122_v36 = vld [vmem:[%s5796_s1 + $0x2c] sm:$0xf]  ;;  %v4318_v37 = vld [vmem:[%s5796_s1 + $0x38] sm:$0xf0]  ;;  %v4317_v40 = vor.u32 %v5124_v35, %v4316_v33 }
 0x205   : > { %v6159_v0 = vadd.f32 %v1428_v60, %v1427_v63  ;;  %v1416_v1 = vadd.f32 %v5413_v48, %v1415_v61  ;;  %1993 = vmatpush.bf16.msra.mxu2 %v4365_v53  ;;  %v5131_v60 = vld [vmem:[%s5796_s1 + $0x6c] sm:$0xf0]  ;;  %v5129_v61 = vld [vmem:[%s5796_s1 + $0x64] sm:$0xf]  ;;  %2006 = vmatpush.bf16.msra.mxu3 %v4369_v58  ;;  %v4321_v41 = vor.u32 %v5122_v36, %v4318_v37  ;;  %v4292_v8 = vld [vmem:[%s5796_s1] sm:$0xf] }
 0x206   : > { %v4341_v63 = vor.u32 %v5131_v60, %v4340_v59  ;;  %v4293_v47 = vor.u32 %v5119_v42, %v4292_v8  ;;  %v4300_v49 = vld [vmem:[%s5796_s1 + $0x8] sm:$0xf]  ;;  %v5120_v50 = vld [vmem:[%s5796_s1 + $0x14] sm:$0xf0]  ;;  %v5118_v53 = vld [vmem:[%s5796_s1 + $0xc] sm:$0xf] }
 0x207   : > { %5416 = vtanh.f32 %v6159_v0  ;;  %v1420_v4 = vsel %vm1419_vm6, %v5413_v48, %v1416_v1  ;;  %v4357_v48 = vor.u32 %v5135_v46, %v4356_v45  ;;  %v4342_v1 = vld [vmem:[%s5796_s1 + $0x70] sm:$0xf0]  ;;  %v4302_v54 = vld [vmem:[%s5796_s1 + $0x18] sm:$0xf0]  ;;  %v5180_v8 = vld [vmem:[%s5796_s1 + $0xec] sm:$0xf0] }
 0x208   : > { %v1425_v62 = vsel %vm1422_vm7, %v1424_v5, %v1420_v4  ;;  %1980 = vmatpush.bf16.msra.mxu1 %v4361_v52  ;;  %v4345_v4 = vor.u32 %v5129_v61, %v4342_v1  ;;  %v4349_v5 = vor.u32 %v5132_v3, %v4348_v2  ;;  %v4301_v52 = vor.u32 %v5120_v50, %v4300_v49  ;;  %v1444_v1 = vld [vmem:[%s6205_s30 + $0x10] sm:$0xff]  ;;  %v5178_v42 = vld [vmem:[%s5796_s1 + $0xe4] sm:$0xf]  ;;  %v5179_v49 = vld [vmem:[%s5796_s1 + $0xec] sm:$0xf]  ;;  %s5310_s30 = smul.u32 4294967272, %s5652_s21 }
 0x209   : > { %1967 = vmatpush.bf16.msra.mxu0 %v4357_v48  ;;  %v4294_v48 = vld [vmem:[%s5796_s1 + $0x10] sm:$0xf0]  ;;  %v4550_v50 = vld [vmem:[%s5796_s1 + $0xf8] sm:$0xf0] }
 0x20a   : > { %1994 = vmatpush.bf16.msra.mxu2 %v4349_v5  ;;  %v4297_v51 = vor.u32 %v5117_v43, %v4294_v48 }
 0x20c   : > { %1981 = vmatpush.bf16.msra.mxu1 %v4345_v4 }
 0x20d   : > { %v5417_v9 = vpop.eup %5416  ;;  %1968 = vmatpush.bf16.msra.mxu0 %v4341_v63 }
 0x20e   : > { %v1431_v10 = vmul.f32 %v5417_v9, %v1425_v62  ;;  %v5130_v9 = vld [vmem:[%s5796_s1 + $0x6c] sm:$0xf]  ;;  %v4350_v62 = vld [vmem:[%s5796_s1 + $0x78] sm:$0xf0]  ;;  %1995 = vmatpush.bf16.msra.mxu2 %v4333_v13 }
 0x20f   : > { %v4353_v14 = vor.u32 %v5130_v9, %v4350_v62 }
 0x210   : > { %4150 = vst [vmem:[%s3602_s28 + $0x8] sm:$0xff] %v1431_v10  ;;  %v1446_v11 = vpack.c.bf16 %v1431_v10, %v1431_v10  ;;  %1982 = vmatpush.bf16.msra.mxu1 %v4329_v24  ;;  %s6334_s28 = sshll.u32 %s2085_s15, 3 }
 0x211   : > { %2007 = vmatpush.bf16.msra.mxu3 %v4353_v14  ;;  %1969 = vmatpush.bf16.msra.mxu0 %v4325_v18  ;;  %s2087_s16 = sshra.s32 %s6334_s28, 3  ;;  %s2408_s9 = scalar_lea.vmem [#allocation3], %s6334_s28 }
 0x212   : > { %1647 = vmatmul.bf16.vlgmr.msrb.gmra.mxu0 %v1446_v11  ;;  %1660 = vmatmul.bf16.vlgmr.msrb.gmra.mxu1 %v1446_v11  ;;  %s6353_s17 = sshll.u32 %s2087_s16, 5 }
 0x213   : > { %1673 = vmatmul.bf16.vlgmr.msrb.gmra.mxu2 %v1446_v11  ;;  %1686 = vmatmul.bf16.vlgmr.msrb.gmra.mxu3 %v1446_v11  ;;  %s6372_s25 = scalar_lea.vmem [#allocation2], %s6353_s17 }
 0x214   : > { %1983 = vmatpush.bf16.msra.mxu1 %v4313_v34  ;;  %1996 = vmatpush.bf16.msra.mxu2 %v4317_v40 }
 0x215   : > { %2008 = vmatpush.bf16.msra.mxu3 %v4337_v29  ;;  %1970 = vmatpush.bf16.msra.mxu0 %v4309_v30 }
 0x218   : > { %1984 = vmatpush.bf16.msra.mxu1 %v4297_v51  ;;  %1997 = vmatpush.bf16.msra.mxu2 %v4301_v52  ;;  %v4553_v51 = vor.u32 %v5179_v49, %v4550_v50  ;;  %v4524_v52 = vld [vmem:[%s5796_s1 + $0xc0] sm:$0xf]  ;;  %v5161_v49 = vld [vmem:[%s5796_s1 + $0x54] sm:$0xf0] }
 0x219   : > { %2009 = vmatpush.bf16.msra.mxu3 %v4321_v41  ;;  %1971 = vmatpush.bf16.msra.mxu0 %v4293_v47  ;;  %v4540_v41 = vld [vmem:[%s5796_s1 + $0xe0] sm:$0xf] }
 0x21a   : > { %v4541_v43 = vor.u32 %v5180_v8, %v4540_v41 }
 0x21d   : > { %2289 = vmatpush.bf16.msrb.mxu0 %v4541_v43  ;;  %v4460_v43 = vld [vmem:[%s5796_s1 + $0x40] sm:$0xf] }
 0x28f   : > { %v1648_v10 = vpop.f32.mrf.mxu0  ;;  %v1661_v11 = vpop.f32.mrf.mxu1 }
 0x290   : > { %v1691_v15 = vadd.f32 %v1648_v10, %v1442_v56  ;;  %v1692_v6 = vadd.f32 %v1661_v11, %v1443_v57  ;;  %v4305_v57 = vor.u32 %v5118_v53, %v4302_v54  ;;  %v5176_v53 = vld [vmem:[%s5796_s1 + $0xcc] sm:$0xf0]  ;;  %v5174_v54 = vld [vmem:[%s5796_s1 + $0xc4] sm:$0xf] }
 0x292   : > { %v4282_v12 = vmul.f32 -1.442695, %v1691_v15  ;;  %v4283_v22 = vmul.f32 -1.442695, %v1692_v6  ;;  %2010 = vmatpush.bf16.msra.mxu3 %v4305_v57  ;;  %v4532_v57 = vld [vmem:[%s5796_s1 + $0xc8] sm:$0xf] }
 0x294   : > { %5418 = vpow2.f32 %v4282_v12 }
 0x295   : > { %5420 = vpow2.f32 %v4283_v22 }
 0x296   : > { %v1674_v38 = vpop.f32.mrf.mxu2  ;;  %v1687_v39 = vpop.f32.mrf.mxu3  ;;  %2328 = vmatpush.bf16.msrb.mxu3 %v4553_v51 }
 0x297   : > { %v1694_v44 = vadd.f32 %v1687_v39, %v1445_v23  ;;  %v1650_v45 = vpop.f32.mrf.mxu0  ;;  %v1663_v46 = vpop.f32.mrf.mxu1  ;;  %v1693_v5 = vadd.f32 %v1674_v38, %v1444_v1 }
 0x298   : > { %v4548_v45 = vld [vmem:[%s5796_s1 + $0xe8] sm:$0xf]  ;;  %v5181_v46 = vld [vmem:[%s5796_s1 + $0xf4] sm:$0xf0] }
 0x299   : > { %v4284_v55 = vmul.f32 -1.442695, %v1694_v44  ;;  %v4542_v44 = vld [vmem:[%s5796_s1 + $0xf0] sm:$0xf0]  ;;  %v4549_v48 = vor.u32 %v5181_v46, %v4548_v45  ;;  %v5158_v45 = vld [vmem:[%s5796_s1 + $0x44] sm:$0xf] }
 0x29a   : > { %v5419_v56 = vpop.eup %5418  ;;  %v4545_v47 = vor.u32 %v5178_v42, %v4542_v44  ;;  %v5160_v44 = vld [vmem:[%s5796_s1 + $0x4c] sm:$0xf0] }
 0x29b   : > { %v5421_v58 = vpop.eup %5420  ;;  %v1698_v59 = vadd.f32 1.0, %v5419_v56  ;;  %5422 = vpow2.f32 %v4284_v55  ;;  %2315 = vmatpush.bf16.msrb.mxu2 %v4549_v48  ;;  %v4525_v55 = vor.u32 %v5176_v53, %v4524_v52  ;;  %v4526_v56 = vld [vmem:[%s5796_s1 + $0xd0] sm:$0xf0]  ;;  %v4461_v46 = vor.u32 %v5160_v44, %v4460_v43  ;;  %v4468_v48 = vld [vmem:[%s5796_s1 + $0x48] sm:$0xf]  ;;  %v1770_v52 = vld [vmem:[%s6290_s13 + $0x18] sm:$0xff] }
 0x29c   : > { %v1717_v60 = vadd.f32 1.0, %v5421_v58  ;;  %2302 = vmatpush.bf16.msrb.mxu1 %v4545_v47  ;;  %v5177_v58 = vld [vmem:[%s5796_s1 + $0xd4] sm:$0xf0]  ;;  %v4462_v47 = vld [vmem:[%s5796_s1 + $0x50] sm:$0xf0] }
 0x29d   : > { %5424 = vrcp.f32 %v1698_v59  ;;  %v1710_v15 = vand.u32 2147483648, %v1698_v59  ;;  %v1708_v7 = vand.u32 2147483647, %v1698_v59  ;;  %vm1704_vm10 = vweird.f32 %v1698_v59  ;;  %2290 = vmatpush.bf16.msrb.mxu0 %v4525_v55  ;;  %v5159_v55 = vld [vmem:[%s5796_s1 + $0x4c] sm:$0xf] }
 0x29e   : > { %5426 = vrcp.f32 %v1717_v60  ;;  %v1676_v61 = vpop.f32.mrf.mxu2  ;;  %v1689_v63 = vpop.f32.mrf.mxu3  ;;  %v1729_v6 = vand.u32 2147483648, %v1717_v60  ;;  %v1727_v18 = vand.u32 2147483647, %v1717_v60  ;;  %vm1723_vm11 = vweird.f32 %v1717_v60 }
 0x29f   : > { %v1711_v21 = vor.u32 1.1754944e-38, %v1710_v15  ;;  %vm1709_vm14 = vcmp.eq.f32.partialorder %v1708_v7, 8.507059e+37  ;;  %v5175_v61 = vld [vmem:[%s5796_s1 + $0xcc] sm:$0xf]  ;;  %v4534_v63 = vld [vmem:[%s5796_s1 + $0xd8] sm:$0xf0]  ;;  %v4465_v53 = vor.u32 %v5158_v45, %v4462_v47 }
 0x2a0   : > { %v1730_v23 = vor.u32 1.1754944e-38, %v1729_v6  ;;  %vm1728_vm15 = vcmp.eq.f32.partialorder %v1727_v18, 8.507059e+37  ;;  %v4537_v1 = vor.u32 %v5175_v61, %v4534_v63  ;;  %v5171_v15 = vld [vmem:[%s5796_s1 + $0xac] sm:$0xf]  ;;  %v4518_v6 = vld [vmem:[%s5796_s1 + $0xb8] sm:$0xf0] }
 0x2a1   : > { %v5423_v2 = vpop.eup %5422  ;;  %v4492_v7 = vld [vmem:[%s5796_s1 + $0x80] sm:$0xf]  ;;  %v5166_v18 = vld [vmem:[%s5796_s1 + $0x84] sm:$0xf]  ;;  %v4446_v63 = vld [vmem:[%s5796_s1 + $0x30] sm:$0xf0] }
 0x2a2   : > { %v1737_v3 = vadd.f32 1.0, %v5423_v2  ;;  %v4508_v2 = vld [vmem:[%s5796_s1 + $0xa0] sm:$0xf]  ;;  %2329 = vmatpush.bf16.msrb.mxu3 %v4537_v1  ;;  %v5154_v61 = vld [vmem:[%s5796_s1 + $0x24] sm:$0xf] }
 0x2a3   : > { %v5425_v4 = vpop.eup %5424  ;;  %v4452_v1 = vld [vmem:[%s5796_s1 + $0x28] sm:$0xf] }
 0x2a4   : > { %v5427_v9 = vpop.eup %5426  ;;  %v1700_v62 = vmul.f32 %v5425_v4, %v1698_v59  ;;  %5428 = vrcp.f32 %v1737_v3  ;;  %vm1705_vm8 = vweird.f32 %v5425_v4  ;;  %v1749_v34 = vand.u32 2147483648, %v1737_v3 }
 0x2a5   : > { %v1719_v10 = vmul.f32 %v5427_v9, %v1717_v60  ;;  %5430 = vtanh.f32 %v1693_v5  ;;  %vm1724_vm9 = vweird.f32 %v5427_v9  ;;  %vm1706_vm12 = vmor %vm1704_vm10, %vm1705_vm8  ;;  %vm1743_vm1 = vweird.f32 %v1737_v3 }
 0x2a6   : > { %v1701_v11 = vsub.f32 1.0, %v1700_v62  ;;  %vm1725_vm13 = vmor %vm1723_vm11, %vm1724_vm9  ;;  %v1747_v35 = vand.u32 2147483647, %v1737_v3  ;;  %v1750_v37 = vor.u32 1.1754944e-38, %v1749_v34  ;;  %v4529_v59 = vor.u32 %v5174_v54, %v4526_v56  ;;  %v4516_v62 = vld [vmem:[%s5796_s1 + $0xa8] sm:$0xf] }
 0x2a7   : > { %v1720_v14 = vsub.f32 1.0, %v1719_v10  ;;  %v4533_v60 = vor.u32 %v5177_v58, %v4532_v57  ;;  %v5173_v10 = vld [vmem:[%s5796_s1 + $0xb4] sm:$0xf0]  ;;  %v4484_v34 = vld [vmem:[%s5796_s1 + $0x68] sm:$0xf]  ;;  %v4469_v54 = vor.u32 %v5161_v49, %v4468_v48 }
 0x2a8   : > { %v1702_v16 = vmul.f32 %v5425_v4, %v1701_v11  ;;  %vm1748_vm3 = vcmp.eq.f32.partialorder %v1747_v35, 8.507059e+37  ;;  %2303 = vmatpush.bf16.msrb.mxu1 %v4529_v59  ;;  %v5165_v35 = vld [vmem:[%s5796_s1 + $0x74] sm:$0xf0]  ;;  %v4470_v56 = vld [vmem:[%s5796_s1 + $0x58] sm:$0xf0] }
 0x2a9   : > { %v1721_v17 = vmul.f32 %v5427_v9, %v1720_v14  ;;  %2316 = vmatpush.bf16.msrb.mxu2 %v4533_v60  ;;  %v4517_v14 = vor.u32 %v5173_v10, %v4516_v62  ;;  %v4444_v57 = vld [vmem:[%s5796_s1 + $0x20] sm:$0xf]  ;;  %v5156_v58 = vld [vmem:[%s5796_s1 + $0x2c] sm:$0xf0]  ;;  %v4473_v59 = vor.u32 %v5159_v55, %v4470_v56 }
 0x2aa   : > { %v5429_v19 = vpop.eup %5428  ;;  %v1703_v20 = vadd.f32 %v5425_v4, %v1702_v16  ;;  %v4521_v16 = vor.u32 %v5171_v15, %v4518_v6  ;;  %v4445_v60 = vor.u32 %v5156_v58, %v4444_v57  ;;  %v5152_v15 = vld [vmem:[%s5796_s1 + $0xc] sm:$0xf0]  ;;  %v5150_v6 = vld [vmem:[%s5796_s1 + $0x4] sm:$0xf] }
 0x2ab   : > { %v1722_v12 = vadd.f32 %v5427_v9, %v1721_v17  ;;  %v1739_v22 = vmul.f32 %v5429_v19, %v1737_v3  ;;  %v5431_v13 = vpop.eup %5430  ;;  %vm1744_vm0 = vweird.f32 %v5429_v19  ;;  %v5172_v3 = vld [vmem:[%s5796_s1 + $0xac] sm:$0xf0] }
 0x2ac   : > { %v1707_v24 = vsel %vm1706_vm12, %v5425_v4, %v1703_v20  ;;  %vm1745_vm2 = vmor %vm1743_vm1, %vm1744_vm0  ;;  %v5170_v4 = vld [vmem:[%s5796_s1 + $0xa4] sm:$0xf]  ;;  %v4509_v5 = vor.u32 %v5172_v3, %v4508_v2  ;;  %v5168_v17 = vld [vmem:[%s5796_s1 + $0x8c] sm:$0xf0]  ;;  %2330 = vmatpush.bf16.msrb.mxu3 %v4521_v16  ;;  %v4449_v2 = vor.u32 %v5154_v61, %v4446_v63 }
 0x2ad   : > { %v1712_v25 = vsel %vm1709_vm14, %v1711_v21, %v1707_v24  ;;  %v1726_v26 = vsel %vm1725_vm13, %v5427_v9, %v1722_v12  ;;  %v1740_v27 = vsub.f32 1.0, %v1739_v22  ;;  %v4510_v9 = vld [vmem:[%s5796_s1 + $0xb0] sm:$0xf0]  ;;  %2317 = vmatpush.bf16.msrb.mxu2 %v4517_v14  ;;  %v4500_v21 = vld [vmem:[%s5796_s1 + $0x88] sm:$0xf] }
 0x2ae   : > { %v1731_v28 = vsel %vm1728_vm15, %v1730_v23, %v1726_v26  ;;  %v1754_v29 = vmul.f32 %v5431_v13, %v1712_v25  ;;  %v4513_v11 = vor.u32 %v5170_v4, %v4510_v9  ;;  %2291 = vmatpush.bf16.msrb.mxu0 %v4509_v5  ;;  %v4494_v20 = vld [vmem:[%s5796_s1 + $0x90] sm:$0xf0]  ;;  %v5169_v12 = vld [vmem:[%s5796_s1 + $0x94] sm:$0xf0]  ;;  %v5167_v24 = vld [vmem:[%s5796_s1 + $0x8c] sm:$0xf] }
 0x2af   : > { %v1753_v30 = vmul.f32 %v1731_v28, %v6159_v0  ;;  %v1741_v31 = vmul.f32 %v5429_v19, %v1740_v27  ;;  %v4497_v22 = vor.u32 %v5166_v18, %v4494_v20  ;;  %v4501_v23 = vor.u32 %v5169_v12, %v4500_v21  ;;  %v4502_v13 = vld [vmem:[%s5796_s1 + $0x98] sm:$0xf0]  ;;  %v1767_v25 = vld [vmem:[%s6290_s13] sm:$0xff]  ;;  %v1768_v26 = vld [vmem:[%s6290_s13 + $0x8] sm:$0xff] }
 0x2b0   : > { %2304 = vmatpush.bf16.msrb.mxu1 %v4513_v11  ;;  %v4505_v27 = vor.u32 %v5167_v24, %v4502_v13  ;;  %v4476_v28 = vld [vmem:[%s5796_s1 + $0x60] sm:$0xf]  ;;  %v5157_v3 = vld [vmem:[%s5796_s1 + $0x34] sm:$0xf0]  ;;  %v5155_v4 = vld [vmem:[%s5796_s1 + $0x2c] sm:$0xf] }
 0x2b1   : > { %v6244_v32 = vadd.f32 %v1754_v29, %v1753_v30  ;;  %v1742_v33 = vadd.f32 %v5429_v19, %v1741_v31  ;;  %2318 = vmatpush.bf16.msrb.mxu2 %v4501_v23  ;;  %v5164_v29 = vld [vmem:[%s5796_s1 + $0x6c] sm:$0xf0]  ;;  %v5162_v30 = vld [vmem:[%s5796_s1 + $0x64] sm:$0xf]  ;;  %v4454_v5 = vld [vmem:[%s5796_s1 + $0x38] sm:$0xf0]  ;;  %v4453_v10 = vor.u32 %v5157_v3, %v4452_v1 }
 0x2b2   : > { %2331 = vmatpush.bf16.msrb.mxu3 %v4505_v27  ;;  %v4477_v31 = vor.u32 %v5164_v29, %v4476_v28  ;;  %v4457_v11 = vor.u32 %v5155_v4, %v4454_v5  ;;  %v4428_v14 = vld [vmem:[%s5796_s1] sm:$0xf]  ;;  %v4436_v20 = vld [vmem:[%s5796_s1 + $0x8] sm:$0xf]  ;;  %v5153_v21 = vld [vmem:[%s5796_s1 + $0x14] sm:$0xf0] }
 0x2b3   : > { %5432 = vtanh.f32 %v6244_v32  ;;  %v1746_v36 = vsel %vm1745_vm2, %v5429_v19, %v1742_v33  ;;  %v4493_v19 = vor.u32 %v5168_v17, %v4492_v7  ;;  %v4478_v33 = vld [vmem:[%s5796_s1 + $0x70] sm:$0xf0]  ;;  %v4429_v18 = vor.u32 %v5152_v15, %v4428_v14  ;;  %v5151_v23 = vld [vmem:[%s5796_s1 + $0xc] sm:$0xf]  ;;  %v4438_v24 = vld [vmem:[%s5796_s1 + $0x18] sm:$0xf0] }
 0x2b4   : > { %v1751_v38 = vsel %vm1748_vm3, %v1750_v37, %v1746_v36  ;;  %2305 = vmatpush.bf16.msrb.mxu1 %v4497_v22  ;;  %v4481_v36 = vor.u32 %v5162_v30, %v4478_v33  ;;  %v4485_v37 = vor.u32 %v5165_v35, %v4484_v34  ;;  %v4437_v22 = vor.u32 %v5153_v21, %v4436_v20  ;;  %v1769_v33 = vld [vmem:[%s6290_s13 + $0x10] sm:$0xff]  ;;  %v5213_v15 = vld [vmem:[%s5796_s1 + $0xe4] sm:$0xf]  ;;  %v5214_v20 = vld [vmem:[%s5796_s1 + $0xec] sm:$0xf]  ;;  %s3623_s13 = scalar_lea.vmem [#allocation3], %s5310_s30 }
 0x2b5   : > { %2292 = vmatpush.bf16.msrb.mxu0 %v4493_v19  ;;  %v4430_v19 = vld [vmem:[%s5796_s1 + $0x10] sm:$0xf0]  ;;  %v5215_v14 = vld [vmem:[%s5796_s1 + $0xec] sm:$0xf0]  ;;  %v4684_v21 = vld [vmem:[%s5796_s1 + $0xf8] sm:$0xf0] }
 0x2b6   : > { %2319 = vmatpush.bf16.msrb.mxu2 %v4485_v37  ;;  %v4433_v12 = vor.u32 %v5150_v6, %v4430_v19 }
 0x2b8   : > { %2306 = vmatpush.bf16.msrb.mxu1 %v4481_v36 }
 0x2b9   : > { %v5433_v0 = vpop.eup %5432  ;;  %2293 = vmatpush.bf16.msrb.mxu0 %v4477_v31 }
 0x2ba   : > { %v1757_v39 = vmul.f32 %v5433_v0, %v1751_v38  ;;  %v5163_v0 = vld [vmem:[%s5796_s1 + $0x6c] sm:$0xf]  ;;  %v4486_v38 = vld [vmem:[%s5796_s1 + $0x78] sm:$0xf0]  ;;  %2320 = vmatpush.bf16.msrb.mxu2 %v4469_v54 }
 0x2bb   : > { %v4489_v41 = vor.u32 %v5163_v0, %v4486_v38 }
 0x2bc   : > { %4286 = vst [vmem:[%s3608_s11 + $0x10] sm:$0xff] %v1757_v39  ;;  %v1771_v40 = vpack.c.bf16 %v1757_v39, %v1757_v39  ;;  %2307 = vmatpush.bf16.msrb.mxu1 %v4465_v53  ;;  %s6418_s11 = sadd.s32 40, %s5310_s30 }
 0x2bd   : > { %2332 = vmatpush.bf16.msrb.mxu3 %v4489_v41  ;;  %2294 = vmatpush.bf16.msrb.mxu0 %v4461_v46  ;;  %s2413_s27 = sshra.s32 %s6418_s11, 3 }
 0x2be   : > { %1972 = vmatmul.bf16.vlgmr.msra.gmra.mxu0 %v1771_v40  ;;  %1985 = vmatmul.bf16.vlgmr.msra.gmra.mxu1 %v1771_v40  ;;  %s6437_s26 = sshll.u32 %s2413_s27, 5 }
 0x2bf   : > { %1998 = vmatmul.bf16.vlgmr.msra.gmra.mxu2 %v1771_v40  ;;  %2011 = vmatmul.bf16.vlgmr.msra.gmra.mxu3 %v1771_v40  ;;  %s6456_s10 = scalar_lea.vmem [#allocation2], %s6437_s26 }
 0x2c0   : > { %2308 = vmatpush.bf16.msrb.mxu1 %v4449_v2  ;;  %2321 = vmatpush.bf16.msrb.mxu2 %v4453_v10 }
 0x2c1   : > { %2333 = vmatpush.bf16.msrb.mxu3 %v4473_v59  ;;  %2295 = vmatpush.bf16.msrb.mxu0 %v4445_v60 }
 0x2c4   : > { %2309 = vmatpush.bf16.msrb.mxu1 %v4433_v12  ;;  %2322 = vmatpush.bf16.msrb.mxu2 %v4437_v22  ;;  %v4687_v12 = vor.u32 %v5214_v20, %v4684_v21  ;;  %v4658_v22 = vld [vmem:[%s5796_s1 + $0xc0] sm:$0xf]  ;;  %v5196_v20 = vld [vmem:[%s5796_s1 + $0x54] sm:$0xf0] }
 0x2c5   : > { %2334 = vmatpush.bf16.msrb.mxu3 %v4457_v11  ;;  %2296 = vmatpush.bf16.msrb.mxu0 %v4429_v18  ;;  %v4674_v11 = vld [vmem:[%s5796_s1 + $0xe0] sm:$0xf] }
 0x2c6   : > { %v4675_v6 = vor.u32 %v5215_v14, %v4674_v11 }
 0x2c9   : > { %2615 = vmatpush.bf16.msra.mxu0 %v4675_v6  ;;  %v4594_v6 = vld [vmem:[%s5796_s1 + $0x40] sm:$0xf] }
 0x33b   : > { %v1973_v39 = vpop.f32.mrf.mxu0  ;;  %v1986_v40 = vpop.f32.mrf.mxu1 }
 0x33c   : > { %v2016_v8 = vadd.f32 %v1973_v39, %v1767_v25  ;;  %v2017_v42 = vadd.f32 %v1986_v40, %v1768_v26  ;;  %v4441_v26 = vor.u32 %v5151_v23, %v4438_v24  ;;  %v5211_v23 = vld [vmem:[%s5796_s1 + $0xcc] sm:$0xf0]  ;;  %v5209_v24 = vld [vmem:[%s5796_s1 + $0xc4] sm:$0xf] }
 0x33e   : > { %v4418_v50 = vmul.f32 -1.442695, %v2016_v8  ;;  %v4419_v51 = vmul.f32 -1.442695, %v2017_v42  ;;  %2335 = vmatpush.bf16.msrb.mxu3 %v4441_v26  ;;  %v4666_v26 = vld [vmem:[%s5796_s1 + $0xc8] sm:$0xf] }
 0x340   : > { %5434 = vpow2.f32 %v4418_v50 }
 0x341   : > { %5436 = vpow2.f32 %v4419_v51 }
 0x342   : > { %v1999_v9 = vpop.f32.mrf.mxu2  ;;  %v2012_v62 = vpop.f32.mrf.mxu3  ;;  %2654 = vmatpush.bf16.msra.mxu3 %v4687_v12 }
 0x343   : > { %v2019_v16 = vadd.f32 %v2012_v62, %v1770_v52  ;;  %v1975_v7 = vpop.f32.mrf.mxu0  ;;  %v1988_v17 = vpop.f32.mrf.mxu1  ;;  %v2018_v37 = vadd.f32 %v1999_v9, %v1769_v33 }
 0x344   : > { %v4682_v7 = vld [vmem:[%s5796_s1 + $0xe8] sm:$0xf]  ;;  %v5216_v17 = vld [vmem:[%s5796_s1 + $0xf4] sm:$0xf0] }
 0x345   : > { %v4420_v13 = vmul.f32 -1.442695, %v2019_v16  ;;  %v4676_v16 = vld [vmem:[%s5796_s1 + $0xf0] sm:$0xf0]  ;;  %v4683_v19 = vor.u32 %v5216_v17, %v4682_v7  ;;  %v5193_v7 = vld [vmem:[%s5796_s1 + $0x44] sm:$0xf] }
 0x346   : > { %v5435_v25 = vpop.eup %5434  ;;  %v4679_v18 = vor.u32 %v5213_v15, %v4676_v16  ;;  %v5195_v16 = vld [vmem:[%s5796_s1 + $0x4c] sm:$0xf0] }
 0x347   : > { %v5437_v27 = vpop.eup %5436  ;;  %v2023_v28 = vadd.f32 1.0, %v5435_v25  ;;  %5438 = vpow2.f32 %v4420_v13  ;;  %2641 = vmatpush.bf16.msra.mxu2 %v4683_v19  ;;  %v4659_v13 = vor.u32 %v5211_v23, %v4658_v22  ;;  %v4660_v25 = vld [vmem:[%s5796_s1 + $0xd0] sm:$0xf0]  ;;  %v4595_v17 = vor.u32 %v5195_v16, %v4594_v6  ;;  %v4602_v19 = vld [vmem:[%s5796_s1 + $0x48] sm:$0xf]  ;;  %v2095_v22 = vld [vmem:[%s6372_s25 + $0x18] sm:$0xff] }
 0x348   : > { %v2042_v29 = vadd.f32 1.0, %v5437_v27  ;;  %2628 = vmatpush.bf16.msra.mxu1 %v4679_v18  ;;  %v5212_v27 = vld [vmem:[%s5796_s1 + $0xd4] sm:$0xf0]  ;;  %v4596_v18 = vld [vmem:[%s5796_s1 + $0x50] sm:$0xf0] }
 0x349   : > { %5440 = vrcp.f32 %v2023_v28  ;;  %v2035_v8 = vand.u32 2147483648, %v2023_v28  ;;  %v2033_v44 = vand.u32 2147483647, %v2023_v28  ;;  %vm2029_vm6 = vweird.f32 %v2023_v28  ;;  %2616 = vmatpush.bf16.msra.mxu0 %v4659_v13  ;;  %v5194_v13 = vld [vmem:[%s5796_s1 + $0x4c] sm:$0xf] }
 0x34a   : > { %5442 = vrcp.f32 %v2042_v29  ;;  %v2001_v30 = vpop.f32.mrf.mxu2  ;;  %v2014_v31 = vpop.f32.mrf.mxu3  ;;  %v2054_v42 = vand.u32 2147483648, %v2042_v29  ;;  %v2052_v46 = vand.u32 2147483647, %v2042_v29  ;;  %vm2048_vm7 = vweird.f32 %v2042_v29 }
 0x34b   : > { %v2036_v49 = vor.u32 1.1754944e-38, %v2035_v8  ;;  %vm2034_vm10 = vcmp.eq.f32.partialorder %v2033_v44, 8.507059e+37  ;;  %v5210_v30 = vld [vmem:[%s5796_s1 + $0xcc] sm:$0xf]  ;;  %v4668_v31 = vld [vmem:[%s5796_s1 + $0xd8] sm:$0xf0]  ;;  %v4599_v23 = vor.u32 %v5193_v7, %v4596_v18 }
 0x34c   : > { %v2055_v52 = vor.u32 1.1754944e-38, %v2054_v42  ;;  %vm2053_vm11 = vcmp.eq.f32.partialorder %v2052_v46, 8.507059e+37  ;;  %v4671_v33 = vor.u32 %v5210_v30, %v4668_v31  ;;  %v5206_v8 = vld [vmem:[%s5796_s1 + $0xac] sm:$0xf]  ;;  %v4652_v42 = vld [vmem:[%s5796_s1 + $0xb8] sm:$0xf0] }
 0x34d   : > { %v5439_v34 = vpop.eup %5438  ;;  %v4626_v44 = vld [vmem:[%s5796_s1 + $0x80] sm:$0xf]  ;;  %v5201_v46 = vld [vmem:[%s5796_s1 + $0x84] sm:$0xf]  ;;  %v4580_v31 = vld [vmem:[%s5796_s1 + $0x30] sm:$0xf0] }
 0x34e   : > { %v2062_v35 = vadd.f32 1.0, %v5439_v34  ;;  %v4642_v34 = vld [vmem:[%s5796_s1 + $0xa0] sm:$0xf]  ;;  %2655 = vmatpush.bf16.msra.mxu3 %v4671_v33  ;;  %v5189_v30 = vld [vmem:[%s5796_s1 + $0x24] sm:$0xf] }
 0x34f   : > { %v5441_v36 = vpop.eup %5440  ;;  %v4586_v33 = vld [vmem:[%s5796_s1 + $0x28] sm:$0xf] }
 0x350   : > { %v5443_v0 = vpop.eup %5442  ;;  %v2025_v38 = vmul.f32 %v5441_v36, %v2023_v28  ;;  %5444 = vrcp.f32 %v2062_v35  ;;  %vm2030_vm4 = vweird.f32 %v5441_v36  ;;  %v2074_v2 = vand.u32 2147483648, %v2062_v35 }
 0x351   : > { %v2044_v39 = vmul.f32 %v5443_v0, %v2042_v29  ;;  %5446 = vtanh.f32 %v2018_v37  ;;  %vm2049_vm5 = vweird.f32 %v5443_v0  ;;  %vm2031_vm8 = vmor %vm2029_vm6, %vm2030_vm4  ;;  %vm2068_vm13 = vweird.f32 %v2062_v35 }
 0x352   : > { %v2026_v40 = vsub.f32 1.0, %v2025_v38  ;;  %vm2050_vm9 = vmor %vm2048_vm7, %vm2049_vm5  ;;  %v2072_v3 = vand.u32 2147483647, %v2062_v35  ;;  %v2075_v5 = vor.u32 1.1754944e-38, %v2074_v2  ;;  %v4663_v28 = vor.u32 %v5209_v24, %v4660_v25  ;;  %v4650_v38 = vld [vmem:[%s5796_s1 + $0xa8] sm:$0xf] }
 0x353   : > { %v2045_v41 = vsub.f32 1.0, %v2044_v39  ;;  %v4667_v29 = vor.u32 %v5212_v27, %v4666_v26  ;;  %v5208_v39 = vld [vmem:[%s5796_s1 + $0xb4] sm:$0xf0]  ;;  %v4618_v2 = vld [vmem:[%s5796_s1 + $0x68] sm:$0xf]  ;;  %v4603_v24 = vor.u32 %v5196_v20, %v4602_v19 }
 0x354   : > { %v2027_v43 = vmul.f32 %v5441_v36, %v2026_v40  ;;  %vm2073_vm15 = vcmp.eq.f32.partialorder %v2072_v3, 8.507059e+37  ;;  %2629 = vmatpush.bf16.msra.mxu1 %v4663_v28  ;;  %v5200_v3 = vld [vmem:[%s5796_s1 + $0x74] sm:$0xf0]  ;;  %v4604_v25 = vld [vmem:[%s5796_s1 + $0x58] sm:$0xf0] }
 0x355   : > { %v2046_v45 = vmul.f32 %v5443_v0, %v2045_v41  ;;  %2642 = vmatpush.bf16.msra.mxu2 %v4667_v29  ;;  %v4651_v41 = vor.u32 %v5208_v39, %v4650_v38  ;;  %v4578_v26 = vld [vmem:[%s5796_s1 + $0x20] sm:$0xf]  ;;  %v5191_v27 = vld [vmem:[%s5796_s1 + $0x2c] sm:$0xf0]  ;;  %v4607_v28 = vor.u32 %v5194_v13, %v4604_v25 }
 0x356   : > { %v5445_v47 = vpop.eup %5444  ;;  %v2028_v48 = vadd.f32 %v5441_v36, %v2027_v43  ;;  %v4655_v43 = vor.u32 %v5206_v8, %v4652_v42  ;;  %v4579_v29 = vor.u32 %v5191_v27, %v4578_v26  ;;  %v5187_v8 = vld [vmem:[%s5796_s1 + $0xc] sm:$0xf0]  ;;  %v5185_v42 = vld [vmem:[%s5796_s1 + $0x4] sm:$0xf] }
 0x357   : > { %v2047_v50 = vadd.f32 %v5443_v0, %v2046_v45  ;;  %v2064_v51 = vmul.f32 %v5445_v47, %v2062_v35  ;;  %v5447_v54 = vpop.eup %5446  ;;  %vm2069_vm12 = vweird.f32 %v5445_v47  ;;  %v5207_v35 = vld [vmem:[%s5796_s1 + $0xac] sm:$0xf0] }
 0x358   : > { %v2032_v53 = vsel %vm2031_vm8, %v5441_v36, %v2028_v48  ;;  %vm2070_vm14 = vmor %vm2068_vm13, %vm2069_vm12  ;;  %v5205_v36 = vld [vmem:[%s5796_s1 + $0xa4] sm:$0xf]  ;;  %v4643_v37 = vor.u32 %v5207_v35, %v4642_v34  ;;  %v5203_v45 = vld [vmem:[%s5796_s1 + $0x8c] sm:$0xf0]  ;;  %2656 = vmatpush.bf16.msra.mxu3 %v4655_v43  ;;  %v4583_v34 = vor.u32 %v5189_v30, %v4580_v31 }
 0x359   : > { %v2037_v55 = vsel %vm2034_vm10, %v2036_v49, %v2032_v53  ;;  %v2051_v56 = vsel %vm2050_vm9, %v5443_v0, %v2047_v50  ;;  %v2065_v57 = vsub.f32 1.0, %v2064_v51  ;;  %v4644_v0 = vld [vmem:[%s5796_s1 + $0xb0] sm:$0xf0]  ;;  %2643 = vmatpush.bf16.msra.mxu2 %v4651_v41  ;;  %v4634_v49 = vld [vmem:[%s5796_s1 + $0x88] sm:$0xf] }
 0x35a   : > { %v2056_v58 = vsel %vm2053_vm11, %v2055_v52, %v2051_v56  ;;  %v2079_v59 = vmul.f32 %v5447_v54, %v2037_v55  ;;  %v4647_v40 = vor.u32 %v5205_v36, %v4644_v0  ;;  %2617 = vmatpush.bf16.msra.mxu0 %v4643_v37  ;;  %v4628_v48 = vld [vmem:[%s5796_s1 + $0x90] sm:$0xf0]  ;;  %v5204_v50 = vld [vmem:[%s5796_s1 + $0x94] sm:$0xf0]  ;;  %v5202_v53 = vld [vmem:[%s5796_s1 + $0x8c] sm:$0xf] }
 0x35b   : > { %v2078_v60 = vmul.f32 %v2056_v58, %v6244_v32  ;;  %v2066_v61 = vmul.f32 %v5445_v47, %v2065_v57  ;;  %v4631_v51 = vor.u32 %v5201_v46, %v4628_v48  ;;  %v4635_v52 = vor.u32 %v5204_v50, %v4634_v49  ;;  %v4636_v54 = vld [vmem:[%s5796_s1 + $0x98] sm:$0xf0]  ;;  %v2092_v55 = vld [vmem:[%s6372_s25] sm:$0xff]  ;;  %v2093_v56 = vld [vmem:[%s6372_s25 + $0x8] sm:$0xff] }
 0x35c   : > { %2630 = vmatpush.bf16.msra.mxu1 %v4647_v40  ;;  %v4639_v57 = vor.u32 %v5202_v53, %v4636_v54  ;;  %v4610_v58 = vld [vmem:[%s5796_s1 + $0x60] sm:$0xf]  ;;  %v5192_v35 = vld [vmem:[%s5796_s1 + $0x34] sm:$0xf0]  ;;  %v5190_v36 = vld [vmem:[%s5796_s1 + $0x2c] sm:$0xf] }
 0x35d   : > { %v6329_v63 = vadd.f32 %v2079_v59, %v2078_v60  ;;  %v2067_v1 = vadd.f32 %v5445_v47, %v2066_v61  ;;  %2644 = vmatpush.bf16.msra.mxu2 %v4635_v52  ;;  %v5199_v59 = vld [vmem:[%s5796_s1 + $0x6c] sm:$0xf0]  ;;  %v5197_v60 = vld [vmem:[%s5796_s1 + $0x64] sm:$0xf]  ;;  %v4588_v37 = vld [vmem:[%s5796_s1 + $0x38] sm:$0xf0]  ;;  %v4587_v39 = vor.u32 %v5192_v35, %v4586_v33 }
 0x35e   : > { %2657 = vmatpush.bf16.msra.mxu3 %v4639_v57  ;;  %v4611_v61 = vor.u32 %v5199_v59, %v4610_v58  ;;  %v4591_v40 = vor.u32 %v5190_v36, %v4588_v37  ;;  %v4562_v41 = vld [vmem:[%s5796_s1] sm:$0xf]  ;;  %v4570_v48 = vld [vmem:[%s5796_s1 + $0x8] sm:$0xf]  ;;  %v5188_v49 = vld [vmem:[%s5796_s1 + $0x14] sm:$0xf0] }
 0x35f   : > { %5448 = vtanh.f32 %v6329_v63  ;;  %v2071_v4 = vsel %vm2070_vm14, %v5445_v47, %v2067_v1  ;;  %v4627_v47 = vor.u32 %v5203_v45, %v4626_v44  ;;  %v4612_v1 = vld [vmem:[%s5796_s1 + $0x70] sm:$0xf0]  ;;  %v4563_v46 = vor.u32 %v5187_v8, %v4562_v41  ;;  %v5186_v52 = vld [vmem:[%s5796_s1 + $0xc] sm:$0xf]  ;;  %v4572_v53 = vld [vmem:[%s5796_s1 + $0x18] sm:$0xf0] }
 0x360   : > { %v2076_v9 = vsel %vm2073_vm15, %v2075_v5, %v2071_v4  ;;  %2631 = vmatpush.bf16.msra.mxu1 %v4631_v51  ;;  %v4615_v4 = vor.u32 %v5197_v60, %v4612_v1  ;;  %v4619_v5 = vor.u32 %v5200_v3, %v4618_v2  ;;  %v4571_v51 = vor.u32 %v5188_v49, %v4570_v48  ;;  %v2094_v1 = vld [vmem:[%s6372_s25 + $0x10] sm:$0xff]  ;;  %v5248_v8 = vld [vmem:[%s5796_s1 + $0xe4] sm:$0xf]  ;;  %v5249_v48 = vld [vmem:[%s5796_s1 + $0xec] sm:$0xf]  ;;  %s5312_s25 = smul.u32 4294967240, %s5652_s21 }
 0x361   : > { %2618 = vmatpush.bf16.msra.mxu0 %v4627_v47  ;;  %v4564_v47 = vld [vmem:[%s5796_s1 + $0x10] sm:$0xf0]  ;;  %v5250_v41 = vld [vmem:[%s5796_s1 + $0xec] sm:$0xf0]  ;;  %v4820_v49 = vld [vmem:[%s5796_s1 + $0xf8] sm:$0xf0] }
 0x362   : > { %2645 = vmatpush.bf16.msra.mxu2 %v4619_v5  ;;  %v4567_v50 = vor.u32 %v5185_v42, %v4564_v47  ;;  %s3635_s26 = scalar_lea.vmem [#allocation3], %s5312_s25 }
 0x364   : > { %2632 = vmatpush.bf16.msra.mxu1 %v4615_v4 }
 0x365   : > { %v5449_v32 = vpop.eup %5448  ;;  %2619 = vmatpush.bf16.msra.mxu0 %v4611_v61 }
 0x366   : > { %v2082_v62 = vmul.f32 %v5449_v32, %v2076_v9  ;;  %v5198_v32 = vld [vmem:[%s5796_s1 + $0x6c] sm:$0xf]  ;;  %v4620_v9 = vld [vmem:[%s5796_s1 + $0x78] sm:$0xf0]  ;;  %2646 = vmatpush.bf16.msra.mxu2 %v4603_v24 }
 0x367   : > { %v4623_v11 = vor.u32 %v5198_v32, %v4620_v9 }
 0x368   : > { %4422 = vst [vmem:[%s3613_s14 + $0x18] sm:$0xff] %v2082_v62  ;;  %v2096_v10 = vpack.c.bf16 %v2082_v62, %v2082_v62  ;;  %2633 = vmatpush.bf16.msra.mxu1 %v4599_v23  ;;  %s5311_s14 = smul.u32 4294967256, %s5652_s21 }
 0x369   : > { %2658 = vmatpush.bf16.msra.mxu3 %v4623_v11  ;;  %2620 = vmatpush.bf16.msra.mxu0 %v4595_v17 }
 0x36a   : > { %2297 = vmatmul.bf16.vlgmr.msrb.gmra.mxu0 %v2096_v10  ;;  %2310 = vmatmul.bf16.vlgmr.msrb.gmra.mxu1 %v2096_v10  ;;  %s6503_s15 = sadd.s32 48, %s5311_s14 }
 0x36b   : > { %2323 = vmatmul.bf16.vlgmr.msrb.gmra.mxu2 %v2096_v10  ;;  %2336 = vmatmul.bf16.vlgmr.msrb.gmra.mxu3 %v2096_v10  ;;  %s2739_s28 = sshra.s32 %s6503_s15, 3 }
 0x36c   : > { %2634 = vmatpush.bf16.msra.mxu1 %v4583_v34  ;;  %2647 = vmatpush.bf16.msra.mxu2 %v4587_v39  ;;  %s6522_s16 = sshll.u32 %s2739_s28, 5 }
 0x36d   : > { %2659 = vmatpush.bf16.msra.mxu3 %v4607_v28  ;;  %2621 = vmatpush.bf16.msra.mxu0 %v4579_v29  ;;  %s6541_s17 = scalar_lea.vmem [#allocation2], %s6522_s16 }
 0x370   : > { %2635 = vmatpush.bf16.msra.mxu1 %v4567_v50  ;;  %2648 = vmatpush.bf16.msra.mxu2 %v4571_v51  ;;  %v4823_v50 = vor.u32 %v5249_v48, %v4820_v49  ;;  %v4794_v51 = vld [vmem:[%s5796_s1 + $0xc0] sm:$0xf]  ;;  %v5231_v48 = vld [vmem:[%s5796_s1 + $0x54] sm:$0xf0] }
 0x371   : > { %2660 = vmatpush.bf16.msra.mxu3 %v4591_v40  ;;  %2622 = vmatpush.bf16.msra.mxu0 %v4563_v46  ;;  %v4810_v40 = vld [vmem:[%s5796_s1 + $0xe0] sm:$0xf] }
 0x372   : > { %v4811_v42 = vor.u32 %v5250_v41, %v4810_v40 }
 0x375   : > { %2941 = vmatpush.bf16.msrb.mxu0 %v4811_v42  ;;  %v4730_v42 = vld [vmem:[%s5796_s1 + $0x40] sm:$0xf] }
 0x3e7   : > { %v2298_v62 = vpop.f32.mrf.mxu0  ;;  %v2311_v10 = vpop.f32.mrf.mxu1 }
 0x3e8   : > { %v2341_v14 = vadd.f32 %v2298_v62, %v2092_v55  ;;  %v2342_v15 = vadd.f32 %v2311_v10, %v2093_v56  ;;  %v4575_v56 = vor.u32 %v5186_v52, %v4572_v53  ;;  %v5246_v52 = vld [vmem:[%s5796_s1 + $0xcc] sm:$0xf0]  ;;  %v5244_v53 = vld [vmem:[%s5796_s1 + $0xc4] sm:$0xf] }
 0x3ea   : > { %v4554_v21 = vmul.f32 -1.442695, %v2341_v14  ;;  %v4555_v12 = vmul.f32 -1.442695, %v2342_v15  ;;  %2661 = vmatpush.bf16.msra.mxu3 %v4575_v56  ;;  %v4802_v56 = vld [vmem:[%s5796_s1 + $0xc8] sm:$0xf] }
 0x3ec   : > { %5450 = vpow2.f32 %v4554_v21 }
 0x3ed   : > { %5452 = vpow2.f32 %v4555_v12 }
 0x3ee   : > { %v2324_v0 = vpop.f32.mrf.mxu2  ;;  %v2337_v38 = vpop.f32.mrf.mxu3  ;;  %2980 = vmatpush.bf16.msrb.mxu3 %v4823_v50 }
 0x3ef   : > { %v2344_v43 = vadd.f32 %v2337_v38, %v2095_v22  ;;  %v2300_v44 = vpop.f32.mrf.mxu0  ;;  %v2313_v45 = vpop.f32.mrf.mxu1  ;;  %v2343_v5 = vadd.f32 %v2324_v0, %v2094_v1 }
 0x3f0   : > { %v4818_v44 = vld [vmem:[%s5796_s1 + $0xe8] sm:$0xf]  ;;  %v5251_v45 = vld [vmem:[%s5796_s1 + $0xf4] sm:$0xf0] }
 0x3f1   : > { %v4556_v54 = vmul.f32 -1.442695, %v2344_v43  ;;  %v4812_v43 = vld [vmem:[%s5796_s1 + $0xf0] sm:$0xf0]  ;;  %v4819_v47 = vor.u32 %v5251_v45, %v4818_v44  ;;  %v5228_v44 = vld [vmem:[%s5796_s1 + $0x44] sm:$0xf] }
 0x3f2   : > { %v5451_v55 = vpop.eup %5450  ;;  %v4815_v46 = vor.u32 %v5248_v8, %v4812_v43  ;;  %v5230_v43 = vld [vmem:[%s5796_s1 + $0x4c] sm:$0xf0] }
 0x3f3   : > { %v5453_v57 = vpop.eup %5452  ;;  %v2348_v58 = vadd.f32 1.0, %v5451_v55  ;;  %5454 = vpow2.f32 %v4556_v54  ;;  %2967 = vmatpush.bf16.msrb.mxu2 %v4819_v47  ;;  %v4795_v54 = vor.u32 %v5246_v52, %v4794_v51  ;;  %v4796_v55 = vld [vmem:[%s5796_s1 + $0xd0] sm:$0xf0]  ;;  %v4731_v45 = vor.u32 %v5230_v43, %v4730_v42  ;;  %v4738_v47 = vld [vmem:[%s5796_s1 + $0x48] sm:$0xf]  ;;  %v2421_v51 = vld [vmem:[%s6456_s10 + $0x18] sm:$0xff] }
 0x3f4   : > { %v2367_v59 = vadd.f32 1.0, %v5453_v57  ;;  %2954 = vmatpush.bf16.msrb.mxu1 %v4815_v46  ;;  %v5247_v57 = vld [vmem:[%s5796_s1 + $0xd4] sm:$0xf0]  ;;  %v4732_v46 = vld [vmem:[%s5796_s1 + $0x50] sm:$0xf0] }
 0x3f5   : > { %5456 = vrcp.f32 %v2348_v58  ;;  %v2360_v14 = vand.u32 2147483648, %v2348_v58  ;;  %v2358_v16 = vand.u32 2147483647, %v2348_v58  ;;  %vm2354_vm2 = vweird.f32 %v2348_v58  ;;  %2942 = vmatpush.bf16.msrb.mxu0 %v4795_v54  ;;  %v5229_v54 = vld [vmem:[%s5796_s1 + $0x4c] sm:$0xf] }
 0x3f6   : > { %5458 = vrcp.f32 %v2367_v59  ;;  %v2326_v60 = vpop.f32.mrf.mxu2  ;;  %v2339_v61 = vpop.f32.mrf.mxu3  ;;  %v2379_v15 = vand.u32 2147483648, %v2367_v59  ;;  %v2377_v17 = vand.u32 2147483647, %v2367_v59  ;;  %vm2373_vm3 = vweird.f32 %v2367_v59 }
 0x3f7   : > { %v2361_v20 = vor.u32 1.1754944e-38, %v2360_v14  ;;  %vm2359_vm6 = vcmp.eq.f32.partialorder %v2358_v16, 8.507059e+37  ;;  %v5245_v60 = vld [vmem:[%s5796_s1 + $0xcc] sm:$0xf]  ;;  %v4804_v61 = vld [vmem:[%s5796_s1 + $0xd8] sm:$0xf0]  ;;  %v4735_v52 = vor.u32 %v5228_v44, %v4732_v46 }
 0x3f8   : > { %v2380_v22 = vor.u32 1.1754944e-38, %v2379_v15  ;;  %vm2378_vm7 = vcmp.eq.f32.partialorder %v2377_v17, 8.507059e+37  ;;  %v4807_v1 = vor.u32 %v5245_v60, %v4804_v61  ;;  %v5241_v14 = vld [vmem:[%s5796_s1 + $0xac] sm:$0xf]  ;;  %v4788_v15 = vld [vmem:[%s5796_s1 + $0xb8] sm:$0xf0] }
 0x3f9   : > { %v5455_v2 = vpop.eup %5454  ;;  %v4762_v16 = vld [vmem:[%s5796_s1 + $0x80] sm:$0xf]  ;;  %v5236_v17 = vld [vmem:[%s5796_s1 + $0x84] sm:$0xf]  ;;  %v4716_v61 = vld [vmem:[%s5796_s1 + $0x30] sm:$0xf0] }
 0x3fa   : > { %v2387_v3 = vadd.f32 1.0, %v5455_v2  ;;  %v4778_v2 = vld [vmem:[%s5796_s1 + $0xa0] sm:$0xf]  ;;  %2981 = vmatpush.bf16.msrb.mxu3 %v4807_v1  ;;  %v5224_v60 = vld [vmem:[%s5796_s1 + $0x24] sm:$0xf] }
 0x3fb   : > { %v5457_v4 = vpop.eup %5456  ;;  %v4722_v1 = vld [vmem:[%s5796_s1 + $0x28] sm:$0xf] }
 0x3fc   : > { %v5459_v32 = vpop.eup %5458  ;;  %v2350_v9 = vmul.f32 %v5457_v4, %v2348_v58  ;;  %5460 = vrcp.f32 %v2387_v3  ;;  %vm2355_vm0 = vweird.f32 %v5457_v4  ;;  %v2399_v34 = vand.u32 2147483648, %v2387_v3 }
 0x3fd   : > { %v2369_v62 = vmul.f32 %v5459_v32, %v2367_v59  ;;  %5462 = vtanh.f32 %v2343_v5  ;;  %vm2374_vm1 = vweird.f32 %v5459_v32  ;;  %vm2356_vm4 = vmor %vm2354_vm2, %vm2355_vm0  ;;  %vm2393_vm9 = vweird.f32 %v2387_v3 }
 0x3fe   : > { %v2351_v10 = vsub.f32 1.0, %v2350_v9  ;;  %vm2375_vm5 = vmor %vm2373_vm3, %vm2374_vm1  ;;  %v2397_v35 = vand.u32 2147483647, %v2387_v3  ;;  %v2400_v37 = vor.u32 1.1754944e-38, %v2399_v34  ;;  %v4799_v58 = vor.u32 %v5244_v53, %v4796_v55  ;;  %v4786_v9 = vld [vmem:[%s5796_s1 + $0xa8] sm:$0xf] }
 0x3ff   : > { %v2370_v11 = vsub.f32 1.0, %v2369_v62  ;;  %v4803_v59 = vor.u32 %v5247_v57, %v4802_v56  ;;  %v5243_v62 = vld [vmem:[%s5796_s1 + $0xb4] sm:$0xf0]  ;;  %v4754_v34 = vld [vmem:[%s5796_s1 + $0x68] sm:$0xf]  ;;  %v4739_v53 = vor.u32 %v5231_v48, %v4738_v47 }
 0x400   : > { %v2352_v6 = vmul.f32 %v5457_v4, %v2351_v10  ;;  %vm2398_vm11 = vcmp.eq.f32.partialorder %v2397_v35, 8.507059e+37  ;;  %2955 = vmatpush.bf16.msrb.mxu1 %v4799_v58  ;;  %v5235_v35 = vld [vmem:[%s5796_s1 + $0x74] sm:$0xf0]  ;;  %v4740_v55 = vld [vmem:[%s5796_s1 + $0x58] sm:$0xf0] }
 0x401   : > { %v2371_v7 = vmul.f32 %v5459_v32, %v2370_v11  ;;  %2968 = vmatpush.bf16.msrb.mxu2 %v4803_v59  ;;  %v4787_v11 = vor.u32 %v5243_v62, %v4786_v9  ;;  %v4714_v56 = vld [vmem:[%s5796_s1 + $0x20] sm:$0xf]  ;;  %v5226_v57 = vld [vmem:[%s5796_s1 + $0x2c] sm:$0xf0]  ;;  %v4743_v58 = vor.u32 %v5229_v54, %v4740_v55 }
 0x402   : > { %v5461_v18 = vpop.eup %5460  ;;  %v2353_v19 = vadd.f32 %v5457_v4, %v2352_v6  ;;  %v4791_v6 = vor.u32 %v5241_v14, %v4788_v15  ;;  %v4715_v59 = vor.u32 %v5226_v57, %v4714_v56  ;;  %v5222_v14 = vld [vmem:[%s5796_s1 + $0xc] sm:$0xf0]  ;;  %v5220_v15 = vld [vmem:[%s5796_s1 + $0x4] sm:$0xf] }
 0x403   : > { %v2372_v21 = vadd.f32 %v5459_v32, %v2371_v7  ;;  %v2389_v12 = vmul.f32 %v5461_v18, %v2387_v3  ;;  %v5463_v24 = vpop.eup %5462  ;;  %vm2394_vm8 = vweird.f32 %v5461_v18  ;;  %v5242_v3 = vld [vmem:[%s5796_s1 + $0xac] sm:$0xf0] }
 0x404   : > { %v2357_v23 = vsel %vm2356_vm4, %v5457_v4, %v2353_v19  ;;  %vm2395_vm10 = vmor %vm2393_vm9, %vm2394_vm8  ;;  %v5240_v4 = vld [vmem:[%s5796_s1 + $0xa4] sm:$0xf]  ;;  %v4779_v5 = vor.u32 %v5242_v3, %v4778_v2  ;;  %v5238_v7 = vld [vmem:[%s5796_s1 + $0x8c] sm:$0xf0]  ;;  %2982 = vmatpush.bf16.msrb.mxu3 %v4791_v6  ;;  %v4719_v2 = vor.u32 %v5224_v60, %v4716_v61 }
 0x405   : > { %v2362_v13 = vsel %vm2359_vm6, %v2361_v20, %v2357_v23  ;;  %v2376_v25 = vsel %vm2375_vm5, %v5459_v32, %v2372_v21  ;;  %v2390_v26 = vsub.f32 1.0, %v2389_v12  ;;  %v4780_v32 = vld [vmem:[%s5796_s1 + $0xb0] sm:$0xf0]  ;;  %2969 = vmatpush.bf16.msrb.mxu2 %v4787_v11  ;;  %v4770_v20 = vld [vmem:[%s5796_s1 + $0x88] sm:$0xf] }
 0x406   : > { %v2381_v27 = vsel %vm2378_vm7, %v2380_v22, %v2376_v25  ;;  %v2404_v28 = vmul.f32 %v5463_v24, %v2362_v13  ;;  %v4783_v10 = vor.u32 %v5240_v4, %v4780_v32  ;;  %2943 = vmatpush.bf16.msrb.mxu0 %v4779_v5  ;;  %v4764_v19 = vld [vmem:[%s5796_s1 + $0x90] sm:$0xf0]  ;;  %v5239_v21 = vld [vmem:[%s5796_s1 + $0x94] sm:$0xf0]  ;;  %v5237_v23 = vld [vmem:[%s5796_s1 + $0x8c] sm:$0xf] }
 0x407   : > { %v2403_v29 = vmul.f32 %v2381_v27, %v6329_v63  ;;  %v2391_v30 = vmul.f32 %v5461_v18, %v2390_v26  ;;  %v4767_v12 = vor.u32 %v5236_v17, %v4764_v19  ;;  %v4771_v22 = vor.u32 %v5239_v21, %v4770_v20  ;;  %v4772_v24 = vld [vmem:[%s5796_s1 + $0x98] sm:$0xf0]  ;;  %v2418_v13 = vld [vmem:[%s6456_s10] sm:$0xff]  ;;  %v2419_v25 = vld [vmem:[%s6456_s10 + $0x8] sm:$0xff] }
 0x408   : > { %2956 = vmatpush.bf16.msrb.mxu1 %v4783_v10  ;;  %v4775_v26 = vor.u32 %v5237_v23, %v4772_v24  ;;  %v4746_v27 = vld [vmem:[%s5796_s1 + $0x60] sm:$0xf]  ;;  %v5227_v3 = vld [vmem:[%s5796_s1 + $0x34] sm:$0xf0]  ;;  %v5225_v4 = vld [vmem:[%s5796_s1 + $0x2c] sm:$0xf] }
 0x409   : > { %v6411_v31 = vadd.f32 %v2404_v28, %v2403_v29  ;;  %v2392_v33 = vadd.f32 %v5461_v18, %v2391_v30  ;;  %2970 = vmatpush.bf16.msrb.mxu2 %v4771_v22  ;;  %v5234_v28 = vld [vmem:[%s5796_s1 + $0x6c] sm:$0xf0]  ;;  %v5232_v29 = vld [vmem:[%s5796_s1 + $0x64] sm:$0xf]  ;;  %v4724_v5 = vld [vmem:[%s5796_s1 + $0x38] sm:$0xf0]  ;;  %v4723_v62 = vor.u32 %v5227_v3, %v4722_v1 }
 0x40a   : > { %2983 = vmatpush.bf16.msrb.mxu3 %v4775_v26  ;;  %v4747_v30 = vor.u32 %v5234_v28, %v4746_v27  ;;  %v4727_v10 = vor.u32 %v5225_v4, %v4724_v5  ;;  %v4698_v11 = vld [vmem:[%s5796_s1] sm:$0xf]  ;;  %v4706_v19 = vld [vmem:[%s5796_s1 + $0x8] sm:$0xf]  ;;  %v5223_v20 = vld [vmem:[%s5796_s1 + $0x14] sm:$0xf0] }
 0x40b   : > { %5464 = vtanh.f32 %v6411_v31  ;;  %v2396_v36 = vsel %vm2395_vm10, %v5461_v18, %v2392_v33  ;;  %v4763_v18 = vor.u32 %v5238_v7, %v4762_v16  ;;  %v4748_v33 = vld [vmem:[%s5796_s1 + $0x70] sm:$0xf0]  ;;  %v4699_v17 = vor.u32 %v5222_v14, %v4698_v11  ;;  %v5221_v22 = vld [vmem:[%s5796_s1 + $0xc] sm:$0xf]  ;;  %v4708_v23 = vld [vmem:[%s5796_s1 + $0x18] sm:$0xf0] }
 0x40c   : > { %v2401_v0 = vsel %vm2398_vm11, %v2400_v37, %v2396_v36  ;;  %2957 = vmatpush.bf16.msrb.mxu1 %v4767_v12  ;;  %v4751_v36 = vor.u32 %v5232_v29, %v4748_v33  ;;  %v4755_v37 = vor.u32 %v5235_v35, %v4754_v34  ;;  %v4707_v12 = vor.u32 %v5223_v20, %v4706_v19  ;;  %v2420_v33 = vld [vmem:[%s6456_s10 + $0x10] sm:$0xff]  ;;  %v5283_v14 = vld [vmem:[%s5796_s1 + $0xe4] sm:$0xf]  ;;  %v5284_v19 = vld [vmem:[%s5796_s1 + $0xec] sm:$0xf] }
 0x40d   : > { %2944 = vmatpush.bf16.msrb.mxu0 %v4763_v18  ;;  %v4700_v18 = vld [vmem:[%s5796_s1 + $0x10] sm:$0xf0]  ;;  %v5285_v11 = vld [vmem:[%s5796_s1 + $0xec] sm:$0xf0]  ;;  %v4956_v20 = vld [vmem:[%s5796_s1 + $0xf8] sm:$0xf0] }
 0x40e   : > { %2971 = vmatpush.bf16.msrb.mxu2 %v4755_v37  ;;  %v4703_v21 = vor.u32 %v5220_v15, %v4700_v18 }
 0x410   : > { %2958 = vmatpush.bf16.msrb.mxu1 %v4751_v36 }
 0x411   : > { %v5465_v63 = vpop.eup %5464  ;;  %2945 = vmatpush.bf16.msrb.mxu0 %v4747_v30 }
 0x412   : > { %v2407_v38 = vmul.f32 %v5465_v63, %v2401_v0  ;;  %v5233_v63 = vld [vmem:[%s5796_s1 + $0x6c] sm:$0xf]  ;;  %v4756_v0 = vld [vmem:[%s5796_s1 + $0x78] sm:$0xf0]  ;;  %2972 = vmatpush.bf16.msrb.mxu2 %v4739_v53 }
 0x413   : > { %v4759_v40 = vor.u32 %v5233_v63, %v4756_v0 }
 0x414   : > { %2409 = vst [vmem:[%s2408_s9] sm:$0xff] %v2407_v38  ;;  %v2422_v39 = vpack.c.bf16 %v2407_v38, %v2407_v38  ;;  %2959 = vmatpush.bf16.msrb.mxu1 %v4735_v52  ;;  %s5253_s9 = sadd.s32 56, %s5312_s25 }
 0x415   : > { %2984 = vmatpush.bf16.msrb.mxu3 %v4759_v40  ;;  %2946 = vmatpush.bf16.msrb.mxu0 %v4731_v45  ;;  %s3065_s30 = sshra.s32 %s5253_s9, 3 }
 0x416   : > { %2623 = vmatmul.bf16.vlgmr.msra.gmra.mxu0 %v2422_v39  ;;  %2636 = vmatmul.bf16.vlgmr.msra.gmra.mxu1 %v2422_v39  ;;  %s5254_s11 = sshll.u32 %s3065_s30, 5 }
 0x417   : > { %2649 = vmatmul.bf16.vlgmr.msra.gmra.mxu2 %v2422_v39  ;;  %2662 = vmatmul.bf16.vlgmr.msra.gmra.mxu3 %v2422_v39  ;;  %s3069_s27 = scalar_lea.vmem [#allocation2], %s5254_s11 }
 0x418   : > { %2960 = vmatpush.bf16.msrb.mxu1 %v4719_v2  ;;  %2973 = vmatpush.bf16.msrb.mxu2 %v4723_v62 }
 0x419   : > { %2985 = vmatpush.bf16.msrb.mxu3 %v4743_v58  ;;  %2947 = vmatpush.bf16.msrb.mxu0 %v4715_v59 }
 0x41c   : > { %2961 = vmatpush.bf16.msrb.mxu1 %v4703_v21  ;;  %2974 = vmatpush.bf16.msrb.mxu2 %v4707_v12  ;;  %v4959_v21 = vor.u32 %v5284_v19, %v4956_v20  ;;  %v4930_v12 = vld [vmem:[%s5796_s1 + $0xc0] sm:$0xf]  ;;  %v5266_v19 = vld [vmem:[%s5796_s1 + $0x54] sm:$0xf0] }
 0x41d   : > { %2986 = vmatpush.bf16.msrb.mxu3 %v4727_v10  ;;  %2948 = vmatpush.bf16.msrb.mxu0 %v4699_v17  ;;  %v4946_v10 = vld [vmem:[%s5796_s1 + $0xe0] sm:$0xf] }
 0x41e   : > { %v4947_v15 = vor.u32 %v5285_v11, %v4946_v10 }
 0x421   : > { %3267 = vmatpush.bf16.msra.mxu0 %v4947_v15  ;;  %v4866_v15 = vld [vmem:[%s5796_s1 + $0x40] sm:$0xf] }
 0x493   : > { %v2624_v38 = vpop.f32.mrf.mxu0  ;;  %v2637_v39 = vpop.f32.mrf.mxu1 }
 0x494   : > { %v2667_v41 = vadd.f32 %v2624_v38, %v2418_v13  ;;  %v2668_v8 = vadd.f32 %v2637_v39, %v2419_v25  ;;  %v4711_v25 = vor.u32 %v5221_v22, %v4708_v23  ;;  %v5281_v22 = vld [vmem:[%s5796_s1 + $0xcc] sm:$0xf0]  ;;  %v5279_v23 = vld [vmem:[%s5796_s1 + $0xc4] sm:$0xf] }
 0x496   : > { %v4688_v49 = vmul.f32 -1.442695, %v2667_v41  ;;  %v4689_v50 = vmul.f32 -1.442695, %v2668_v8  ;;  %2987 = vmatpush.bf16.msrb.mxu3 %v4711_v25  ;;  %v4938_v25 = vld [vmem:[%s5796_s1 + $0xc8] sm:$0xf] }
 0x498   : > { %5466 = vpow2.f32 %v4688_v49 }
 0x499   : > { %5468 = vpow2.f32 %v4689_v50 }
 0x49a   : > { %v2650_v32 = vpop.f32.mrf.mxu2  ;;  %v2663_v9 = vpop.f32.mrf.mxu3  ;;  %3306 = vmatpush.bf16.msra.mxu3 %v4959_v21 }
 0x49b   : > { %v2670_v6 = vadd.f32 %v2663_v9, %v2421_v51  ;;  %v2626_v16 = vpop.f32.mrf.mxu0  ;;  %v2639_v7 = vpop.f32.mrf.mxu1  ;;  %v2669_v37 = vadd.f32 %v2650_v32, %v2420_v33 }
 0x49c   : > { %v4954_v16 = vld [vmem:[%s5796_s1 + $0xe8] sm:$0xf]  ;;  %v5286_v7 = vld [vmem:[%s5796_s1 + $0xf4] sm:$0xf0] }
 0x49d   : > { %v4690_v24 = vmul.f32 -1.442695, %v2670_v6  ;;  %v4948_v6 = vld [vmem:[%s5796_s1 + $0xf0] sm:$0xf0]  ;;  %v4955_v18 = vor.u32 %v5286_v7, %v4954_v16  ;;  %v5263_v16 = vld [vmem:[%s5796_s1 + $0x44] sm:$0xf] }
 0x49e   : > { %v5467_v13 = vpop.eup %5466  ;;  %v4951_v17 = vor.u32 %v5283_v14, %v4948_v6  ;;  %v5265_v6 = vld [vmem:[%s5796_s1 + $0x4c] sm:$0xf0] }
 0x49f   : > { %v5469_v26 = vpop.eup %5468  ;;  %v2674_v27 = vadd.f32 1.0, %v5467_v13  ;;  %5470 = vpow2.f32 %v4690_v24  ;;  %3293 = vmatpush.bf16.msra.mxu2 %v4955_v18  ;;  %v4931_v24 = vor.u32 %v5281_v22, %v4930_v12  ;;  %v4932_v13 = vld [vmem:[%s5796_s1 + $0xd0] sm:$0xf0]  ;;  %v4867_v7 = vor.u32 %v5265_v6, %v4866_v15  ;;  %v4874_v18 = vld [vmem:[%s5796_s1 + $0x48] sm:$0xf]  ;;  %v2747_v12 = vld [vmem:[%s6541_s17 + $0x18] sm:$0xff] }
 0x4a0   : > { %v2693_v28 = vadd.f32 1.0, %v5469_v26  ;;  %3280 = vmatpush.bf16.msra.mxu1 %v4951_v17  ;;  %v5282_v26 = vld [vmem:[%s5796_s1 + $0xd4] sm:$0xf0]  ;;  %v4868_v17 = vld [vmem:[%s5796_s1 + $0x50] sm:$0xf0] }
 0x4a1   : > { %5472 = vrcp.f32 %v2674_v27  ;;  %v2686_v41 = vand.u32 2147483648, %v2674_v27  ;;  %v2684_v43 = vand.u32 2147483647, %v2674_v27  ;;  %vm2680_vm14 = vweird.f32 %v2674_v27  ;;  %3268 = vmatpush.bf16.msra.mxu0 %v4931_v24  ;;  %v5264_v24 = vld [vmem:[%s5796_s1 + $0x4c] sm:$0xf] }
 0x4a2   : > { %5474 = vrcp.f32 %v2693_v28  ;;  %v2652_v29 = vpop.f32.mrf.mxu2  ;;  %v2665_v30 = vpop.f32.mrf.mxu3  ;;  %v2705_v8 = vand.u32 2147483648, %v2693_v28  ;;  %v2703_v45 = vand.u32 2147483647, %v2693_v28  ;;  %vm2699_vm15 = vweird.f32 %v2693_v28 }
 0x4a3   : > { %v2687_v48 = vor.u32 1.1754944e-38, %v2686_v41  ;;  %vm2685_vm2 = vcmp.eq.f32.partialorder %v2684_v43, 8.507059e+37  ;;  %v5280_v29 = vld [vmem:[%s5796_s1 + $0xcc] sm:$0xf]  ;;  %v4940_v30 = vld [vmem:[%s5796_s1 + $0xd8] sm:$0xf0]  ;;  %v4871_v22 = vor.u32 %v5263_v16, %v4868_v17 }
 0x4a4   : > { %v2706_v51 = vor.u32 1.1754944e-38, %v2705_v8  ;;  %vm2704_vm3 = vcmp.eq.f32.partialorder %v2703_v45, 8.507059e+37  ;;  %v4943_v33 = vor.u32 %v5280_v29, %v4940_v30  ;;  %v5276_v41 = vld [vmem:[%s5796_s1 + $0xac] sm:$0xf]  ;;  %v4924_v8 = vld [vmem:[%s5796_s1 + $0xb8] sm:$0xf0] }
 0x4a5   : > { %v5471_v34 = vpop.eup %5470  ;;  %v4898_v43 = vld [vmem:[%s5796_s1 + $0x80] sm:$0xf]  ;;  %v5271_v45 = vld [vmem:[%s5796_s1 + $0x84] sm:$0xf]  ;;  %v4852_v30 = vld [vmem:[%s5796_s1 + $0x30] sm:$0xf0] }
 0x4a6   : > { %v2713_v35 = vadd.f32 1.0, %v5471_v34  ;;  %v4914_v34 = vld [vmem:[%s5796_s1 + $0xa0] sm:$0xf]  ;;  %3307 = vmatpush.bf16.msra.mxu3 %v4943_v33  ;;  %v5259_v29 = vld [vmem:[%s5796_s1 + $0x24] sm:$0xf] }
 0x4a7   : > { %v5473_v36 = vpop.eup %5472  ;;  %v4858_v33 = vld [vmem:[%s5796_s1 + $0x28] sm:$0xf] }
 0x4a8   : > { %v5475_v63 = vpop.eup %5474  ;;  %v2676_v0 = vmul.f32 %v5473_v36, %v2674_v27  ;;  %5476 = vrcp.f32 %v2713_v35  ;;  %vm2681_vm12 = vweird.f32 %v5473_v36  ;;  %v2725_v2 = vand.u32 2147483648, %v2713_v35 }
 0x4a9   : > { %v2695_v38 = vmul.f32 %v5475_v63, %v2693_v28  ;;  %5478 = vtanh.f32 %v2669_v37  ;;  %vm2700_vm13 = vweird.f32 %v5475_v63  ;;  %vm2682_vm0 = vmor %vm2680_vm14, %vm2681_vm12  ;;  %vm2719_vm5 = vweird.f32 %v2713_v35 }
 0x4aa   : > { %v2677_v39 = vsub.f32 1.0, %v2676_v0  ;;  %vm2701_vm1 = vmor %vm2699_vm15, %vm2700_vm13  ;;  %v2723_v3 = vand.u32 2147483647, %v2713_v35  ;;  %v2726_v5 = vor.u32 1.1754944e-38, %v2725_v2  ;;  %v4935_v27 = vor.u32 %v5279_v23, %v4932_v13  ;;  %v4922_v0 = vld [vmem:[%s5796_s1 + $0xa8] sm:$0xf] }
 0x4ab   : > { %v2696_v40 = vsub.f32 1.0, %v2695_v38  ;;  %v4939_v28 = vor.u32 %v5282_v26, %v4938_v25  ;;  %v5278_v38 = vld [vmem:[%s5796_s1 + $0xb4] sm:$0xf0]  ;;  %v4890_v2 = vld [vmem:[%s5796_s1 + $0x68] sm:$0xf]  ;;  %v4875_v23 = vor.u32 %v5266_v19, %v4874_v18 }
 0x4ac   : > { %v2678_v42 = vmul.f32 %v5473_v36, %v2677_v39  ;;  %vm2724_vm7 = vcmp.eq.f32.partialorder %v2723_v3, 8.507059e+37  ;;  %3281 = vmatpush.bf16.msra.mxu1 %v4935_v27  ;;  %v5270_v3 = vld [vmem:[%s5796_s1 + $0x74] sm:$0xf0]  ;;  %v4876_v13 = vld [vmem:[%s5796_s1 + $0x58] sm:$0xf0] }
 0x4ad   : > { %v2697_v44 = vmul.f32 %v5475_v63, %v2696_v40  ;;  %3294 = vmatpush.bf16.msra.mxu2 %v4939_v28  ;;  %v4923_v40 = vor.u32 %v5278_v38, %v4922_v0  ;;  %v4850_v25 = vld [vmem:[%s5796_s1 + $0x20] sm:$0xf]  ;;  %v5261_v26 = vld [vmem:[%s5796_s1 + $0x2c] sm:$0xf0]  ;;  %v4879_v27 = vor.u32 %v5264_v24, %v4876_v13 }
 0x4ae   : > { %v5477_v46 = vpop.eup %5476  ;;  %v2679_v47 = vadd.f32 %v5473_v36, %v2678_v42  ;;  %v4927_v42 = vor.u32 %v5276_v41, %v4924_v8  ;;  %v4851_v28 = vor.u32 %v5261_v26, %v4850_v25  ;;  %v5257_v41 = vld [vmem:[%s5796_s1 + $0xc] sm:$0xf0]  ;;  %v5255_v8 = vld [vmem:[%s5796_s1 + $0x4] sm:$0xf] }
 0x4af   : > { %v2698_v49 = vadd.f32 %v5475_v63, %v2697_v44  ;;  %v2715_v50 = vmul.f32 %v5477_v46, %v2713_v35  ;;  %v5479_v53 = vpop.eup %5478  ;;  %vm2720_vm4 = vweird.f32 %v5477_v46  ;;  %v5277_v35 = vld [vmem:[%s5796_s1 + $0xac] sm:$0xf0] }
 0x4b0   : > { %v2683_v52 = vsel %vm2682_vm0, %v5473_v36, %v2679_v47  ;;  %vm2721_vm6 = vmor %vm2719_vm5, %vm2720_vm4  ;;  %v5275_v36 = vld [vmem:[%s5796_s1 + $0xa4] sm:$0xf]  ;;  %v4915_v37 = vor.u32 %v5277_v35, %v4914_v34  ;;  %v5273_v44 = vld [vmem:[%s5796_s1 + $0x8c] sm:$0xf0]  ;;  %3308 = vmatpush.bf16.msra.mxu3 %v4927_v42  ;;  %v4855_v34 = vor.u32 %v5259_v29, %v4852_v30 }
 0x4b1   : > { %v2688_v54 = vsel %vm2685_vm2, %v2687_v48, %v2683_v52  ;;  %v2702_v55 = vsel %vm2701_vm1, %v5475_v63, %v2698_v49  ;;  %v2716_v56 = vsub.f32 1.0, %v2715_v50  ;;  %v4916_v63 = vld [vmem:[%s5796_s1 + $0xb0] sm:$0xf0]  ;;  %3295 = vmatpush.bf16.msra.mxu2 %v4923_v40  ;;  %v4906_v48 = vld [vmem:[%s5796_s1 + $0x88] sm:$0xf] }
 0x4b2   : > { %v2707_v57 = vsel %vm2704_vm3, %v2706_v51, %v2702_v55  ;;  %v2730_v58 = vmul.f32 %v5479_v53, %v2688_v54  ;;  %v4919_v39 = vor.u32 %v5275_v36, %v4916_v63  ;;  %3269 = vmatpush.bf16.msra.mxu0 %v4915_v37  ;;  %v4900_v47 = vld [vmem:[%s5796_s1 + $0x90] sm:$0xf0]  ;;  %v5274_v49 = vld [vmem:[%s5796_s1 + $0x94] sm:$0xf0]  ;;  %v5272_v52 = vld [vmem:[%s5796_s1 + $0x8c] sm:$0xf] }
 0x4b3   : > { %v2729_v59 = vmul.f32 %v2707_v57, %v6411_v31  ;;  %v2717_v60 = vmul.f32 %v5477_v46, %v2716_v56  ;;  %v4903_v50 = vor.u32 %v5271_v45, %v4900_v47  ;;  %v4907_v51 = vor.u32 %v5274_v49, %v4906_v48  ;;  %v4908_v53 = vld [vmem:[%s5796_s1 + $0x98] sm:$0xf0]  ;;  %v2744_v54 = vld [vmem:[%s6541_s17] sm:$0xff]  ;;  %v2745_v55 = vld [vmem:[%s6541_s17 + $0x8] sm:$0xff] }
 0x4b4   : > { %3282 = vmatpush.bf16.msra.mxu1 %v4919_v39  ;;  %v4911_v56 = vor.u32 %v5272_v52, %v4908_v53  ;;  %v4882_v57 = vld [vmem:[%s5796_s1 + $0x60] sm:$0xf]  ;;  %v5262_v35 = vld [vmem:[%s5796_s1 + $0x34] sm:$0xf0]  ;;  %v5260_v36 = vld [vmem:[%s5796_s1 + $0x2c] sm:$0xf] }
 0x4b5   : > { %v6495_v61 = vadd.f32 %v2730_v58, %v2729_v59  ;;  %v2718_v1 = vadd.f32 %v5477_v46, %v2717_v60  ;;  %3296 = vmatpush.bf16.msra.mxu2 %v4907_v51  ;;  %v5269_v58 = vld [vmem:[%s5796_s1 + $0x6c] sm:$0xf0]  ;;  %v5267_v59 = vld [vmem:[%s5796_s1 + $0x64] sm:$0xf]  ;;  %v4860_v37 = vld [vmem:[%s5796_s1 + $0x38] sm:$0xf0]  ;;  %v4859_v38 = vor.u32 %v5262_v35, %v4858_v33 }
 0x4b6   : > { %3309 = vmatpush.bf16.msra.mxu3 %v4911_v56  ;;  %v4883_v60 = vor.u32 %v5269_v58, %v4882_v57  ;;  %v4863_v39 = vor.u32 %v5260_v36, %v4860_v37  ;;  %v4834_v40 = vld [vmem:[%s5796_s1] sm:$0xf]  ;;  %v4842_v47 = vld [vmem:[%s5796_s1 + $0x8] sm:$0xf]  ;;  %v5258_v48 = vld [vmem:[%s5796_s1 + $0x14] sm:$0xf0] }
 0x4b7   : > { %5480 = vtanh.f32 %v6495_v61  ;;  %v2722_v4 = vsel %vm2721_vm6, %v5477_v46, %v2718_v1  ;;  %v4899_v46 = vor.u32 %v5273_v44, %v4898_v43  ;;  %v4884_v1 = vld [vmem:[%s5796_s1 + $0x70] sm:$0xf0]  ;;  %v4835_v45 = vor.u32 %v5257_v41, %v4834_v40  ;;  %v5256_v51 = vld [vmem:[%s5796_s1 + $0xc] sm:$0xf]  ;;  %v4844_v52 = vld [vmem:[%s5796_s1 + $0x18] sm:$0xf0] }
 0x4b8   : > { %v2727_v32 = vsel %vm2724_vm7, %v2726_v5, %v2722_v4  ;;  %3283 = vmatpush.bf16.msra.mxu1 %v4903_v50  ;;  %v4887_v4 = vor.u32 %v5267_v59, %v4884_v1  ;;  %v4891_v5 = vor.u32 %v5270_v3, %v4890_v2  ;;  %v4843_v50 = vor.u32 %v5258_v48, %v4842_v47  ;;  %v2746_v1 = vld [vmem:[%s6541_s17 + $0x10] sm:$0xff]  ;;  %v3071_v40 = vld [vmem:[%s3069_s27 + $0x8] sm:$0xff] }
 0x4b9   : > { %3270 = vmatpush.bf16.msra.mxu0 %v4899_v46  ;;  %v4836_v46 = vld [vmem:[%s5796_s1 + $0x10] sm:$0xf0] }
 0x4ba   : > { %3297 = vmatpush.bf16.msra.mxu2 %v4891_v5  ;;  %v4839_v49 = vor.u32 %v5255_v8, %v4836_v46  ;;  %v3073_v46 = vld [vmem:[%s3069_s27 + $0x18] sm:$0xff] }
 0x4bc   : > { %3284 = vmatpush.bf16.msra.mxu1 %v4887_v4 }
 0x4bd   : > { %v5481_v31 = vpop.eup %5480  ;;  %3271 = vmatpush.bf16.msra.mxu0 %v4883_v60 }
 0x4be   : > { %v2733_v9 = vmul.f32 %v5481_v31, %v2727_v32  ;;  %v5268_v31 = vld [vmem:[%s5796_s1 + $0x6c] sm:$0xf]  ;;  %v4892_v32 = vld [vmem:[%s5796_s1 + $0x78] sm:$0xf0]  ;;  %3298 = vmatpush.bf16.msra.mxu2 %v4875_v23  ;;  %s3629_s1 = scalar_lea.vmem [#allocation3], %s5311_s14 }
 0x4bf   : > { %v4895_v10 = vor.u32 %v5268_v31, %v4892_v32 }
 0x4c0   : > { %4692 = vst [vmem:[%s3623_s13 + $0x28] sm:$0xff] %v2733_v9  ;;  %v2748_v62 = vpack.c.bf16 %v2733_v9, %v2733_v9  ;;  %3285 = vmatpush.bf16.msra.mxu1 %v4871_v22 }
 0x4c1   : > { %3310 = vmatpush.bf16.msra.mxu3 %v4895_v10  ;;  %3272 = vmatpush.bf16.msra.mxu0 %v4867_v7 }
 0x4c2   : > { %2949 = vmatmul.bf16.vlgmr.msrb.gmra.mxu0 %v2748_v62  ;;  %2962 = vmatmul.bf16.vlgmr.msrb.gmra.mxu1 %v2748_v62 }
 0x4c3   : > { %2975 = vmatmul.bf16.vlgmr.msrb.gmra.mxu2 %v2748_v62  ;;  %2988 = vmatmul.bf16.vlgmr.msrb.gmra.mxu3 %v2748_v62 }
 0x4c4   : > { %3286 = vmatpush.bf16.msra.mxu1 %v4855_v34  ;;  %3299 = vmatpush.bf16.msra.mxu2 %v4859_v38 }
 0x4c5   : > { %3311 = vmatpush.bf16.msra.mxu3 %v4879_v27  ;;  %3273 = vmatpush.bf16.msra.mxu0 %v4851_v28 }
 0x4c8   : > { %3287 = vmatpush.bf16.msra.mxu1 %v4839_v49  ;;  %3300 = vmatpush.bf16.msra.mxu2 %v4843_v50 }
 0x4c9   : > { %3312 = vmatpush.bf16.msra.mxu3 %v4863_v39  ;;  %3274 = vmatpush.bf16.msra.mxu0 %v4835_v45  ;;  %v3070_v39 = vld [vmem:[%s3069_s27] sm:$0xff] }
 0x53f   : > { %v2950_v9 = vpop.f32.mrf.mxu0  ;;  %v2963_v62 = vpop.f32.mrf.mxu1 }
 0x540   : > { %v2993_v11 = vadd.f32 %v2950_v9, %v2744_v54  ;;  %v2994_v14 = vadd.f32 %v2963_v62, %v2745_v55  ;;  %v4847_v55 = vor.u32 %v5256_v51, %v4844_v52 }
 0x542   : > { %v4824_v20 = vmul.f32 -1.442695, %v2993_v11  ;;  %v4825_v21 = vmul.f32 -1.442695, %v2994_v14  ;;  %3313 = vmatpush.bf16.msra.mxu3 %v4847_v55 }
 0x544   : > { %5482 = vpow2.f32 %v4824_v20 }
 0x545   : > { %5484 = vpow2.f32 %v4825_v21 }
 0x546   : > { %v2976_v63 = vpop.f32.mrf.mxu2  ;;  %v2989_v0 = vpop.f32.mrf.mxu3 }
 0x547   : > { %v2996_v42 = vadd.f32 %v2989_v0, %v2747_v12  ;;  %v2952_v43 = vpop.f32.mrf.mxu0  ;;  %v2965_v44 = vpop.f32.mrf.mxu1  ;;  %v2995_v5 = vadd.f32 %v2976_v63, %v2746_v1 }
 0x549   : > { %v4826_v53 = vmul.f32 -1.442695, %v2996_v42 }
 0x54a   : > { %v5483_v54 = vpop.eup %5482 }
 0x54b   : > { %v5485_v56 = vpop.eup %5484  ;;  %v3000_v57 = vadd.f32 1.0, %v5483_v54  ;;  %5486 = vpow2.f32 %v4826_v53 }
 0x54c   : > { %v3019_v58 = vadd.f32 1.0, %v5485_v56 }
 0x54d   : > { %5488 = vrcp.f32 %v3000_v57  ;;  %v3012_v11 = vand.u32 2147483648, %v3000_v57  ;;  %v3010_v6 = vand.u32 2147483647, %v3000_v57  ;;  %vm3006_vm10 = vweird.f32 %v3000_v57 }
 0x54e   : > { %5490 = vrcp.f32 %v3019_v58  ;;  %v2978_v59 = vpop.f32.mrf.mxu2  ;;  %v2991_v60 = vpop.f32.mrf.mxu3  ;;  %v3031_v14 = vand.u32 2147483648, %v3019_v58  ;;  %v3029_v7 = vand.u32 2147483647, %v3019_v58  ;;  %vm3025_vm11 = vweird.f32 %v3019_v58 }
 0x54f   : > { %v3013_v19 = vor.u32 1.1754944e-38, %v3012_v11  ;;  %vm3011_vm14 = vcmp.eq.f32.partialorder %v3010_v6, 8.507059e+37  ;;  %v3072_v59 = vld [vmem:[%s3069_s27 + $0x10] sm:$0xff] }
 0x550   : > { %v3032_v12 = vor.u32 1.1754944e-38, %v3031_v14  ;;  %vm3030_vm15 = vcmp.eq.f32.partialorder %v3029_v7, 8.507059e+37 }
 0x551   : > { %v5487_v2 = vpop.eup %5486 }
 0x552   : > { %v3039_v3 = vadd.f32 1.0, %v5487_v2 }
 0x553   : > { %v5489_v4 = vpop.eup %5488 }
 0x554   : > { %v5491_v31 = vpop.eup %5490  ;;  %v3002_v32 = vmul.f32 %v5489_v4, %v3000_v57  ;;  %5492 = vrcp.f32 %v3039_v3  ;;  %vm3007_vm8 = vweird.f32 %v5489_v4  ;;  %v3051_v34 = vand.u32 2147483648, %v3039_v3 }
 0x555   : > { %v3021_v9 = vmul.f32 %v5491_v31, %v3019_v58  ;;  %5494 = vtanh.f32 %v2995_v5  ;;  %vm3026_vm9 = vweird.f32 %v5491_v31  ;;  %vm3008_vm12 = vmor %vm3006_vm10, %vm3007_vm8  ;;  %vm3045_vm1 = vweird.f32 %v3039_v3 }
 0x556   : > { %v3003_v62 = vsub.f32 1.0, %v3002_v32  ;;  %vm3027_vm13 = vmor %vm3025_vm11, %vm3026_vm9  ;;  %v3049_v35 = vand.u32 2147483647, %v3039_v3  ;;  %v3052_v37 = vor.u32 1.1754944e-38, %v3051_v34 }
 0x557   : > { %v3022_v10 = vsub.f32 1.0, %v3021_v9 }
 0x558   : > { %v3004_v15 = vmul.f32 %v5489_v4, %v3003_v62  ;;  %vm3050_vm3 = vcmp.eq.f32.partialorder %v3049_v35, 8.507059e+37 }
 0x559   : > { %v3023_v16 = vmul.f32 %v5491_v31, %v3022_v10 }
 0x55a   : > { %v5493_v17 = vpop.eup %5492  ;;  %v3005_v18 = vadd.f32 %v5489_v4, %v3004_v15 }
 0x55b   : > { %v3024_v20 = vadd.f32 %v5491_v31, %v3023_v16  ;;  %v3041_v21 = vmul.f32 %v5493_v17, %v3039_v3  ;;  %v5495_v23 = vpop.eup %5494  ;;  %vm3046_vm0 = vweird.f32 %v5493_v17 }
 0x55c   : > { %v3009_v22 = vsel %vm3008_vm12, %v5489_v4, %v3005_v18  ;;  %vm3047_vm2 = vmor %vm3045_vm1, %vm3046_vm0 }
 0x55d   : > { %v3014_v24 = vsel %vm3011_vm14, %v3013_v19, %v3009_v22  ;;  %v3028_v13 = vsel %vm3027_vm13, %v5491_v31, %v3024_v20  ;;  %v3042_v25 = vsub.f32 1.0, %v3041_v21 }
 0x55e   : > { %v3033_v26 = vsel %vm3030_vm15, %v3032_v12, %v3028_v13  ;;  %v3056_v27 = vmul.f32 %v5495_v23, %v3014_v24 }
 0x55f   : > { %v3055_v28 = vmul.f32 %v3033_v26, %v6495_v61  ;;  %v3043_v29 = vmul.f32 %v5493_v17, %v3042_v25 }
 0x561   : > { %v6580_v30 = vadd.f32 %v3056_v27, %v3055_v28  ;;  %v3044_v33 = vadd.f32 %v5493_v17, %v3043_v29 }
 0x563   : > { %5496 = vtanh.f32 %v6580_v30  ;;  %v3048_v36 = vsel %vm3047_vm2, %v5493_v17, %v3044_v33 }
 0x564   : > { %v3053_v61 = vsel %vm3050_vm3, %v3052_v37, %v3048_v36 }
 0x569   : > { %v5497_v63 = vpop.eup %5496 }
 0x56a   : > { %v3059_v0 = vmul.f32 %v5497_v63, %v3053_v61 }
 0x56c   : > { %4828 = vst [vmem:[%s3629_s1 + $0x30] sm:$0xff] %v3059_v0  ;;  %v3074_v38 = vpack.c.bf16 %v3059_v0, %v3059_v0 }
 0x56e   : > { %3275 = vmatmul.bf16.vlgmr.msra.gmra.mxu0 %v3074_v38  ;;  %3288 = vmatmul.bf16.vlgmr.msra.gmra.mxu1 %v3074_v38 }
 0x56f   : > { %3301 = vmatmul.bf16.vlgmr.msra.gmra.mxu2 %v3074_v38  ;;  %3314 = vmatmul.bf16.vlgmr.msra.gmra.mxu3 %v3074_v38 }
 0x5eb   : > { %v3276_v41 = vpop.f32.mrf.mxu0  ;;  %v3289_v8 = vpop.f32.mrf.mxu1 }
 0x5ec   : > { %v3319_v42 = vadd.f32 %v3276_v41, %v3070_v39  ;;  %v3320_v43 = vadd.f32 %v3289_v8, %v3071_v40 }
 0x5ee   : > { %v4960_v44 = vmul.f32 -1.442695, %v3319_v42  ;;  %v4961_v45 = vmul.f32 -1.442695, %v3320_v43 }
 0x5f0   : > { %5498 = vpow2.f32 %v4960_v44 }
 0x5f1   : > { %5500 = vpow2.f32 %v4961_v45 }
 0x5f2   : > { %v3302_v47 = vpop.f32.mrf.mxu2  ;;  %v3315_v48 = vpop.f32.mrf.mxu3 }
 0x5f3   : > { %v3322_v49 = vadd.f32 %v3315_v48, %v3073_v46  ;;  %v3278_v50 = vpop.f32.mrf.mxu0  ;;  %v3291_v51 = vpop.f32.mrf.mxu1  ;;  %v3321_v3 = vadd.f32 %v3302_v47, %v3072_v59 }
 0x5f5   : > { %v4962_v52 = vmul.f32 -1.442695, %v3322_v49 }
 0x5f6   : > { %v5499_v53 = vpop.eup %5498 }
 0x5f7   : > { %v5501_v54 = vpop.eup %5500  ;;  %v3326_v55 = vadd.f32 1.0, %v5499_v53  ;;  %5502 = vpow2.f32 %v4962_v52 }
 0x5f8   : > { %v3345_v56 = vadd.f32 1.0, %v5501_v54 }
 0x5f9   : > { %5504 = vrcp.f32 %v3326_v55  ;;  %v3338_v62 = vand.u32 2147483648, %v3326_v55  ;;  %v3336_v14 = vand.u32 2147483647, %v3326_v55  ;;  %vm3332_vm6 = vweird.f32 %v3326_v55 }
 0x5fa   : > { %5506 = vrcp.f32 %v3345_v56  ;;  %v3304_v57 = vpop.f32.mrf.mxu2  ;;  %v3317_v58 = vpop.f32.mrf.mxu3  ;;  %v3357_v10 = vand.u32 2147483648, %v3345_v56  ;;  %v3355_v6 = vand.u32 2147483647, %v3345_v56  ;;  %vm3351_vm7 = vweird.f32 %v3345_v56 }
 0x5fb   : > { %v3339_v17 = vor.u32 1.1754944e-38, %v3338_v62  ;;  %vm3337_vm10 = vcmp.eq.f32.partialorder %v3336_v14, 8.507059e+37 }
 0x5fc   : > { %v3358_v20 = vor.u32 1.1754944e-38, %v3357_v10  ;;  %vm3356_vm11 = vcmp.eq.f32.partialorder %v3355_v6, 8.507059e+37 }
 0x5fd   : > { %v5503_v60 = vpop.eup %5502 }
 0x5fe   : > { %v3365_v1 = vadd.f32 1.0, %v5503_v60 }
 0x5ff   : > { %v5505_v2 = vpop.eup %5504 }
 0x600   : > { %v5507_v4 = vpop.eup %5506  ;;  %v3328_v5 = vmul.f32 %v5505_v2, %v3326_v55  ;;  %5508 = vrcp.f32 %v3365_v1  ;;  %vm3333_vm4 = vweird.f32 %v5505_v2  ;;  %v3377_v33 = vand.u32 2147483648, %v3365_v1 }
 0x601   : > { %v3347_v31 = vmul.f32 %v5507_v4, %v3345_v56  ;;  %5510 = vtanh.f32 %v3321_v3  ;;  %vm3352_vm5 = vweird.f32 %v5507_v4  ;;  %vm3334_vm8 = vmor %vm3332_vm6, %vm3333_vm4  ;;  %vm3371_vm13 = vweird.f32 %v3365_v1 }
 0x602   : > { %v3329_v32 = vsub.f32 1.0, %v3328_v5  ;;  %vm3353_vm9 = vmor %vm3351_vm7, %vm3352_vm5  ;;  %v3375_v34 = vand.u32 2147483647, %v3365_v1  ;;  %v3378_v36 = vor.u32 1.1754944e-38, %v3377_v33 }
 0x603   : > { %v3348_v9 = vsub.f32 1.0, %v3347_v31 }
 0x604   : > { %v3330_v11 = vmul.f32 %v5505_v2, %v3329_v32  ;;  %vm3376_vm15 = vcmp.eq.f32.partialorder %v3375_v34, 8.507059e+37 }
 0x605   : > { %v3349_v15 = vmul.f32 %v5507_v4, %v3348_v9 }
 0x606   : > { %v5509_v16 = vpop.eup %5508  ;;  %v3331_v7 = vadd.f32 %v5505_v2, %v3330_v11 }
 0x607   : > { %v3350_v18 = vadd.f32 %v5507_v4, %v3349_v15  ;;  %v3367_v19 = vmul.f32 %v5509_v16, %v3365_v1  ;;  %v5511_v12 = vpop.eup %5510  ;;  %vm3372_vm12 = vweird.f32 %v5509_v16 }
 0x608   : > { %v3335_v21 = vsel %vm3334_vm8, %v5505_v2, %v3331_v7  ;;  %vm3373_vm14 = vmor %vm3371_vm13, %vm3372_vm12 }
 0x609   : > { %v3340_v22 = vsel %vm3337_vm10, %v3339_v17, %v3335_v21  ;;  %v3354_v23 = vsel %vm3353_vm9, %v5507_v4, %v3350_v18  ;;  %v3368_v24 = vsub.f32 1.0, %v3367_v19 }
 0x60a   : > { %v3359_v13 = vsel %vm3356_vm11, %v3358_v20, %v3354_v23  ;;  %v3382_v25 = vmul.f32 %v5511_v12, %v3340_v22 }
 0x60b   : > { %v3381_v26 = vmul.f32 %v3359_v13, %v6580_v30  ;;  %v3369_v27 = vmul.f32 %v5509_v16, %v3368_v24 }
 0x60d   : > { %v3383_v28 = vadd.f32 %v3382_v25, %v3381_v26  ;;  %v3370_v29 = vadd.f32 %v5509_v16, %v3369_v27 }
 0x60f   : > { %5512 = vtanh.f32 %v3383_v28  ;;  %v3374_v35 = vsel %vm3373_vm14, %v5509_v16, %v3370_v29 }
 0x610   : > { %v3379_v63 = vsel %vm3376_vm15, %v3378_v36, %v3374_v35 }
 0x614   : > { %3392 = sbr.rel (!%p3388_p6) target bundleno = 1562 (0x61a), region = 56 }
 0x615   : > { %v5513_v37 = vpop.eup %5512 }
 0x616   : > { %v3385_v61 = vmul.f32 %v5513_v37, %v3379_v63 }
 0x618   : > { %4964 = vst [vmem:[%s3635_s26 + $0x38] sm:$0xff] %v3385_v61 }
 0x619   : > { %3393 = vst [vmem:[%s6007_s12] sm:$0xff] %v3385_v61 }
 0x61a PF: > { %s3425_s10 = scalar_lea.sflag [#allocation8], %s5785_s22  ;;  %s4968_s13 = sshll.u32 (%p5746_p9), %s5652_s21, 2 }
 0x61b   : > { %s3440_s28 = scalar_lea.vmem (%p5746_p9), %s6658_s4, %s4968_s13 }
 0x620   : > { %v3396_v30 = vld [vmem:[#allocation3] sm:$0xff]  ;;  %v3397_v0 = vld [vmem:[#allocation3 + $0x8] sm:$0xff]  ;;  %v3398_v38 = vld [vmem:[#allocation3 + $0x10] sm:$0xff] }
 0x621   : > { %v5291_v39 = vpack.c.bf16 %v3397_v0, %v3396_v30  ;;  %v3399_v40 = vld [vmem:[#allocation3 + $0x18] sm:$0xff]  ;;  %v3400_v41 = vld [vmem:[#allocation3 + $0x20] sm:$0xff]  ;;  %v3401_v8 = vld [vmem:[#allocation3 + $0x28] sm:$0xff] }
 0x622   : > { %v5296_v42 = vpack.c.bf16 %v3399_v40, %v3398_v38  ;;  %v5301_v43 = vpack.c.bf16 %v3401_v8, %v3400_v41  ;;  %v3402_v44 = vld [vmem:[#allocation3 + $0x30] sm:$0xff]  ;;  %v3403_v45 = vld [vmem:[#allocation3 + $0x38] sm:$0xff]  ;;  %3431 = sbr.rel (!%p5746_p9) target bundleno = 1587 (0x633), region = 60 }
 0x623   : > { %5292 = vst [vmem:[%s6003_s29] sm:$0xff] %v5291_v39   ;;  %v5306_v46 = vpack.c.bf16 %v3403_v45, %v3402_v44 }
 0x624   : > { %5313 = vst [vmem:[%s6003_s29 + $0x8] sm:$0xff] %v5296_v42  }
 0x625   : > { %5314 = vst [vmem:[%s6003_s29 + $0x10] sm:$0xff] %v5301_v43  }
 0x626   : > { %5315 = vst [vmem:[%s6003_s29 + $0x18] sm:$0xff] %v5306_v46  }
 0x62a   : > { %v3457_v47 = vld [vmem:[%s6003_s29] sm:$0xf]  ;;  %v3459_v48 = vld [vmem:[%s6003_s29 + $0x4] sm:$0xf] }
 0x62b   : > { %v3461_v49 = vld [vmem:[%s6003_s29 + $0x8] sm:$0xf]  ;;  %3458 = vst [vmem:[%s3440_s28] sm:$0xf] %v3457_v47  ;;  %v3463_v50 = vld [vmem:[%s6003_s29 + $0xc] sm:$0xf] }
 0x62c   : > { %3460 = vst [vmem:[%s3440_s28 + $0x8] sm:$0xf] %v3459_v48  ;;  %v3465_v51 = vld [vmem:[%s6003_s29 + $0x10] sm:$0xf]  ;;  %v3467_v52 = vld [vmem:[%s6003_s29 + $0x14] sm:$0xf] }
 0x62d   : > { %3462 = vst [vmem:[%s3440_s28 + $0x10] sm:$0xf] %v3461_v49  ;;  %v3469_v53 = vld [vmem:[%s6003_s29 + $0x18] sm:$0xf]  ;;  %v3471_v54 = vld [vmem:[%s6003_s29 + $0x1c] sm:$0xf] }
 0x62e   : > { %3464 = vst [vmem:[%s3440_s28 + $0x18] sm:$0xf] %v3463_v50 }
 0x62f   : > { %3466 = vst [vmem:[%s3440_s28 + $0x20] sm:$0xf] %v3465_v51 }
 0x630   : > { %3468 = vst [vmem:[%s3440_s28 + $0x28] sm:$0xf] %v3467_v52 }
 0x631   : > { %3470 = vst [vmem:[%s3440_s28 + $0x30] sm:$0xf] %v3469_v53 }
 0x632   : > { %3472 = vst [vmem:[%s3440_s28 + $0x38] sm:$0xf] %v3471_v54 }
 0x633 PF: > { %s3516_s17 = scalar_lea.hbm %s6659_s5, %s6250_s24  ;;  %s3518_s1 = sshll.u32 %s6007_s12, 4  ;;  %s3519_s1 = int_to_ptr.vmem [resolvable:$true] %s3518_s1 }
 0x634   : > { %s3520_s25 = sshll.u32 %s3516_s17, 4  ;;  %s5594_s27 = scalar_lea.hbm %s6659_s5, 16  ;;  %s3521_s25 = int_to_ptr.hbm [resolvable:$true] %s3520_s25 }
 0x635   : > { %s5588_s9 = sshra.s32 %s3521_s25, 4  ;;  %s5589_s9 = int_to_ptr.hbm [resolvable:$true] %s5588_s9 }
 0x636   : > { %s5590_s30 = scalar_lea.hbm %s5589_s9, 8  ;;  %p5595_p13 = scmp.lt.s32.totalorder %s5589_s9, %s6659_s5 }
 0x637   : > { %p5591_p7 = scmp.ne.s32.totalorder %s5589_s9, %s5590_s30  ;;  %p5596_p0 = scmp.lt.s32.totalorder %s5594_s27, %s5590_s30 }
 0x639   : > { %p5592_p8 = pnand %p5591_p7, %p5746_p9  ;;  %p5597_p1 = por %p5596_p0, %p5595_p13 }
 0x63b   : > { %p5593_p10 = pneg %p5592_p8 }
 0x63d   : > { %p5598_p2 = pnand %p5597_p1, %p5593_p10 }
 0x63f   : > { %5601 = shalt.err (!%p5598_p2)
}
 0x640   : > { %5320 = dma.vmem_to_hbm [thread:$0]  (%p5746_p9), %s3519_s1, 128, %s3521_s25, %s3425_s10  }
 0x641 PF: > { %s3539_s12 = sand.u32 1, %s5640_s18   ;;  %p5330_p3 = pnand %p3723_p12, %p5753_p11 }
 0x642   : > { %s3540_s24 = scalar_lea.sflag [#allocation8], %s3539_s12 }
 0x643   : > { %p5331_p4 = pneg %p5330_p3 }
 0x645   : > { %5635 = dma.done.wait (%p5331_p4), %s3540_s24, 128  }
 0x646   : > { %5637 = vsyncadd (%p5331_p4), %s3540_s24, 4294967168  ;;  %s25_s23 = sadd.s32 1, %s5660_s23   ;;  %s6671_s21 = sld [smem:[#allocation16_spill]] }
 0x647   : > { %p22_p5 = scmp.ge.s32.totalorder %s25_s23, 4   ;;  %s6672_s22 = sld [smem:[#allocation17_spill]] }
 0x648   : > { %s6673_s18 = smov %s5644_s19  ;;  %s6674_s19 = smov %s5648_s20 }
 0x649   : > { %s6675_s20 = smov %s5751_s7  ;;  %24 = sbr.rel (!%p22_p5) target bundleno = 10 (0xa), region = 181 }
 0x64e   :  { %3546 = vsyncpa [#allocation7], 1 }
 0x64f   :  { %3548 = vsyncpa [#allocation7 + $0x1], 1 }
 0x650   :  { %3549 = vsyncpa [#allocation10], 1 }
 0x651   :  { %3551 = vsyncpa [#allocation10 + $0x1], 1 }
 0x652   :  { %3552 = vsyncpa [#allocation8], 1 }
 0x653   :  { %3554 = vsyncpa [#allocation8 + $0x1], 1 }

</bundles_post_ra>
